<compile_context>
chip_gen: v7x
topology: tpu7x:2x2x1
jax: 0.10.0
libtpu: 0.0.40
codegen_flags: <defaults>
</compile_context>

<pallas_src>
import jax
import jax.numpy as jnp
from jax import lax
from jax.experimental import pallas as pl
from jax.experimental.pallas import tpu as pltpu

TB = 8  # samples per grid step (multiple of 8 keeps every in-kernel slice tile-friendly)


# ---------------------------------------------------------------------------
# Fused kernel
# ---------------------------------------------------------------------------
def _lenet_kernel(p1_ref, w1_ref, b1_ref, w2_ref, b2_ref,
                  wf1_ref, bf1_ref, wf2_ref, bf2_ref,
                  o_ref, y1_ref, p2_ref, z_ref):
    n1 = 144 * TB   # (12x12 pooled positions) * TB samples, per 2x2 pool offset
    n2 = 16 * TB    # (4x4  pooled positions) * TB samples, per 2x2 pool offset

    # ---- conv1 as a single transposed matmul, then 2x2 max-pool + bias + relu ----
    # p1_ref[0]: (25, 4*n1), columns ordered (pool offset, row/col parity, ch, cw, sample)
    c1 = jnp.dot(w1_ref[...], p1_ref[0], preferred_element_type=jnp.float32)   # (4, 4*n1)
    m1 = jnp.maximum(jnp.maximum(c1[:, 0 * n1:1 * n1], c1[:, 1 * n1:2 * n1]),
                     jnp.maximum(c1[:, 2 * n1:3 * n1], c1[:, 3 * n1:4 * n1]))
    y1_ref[...] = jnp.maximum(m1 + b1_ref[...], 0.0)     # (4, n1): (cin) x (rh,rw,ch,cw,b)

    # ---- conv2: pool-grouped im2col built entirely in VMEM (static slices only) ----
    # p2_ref rows = (kh, kw, cin); columns = (pool offset, ph, pw, sample)
    for p in range(4):                          # pool-window offset (di, dj)
        di, dj = p // 2, p % 2
        for t in range(25):                     # conv2 tap (kh, kw)
            kh, kw = t // 5, t % 5
            qh, rh = divmod(di + kh, 2)
            qw, rw = divmod(dj + kw, 2)
            for ph in range(4):                 # pooled output row
                src = ((rh * 2 + rw) * 36 + (qh + ph) * 6 + qw) * TB
                dst = (p * 16 + ph * 4) * TB
                p2_ref[t * 4:(t + 1) * 4, dst:dst + 4 * TB] = \
                    y1_ref[:, src:src + 4 * TB]

    c2 = jnp.dot(w2_ref[...], p2_ref[...], preferred_element_type=jnp.float32)  # (8, 4*n2)
    m2 = jnp.maximum(jnp.maximum(c2[:, 0 * n2:1 * n2], c2[:, 1 * n2:2 * n2]),
                     jnp.maximum(c2[:, 2 * n2:3 * n2], c2[:, 3 * n2:4 * n2]))
    z_ref[...] = jnp.maximum(m2 + b2_ref[...], 0.0)       # (8, n2): (cout) x (ph,pw,b)

    # ---- flatten to (TB, 128) rows (fc1 weight is pre-permuted to this order) ----
    flat_t = jnp.concatenate(
        [z_ref[:, s * TB:(s + 1) * TB] for s in range(16)], axis=0)   # (128, TB)
    flat = jnp.transpose(flat_t)                                       # (TB, 128)

    # ---- fc1 + relu + fc2 (fc2 padded 10 -> 128 so the store is lane-dense) ----
    h = jnp.dot(flat, wf1_ref[...], preferred_element_type=jnp.float32) + bf1_ref[...]
    h = jnp.maximum(h, 0.0)
    out = jnp.dot(h, wf2_ref[...], preferred_element_type=jnp.float32) + bf2_ref[...]
    o_ref[...] = out.astype(o_ref.dtype)


# ---------------------------------------------------------------------------
# Wrapper-side layout plumbing (cheap XLA glue on the raw 28x28 input only)
# ---------------------------------------------------------------------------
def _conv1_patches(x, n_tiles):
    """x: (Bpad, 28, 28) -> (n_tiles, 25, 4*144*TB) transposed im2col patches.

    Columns are ordered (pool offset (di,dj), row parity rh, col parity rw,
    pooled row ch, pooled col cw, sample) so that conv1's matmul output is already
    grouped exactly the way the in-kernel conv2 im2col needs (static slices only).
    """
    # TODO(synk): building these conv1 patches in-kernel from the raw (TB,28,28)
    # block would cut conv1 HBM traffic a further ~14x at large batch.
    taps = [x[:, kh:kh + 24, kw:kw + 24] for kh in range(5) for kw in range(5)]
    pat = jnp.stack(taps, axis=0)                        # (25, Bpad, 24, 24)
    # conv output row oi = 4*ch + 2*rh + di ; col oj = 4*cw + 2*rw + dj
    pat = pat.reshape(25, -1, 6, 2, 2, 6, 2, 2)          # (f, B, ch, rh, di, cw, rw, dj)
    pat = pat.transpose(0, 4, 7, 3, 6, 2, 5, 1)          # (f, di, dj, rh, rw, ch, cw, B)
    pat = pat.reshape(25, 4, 144, n_tiles, TB)
    return pat.transpose(3, 0, 1, 2, 4).reshape(n_tiles, 25, 4 * 144 * TB)


def prepare_params(params):
    """One-time weight re-layout (hoisted out of the per-call path)."""
    w1 = params["conv1_w"].reshape(4, 25)                                   # (cout, kh*kw)
    b1 = params["conv1_b"].reshape(4, 1)
    w2 = jnp.transpose(params["conv2_w"], (0, 2, 3, 1)).reshape(8, 100)     # (cout, kh*kw*cin)
    b2 = params["conv2_b"].reshape(8, 1)
    # torch flatten order is (c, ph, pw); the kernel's flat order is (ph, pw, c)
    wf1 = (params["fc1_w"].T.reshape(8, 4, 4, 128)
           .transpose(1, 2, 0, 3).reshape(128, 128))
    bf1 = params["fc1_b"].reshape(1, 128)
    wf2 = jnp.zeros((128, 128), jnp.float32).at[:, :10].set(params["fc2_w"].T)
    bf2 = jnp.zeros((1, 128), jnp.float32).at[:, :10].set(params["fc2_b"])
    return (w1, b1, w2, b2, wf1, bf1, wf2, bf2)


@jax.jit
def lenet_forward(x_nchw, prep):
    w1, b1, w2, b2, wf1, bf1, wf2, bf2 = prep
    B = x_nchw.shape[0]
    x = x_nchw[:, 0, :, :].astype(jnp.float32)           # Cin == 1
    pad = (-B) % TB
    if pad:
        x = jnp.concatenate([x, jnp.zeros((pad,) + x.shape[1:], x.dtype)], axis=0)
    n_tiles = x.shape[0] // TB
    p1 = _conv1_patches(x, n_tiles)

    out = pl.pallas_call(
        _lenet_kernel,
        grid=(n_tiles,),
        in_specs=[
            pl.BlockSpec((1, 25, 4 * 144 * TB), lambda i: (i, 0, 0)),   # conv1 patches
            pl.BlockSpec((4, 25), lambda i: (0, 0)),                    # conv1 weight
            pl.BlockSpec((4, 1), lambda i: (0, 0)),
            pl.BlockSpec((8, 100), lambda i: (0, 0)),                   # conv2 weight
            pl.BlockSpec((8, 1), lambda i: (0, 0)),
            pl.BlockSpec((128, 128), lambda i: (0, 0)),                 # fc1 (permuted)
            pl.BlockSpec((1, 128), lambda i: (0, 0)),
            pl.BlockSpec((128, 128), lambda i: (0, 0)),                 # fc2 (padded)
            pl.BlockSpec((1, 128), lambda i: (0, 0)),
        ],
        out_specs=pl.BlockSpec((TB, 128), lambda i: (i, 0)),
        out_shape=jax.ShapeDtypeStruct((n_tiles * TB, 128), jnp.float32),
        scratch_shapes=[
            pltpu.VMEM((4, 144 * TB), jnp.float32),    # pooled conv1 activations
            pltpu.VMEM((100, 64 * TB), jnp.float32),   # conv2 im2col patches
            pltpu.VMEM((8, 16 * TB), jnp.float32),     # pooled conv2 activations
        ],
        compiler_params=pltpu.CompilerParams(
            dimension_semantics=("parallel",)),
    )(p1, w1, b1, w2, b2, wf1, bf1, wf2, bf2)
    return out[:B, :10]


# ---------------------------------------------------------------------------
# Deterministic synthetic parameters (PyTorch layer shapes) + pure-JAX reference
# ---------------------------------------------------------------------------
def init_params(key):
    ks = jax.random.split(key, 8)

    def r(k, shape, scale):
        return (scale * jax.random.normal(k, shape)).astype(jnp.float32)

    return {
        "conv1_w": r(ks[0], (4, 1, 5, 5), 0.2),
        "conv1_b": r(ks[1], (4,), 0.1),
        "conv2_w": r(ks[2], (8, 4, 5, 5), 0.1),
        "conv2_b": r(ks[3], (8,), 0.1),
        "fc1_w": r(ks[4], (128, 128), 0.05),
        "fc1_b": r(ks[5], (128,), 0.05),
        "fc2_w": r(ks[6], (10, 128), 0.05),
        "fc2_b": r(ks[7], (10,), 0.05),
    }


def reference_forward(x_nchw, params):
    """Pure-JAX/XLA reference mirroring the PyTorch module exactly."""
    prec = lax.Precision.HIGHEST

    def conv(x, w, b):
        y = lax.conv_general_dilated(
            x, w, window_strides=(1, 1), padding="VALID",
            dimension_numbers=("NCHW", "OIHW", "NCHW"), precision=prec)
        return y + b[None, :, None, None]

    def pool(x):
        return lax.reduce_window(x, -jnp.inf, lax.max,
                                 (1, 1, 2, 2), (1, 1, 2, 2), "VALID")

    y = jnp.maximum(pool(conv(x_nchw, params["conv1_w"], params["conv1_b"])), 0.0)
    y = jnp.maximum(pool(conv(y, params["conv2_w"], params["conv2_b"])), 0.0)
    flat = y.reshape(x_nchw.shape[0], -1)
    h = jnp.maximum(jnp.dot(flat, params["fc1_w"].T, precision=prec) + params["fc1_b"], 0.0)
    return jnp.dot(h, params["fc2_w"].T, precision=prec) + params["fc2_b"]


if __name__ == "__main__":
    key = jax.random.PRNGKey(0)
    pkey, xkey = jax.random.split(key)
    params = init_params(pkey)
    prep = prepare_params(params)

    # LeNet's fc1(128) implies 1x28x28 inputs; batch 16 = 2 "parallel" grid steps of TB=8.
    x = jax.random.normal(xkey, (16, 1, 28, 28), dtype=jnp.float32)

    out = jax.block_until_ready(lenet_forward(x, prep))
    assert out.shape == (16, 10)

    ref = reference_forward(x, params)
    err = float(jnp.max(jnp.abs(out - ref)))
    assert jnp.allclose(out, ref, atol=2e-2, rtol=2e-2), \
        f"Pallas output mismatch vs reference (max abs err {err})"

    print("KERNEL_OK")
</pallas_src>

<mosaic_0001>
module attributes {stable_mosaic.version = 11 : i64} {
  func.func @_lenet_kernel(%arg0: i32, %arg1: memref<1x25x4608xf32, #tpu.memory_space<vmem>>, %arg2: memref<4x25xf32, #tpu.memory_space<vmem>>, %arg3: memref<4x1xf32, #tpu.memory_space<vmem>>, %arg4: memref<8x100xf32, #tpu.memory_space<vmem>>, %arg5: memref<8x1xf32, #tpu.memory_space<vmem>>, %arg6: memref<128x128xf32, #tpu.memory_space<vmem>>, %arg7: memref<1x128xf32, #tpu.memory_space<vmem>>, %arg8: memref<128x128xf32, #tpu.memory_space<vmem>>, %arg9: memref<1x128xf32, #tpu.memory_space<vmem>>, %arg10: memref<8x128xf32, #tpu.memory_space<vmem>>, %arg11: memref<4x1152xf32, #tpu.memory_space<vmem>>, %arg12: memref<100x512xf32, #tpu.memory_space<vmem>>, %arg13: memref<8x128xf32, #tpu.memory_space<vmem>>) attributes {dimension_semantics = [#tpu.dimension_semantics<parallel>], iteration_bounds = array<i64: 2>, scalar_prefetch = 0 : i64, scratch_operands = 3 : i64, tpu.core_type = #tpu.core_type<tc>, window_params = [{transform_indices = @transform_0, window_bounds = array<i64: 1, 25, 4608>}, {pipeline_mode = #tpu.pipeline_mode<synchronous>, transform_indices = @transform_1, window_bounds = array<i64: 4, 25>}, {pipeline_mode = #tpu.pipeline_mode<synchronous>, transform_indices = @transform_2, window_bounds = array<i64: 4, 1>}, {pipeline_mode = #tpu.pipeline_mode<synchronous>, transform_indices = @transform_3, window_bounds = array<i64: 8, 100>}, {pipeline_mode = #tpu.pipeline_mode<synchronous>, transform_indices = @transform_4, window_bounds = array<i64: 8, 1>}, {pipeline_mode = #tpu.pipeline_mode<synchronous>, transform_indices = @transform_5, window_bounds = array<i64: 128, 128>}, {pipeline_mode = #tpu.pipeline_mode<synchronous>, transform_indices = @transform_6, window_bounds = array<i64: 1, 128>}, {pipeline_mode = #tpu.pipeline_mode<synchronous>, transform_indices = @transform_7, window_bounds = array<i64: 128, 128>}, {pipeline_mode = #tpu.pipeline_mode<synchronous>, transform_indices = @transform_8, window_bounds = array<i64: 1, 128>}, {transform_indices = @transform_9, window_bounds = array<i64: 8, 128>}]} {
    %c0 = arith.constant 0 : index
    %c0_0 = arith.constant 0 : index
    %0 = vector.load %arg2[%c0, %c0_0] : memref<4x25xf32, #tpu.memory_space<vmem>>, vector<4x25xf32>
    %c0_1 = arith.constant 0 : index
    %c0_2 = arith.constant 0 : index
    %c0_3 = arith.constant 0 : index
    %1 = vector.load %arg1[%c0_1, %c0_2, %c0_3] : memref<1x25x4608xf32, #tpu.memory_space<vmem>>, vector<1x25x4608xf32>
    %2 = vector.shape_cast %1 : vector<1x25x4608xf32> to vector<25x4608xf32>
    %cst = arith.constant dense<0.000000e+00> : vector<4x4608xf32>
    %3 = tpu.matmul %0, %2, %cst {dimension_numbers = #tpu.dot_dimension_numbers<[1], [0], [0], [1], [0, 0, 1, 1], [], []>} : vector<4x25xf32>, vector<25x4608xf32>, vector<4x4608xf32> -> vector<4x4608xf32>
    %4 = vector.extract_strided_slice %3 {offsets = [0, 0], sizes = [4, 1152], strides = [1, 1]} : vector<4x4608xf32> to vector<4x1152xf32>
    %5 = vector.extract_strided_slice %3 {offsets = [0, 1152], sizes = [4, 1152], strides = [1, 1]} : vector<4x4608xf32> to vector<4x1152xf32>
    %6 = arith.maximumf %4, %5 : vector<4x1152xf32>
    %7 = vector.extract_strided_slice %3 {offsets = [0, 2304], sizes = [4, 1152], strides = [1, 1]} : vector<4x4608xf32> to vector<4x1152xf32>
    %8 = vector.extract_strided_slice %3 {offsets = [0, 3456], sizes = [4, 1152], strides = [1, 1]} : vector<4x4608xf32> to vector<4x1152xf32>
    %9 = arith.maximumf %7, %8 : vector<4x1152xf32>
    %10 = arith.maximumf %6, %9 : vector<4x1152xf32>
    %c0_4 = arith.constant 0 : index
    %c0_5 = arith.constant 0 : index
    %11 = vector.load %arg3[%c0_4, %c0_5] : memref<4x1xf32, #tpu.memory_space<vmem>>, vector<4x1xf32>
    %12 = vector.broadcast %11 : vector<4x1xf32> to vector<4x1152xf32>
    %13 = arith.addf %10, %12 : vector<4x1152xf32>
    %cst_6 = arith.constant 0.000000e+00 : f32
    %14 = vector.broadcast %cst_6 : f32 to vector<4x1152xf32>
    %15 = arith.maximumf %13, %14 : vector<4x1152xf32>
    %c0_7 = arith.constant 0 : index
    %c0_8 = arith.constant 0 : index
    %16 = vector.load %arg11[%c0_7, %c0_8] : memref<4x1152xf32, #tpu.memory_space<vmem>>, vector<4x1152xf32>
    tpu.vector_store %arg11[%c0_7, %c0_8], %15 {strides = array<i32>} : memref<4x1152xf32, #tpu.memory_space<vmem>>, vector<4x1152xf32>,
    %c0_9 = arith.constant 0 : index
    %c0_10 = arith.constant 0 : index
    %17 = vector.load %arg11[%c0_9, %c0_10] : memref<4x1152xf32, #tpu.memory_space<vmem>>, vector<4x32xf32>
    %c0_11 = arith.constant 0 : index
    %c0_12 = arith.constant 0 : index
    %18 = vector.load %arg12[%c0_11, %c0_12] : memref<100x512xf32, #tpu.memory_space<vmem>>, vector<4x32xf32>
    tpu.vector_store %arg12[%c0_11, %c0_12], %17 {strides = array<i32>} : memref<100x512xf32, #tpu.memory_space<vmem>>, vector<4x32xf32>,
    %c0_13 = arith.constant 0 : index
    %c48 = arith.constant 48 : index
    %19 = vector.load %arg11[%c0_13, %c48] : memref<4x1152xf32, #tpu.memory_space<vmem>>, vector<4x32xf32>
    %c0_14 = arith.constant 0 : index
    %c32 = arith.constant 32 : index
    %20 = vector.load %arg12[%c0_14, %c32] : memref<100x512xf32, #tpu.memory_space<vmem>>, vector<4x32xf32>
    tpu.vector_store %arg12[%c0_14, %c32], %19 {strides = array<i32>} : memref<100x512xf32, #tpu.memory_space<vmem>>, vector<4x32xf32>,
    %c0_15 = arith.constant 0 : index
    %c96 = arith.constant 96 : index
    %21 = vector.load %arg11[%c0_15, %c96] : memref<4x1152xf32, #tpu.memory_space<vmem>>, vector<4x32xf32>
    %c0_16 = arith.constant 0 : index
    %c64 = arith.constant 64 : index
    %22 = vector.load %arg12[%c0_16, %c64] : memref<100x512xf32, #tpu.memory_space<vmem>>, vector<4x32xf32>
    tpu.vector_store %arg12[%c0_16, %c64], %21 {strides = array<i32>} : memref<100x512xf32, #tpu.memory_space<vmem>>, vector<4x32xf32>,
    %c0_17 = arith.constant 0 : index
    %c144 = arith.constant 144 : index
    %23 = vector.load %arg11[%c0_17, %c144] : memref<4x1152xf32, #tpu.memory_space<vmem>>, vector<4x32xf32>
    %c0_18 = arith.constant 0 : index
    %c96_19 = arith.constant 96 : index
    %24 = vector.load %arg12[%c0_18, %c96_19] : memref<100x512xf32, #tpu.memory_space<vmem>>, vector<4x32xf32>
    tpu.vector_store %arg12[%c0_18, %c96_19], %23 {strides = array<i32>} : memref<100x512xf32, #tpu.memory_space<vmem>>, vector<4x32xf32>,
    %c0_20 = arith.constant 0 : index
    %c288 = arith.constant 288 : index
    %25 = vector.load %arg11[%c0_20, %c288] : memref<4x1152xf32, #tpu.memory_space<vmem>>, vector<4x32xf32>
    %c4 = arith.constant 4 : index
    %c0_21 = arith.constant 0 : index
    %26 = vector.load %arg12[%c4, %c0_21] : memref<100x512xf32, #tpu.memory_space<vmem>>, vector<4x32xf32>
    tpu.vector_store %arg12[%c4, %c0_21], %25 {strides = array<i32>} : memref<100x512xf32, #tpu.memory_space<vmem>>, vector<4x32xf32>,
    %c0_22 = arith.constant 0 : index
    %c336 = arith.constant 336 : index
    %27 = vector.load %arg11[%c0_22, %c336] : memref<4x1152xf32, #tpu.memory_space<vmem>>, vector<4x32xf32>
    %c4_23 = arith.constant 4 : index
    %c32_24 = arith.constant 32 : index
    %28 = vector.load %arg12[%c4_23, %c32_24] : memref<100x512xf32, #tpu.memory_space<vmem>>, vector<4x32xf32>
    tpu.vector_store %arg12[%c4_23, %c32_24], %27 {strides = array<i32>} : memref<100x512xf32, #tpu.memory_space<vmem>>, vector<4x32xf32>,
    %c0_25 = arith.constant 0 : index
    %c384 = arith.constant 384 : index
    %29 = vector.load %arg11[%c0_25, %c384] : memref<4x1152xf32, #tpu.memory_space<vmem>>, vector<4x32xf32>
    %c4_26 = arith.constant 4 : index
    %c64_27 = arith.constant 64 : index
    %30 = vector.load %arg12[%c4_26, %c64_27] : memref<100x512xf32, #tpu.memory_space<vmem>>, vector<4x32xf32>
    tpu.vector_store %arg12[%c4_26, %c64_27], %29 {strides = array<i32>} : memref<100x512xf32, #tpu.memory_space<vmem>>, vector<4x32xf32>,
    %c0_28 = arith.constant 0 : index
    %c432 = arith.constant 432 : index
    %31 = vector.load %arg11[%c0_28, %c432] : memref<4x1152xf32, #tpu.memory_space<vmem>>, vector<4x32xf32>
    %c4_29 = arith.constant 4 : index
    %c96_30 = arith.constant 96 : index
    %32 = vector.load %arg12[%c4_29, %c96_30] : memref<100x512xf32, #tpu.memory_space<vmem>>, vector<4x32xf32>
    tpu.vector_store %arg12[%c4_29, %c96_30], %31 {strides = array<i32>} : memref<100x512xf32, #tpu.memory_space<vmem>>, vector<4x32xf32>,
    %c0_31 = arith.constant 0 : index
    %c8 = arith.constant 8 : index
    %33 = vector.load %arg11[%c0_31, %c8] : memref<4x1152xf32, #tpu.memory_space<vmem>>, vector<4x32xf32>
    %c8_32 = arith.constant 8 : index
    %c0_33 = arith.constant 0 : index
    %34 = vector.load %arg12[%c8_32, %c0_33] : memref<100x512xf32, #tpu.memory_space<vmem>>, vector<4x32xf32>
    tpu.vector_store %arg12[%c8_32, %c0_33], %33 {strides = array<i32>} : memref<100x512xf32, #tpu.memory_space<vmem>>, vector<4x32xf32>,
    %c0_34 = arith.constant 0 : index
    %c56 = arith.constant 56 : index
    %35 = vector.load %arg11[%c0_34, %c56] : memref<4x1152xf32, #tpu.memory_space<vmem>>, vector<4x32xf32>
    %c8_35 = arith.constant 8 : index
    %c32_36 = arith.constant 32 : index
    %36 = vector.load %arg12[%c8_35, %c32_36] : memref<100x512xf32, #tpu.memory_space<vmem>>, vector<4x32xf32>
    tpu.vector_store %arg12[%c8_35, %c32_36], %35 {strides = array<i32>} : memref<100x512xf32, #tpu.memory_space<vmem>>, vector<4x32xf32>,
    %c0_37 = arith.constant 0 : index
    %c104 = arith.constant 104 : index
    %37 = vector.load %arg11[%c0_37, %c104] : memref<4x1152xf32, #tpu.memory_space<vmem>>, vector<4x32xf32>
    %c8_38 = arith.constant 8 : index
    %c64_39 = arith.constant 64 : index
    %38 = vector.load %arg12[%c8_38, %c64_39] : memref<100x512xf32, #tpu.memory_space<vmem>>, vector<4x32xf32>
    tpu.vector_store %arg12[%c8_38, %c64_39], %37 {strides = array<i32>} : memref<100x512xf32, #tpu.memory_space<vmem>>, vector<4x32xf32>,
    %c0_40 = arith.constant 0 : index
    %c152 = arith.constant 152 : index
    %39 = vector.load %arg11[%c0_40, %c152] : memref<4x1152xf32, #tpu.memory_space<vmem>>, vector<4x32xf32>
    %c8_41 = arith.constant 8 : index
    %c96_42 = arith.constant 96 : index
    %40 = vector.load %arg12[%c8_41, %c96_42] : memref<100x512xf32, #tpu.memory_space<vmem>>, vector<4x32xf32>
    tpu.vector_store %arg12[%c8_41, %c96_42], %39 {strides = array<i32>} : memref<100x512xf32, #tpu.memory_space<vmem>>, vector<4x32xf32>,
    %c0_43 = arith.constant 0 : index
    %c296 = arith.constant 296 : index
    %41 = vector.load %arg11[%c0_43, %c296] : memref<4x1152xf32, #tpu.memory_space<vmem>>, vector<4x32xf32>
    %c12 = arith.constant 12 : index
    %c0_44 = arith.constant 0 : index
    %42 = vector.load %arg12[%c12, %c0_44] : memref<100x512xf32, #tpu.memory_space<vmem>>, vector<4x32xf32>
    tpu.vector_store %arg12[%c12, %c0_44], %41 {strides = array<i32>} : memref<100x512xf32, #tpu.memory_space<vmem>>, vector<4x32xf32>,
    %c0_45 = arith.constant 0 : index
    %c344 = arith.constant 344 : index
    %43 = vector.load %arg11[%c0_45, %c344] : memref<4x1152xf32, #tpu.memory_space<vmem>>, vector<4x32xf32>
    %c12_46 = arith.constant 12 : index
    %c32_47 = arith.constant 32 : index
    %44 = vector.load %arg12[%c12_46, %c32_47] : memref<100x512xf32, #tpu.memory_space<vmem>>, vector<4x32xf32>
    tpu.vector_store %arg12[%c12_46, %c32_47], %43 {strides = array<i32>} : memref<100x512xf32, #tpu.memory_space<vmem>>, vector<4x32xf32>,
    %c0_48 = arith.constant 0 : index
    %c392 = arith.constant 392 : index
    %45 = vector.load %arg11[%c0_48, %c392] : memref<4x1152xf32, #tpu.memory_space<vmem>>, vector<4x32xf32>
    %c12_49 = arith.constant 12 : index
    %c64_50 = arith.constant 64 : index
    %46 = vector.load %arg12[%c12_49, %c64_50] : memref<100x512xf32, #tpu.memory_space<vmem>>, vector<4x32xf32>
    tpu.vector_store %arg12[%c12_49, %c64_50], %45 {strides = array<i32>} : memref<100x512xf32, #tpu.memory_space<vmem>>, vector<4x32xf32>,
    %c0_51 = arith.constant 0 : index
    %c440 = arith.constant 440 : index
    %47 = vector.load %arg11[%c0_51, %c440] : memref<4x1152xf32, #tpu.memory_space<vmem>>, vector<4x32xf32>
    %c12_52 = arith.constant 12 : index
    %c96_53 = arith.constant 96 : index
    %48 = vector.load %arg12[%c12_52, %c96_53] : memref<100x512xf32, #tpu.memory_space<vmem>>, vector<4x32xf32>
    tpu.vector_store %arg12[%c12_52, %c96_53], %47 {strides = array<i32>} : memref<100x512xf32, #tpu.memory_space<vmem>>, vector<4x32xf32>,
    %c0_54 = arith.constant 0 : index
    %c16 = arith.constant 16 : index
    %49 = vector.load %arg11[%c0_54, %c16] : memref<4x1152xf32, #tpu.memory_space<vmem>>, vector<4x32xf32>
    %c16_55 = arith.constant 16 : index
    %c0_56 = arith.constant 0 : index
    %50 = vector.load %arg12[%c16_55, %c0_56] : memref<100x512xf32, #tpu.memory_space<vmem>>, vector<4x32xf32>
    tpu.vector_store %arg12[%c16_55, %c0_56], %49 {strides = array<i32>} : memref<100x512xf32, #tpu.memory_space<vmem>>, vector<4x32xf32>,
    %c0_57 = arith.constant 0 : index
    %c64_58 = arith.constant 64 : index
    %51 = vector.load %arg11[%c0_57, %c64_58] : memref<4x1152xf32, #tpu.memory_space<vmem>>, vector<4x32xf32>
    %c16_59 = arith.constant 16 : index
    %c32_60 = arith.constant 32 : index
    %52 = vector.load %arg12[%c16_59, %c32_60] : memref<100x512xf32, #tpu.memory_space<vmem>>, vector<4x32xf32>
    tpu.vector_store %arg12[%c16_59, %c32_60], %51 {strides = array<i32>} : memref<100x512xf32, #tpu.memory_space<vmem>>, vector<4x32xf32>,
    %c0_61 = arith.constant 0 : index
    %c112 = arith.constant 112 : index
    %53 = vector.load %arg11[%c0_61, %c112] : memref<4x1152xf32, #tpu.memory_space<vmem>>, vector<4x32xf32>
    %c16_62 = arith.constant 16 : index
    %c64_63 = arith.constant 64 : index
    %54 = vector.load %arg12[%c16_62, %c64_63] : memref<100x512xf32, #tpu.memory_space<vmem>>, vector<4x32xf32>
    tpu.vector_store %arg12[%c16_62, %c64_63], %53 {strides = array<i32>} : memref<100x512xf32, #tpu.memory_space<vmem>>, vector<4x32xf32>,
    %c0_64 = arith.constant 0 : index
    %c160 = arith.constant 160 : index
    %55 = vector.load %arg11[%c0_64, %c160] : memref<4x1152xf32, #tpu.memory_space<vmem>>, vector<4x32xf32>
    %c16_65 = arith.constant 16 : index
    %c96_66 = arith.constant 96 : index
    %56 = vector.load %arg12[%c16_65, %c96_66] : memref<100x512xf32, #tpu.memory_space<vmem>>, vector<4x32xf32>
    tpu.vector_store %arg12[%c16_65, %c96_66], %55 {strides = array<i32>} : memref<100x512xf32, #tpu.memory_space<vmem>>, vector<4x32xf32>,
    %c0_67 = arith.constant 0 : index
    %c576 = arith.constant 576 : index
    %57 = vector.load %arg11[%c0_67, %c576] : memref<4x1152xf32, #tpu.memory_space<vmem>>, vector<4x32xf32>
    %c20 = arith.constant 20 : index
    %c0_68 = arith.constant 0 : index
    %58 = vector.load %arg12[%c20, %c0_68] : memref<100x512xf32, #tpu.memory_space<vmem>>, vector<4x32xf32>
    tpu.vector_store %arg12[%c20, %c0_68], %57 {strides = array<i32>} : memref<100x512xf32, #tpu.memory_space<vmem>>, vector<4x32xf32>,
    %c0_69 = arith.constant 0 : index
    %c624 = arith.constant 624 : index
    %59 = vector.load %arg11[%c0_69, %c624] : memref<4x1152xf32, #tpu.memory_space<vmem>>, vector<4x32xf32>
    %c20_70 = arith.constant 20 : index
    %c32_71 = arith.constant 32 : index
    %60 = vector.load %arg12[%c20_70, %c32_71] : memref<100x512xf32, #tpu.memory_space<vmem>>, vector<4x32xf32>
    tpu.vector_store %arg12[%c20_70, %c32_71], %59 {strides = array<i32>} : memref<100x512xf32, #tpu.memory_space<vmem>>, vector<4x32xf32>,
    %c0_72 = arith.constant 0 : index
    %c672 = arith.constant 672 : index
    %61 = vector.load %arg11[%c0_72, %c672] : memref<4x1152xf32, #tpu.memory_space<vmem>>, vector<4x32xf32>
    %c20_73 = arith.constant 20 : index
    %c64_74 = arith.constant 64 : index
    %62 = vector.load %arg12[%c20_73, %c64_74] : memref<100x512xf32, #tpu.memory_space<vmem>>, vector<4x32xf32>
    tpu.vector_store %arg12[%c20_73, %c64_74], %61 {strides = array<i32>} : memref<100x512xf32, #tpu.memory_space<vmem>>, vector<4x32xf32>,
    %c0_75 = arith.constant 0 : index
    %c720 = arith.constant 720 : index
    %63 = vector.load %arg11[%c0_75, %c720] : memref<4x1152xf32, #tpu.memory_space<vmem>>, vector<4x32xf32>
    %c20_76 = arith.constant 20 : index
    %c96_77 = arith.constant 96 : index
    %64 = vector.load %arg12[%c20_76, %c96_77] : memref<100x512xf32, #tpu.memory_space<vmem>>, vector<4x32xf32>
    tpu.vector_store %arg12[%c20_76, %c96_77], %63 {strides = array<i32>} : memref<100x512xf32, #tpu.memory_space<vmem>>, vector<4x32xf32>,
    %c0_78 = arith.constant 0 : index
    %c864 = arith.constant 864 : index
    %65 = vector.load %arg11[%c0_78, %c864] : memref<4x1152xf32, #tpu.memory_space<vmem>>, vector<4x32xf32>
    %c24 = arith.constant 24 : index
    %c0_79 = arith.constant 0 : index
    %66 = vector.load %arg12[%c24, %c0_79] : memref<100x512xf32, #tpu.memory_space<vmem>>, vector<4x32xf32>
    tpu.vector_store %arg12[%c24, %c0_79], %65 {strides = array<i32>} : memref<100x512xf32, #tpu.memory_space<vmem>>, vector<4x32xf32>,
    %c0_80 = arith.constant 0 : index
    %c912 = arith.constant 912 : index
    %67 = vector.load %arg11[%c0_80, %c912] : memref<4x1152xf32, #tpu.memory_space<vmem>>, vector<4x32xf32>
    %c24_81 = arith.constant 24 : index
    %c32_82 = arith.constant 32 : index
    %68 = vector.load %arg12[%c24_81, %c32_82] : memref<100x512xf32, #tpu.memory_space<vmem>>, vector<4x32xf32>
    tpu.vector_store %arg12[%c24_81, %c32_82], %67 {strides = array<i32>} : memref<100x512xf32, #tpu.memory_space<vmem>>, vector<4x32xf32>,
    %c0_83 = arith.constant 0 : index
    %c960 = arith.constant 960 : index
    %69 = vector.load %arg11[%c0_83, %c960] : memref<4x1152xf32, #tpu.memory_space<vmem>>, vector<4x32xf32>
    %c24_84 = arith.constant 24 : index
    %c64_85 = arith.constant 64 : index
    %70 = vector.load %arg12[%c24_84, %c64_85] : memref<100x512xf32, #tpu.memory_space<vmem>>, vector<4x32xf32>
    tpu.vector_store %arg12[%c24_84, %c64_85], %69 {strides = array<i32>} : memref<100x512xf32, #tpu.memory_space<vmem>>, vector<4x32xf32>,
    %c0_86 = arith.constant 0 : index
    %c1008 = arith.constant 1008 : index
    %71 = vector.load %arg11[%c0_86, %c1008] : memref<4x1152xf32, #tpu.memory_space<vmem>>, vector<4x32xf32>
    %c24_87 = arith.constant 24 : index
    %c96_88 = arith.constant 96 : index
    %72 = vector.load %arg12[%c24_87, %c96_88] : memref<100x512xf32, #tpu.memory_space<vmem>>, vector<4x32xf32>
    tpu.vector_store %arg12[%c24_87, %c96_88], %71 {strides = array<i32>} : memref<100x512xf32, #tpu.memory_space<vmem>>, vector<4x32xf32>,
    %c0_89 = arith.constant 0 : index
    %c584 = arith.constant 584 : index
    %73 = vector.load %arg11[%c0_89, %c584] : memref<4x1152xf32, #tpu.memory_space<vmem>>, vector<4x32xf32>
    %c28 = arith.constant 28 : index
    %c0_90 = arith.constant 0 : index
    %74 = vector.load %arg12[%c28, %c0_90] : memref<100x512xf32, #tpu.memory_space<vmem>>, vector<4x32xf32>
    tpu.vector_store %arg12[%c28, %c0_90], %73 {strides = array<i32>} : memref<100x512xf32, #tpu.memory_space<vmem>>, vector<4x32xf32>,
    %c0_91 = arith.constant 0 : index
    %c632 = arith.constant 632 : index
    %75 = vector.load %arg11[%c0_91, %c632] : memref<4x1152xf32, #tpu.memory_space<vmem>>, vector<4x32xf32>
    %c28_92 = arith.constant 28 : index
    %c32_93 = arith.constant 32 : index
    %76 = vector.load %arg12[%c28_92, %c32_93] : memref<100x512xf32, #tpu.memory_space<vmem>>, vector<4x32xf32>
    tpu.vector_store %arg12[%c28_92, %c32_93], %75 {strides = array<i32>} : memref<100x512xf32, #tpu.memory_space<vmem>>, vector<4x32xf32>,
    %c0_94 = arith.constant 0 : index
    %c680 = arith.constant 680 : index
    %77 = vector.load %arg11[%c0_94, %c680] : memref<4x1152xf32, #tpu.memory_space<vmem>>, vector<4x32xf32>
    %c28_95 = arith.constant 28 : index
    %c64_96 = arith.constant 64 : index
    %78 = vector.load %arg12[%c28_95, %c64_96] : memref<100x512xf32, #tpu.memory_space<vmem>>, vector<4x32xf32>
    tpu.vector_store %arg12[%c28_95, %c64_96], %77 {strides = array<i32>} : memref<100x512xf32, #tpu.memory_space<vmem>>, vector<4x32xf32>,
    %c0_97 = arith.constant 0 : index
    %c728 = arith.constant 728 : index
    %79 = vector.load %arg11[%c0_97, %c728] : memref<4x1152xf32, #tpu.memory_space<vmem>>, vector<4x32xf32>
    %c28_98 = arith.constant 28 : index
    %c96_99 = arith.constant 96 : index
    %80 = vector.load %arg12[%c28_98, %c96_99] : memref<100x512xf32, #tpu.memory_space<vmem>>, vector<4x32xf32>
    tpu.vector_store %arg12[%c28_98, %c96_99], %79 {strides = array<i32>} : memref<100x512xf32, #tpu.memory_space<vmem>>, vector<4x32xf32>,
    %c0_100 = arith.constant 0 : index
    %c872 = arith.constant 872 : index
    %81 = vector.load %arg11[%c0_100, %c872] : memref<4x1152xf32, #tpu.memory_space<vmem>>, vector<4x32xf32>
    %c32_101 = arith.constant 32 : index
    %c0_102 = arith.constant 0 : index
    %82 = vector.load %arg12[%c32_101, %c0_102] : memref<100x512xf32, #tpu.memory_space<vmem>>, vector<4x32xf32>
    tpu.vector_store %arg12[%c32_101, %c0_102], %81 {strides = array<i32>} : memref<100x512xf32, #tpu.memory_space<vmem>>, vector<4x32xf32>,
    %c0_103 = arith.constant 0 : index
    %c920 = arith.constant 920 : index
    %83 = vector.load %arg11[%c0_103, %c920] : memref<4x1152xf32, #tpu.memory_space<vmem>>, vector<4x32xf32>
    %c32_104 = arith.constant 32 : index
    %c32_105 = arith.constant 32 : index
    %84 = vector.load %arg12[%c32_104, %c32_105] : memref<100x512xf32, #tpu.memory_space<vmem>>, vector<4x32xf32>
    tpu.vector_store %arg12[%c32_104, %c32_105], %83 {strides = array<i32>} : memref<100x512xf32, #tpu.memory_space<vmem>>, vector<4x32xf32>,
    %c0_106 = arith.constant 0 : index
    %c968 = arith.constant 968 : index
    %85 = vector.load %arg11[%c0_106, %c968] : memref<4x1152xf32, #tpu.memory_space<vmem>>, vector<4x32xf32>
    %c32_107 = arith.constant 32 : index
    %c64_108 = arith.constant 64 : index
    %86 = vector.load %arg12[%c32_107, %c64_108] : memref<100x512xf32, #tpu.memory_space<vmem>>, vector<4x32xf32>
    tpu.vector_store %arg12[%c32_107, %c64_108], %85 {strides = array<i32>} : memref<100x512xf32, #tpu.memory_space<vmem>>, vector<4x32xf32>,
    %c0_109 = arith.constant 0 : index
    %c1016 = arith.constant 1016 : index
    %87 = vector.load %arg11[%c0_109, %c1016] : memref<4x1152xf32, #tpu.memory_space<vmem>>, vector<4x32xf32>
    %c32_110 = arith.constant 32 : index
    %c96_111 = arith.constant 96 : index
    %88 = vector.load %arg12[%c32_110, %c96_111] : memref<100x512xf32, #tpu.memory_space<vmem>>, vector<4x32xf32>
    tpu.vector_store %arg12[%c32_110, %c96_111], %87 {strides = array<i32>} : memref<100x512xf32, #tpu.memory_space<vmem>>, vector<4x32xf32>,
    %c0_112 = arith.constant 0 : index
    %c592 = arith.constant 592 : index
    %89 = vector.load %arg11[%c0_112, %c592] : memref<4x1152xf32, #tpu.memory_space<vmem>>, vector<4x32xf32>
    %c36 = arith.constant 36 : index
    %c0_113 = arith.constant 0 : index
    %90 = vector.load %arg12[%c36, %c0_113] : memref<100x512xf32, #tpu.memory_space<vmem>>, vector<4x32xf32>
    tpu.vector_store %arg12[%c36, %c0_113], %89 {strides = array<i32>} : memref<100x512xf32, #tpu.memory_space<vmem>>, vector<4x32xf32>,
    %c0_114 = arith.constant 0 : index
    %c640 = arith.constant 640 : index
    %91 = vector.load %arg11[%c0_114, %c640] : memref<4x1152xf32, #tpu.memory_space<vmem>>, vector<4x32xf32>
    %c36_115 = arith.constant 36 : index
    %c32_116 = arith.constant 32 : index
    %92 = vector.load %arg12[%c36_115, %c32_116] : memref<100x512xf32, #tpu.memory_space<vmem>>, vector<4x32xf32>
    tpu.vector_store %arg12[%c36_115, %c32_116], %91 {strides = array<i32>} : memref<100x512xf32, #tpu.memory_space<vmem>>, vector<4x32xf32>,
    %c0_117 = arith.constant 0 : index
    %c688 = arith.constant 688 : index
    %93 = vector.load %arg11[%c0_117, %c688] : memref<4x1152xf32, #tpu.memory_space<vmem>>, vector<4x32xf32>
    %c36_118 = arith.constant 36 : index
    %c64_119 = arith.constant 64 : index
    %94 = vector.load %arg12[%c36_118, %c64_119] : memref<100x512xf32, #tpu.memory_space<vmem>>, vector<4x32xf32>
    tpu.vector_store %arg12[%c36_118, %c64_119], %93 {strides = array<i32>} : memref<100x512xf32, #tpu.memory_space<vmem>>, vector<4x32xf32>,
    %c0_120 = arith.constant 0 : index
    %c736 = arith.constant 736 : index
    %95 = vector.load %arg11[%c0_120, %c736] : memref<4x1152xf32, #tpu.memory_space<vmem>>, vector<4x32xf32>
    %c36_121 = arith.constant 36 : index
    %c96_122 = arith.constant 96 : index
    %96 = vector.load %arg12[%c36_121, %c96_122] : memref<100x512xf32, #tpu.memory_space<vmem>>, vector<4x32xf32>
    tpu.vector_store %arg12[%c36_121, %c96_122], %95 {strides = array<i32>} : memref<100x512xf32, #tpu.memory_space<vmem>>, vector<4x32xf32>,
    %c0_123 = arith.constant 0 : index
    %c48_124 = arith.constant 48 : index
    %97 = vector.load %arg11[%c0_123, %c48_124] : memref<4x1152xf32, #tpu.memory_space<vmem>>, vector<4x32xf32>
    %c40 = arith.constant 40 : index
    %c0_125 = arith.constant 0 : index
    %98 = vector.load %arg12[%c40, %c0_125] : memref<100x512xf32, #tpu.memory_space<vmem>>, vector<4x32xf32>
    tpu.vector_store %arg12[%c40, %c0_125], %97 {strides = array<i32>} : memref<100x512xf32, #tpu.memory_space<vmem>>, vector<4x32xf32>,
    %c0_126 = arith.constant 0 : index
    %c96_127 = arith.constant 96 : index
    %99 = vector.load %arg11[%c0_126, %c96_127] : memref<4x1152xf32, #tpu.memory_space<vmem>>, vector<4x32xf32>
    %c40_128 = arith.constant 40 : index
    %c32_129 = arith.constant 32 : index
    %100 = vector.load %arg12[%c40_128, %c32_129] : memref<100x512xf32, #tpu.memory_space<vmem>>, vector<4x32xf32>
    tpu.vector_store %arg12[%c40_128, %c32_129], %99 {strides = array<i32>} : memref<100x512xf32, #tpu.memory_space<vmem>>, vector<4x32xf32>,
    %c0_130 = arith.constant 0 : index
    %c144_131 = arith.constant 144 : index
    %101 = vector.load %arg11[%c0_130, %c144_131] : memref<4x1152xf32, #tpu.memory_space<vmem>>, vector<4x32xf32>
    %c40_132 = arith.constant 40 : index
    %c64_133 = arith.constant 64 : index
    %102 = vector.load %arg12[%c40_132, %c64_133] : memref<100x512xf32, #tpu.memory_space<vmem>>, vector<4x32xf32>
    tpu.vector_store %arg12[%c40_132, %c64_133], %101 {strides = array<i32>} : memref<100x512xf32, #tpu.memory_space<vmem>>, vector<4x32xf32>,
    %c0_134 = arith.constant 0 : index
    %c192 = arith.constant 192 : index
    %103 = vector.load %arg11[%c0_134, %c192] : memref<4x1152xf32, #tpu.memory_space<vmem>>, vector<4x32xf32>
    %c40_135 = arith.constant 40 : index
    %c96_136 = arith.constant 96 : index
    %104 = vector.load %arg12[%c40_135, %c96_136] : memref<100x512xf32, #tpu.memory_space<vmem>>, vector<4x32xf32>
    tpu.vector_store %arg12[%c40_135, %c96_136], %103 {strides = array<i32>} : memref<100x512xf32, #tpu.memory_space<vmem>>, vector<4x32xf32>,
    %c0_137 = arith.constant 0 : index
    %c336_138 = arith.constant 336 : index
    %105 = vector.load %arg11[%c0_137, %c336_138] : memref<4x1152xf32, #tpu.memory_space<vmem>>, vector<4x32xf32>
    %c44 = arith.constant 44 : index
    %c0_139 = arith.constant 0 : index
    %106 = vector.load %arg12[%c44, %c0_139] : memref<100x512xf32, #tpu.memory_space<vmem>>, vector<4x32xf32>
    tpu.vector_store %arg12[%c44, %c0_139], %105 {strides = array<i32>} : memref<100x512xf32, #tpu.memory_space<vmem>>, vector<4x32xf32>,
    %c0_140 = arith.constant 0 : index
    %c384_141 = arith.constant 384 : index
    %107 = vector.load %arg11[%c0_140, %c384_141] : memref<4x1152xf32, #tpu.memory_space<vmem>>, vector<4x32xf32>
    %c44_142 = arith.constant 44 : index
    %c32_143 = arith.constant 32 : index
    %108 = vector.load %arg12[%c44_142, %c32_143] : memref<100x512xf32, #tpu.memory_space<vmem>>, vector<4x32xf32>
    tpu.vector_store %arg12[%c44_142, %c32_143], %107 {strides = array<i32>} : memref<100x512xf32, #tpu.memory_space<vmem>>, vector<4x32xf32>,
    %c0_144 = arith.constant 0 : index
    %c432_145 = arith.constant 432 : index
    %109 = vector.load %arg11[%c0_144, %c432_145] : memref<4x1152xf32, #tpu.memory_space<vmem>>, vector<4x32xf32>
    %c44_146 = arith.constant 44 : index
    %c64_147 = arith.constant 64 : index
    %110 = vector.load %arg12[%c44_146, %c64_147] : memref<100x512xf32, #tpu.memory_space<vmem>>, vector<4x32xf32>
    tpu.vector_store %arg12[%c44_146, %c64_147], %109 {strides = array<i32>} : memref<100x512xf32, #tpu.memory_space<vmem>>, vector<4x32xf32>,
    %c0_148 = arith.constant 0 : index
    %c480 = arith.constant 480 : index
    %111 = vector.load %arg11[%c0_148, %c480] : memref<4x1152xf32, #tpu.memory_space<vmem>>, vector<4x32xf32>
    %c44_149 = arith.constant 44 : index
    %c96_150 = arith.constant 96 : index
    %112 = vector.load %arg12[%c44_149, %c96_150] : memref<100x512xf32, #tpu.memory_space<vmem>>, vector<4x32xf32>
    tpu.vector_store %arg12[%c44_149, %c96_150], %111 {strides = array<i32>} : memref<100x512xf32, #tpu.memory_space<vmem>>, vector<4x32xf32>,
    %c0_151 = arith.constant 0 : index
    %c56_152 = arith.constant 56 : index
    %113 = vector.load %arg11[%c0_151, %c56_152] : memref<4x1152xf32, #tpu.memory_space<vmem>>, vector<4x32xf32>
    %c48_153 = arith.constant 48 : index
    %c0_154 = arith.constant 0 : index
    %114 = vector.load %arg12[%c48_153, %c0_154] : memref<100x512xf32, #tpu.memory_space<vmem>>, vector<4x32xf32>
    tpu.vector_store %arg12[%c48_153, %c0_154], %113 {strides = array<i32>} : memref<100x512xf32, #tpu.memory_space<vmem>>, vector<4x32xf32>,
    %c0_155 = arith.constant 0 : index
    %c104_156 = arith.constant 104 : index
    %115 = vector.load %arg11[%c0_155, %c104_156] : memref<4x1152xf32, #tpu.memory_space<vmem>>, vector<4x32xf32>
    %c48_157 = arith.constant 48 : index
    %c32_158 = arith.constant 32 : index
    %116 = vector.load %arg12[%c48_157, %c32_158] : memref<100x512xf32, #tpu.memory_space<vmem>>, vector<4x32xf32>
    tpu.vector_store %arg12[%c48_157, %c32_158], %115 {strides = array<i32>} : memref<100x512xf32, #tpu.memory_space<vmem>>, vector<4x32xf32>,
    %c0_159 = arith.constant 0 : index
    %c152_160 = arith.constant 152 : index
    %117 = vector.load %arg11[%c0_159, %c152_160] : memref<4x1152xf32, #tpu.memory_space<vmem>>, vector<4x32xf32>
    %c48_161 = arith.constant 48 : index
    %c64_162 = arith.constant 64 : index
    %118 = vector.load %arg12[%c48_161, %c64_162] : memref<100x512xf32, #tpu.memory_space<vmem>>, vector<4x32xf32>
    tpu.vector_store %arg12[%c48_161, %c64_162], %117 {strides = array<i32>} : memref<100x512xf32, #tpu.memory_space<vmem>>, vector<4x32xf32>,
    %c0_163 = arith.constant 0 : index
    %c200 = arith.constant 200 : index
    %119 = vector.load %arg11[%c0_163, %c200] : memref<4x1152xf32, #tpu.memory_space<vmem>>, vector<4x32xf32>
    %c48_164 = arith.constant 48 : index
    %c96_165 = arith.constant 96 : index
    %120 = vector.load %arg12[%c48_164, %c96_165] : memref<100x512xf32, #tpu.memory_space<vmem>>, vector<4x32xf32>
    tpu.vector_store %arg12[%c48_164, %c96_165], %119 {strides = array<i32>} : memref<100x512xf32, #tpu.memory_space<vmem>>, vector<4x32xf32>,
    %c0_166 = arith.constant 0 : index
    %c344_167 = arith.constant 344 : index
    %121 = vector.load %arg11[%c0_166, %c344_167] : memref<4x1152xf32, #tpu.memory_space<vmem>>, vector<4x32xf32>
    %c52 = arith.constant 52 : index
    %c0_168 = arith.constant 0 : index
    %122 = vector.load %arg12[%c52, %c0_168] : memref<100x512xf32, #tpu.memory_space<vmem>>, vector<4x32xf32>
    tpu.vector_store %arg12[%c52, %c0_168], %121 {strides = array<i32>} : memref<100x512xf32, #tpu.memory_space<vmem>>, vector<4x32xf32>,
    %c0_169 = arith.constant 0 : index
    %c392_170 = arith.constant 392 : index
    %123 = vector.load %arg11[%c0_169, %c392_170] : memref<4x1152xf32, #tpu.memory_space<vmem>>, vector<4x32xf32>
    %c52_171 = arith.constant 52 : index
    %c32_172 = arith.constant 32 : index
    %124 = vector.load %arg12[%c52_171, %c32_172] : memref<100x512xf32, #tpu.memory_space<vmem>>, vector<4x32xf32>
    tpu.vector_store %arg12[%c52_171, %c32_172], %123 {strides = array<i32>} : memref<100x512xf32, #tpu.memory_space<vmem>>, vector<4x32xf32>,
    %c0_173 = arith.constant 0 : index
    %c440_174 = arith.constant 440 : index
    %125 = vector.load %arg11[%c0_173, %c440_174] : memref<4x1152xf32, #tpu.memory_space<vmem>>, vector<4x32xf32>
    %c52_175 = arith.constant 52 : index
    %c64_176 = arith.constant 64 : index
    %126 = vector.load %arg12[%c52_175, %c64_176] : memref<100x512xf32, #tpu.memory_space<vmem>>, vector<4x32xf32>
    tpu.vector_store %arg12[%c52_175, %c64_176], %125 {strides = array<i32>} : memref<100x512xf32, #tpu.memory_space<vmem>>, vector<4x32xf32>,
    %c0_177 = arith.constant 0 : index
    %c488 = arith.constant 488 : index
    %127 = vector.load %arg11[%c0_177, %c488] : memref<4x1152xf32, #tpu.memory_space<vmem>>, vector<4x32xf32>
    %c52_178 = arith.constant 52 : index
    %c96_179 = arith.constant 96 : index
    %128 = vector.load %arg12[%c52_178, %c96_179] : memref<100x512xf32, #tpu.memory_space<vmem>>, vector<4x32xf32>
    tpu.vector_store %arg12[%c52_178, %c96_179], %127 {strides = array<i32>} : memref<100x512xf32, #tpu.memory_space<vmem>>, vector<4x32xf32>,
    %c0_180 = arith.constant 0 : index
    %c64_181 = arith.constant 64 : index
    %129 = vector.load %arg11[%c0_180, %c64_181] : memref<4x1152xf32, #tpu.memory_space<vmem>>, vector<4x32xf32>
    %c56_182 = arith.constant 56 : index
    %c0_183 = arith.constant 0 : index
    %130 = vector.load %arg12[%c56_182, %c0_183] : memref<100x512xf32, #tpu.memory_space<vmem>>, vector<4x32xf32>
    tpu.vector_store %arg12[%c56_182, %c0_183], %129 {strides = array<i32>} : memref<100x512xf32, #tpu.memory_space<vmem>>, vector<4x32xf32>,
    %c0_184 = arith.constant 0 : index
    %c112_185 = arith.constant 112 : index
    %131 = vector.load %arg11[%c0_184, %c112_185] : memref<4x1152xf32, #tpu.memory_space<vmem>>, vector<4x32xf32>
    %c56_186 = arith.constant 56 : index
    %c32_187 = arith.constant 32 : index
    %132 = vector.load %arg12[%c56_186, %c32_187] : memref<100x512xf32, #tpu.memory_space<vmem>>, vector<4x32xf32>
    tpu.vector_store %arg12[%c56_186, %c32_187], %131 {strides = array<i32>} : memref<100x512xf32, #tpu.memory_space<vmem>>, vector<4x32xf32>,
    %c0_188 = arith.constant 0 : index
    %c160_189 = arith.constant 160 : index
    %133 = vector.load %arg11[%c0_188, %c160_189] : memref<4x1152xf32, #tpu.memory_space<vmem>>, vector<4x32xf32>
    %c56_190 = arith.constant 56 : index
    %c64_191 = arith.constant 64 : index
    %134 = vector.load %arg12[%c56_190, %c64_191] : memref<100x512xf32, #tpu.memory_space<vmem>>, vector<4x32xf32>
    tpu.vector_store %arg12[%c56_190, %c64_191], %133 {strides = array<i32>} : memref<100x512xf32, #tpu.memory_space<vmem>>, vector<4x32xf32>,
    %c0_192 = arith.constant 0 : index
    %c208 = arith.constant 208 : index
    %135 = vector.load %arg11[%c0_192, %c208] : memref<4x1152xf32, #tpu.memory_space<vmem>>, vector<4x32xf32>
    %c56_193 = arith.constant 56 : index
    %c96_194 = arith.constant 96 : index
    %136 = vector.load %arg12[%c56_193, %c96_194] : memref<100x512xf32, #tpu.memory_space<vmem>>, vector<4x32xf32>
    tpu.vector_store %arg12[%c56_193, %c96_194], %135 {strides = array<i32>} : memref<100x512xf32, #tpu.memory_space<vmem>>, vector<4x32xf32>,
    %c0_195 = arith.constant 0 : index
    %c624_196 = arith.constant 624 : index
    %137 = vector.load %arg11[%c0_195, %c624_196] : memref<4x1152xf32, #tpu.memory_space<vmem>>, vector<4x32xf32>
    %c60 = arith.constant 60 : index
    %c0_197 = arith.constant 0 : index
    %138 = vector.load %arg12[%c60, %c0_197] : memref<100x512xf32, #tpu.memory_space<vmem>>, vector<4x32xf32>
    tpu.vector_store %arg12[%c60, %c0_197], %137 {strides = array<i32>} : memref<100x512xf32, #tpu.memory_space<vmem>>, vector<4x32xf32>,
    %c0_198 = arith.constant 0 : index
    %c672_199 = arith.constant 672 : index
    %139 = vector.load %arg11[%c0_198, %c672_199] : memref<4x1152xf32, #tpu.memory_space<vmem>>, vector<4x32xf32>
    %c60_200 = arith.constant 60 : index
    %c32_201 = arith.constant 32 : index
    %140 = vector.load %arg12[%c60_200, %c32_201] : memref<100x512xf32, #tpu.memory_space<vmem>>, vector<4x32xf32>
    tpu.vector_store %arg12[%c60_200, %c32_201], %139 {strides = array<i32>} : memref<100x512xf32, #tpu.memory_space<vmem>>, vector<4x32xf32>,
    %c0_202 = arith.constant 0 : index
    %c720_203 = arith.constant 720 : index
    %141 = vector.load %arg11[%c0_202, %c720_203] : memref<4x1152xf32, #tpu.memory_space<vmem>>, vector<4x32xf32>
    %c60_204 = arith.constant 60 : index
    %c64_205 = arith.constant 64 : index
    %142 = vector.load %arg12[%c60_204, %c64_205] : memref<100x512xf32, #tpu.memory_space<vmem>>, vector<4x32xf32>
    tpu.vector_store %arg12[%c60_204, %c64_205], %141 {strides = array<i32>} : memref<100x512xf32, #tpu.memory_space<vmem>>, vector<4x32xf32>,
    %c0_206 = arith.constant 0 : index
    %c768 = arith.constant 768 : index
    %143 = vector.load %arg11[%c0_206, %c768] : memref<4x1152xf32, #tpu.memory_space<vmem>>, vector<4x32xf32>
    %c60_207 = arith.constant 60 : index
    %c96_208 = arith.constant 96 : index
    %144 = vector.load %arg12[%c60_207, %c96_208] : memref<100x512xf32, #tpu.memory_space<vmem>>, vector<4x32xf32>
    tpu.vector_store %arg12[%c60_207, %c96_208], %143 {strides = array<i32>} : memref<100x512xf32, #tpu.memory_space<vmem>>, vector<4x32xf32>,
    %c0_209 = arith.constant 0 : index
    %c912_210 = arith.constant 912 : index
    %145 = vector.load %arg11[%c0_209, %c912_210] : memref<4x1152xf32, #tpu.memory_space<vmem>>, vector<4x32xf32>
    %c64_211 = arith.constant 64 : index
    %c0_212 = arith.constant 0 : index
    %146 = vector.load %arg12[%c64_211, %c0_212] : memref<100x512xf32, #tpu.memory_space<vmem>>, vector<4x32xf32>
    tpu.vector_store %arg12[%c64_211, %c0_212], %145 {strides = array<i32>} : memref<100x512xf32, #tpu.memory_space<vmem>>, vector<4x32xf32>,
    %c0_213 = arith.constant 0 : index
    %c960_214 = arith.constant 960 : index
    %147 = vector.load %arg11[%c0_213, %c960_214] : memref<4x1152xf32, #tpu.memory_space<vmem>>, vector<4x32xf32>
    %c64_215 = arith.constant 64 : index
    %c32_216 = arith.constant 32 : index
    %148 = vector.load %arg12[%c64_215, %c32_216] : memref<100x512xf32, #tpu.memory_space<vmem>>, vector<4x32xf32>
    tpu.vector_store %arg12[%c64_215, %c32_216], %147 {strides = array<i32>} : memref<100x512xf32, #tpu.memory_space<vmem>>, vector<4x32xf32>,
    %c0_217 = arith.constant 0 : index
    %c1008_218 = arith.constant 1008 : index
    %149 = vector.load %arg11[%c0_217, %c1008_218] : memref<4x1152xf32, #tpu.memory_space<vmem>>, vector<4x32xf32>
    %c64_219 = arith.constant 64 : index
    %c64_220 = arith.constant 64 : index
    %150 = vector.load %arg12[%c64_219, %c64_220] : memref<100x512xf32, #tpu.memory_space<vmem>>, vector<4x32xf32>
    tpu.vector_store %arg12[%c64_219, %c64_220], %149 {strides = array<i32>} : memref<100x512xf32, #tpu.memory_space<vmem>>, vector<4x32xf32>,
    %c0_221 = arith.constant 0 : index
    %c1056 = arith.constant 1056 : index
    %151 = vector.load %arg11[%c0_221, %c1056] : memref<4x1152xf32, #tpu.memory_space<vmem>>, vector<4x32xf32>
    %c64_222 = arith.constant 64 : index
    %c96_223 = arith.constant 96 : index
    %152 = vector.load %arg12[%c64_222, %c96_223] : memref<100x512xf32, #tpu.memory_space<vmem>>, vector<4x32xf32>
    tpu.vector_store %arg12[%c64_222, %c96_223], %151 {strides = array<i32>} : memref<100x512xf32, #tpu.memory_space<vmem>>, vector<4x32xf32>,
    %c0_224 = arith.constant 0 : index
    %c632_225 = arith.constant 632 : index
    %153 = vector.load %arg11[%c0_224, %c632_225] : memref<4x1152xf32, #tpu.memory_space<vmem>>, vector<4x32xf32>
    %c68 = arith.constant 68 : index
    %c0_226 = arith.constant 0 : index
    %154 = vector.load %arg12[%c68, %c0_226] : memref<100x512xf32, #tpu.memory_space<vmem>>, vector<4x32xf32>
    tpu.vector_store %arg12[%c68, %c0_226], %153 {strides = array<i32>} : memref<100x512xf32, #tpu.memory_space<vmem>>, vector<4x32xf32>,
    %c0_227 = arith.constant 0 : index
    %c680_228 = arith.constant 680 : index
    %155 = vector.load %arg11[%c0_227, %c680_228] : memref<4x1152xf32, #tpu.memory_space<vmem>>, vector<4x32xf32>
    %c68_229 = arith.constant 68 : index
    %c32_230 = arith.constant 32 : index
    %156 = vector.load %arg12[%c68_229, %c32_230] : memref<100x512xf32, #tpu.memory_space<vmem>>, vector<4x32xf32>
    tpu.vector_store %arg12[%c68_229, %c32_230], %155 {strides = array<i32>} : memref<100x512xf32, #tpu.memory_space<vmem>>, vector<4x32xf32>,
    %c0_231 = arith.constant 0 : index
    %c728_232 = arith.constant 728 : index
    %157 = vector.load %arg11[%c0_231, %c728_232] : memref<4x1152xf32, #tpu.memory_space<vmem>>, vector<4x32xf32>
    %c68_233 = arith.constant 68 : index
    %c64_234 = arith.constant 64 : index
    %158 = vector.load %arg12[%c68_233, %c64_234] : memref<100x512xf32, #tpu.memory_space<vmem>>, vector<4x32xf32>
    tpu.vector_store %arg12[%c68_233, %c64_234], %157 {strides = array<i32>} : memref<100x512xf32, #tpu.memory_space<vmem>>, vector<4x32xf32>,
    %c0_235 = arith.constant 0 : index
    %c776 = arith.constant 776 : index
    %159 = vector.load %arg11[%c0_235, %c776] : memref<4x1152xf32, #tpu.memory_space<vmem>>, vector<4x32xf32>
    %c68_236 = arith.constant 68 : index
    %c96_237 = arith.constant 96 : index
    %160 = vector.load %arg12[%c68_236, %c96_237] : memref<100x512xf32, #tpu.memory_space<vmem>>, vector<4x32xf32>
    tpu.vector_store %arg12[%c68_236, %c96_237], %159 {strides = array<i32>} : memref<100x512xf32, #tpu.memory_space<vmem>>, vector<4x32xf32>,
    %c0_238 = arith.constant 0 : index
    %c920_239 = arith.constant 920 : index
    %161 = vector.load %arg11[%c0_238, %c920_239] : memref<4x1152xf32, #tpu.memory_space<vmem>>, vector<4x32xf32>
    %c72 = arith.constant 72 : index
    %c0_240 = arith.constant 0 : index
    %162 = vector.load %arg12[%c72, %c0_240] : memref<100x512xf32, #tpu.memory_space<vmem>>, vector<4x32xf32>
    tpu.vector_store %arg12[%c72, %c0_240], %161 {strides = array<i32>} : memref<100x512xf32, #tpu.memory_space<vmem>>, vector<4x32xf32>,
    %c0_241 = arith.constant 0 : index
    %c968_242 = arith.constant 968 : index
    %163 = vector.load %arg11[%c0_241, %c968_242] : memref<4x1152xf32, #tpu.memory_space<vmem>>, vector<4x32xf32>
    %c72_243 = arith.constant 72 : index
    %c32_244 = arith.constant 32 : index
    %164 = vector.load %arg12[%c72_243, %c32_244] : memref<100x512xf32, #tpu.memory_space<vmem>>, vector<4x32xf32>
    tpu.vector_store %arg12[%c72_243, %c32_244], %163 {strides = array<i32>} : memref<100x512xf32, #tpu.memory_space<vmem>>, vector<4x32xf32>,
    %c0_245 = arith.constant 0 : index
    %c1016_246 = arith.constant 1016 : index
    %165 = vector.load %arg11[%c0_245, %c1016_246] : memref<4x1152xf32, #tpu.memory_space<vmem>>, vector<4x32xf32>
    %c72_247 = arith.constant 72 : index
    %c64_248 = arith.constant 64 : index
    %166 = vector.load %arg12[%c72_247, %c64_248] : memref<100x512xf32, #tpu.memory_space<vmem>>, vector<4x32xf32>
    tpu.vector_store %arg12[%c72_247, %c64_248], %165 {strides = array<i32>} : memref<100x512xf32, #tpu.memory_space<vmem>>, vector<4x32xf32>,
    %c0_249 = arith.constant 0 : index
    %c1064 = arith.constant 1064 : index
    %167 = vector.load %arg11[%c0_249, %c1064] : memref<4x1152xf32, #tpu.memory_space<vmem>>, vector<4x32xf32>
    %c72_250 = arith.constant 72 : index
    %c96_251 = arith.constant 96 : index
    %168 = vector.load %arg12[%c72_250, %c96_251] : memref<100x512xf32, #tpu.memory_space<vmem>>, vector<4x32xf32>
    tpu.vector_store %arg12[%c72_250, %c96_251], %167 {strides = array<i32>} : memref<100x512xf32, #tpu.memory_space<vmem>>, vector<4x32xf32>,
    %c0_252 = arith.constant 0 : index
    %c640_253 = arith.constant 640 : index
    %169 = vector.load %arg11[%c0_252, %c640_253] : memref<4x1152xf32, #tpu.memory_space<vmem>>, vector<4x32xf32>
    %c76 = arith.constant 76 : index
    %c0_254 = arith.constant 0 : index
    %170 = vector.load %arg12[%c76, %c0_254] : memref<100x512xf32, #tpu.memory_space<vmem>>, vector<4x32xf32>
    tpu.vector_store %arg12[%c76, %c0_254], %169 {strides = array<i32>} : memref<100x512xf32, #tpu.memory_space<vmem>>, vector<4x32xf32>,
    %c0_255 = arith.constant 0 : index
    %c688_256 = arith.constant 688 : index
    %171 = vector.load %arg11[%c0_255, %c688_256] : memref<4x1152xf32, #tpu.memory_space<vmem>>, vector<4x32xf32>
    %c76_257 = arith.constant 76 : index
    %c32_258 = arith.constant 32 : index
    %172 = vector.load %arg12[%c76_257, %c32_258] : memref<100x512xf32, #tpu.memory_space<vmem>>, vector<4x32xf32>
    tpu.vector_store %arg12[%c76_257, %c32_258], %171 {strides = array<i32>} : memref<100x512xf32, #tpu.memory_space<vmem>>, vector<4x32xf32>,
    %c0_259 = arith.constant 0 : index
    %c736_260 = arith.constant 736 : index
    %173 = vector.load %arg11[%c0_259, %c736_260] : memref<4x1152xf32, #tpu.memory_space<vmem>>, vector<4x32xf32>
    %c76_261 = arith.constant 76 : index
    %c64_262 = arith.constant 64 : index
    %174 = vector.load %arg12[%c76_261, %c64_262] : memref<100x512xf32, #tpu.memory_space<vmem>>, vector<4x32xf32>
    tpu.vector_store %arg12[%c76_261, %c64_262], %173 {strides = array<i32>} : memref<100x512xf32, #tpu.memory_space<vmem>>, vector<4x32xf32>,
    %c0_263 = arith.constant 0 : index
    %c784 = arith.constant 784 : index
    %175 = vector.load %arg11[%c0_263, %c784] : memref<4x1152xf32, #tpu.memory_space<vmem>>, vector<4x32xf32>
    %c76_264 = arith.constant 76 : index
    %c96_265 = arith.constant 96 : index
    %176 = vector.load %arg12[%c76_264, %c96_265] : memref<100x512xf32, #tpu.memory_space<vmem>>, vector<4x32xf32>
    tpu.vector_store %arg12[%c76_264, %c96_265], %175 {strides = array<i32>} : memref<100x512xf32, #tpu.memory_space<vmem>>, vector<4x32xf32>,
    %c0_266 = arith.constant 0 : index
    %c96_267 = arith.constant 96 : index
    %177 = vector.load %arg11[%c0_266, %c96_267] : memref<4x1152xf32, #tpu.memory_space<vmem>>, vector<4x32xf32>
    %c80 = arith.constant 80 : index
    %c0_268 = arith.constant 0 : index
    %178 = vector.load %arg12[%c80, %c0_268] : memref<100x512xf32, #tpu.memory_space<vmem>>, vector<4x32xf32>
    tpu.vector_store %arg12[%c80, %c0_268], %177 {strides = array<i32>} : memref<100x512xf32, #tpu.memory_space<vmem>>, vector<4x32xf32>,
    %c0_269 = arith.constant 0 : index
    %c144_270 = arith.constant 144 : index
    %179 = vector.load %arg11[%c0_269, %c144_270] : memref<4x1152xf32, #tpu.memory_space<vmem>>, vector<4x32xf32>
    %c80_271 = arith.constant 80 : index
    %c32_272 = arith.constant 32 : index
    %180 = vector.load %arg12[%c80_271, %c32_272] : memref<100x512xf32, #tpu.memory_space<vmem>>, vector<4x32xf32>
    tpu.vector_store %arg12[%c80_271, %c32_272], %179 {strides = array<i32>} : memref<100x512xf32, #tpu.memory_space<vmem>>, vector<4x32xf32>,
    %c0_273 = arith.constant 0 : index
    %c192_274 = arith.constant 192 : index
    %181 = vector.load %arg11[%c0_273, %c192_274] : memref<4x1152xf32, #tpu.memory_space<vmem>>, vector<4x32xf32>
    %c80_275 = arith.constant 80 : index
    %c64_276 = arith.constant 64 : index
    %182 = vector.load %arg12[%c80_275, %c64_276] : memref<100x512xf32, #tpu.memory_space<vmem>>, vector<4x32xf32>
    tpu.vector_store %arg12[%c80_275, %c64_276], %181 {strides = array<i32>} : memref<100x512xf32, #tpu.memory_space<vmem>>, vector<4x32xf32>,
    %c0_277 = arith.constant 0 : index
    %c240 = arith.constant 240 : index
    %183 = vector.load %arg11[%c0_277, %c240] : memref<4x1152xf32, #tpu.memory_space<vmem>>, vector<4x32xf32>
    %c80_278 = arith.constant 80 : index
    %c96_279 = arith.constant 96 : index
    %184 = vector.load %arg12[%c80_278, %c96_279] : memref<100x512xf32, #tpu.memory_space<vmem>>, vector<4x32xf32>
    tpu.vector_store %arg12[%c80_278, %c96_279], %183 {strides = array<i32>} : memref<100x512xf32, #tpu.memory_space<vmem>>, vector<4x32xf32>,
    %c0_280 = arith.constant 0 : index
    %c384_281 = arith.constant 384 : index
    %185 = vector.load %arg11[%c0_280, %c384_281] : memref<4x1152xf32, #tpu.memory_space<vmem>>, vector<4x32xf32>
    %c84 = arith.constant 84 : index
    %c0_282 = arith.constant 0 : index
    %186 = vector.load %arg12[%c84, %c0_282] : memref<100x512xf32, #tpu.memory_space<vmem>>, vector<4x32xf32>
    tpu.vector_store %arg12[%c84, %c0_282], %185 {strides = array<i32>} : memref<100x512xf32, #tpu.memory_space<vmem>>, vector<4x32xf32>,
    %c0_283 = arith.constant 0 : index
    %c432_284 = arith.constant 432 : index
    %187 = vector.load %arg11[%c0_283, %c432_284] : memref<4x1152xf32, #tpu.memory_space<vmem>>, vector<4x32xf32>
    %c84_285 = arith.constant 84 : index
    %c32_286 = arith.constant 32 : index
    %188 = vector.load %arg12[%c84_285, %c32_286] : memref<100x512xf32, #tpu.memory_space<vmem>>, vector<4x32xf32>
    tpu.vector_store %arg12[%c84_285, %c32_286], %187 {strides = array<i32>} : memref<100x512xf32, #tpu.memory_space<vmem>>, vector<4x32xf32>,
    %c0_287 = arith.constant 0 : index
    %c480_288 = arith.constant 480 : index
    %189 = vector.load %arg11[%c0_287, %c480_288] : memref<4x1152xf32, #tpu.memory_space<vmem>>, vector<4x32xf32>
    %c84_289 = arith.constant 84 : index
    %c64_290 = arith.constant 64 : index
    %190 = vector.load %arg12[%c84_289, %c64_290] : memref<100x512xf32, #tpu.memory_space<vmem>>, vector<4x32xf32>
    tpu.vector_store %arg12[%c84_289, %c64_290], %189 {strides = array<i32>} : memref<100x512xf32, #tpu.memory_space<vmem>>, vector<4x32xf32>,
    %c0_291 = arith.constant 0 : index
    %c528 = arith.constant 528 : index
    %191 = vector.load %arg11[%c0_291, %c528] : memref<4x1152xf32, #tpu.memory_space<vmem>>, vector<4x32xf32>
    %c84_292 = arith.constant 84 : index
    %c96_293 = arith.constant 96 : index
    %192 = vector.load %arg12[%c84_292, %c96_293] : memref<100x512xf32, #tpu.memory_space<vmem>>, vector<4x32xf32>
    tpu.vector_store %arg12[%c84_292, %c96_293], %191 {strides = array<i32>} : memref<100x512xf32, #tpu.memory_space<vmem>>, vector<4x32xf32>,
    %c0_294 = arith.constant 0 : index
    %c104_295 = arith.constant 104 : index
    %193 = vector.load %arg11[%c0_294, %c104_295] : memref<4x1152xf32, #tpu.memory_space<vmem>>, vector<4x32xf32>
    %c88 = arith.constant 88 : index
    %c0_296 = arith.constant 0 : index
    %194 = vector.load %arg12[%c88, %c0_296] : memref<100x512xf32, #tpu.memory_space<vmem>>, vector<4x32xf32>
    tpu.vector_store %arg12[%c88, %c0_296], %193 {strides = array<i32>} : memref<100x512xf32, #tpu.memory_space<vmem>>, vector<4x32xf32>,
    %c0_297 = arith.constant 0 : index
    %c152_298 = arith.constant 152 : index
    %195 = vector.load %arg11[%c0_297, %c152_298] : memref<4x1152xf32, #tpu.memory_space<vmem>>, vector<4x32xf32>
    %c88_299 = arith.constant 88 : index
    %c32_300 = arith.constant 32 : index
    %196 = vector.load %arg12[%c88_299, %c32_300] : memref<100x512xf32, #tpu.memory_space<vmem>>, vector<4x32xf32>
    tpu.vector_store %arg12[%c88_299, %c32_300], %195 {strides = array<i32>} : memref<100x512xf32, #tpu.memory_space<vmem>>, vector<4x32xf32>,
    %c0_301 = arith.constant 0 : index
    %c200_302 = arith.constant 200 : index
    %197 = vector.load %arg11[%c0_301, %c200_302] : memref<4x1152xf32, #tpu.memory_space<vmem>>, vector<4x32xf32>
    %c88_303 = arith.constant 88 : index
    %c64_304 = arith.constant 64 : index
    %198 = vector.load %arg12[%c88_303, %c64_304] : memref<100x512xf32, #tpu.memory_space<vmem>>, vector<4x32xf32>
    tpu.vector_store %arg12[%c88_303, %c64_304], %197 {strides = array<i32>} : memref<100x512xf32, #tpu.memory_space<vmem>>, vector<4x32xf32>,
    %c0_305 = arith.constant 0 : index
    %c248 = arith.constant 248 : index
    %199 = vector.load %arg11[%c0_305, %c248] : memref<4x1152xf32, #tpu.memory_space<vmem>>, vector<4x32xf32>
    %c88_306 = arith.constant 88 : index
    %c96_307 = arith.constant 96 : index
    %200 = vector.load %arg12[%c88_306, %c96_307] : memref<100x512xf32, #tpu.memory_space<vmem>>, vector<4x32xf32>
    tpu.vector_store %arg12[%c88_306, %c96_307], %199 {strides = array<i32>} : memref<100x512xf32, #tpu.memory_space<vmem>>, vector<4x32xf32>,
    %c0_308 = arith.constant 0 : index
    %c392_309 = arith.constant 392 : index
    %201 = vector.load %arg11[%c0_308, %c392_309] : memref<4x1152xf32, #tpu.memory_space<vmem>>, vector<4x32xf32>
    %c92 = arith.constant 92 : index
    %c0_310 = arith.constant 0 : index
    %202 = vector.load %arg12[%c92, %c0_310] : memref<100x512xf32, #tpu.memory_space<vmem>>, vector<4x32xf32>
    tpu.vector_store %arg12[%c92, %c0_310], %201 {strides = array<i32>} : memref<100x512xf32, #tpu.memory_space<vmem>>, vector<4x32xf32>,
    %c0_311 = arith.constant 0 : index
    %c440_312 = arith.constant 440 : index
    %203 = vector.load %arg11[%c0_311, %c440_312] : memref<4x1152xf32, #tpu.memory_space<vmem>>, vector<4x32xf32>
    %c92_313 = arith.constant 92 : index
    %c32_314 = arith.constant 32 : index
    %204 = vector.load %arg12[%c92_313, %c32_314] : memref<100x512xf32, #tpu.memory_space<vmem>>, vector<4x32xf32>
    tpu.vector_store %arg12[%c92_313, %c32_314], %203 {strides = array<i32>} : memref<100x512xf32, #tpu.memory_space<vmem>>, vector<4x32xf32>,
    %c0_315 = arith.constant 0 : index
    %c488_316 = arith.constant 488 : index
    %205 = vector.load %arg11[%c0_315, %c488_316] : memref<4x1152xf32, #tpu.memory_space<vmem>>, vector<4x32xf32>
    %c92_317 = arith.constant 92 : index
    %c64_318 = arith.constant 64 : index
    %206 = vector.load %arg12[%c92_317, %c64_318] : memref<100x512xf32, #tpu.memory_space<vmem>>, vector<4x32xf32>
    tpu.vector_store %arg12[%c92_317, %c64_318], %205 {strides = array<i32>} : memref<100x512xf32, #tpu.memory_space<vmem>>, vector<4x32xf32>,
    %c0_319 = arith.constant 0 : index
    %c536 = arith.constant 536 : index
    %207 = vector.load %arg11[%c0_319, %c536] : memref<4x1152xf32, #tpu.memory_space<vmem>>, vector<4x32xf32>
    %c92_320 = arith.constant 92 : index
    %c96_321 = arith.constant 96 : index
    %208 = vector.load %arg12[%c92_320, %c96_321] : memref<100x512xf32, #tpu.memory_space<vmem>>, vector<4x32xf32>
    tpu.vector_store %arg12[%c92_320, %c96_321], %207 {strides = array<i32>} : memref<100x512xf32, #tpu.memory_space<vmem>>, vector<4x32xf32>,
    %c0_322 = arith.constant 0 : index
    %c112_323 = arith.constant 112 : index
    %209 = vector.load %arg11[%c0_322, %c112_323] : memref<4x1152xf32, #tpu.memory_space<vmem>>, vector<4x32xf32>
    %c96_324 = arith.constant 96 : index
    %c0_325 = arith.constant 0 : index
    %210 = vector.load %arg12[%c96_324, %c0_325] : memref<100x512xf32, #tpu.memory_space<vmem>>, vector<4x32xf32>
    tpu.vector_store %arg12[%c96_324, %c0_325], %209 {strides = array<i32>} : memref<100x512xf32, #tpu.memory_space<vmem>>, vector<4x32xf32>,
    %c0_326 = arith.constant 0 : index
    %c160_327 = arith.constant 160 : index
    %211 = vector.load %arg11[%c0_326, %c160_327] : memref<4x1152xf32, #tpu.memory_space<vmem>>, vector<4x32xf32>
    %c96_328 = arith.constant 96 : index
    %c32_329 = arith.constant 32 : index
    %212 = vector.load %arg12[%c96_328, %c32_329] : memref<100x512xf32, #tpu.memory_space<vmem>>, vector<4x32xf32>
    tpu.vector_store %arg12[%c96_328, %c32_329], %211 {strides = array<i32>} : memref<100x512xf32, #tpu.memory_space<vmem>>, vector<4x32xf32>,
    %c0_330 = arith.constant 0 : index
    %c208_331 = arith.constant 208 : index
    %213 = vector.load %arg11[%c0_330, %c208_331] : memref<4x1152xf32, #tpu.memory_space<vmem>>, vector<4x32xf32>
    %c96_332 = arith.constant 96 : index
    %c64_333 = arith.constant 64 : index
    %214 = vector.load %arg12[%c96_332, %c64_333] : memref<100x512xf32, #tpu.memory_space<vmem>>, vector<4x32xf32>
    tpu.vector_store %arg12[%c96_332, %c64_333], %213 {strides = array<i32>} : memref<100x512xf32, #tpu.memory_space<vmem>>, vector<4x32xf32>,
    %c0_334 = arith.constant 0 : index
    %c256 = arith.constant 256 : index
    %215 = vector.load %arg11[%c0_334, %c256] : memref<4x1152xf32, #tpu.memory_space<vmem>>, vector<4x32xf32>
    %c96_335 = arith.constant 96 : index
    %c96_336 = arith.constant 96 : index
    %216 = vector.load %arg12[%c96_335, %c96_336] : memref<100x512xf32, #tpu.memory_space<vmem>>, vector<4x32xf32>
    tpu.vector_store %arg12[%c96_335, %c96_336], %215 {strides = array<i32>} : memref<100x512xf32, #tpu.memory_space<vmem>>, vector<4x32xf32>,
    %c0_337 = arith.constant 0 : index
    %c288_338 = arith.constant 288 : index
    %217 = vector.load %arg11[%c0_337, %c288_338] : memref<4x1152xf32, #tpu.memory_space<vmem>>, vector<4x32xf32>
    %c0_339 = arith.constant 0 : index
    %c128 = arith.constant 128 : index
    %218 = vector.load %arg12[%c0_339, %c128] : memref<100x512xf32, #tpu.memory_space<vmem>>, vector<4x32xf32>
    tpu.vector_store %arg12[%c0_339, %c128], %217 {strides = array<i32>} : memref<100x512xf32, #tpu.memory_space<vmem>>, vector<4x32xf32>,
    %c0_340 = arith.constant 0 : index
    %c336_341 = arith.constant 336 : index
    %219 = vector.load %arg11[%c0_340, %c336_341] : memref<4x1152xf32, #tpu.memory_space<vmem>>, vector<4x32xf32>
    %c0_342 = arith.constant 0 : index
    %c160_343 = arith.constant 160 : index
    %220 = vector.load %arg12[%c0_342, %c160_343] : memref<100x512xf32, #tpu.memory_space<vmem>>, vector<4x32xf32>
    tpu.vector_store %arg12[%c0_342, %c160_343], %219 {strides = array<i32>} : memref<100x512xf32, #tpu.memory_space<vmem>>, vector<4x32xf32>,
    %c0_344 = arith.constant 0 : index
    %c384_345 = arith.constant 384 : index
    %221 = vector.load %arg11[%c0_344, %c384_345] : memref<4x1152xf32, #tpu.memory_space<vmem>>, vector<4x32xf32>
    %c0_346 = arith.constant 0 : index
    %c192_347 = arith.constant 192 : index
    %222 = vector.load %arg12[%c0_346, %c192_347] : memref<100x512xf32, #tpu.memory_space<vmem>>, vector<4x32xf32>
    tpu.vector_store %arg12[%c0_346, %c192_347], %221 {strides = array<i32>} : memref<100x512xf32, #tpu.memory_space<vmem>>, vector<4x32xf32>,
    %c0_348 = arith.constant 0 : index
    %c432_349 = arith.constant 432 : index
    %223 = vector.load %arg11[%c0_348, %c432_349] : memref<4x1152xf32, #tpu.memory_space<vmem>>, vector<4x32xf32>
    %c0_350 = arith.constant 0 : index
    %c224 = arith.constant 224 : index
    %224 = vector.load %arg12[%c0_350, %c224] : memref<100x512xf32, #tpu.memory_space<vmem>>, vector<4x32xf32>
    tpu.vector_store %arg12[%c0_350, %c224], %223 {strides = array<i32>} : memref<100x512xf32, #tpu.memory_space<vmem>>, vector<4x32xf32>,
    %c0_351 = arith.constant 0 : index
    %c8_352 = arith.constant 8 : index
    %225 = vector.load %arg11[%c0_351, %c8_352] : memref<4x1152xf32, #tpu.memory_space<vmem>>, vector<4x32xf32>
    %c4_353 = arith.constant 4 : index
    %c128_354 = arith.constant 128 : index
    %226 = vector.load %arg12[%c4_353, %c128_354] : memref<100x512xf32, #tpu.memory_space<vmem>>, vector<4x32xf32>
    tpu.vector_store %arg12[%c4_353, %c128_354], %225 {strides = array<i32>} : memref<100x512xf32, #tpu.memory_space<vmem>>, vector<4x32xf32>,
    %c0_355 = arith.constant 0 : index
    %c56_356 = arith.constant 56 : index
    %227 = vector.load %arg11[%c0_355, %c56_356] : memref<4x1152xf32, #tpu.memory_space<vmem>>, vector<4x32xf32>
    %c4_357 = arith.constant 4 : index
    %c160_358 = arith.constant 160 : index
    %228 = vector.load %arg12[%c4_357, %c160_358] : memref<100x512xf32, #tpu.memory_space<vmem>>, vector<4x32xf32>
    tpu.vector_store %arg12[%c4_357, %c160_358], %227 {strides = array<i32>} : memref<100x512xf32, #tpu.memory_space<vmem>>, vector<4x32xf32>,
    %c0_359 = arith.constant 0 : index
    %c104_360 = arith.constant 104 : index
    %229 = vector.load %arg11[%c0_359, %c104_360] : memref<4x1152xf32, #tpu.memory_space<vmem>>, vector<4x32xf32>
    %c4_361 = arith.constant 4 : index
    %c192_362 = arith.constant 192 : index
    %230 = vector.load %arg12[%c4_361, %c192_362] : memref<100x512xf32, #tpu.memory_space<vmem>>, vector<4x32xf32>
    tpu.vector_store %arg12[%c4_361, %c192_362], %229 {strides = array<i32>} : memref<100x512xf32, #tpu.memory_space<vmem>>, vector<4x32xf32>,
    %c0_363 = arith.constant 0 : index
    %c152_364 = arith.constant 152 : index
    %231 = vector.load %arg11[%c0_363, %c152_364] : memref<4x1152xf32, #tpu.memory_space<vmem>>, vector<4x32xf32>
    %c4_365 = arith.constant 4 : index
    %c224_366 = arith.constant 224 : index
    %232 = vector.load %arg12[%c4_365, %c224_366] : memref<100x512xf32, #tpu.memory_space<vmem>>, vector<4x32xf32>
    tpu.vector_store %arg12[%c4_365, %c224_366], %231 {strides = array<i32>} : memref<100x512xf32, #tpu.memory_space<vmem>>, vector<4x32xf32>,
    %c0_367 = arith.constant 0 : index
    %c296_368 = arith.constant 296 : index
    %233 = vector.load %arg11[%c0_367, %c296_368] : memref<4x1152xf32, #tpu.memory_space<vmem>>, vector<4x32xf32>
    %c8_369 = arith.constant 8 : index
    %c128_370 = arith.constant 128 : index
    %234 = vector.load %arg12[%c8_369, %c128_370] : memref<100x512xf32, #tpu.memory_space<vmem>>, vector<4x32xf32>
    tpu.vector_store %arg12[%c8_369, %c128_370], %233 {strides = array<i32>} : memref<100x512xf32, #tpu.memory_space<vmem>>, vector<4x32xf32>,
    %c0_371 = arith.constant 0 : index
    %c344_372 = arith.constant 344 : index
    %235 = vector.load %arg11[%c0_371, %c344_372] : memref<4x1152xf32, #tpu.memory_space<vmem>>, vector<4x32xf32>
    %c8_373 = arith.constant 8 : index
    %c160_374 = arith.constant 160 : index
    %236 = vector.load %arg12[%c8_373, %c160_374] : memref<100x512xf32, #tpu.memory_space<vmem>>, vector<4x32xf32>
    tpu.vector_store %arg12[%c8_373, %c160_374], %235 {strides = array<i32>} : memref<100x512xf32, #tpu.memory_space<vmem>>, vector<4x32xf32>,
    %c0_375 = arith.constant 0 : index
    %c392_376 = arith.constant 392 : index
    %237 = vector.load %arg11[%c0_375, %c392_376] : memref<4x1152xf32, #tpu.memory_space<vmem>>, vector<4x32xf32>
    %c8_377 = arith.constant 8 : index
    %c192_378 = arith.constant 192 : index
    %238 = vector.load %arg12[%c8_377, %c192_378] : memref<100x512xf32, #tpu.memory_space<vmem>>, vector<4x32xf32>
    tpu.vector_store %arg12[%c8_377, %c192_378], %237 {strides = array<i32>} : memref<100x512xf32, #tpu.memory_space<vmem>>, vector<4x32xf32>,
    %c0_379 = arith.constant 0 : index
    %c440_380 = arith.constant 440 : index
    %239 = vector.load %arg11[%c0_379, %c440_380] : memref<4x1152xf32, #tpu.memory_space<vmem>>, vector<4x32xf32>
    %c8_381 = arith.constant 8 : index
    %c224_382 = arith.constant 224 : index
    %240 = vector.load %arg12[%c8_381, %c224_382] : memref<100x512xf32, #tpu.memory_space<vmem>>, vector<4x32xf32>
    tpu.vector_store %arg12[%c8_381, %c224_382], %239 {strides = array<i32>} : memref<100x512xf32, #tpu.memory_space<vmem>>, vector<4x32xf32>,
    %c0_383 = arith.constant 0 : index
    %c16_384 = arith.constant 16 : index
    %241 = vector.load %arg11[%c0_383, %c16_384] : memref<4x1152xf32, #tpu.memory_space<vmem>>, vector<4x32xf32>
    %c12_385 = arith.constant 12 : index
    %c128_386 = arith.constant 128 : index
    %242 = vector.load %arg12[%c12_385, %c128_386] : memref<100x512xf32, #tpu.memory_space<vmem>>, vector<4x32xf32>
    tpu.vector_store %arg12[%c12_385, %c128_386], %241 {strides = array<i32>} : memref<100x512xf32, #tpu.memory_space<vmem>>, vector<4x32xf32>,
    %c0_387 = arith.constant 0 : index
    %c64_388 = arith.constant 64 : index
    %243 = vector.load %arg11[%c0_387, %c64_388] : memref<4x1152xf32, #tpu.memory_space<vmem>>, vector<4x32xf32>
    %c12_389 = arith.constant 12 : index
    %c160_390 = arith.constant 160 : index
    %244 = vector.load %arg12[%c12_389, %c160_390] : memref<100x512xf32, #tpu.memory_space<vmem>>, vector<4x32xf32>
    tpu.vector_store %arg12[%c12_389, %c160_390], %243 {strides = array<i32>} : memref<100x512xf32, #tpu.memory_space<vmem>>, vector<4x32xf32>,
    %c0_391 = arith.constant 0 : index
    %c112_392 = arith.constant 112 : index
    %245 = vector.load %arg11[%c0_391, %c112_392] : memref<4x1152xf32, #tpu.memory_space<vmem>>, vector<4x32xf32>
    %c12_393 = arith.constant 12 : index
    %c192_394 = arith.constant 192 : index
    %246 = vector.load %arg12[%c12_393, %c192_394] : memref<100x512xf32, #tpu.memory_space<vmem>>, vector<4x32xf32>
    tpu.vector_store %arg12[%c12_393, %c192_394], %245 {strides = array<i32>} : memref<100x512xf32, #tpu.memory_space<vmem>>, vector<4x32xf32>,
    %c0_395 = arith.constant 0 : index
    %c160_396 = arith.constant 160 : index
    %247 = vector.load %arg11[%c0_395, %c160_396] : memref<4x1152xf32, #tpu.memory_space<vmem>>, vector<4x32xf32>
    %c12_397 = arith.constant 12 : index
    %c224_398 = arith.constant 224 : index
    %248 = vector.load %arg12[%c12_397, %c224_398] : memref<100x512xf32, #tpu.memory_space<vmem>>, vector<4x32xf32>
    tpu.vector_store %arg12[%c12_397, %c224_398], %247 {strides = array<i32>} : memref<100x512xf32, #tpu.memory_space<vmem>>, vector<4x32xf32>,
    %c0_399 = arith.constant 0 : index
    %c304 = arith.constant 304 : index
    %249 = vector.load %arg11[%c0_399, %c304] : memref<4x1152xf32, #tpu.memory_space<vmem>>, vector<4x32xf32>
    %c16_400 = arith.constant 16 : index
    %c128_401 = arith.constant 128 : index
    %250 = vector.load %arg12[%c16_400, %c128_401] : memref<100x512xf32, #tpu.memory_space<vmem>>, vector<4x32xf32>
    tpu.vector_store %arg12[%c16_400, %c128_401], %249 {strides = array<i32>} : memref<100x512xf32, #tpu.memory_space<vmem>>, vector<4x32xf32>,
    %c0_402 = arith.constant 0 : index
    %c352 = arith.constant 352 : index
    %251 = vector.load %arg11[%c0_402, %c352] : memref<4x1152xf32, #tpu.memory_space<vmem>>, vector<4x32xf32>
    %c16_403 = arith.constant 16 : index
    %c160_404 = arith.constant 160 : index
    %252 = vector.load %arg12[%c16_403, %c160_404] : memref<100x512xf32, #tpu.memory_space<vmem>>, vector<4x32xf32>
    tpu.vector_store %arg12[%c16_403, %c160_404], %251 {strides = array<i32>} : memref<100x512xf32, #tpu.memory_space<vmem>>, vector<4x32xf32>,
    %c0_405 = arith.constant 0 : index
    %c400 = arith.constant 400 : index
    %253 = vector.load %arg11[%c0_405, %c400] : memref<4x1152xf32, #tpu.memory_space<vmem>>, vector<4x32xf32>
    %c16_406 = arith.constant 16 : index
    %c192_407 = arith.constant 192 : index
    %254 = vector.load %arg12[%c16_406, %c192_407] : memref<100x512xf32, #tpu.memory_space<vmem>>, vector<4x32xf32>
    tpu.vector_store %arg12[%c16_406, %c192_407], %253 {strides = array<i32>} : memref<100x512xf32, #tpu.memory_space<vmem>>, vector<4x32xf32>,
    %c0_408 = arith.constant 0 : index
    %c448 = arith.constant 448 : index
    %255 = vector.load %arg11[%c0_408, %c448] : memref<4x1152xf32, #tpu.memory_space<vmem>>, vector<4x32xf32>
    %c16_409 = arith.constant 16 : index
    %c224_410 = arith.constant 224 : index
    %256 = vector.load %arg12[%c16_409, %c224_410] : memref<100x512xf32, #tpu.memory_space<vmem>>, vector<4x32xf32>
    tpu.vector_store %arg12[%c16_409, %c224_410], %255 {strides = array<i32>} : memref<100x512xf32, #tpu.memory_space<vmem>>, vector<4x32xf32>,
    %c0_411 = arith.constant 0 : index
    %c864_412 = arith.constant 864 : index
    %257 = vector.load %arg11[%c0_411, %c864_412] : memref<4x1152xf32, #tpu.memory_space<vmem>>, vector<4x32xf32>
    %c20_413 = arith.constant 20 : index
    %c128_414 = arith.constant 128 : index
    %258 = vector.load %arg12[%c20_413, %c128_414] : memref<100x512xf32, #tpu.memory_space<vmem>>, vector<4x32xf32>
    tpu.vector_store %arg12[%c20_413, %c128_414], %257 {strides = array<i32>} : memref<100x512xf32, #tpu.memory_space<vmem>>, vector<4x32xf32>,
    %c0_415 = arith.constant 0 : index
    %c912_416 = arith.constant 912 : index
    %259 = vector.load %arg11[%c0_415, %c912_416] : memref<4x1152xf32, #tpu.memory_space<vmem>>, vector<4x32xf32>
    %c20_417 = arith.constant 20 : index
    %c160_418 = arith.constant 160 : index
    %260 = vector.load %arg12[%c20_417, %c160_418] : memref<100x512xf32, #tpu.memory_space<vmem>>, vector<4x32xf32>
    tpu.vector_store %arg12[%c20_417, %c160_418], %259 {strides = array<i32>} : memref<100x512xf32, #tpu.memory_space<vmem>>, vector<4x32xf32>,
    %c0_419 = arith.constant 0 : index
    %c960_420 = arith.constant 960 : index
    %261 = vector.load %arg11[%c0_419, %c960_420] : memref<4x1152xf32, #tpu.memory_space<vmem>>, vector<4x32xf32>
    %c20_421 = arith.constant 20 : index
    %c192_422 = arith.constant 192 : index
    %262 = vector.load %arg12[%c20_421, %c192_422] : memref<100x512xf32, #tpu.memory_space<vmem>>, vector<4x32xf32>
    tpu.vector_store %arg12[%c20_421, %c192_422], %261 {strides = array<i32>} : memref<100x512xf32, #tpu.memory_space<vmem>>, vector<4x32xf32>,
    %c0_423 = arith.constant 0 : index
    %c1008_424 = arith.constant 1008 : index
    %263 = vector.load %arg11[%c0_423, %c1008_424] : memref<4x1152xf32, #tpu.memory_space<vmem>>, vector<4x32xf32>
    %c20_425 = arith.constant 20 : index
    %c224_426 = arith.constant 224 : index
    %264 = vector.load %arg12[%c20_425, %c224_426] : memref<100x512xf32, #tpu.memory_space<vmem>>, vector<4x32xf32>
    tpu.vector_store %arg12[%c20_425, %c224_426], %263 {strides = array<i32>} : memref<100x512xf32, #tpu.memory_space<vmem>>, vector<4x32xf32>,
    %c0_427 = arith.constant 0 : index
    %c584_428 = arith.constant 584 : index
    %265 = vector.load %arg11[%c0_427, %c584_428] : memref<4x1152xf32, #tpu.memory_space<vmem>>, vector<4x32xf32>
    %c24_429 = arith.constant 24 : index
    %c128_430 = arith.constant 128 : index
    %266 = vector.load %arg12[%c24_429, %c128_430] : memref<100x512xf32, #tpu.memory_space<vmem>>, vector<4x32xf32>
    tpu.vector_store %arg12[%c24_429, %c128_430], %265 {strides = array<i32>} : memref<100x512xf32, #tpu.memory_space<vmem>>, vector<4x32xf32>,
    %c0_431 = arith.constant 0 : index
    %c632_432 = arith.constant 632 : index
    %267 = vector.load %arg11[%c0_431, %c632_432] : memref<4x1152xf32, #tpu.memory_space<vmem>>, vector<4x32xf32>
    %c24_433 = arith.constant 24 : index
    %c160_434 = arith.constant 160 : index
    %268 = vector.load %arg12[%c24_433, %c160_434] : memref<100x512xf32, #tpu.memory_space<vmem>>, vector<4x32xf32>
    tpu.vector_store %arg12[%c24_433, %c160_434], %267 {strides = array<i32>} : memref<100x512xf32, #tpu.memory_space<vmem>>, vector<4x32xf32>,
    %c0_435 = arith.constant 0 : index
    %c680_436 = arith.constant 680 : index
    %269 = vector.load %arg11[%c0_435, %c680_436] : memref<4x1152xf32, #tpu.memory_space<vmem>>, vector<4x32xf32>
    %c24_437 = arith.constant 24 : index
    %c192_438 = arith.constant 192 : index
    %270 = vector.load %arg12[%c24_437, %c192_438] : memref<100x512xf32, #tpu.memory_space<vmem>>, vector<4x32xf32>
    tpu.vector_store %arg12[%c24_437, %c192_438], %269 {strides = array<i32>} : memref<100x512xf32, #tpu.memory_space<vmem>>, vector<4x32xf32>,
    %c0_439 = arith.constant 0 : index
    %c728_440 = arith.constant 728 : index
    %271 = vector.load %arg11[%c0_439, %c728_440] : memref<4x1152xf32, #tpu.memory_space<vmem>>, vector<4x32xf32>
    %c24_441 = arith.constant 24 : index
    %c224_442 = arith.constant 224 : index
    %272 = vector.load %arg12[%c24_441, %c224_442] : memref<100x512xf32, #tpu.memory_space<vmem>>, vector<4x32xf32>
    tpu.vector_store %arg12[%c24_441, %c224_442], %271 {strides = array<i32>} : memref<100x512xf32, #tpu.memory_space<vmem>>, vector<4x32xf32>,
    %c0_443 = arith.constant 0 : index
    %c872_444 = arith.constant 872 : index
    %273 = vector.load %arg11[%c0_443, %c872_444] : memref<4x1152xf32, #tpu.memory_space<vmem>>, vector<4x32xf32>
    %c28_445 = arith.constant 28 : index
    %c128_446 = arith.constant 128 : index
    %274 = vector.load %arg12[%c28_445, %c128_446] : memref<100x512xf32, #tpu.memory_space<vmem>>, vector<4x32xf32>
    tpu.vector_store %arg12[%c28_445, %c128_446], %273 {strides = array<i32>} : memref<100x512xf32, #tpu.memory_space<vmem>>, vector<4x32xf32>,
    %c0_447 = arith.constant 0 : index
    %c920_448 = arith.constant 920 : index
    %275 = vector.load %arg11[%c0_447, %c920_448] : memref<4x1152xf32, #tpu.memory_space<vmem>>, vector<4x32xf32>
    %c28_449 = arith.constant 28 : index
    %c160_450 = arith.constant 160 : index
    %276 = vector.load %arg12[%c28_449, %c160_450] : memref<100x512xf32, #tpu.memory_space<vmem>>, vector<4x32xf32>
    tpu.vector_store %arg12[%c28_449, %c160_450], %275 {strides = array<i32>} : memref<100x512xf32, #tpu.memory_space<vmem>>, vector<4x32xf32>,
    %c0_451 = arith.constant 0 : index
    %c968_452 = arith.constant 968 : index
    %277 = vector.load %arg11[%c0_451, %c968_452] : memref<4x1152xf32, #tpu.memory_space<vmem>>, vector<4x32xf32>
    %c28_453 = arith.constant 28 : index
    %c192_454 = arith.constant 192 : index
    %278 = vector.load %arg12[%c28_453, %c192_454] : memref<100x512xf32, #tpu.memory_space<vmem>>, vector<4x32xf32>
    tpu.vector_store %arg12[%c28_453, %c192_454], %277 {strides = array<i32>} : memref<100x512xf32, #tpu.memory_space<vmem>>, vector<4x32xf32>,
    %c0_455 = arith.constant 0 : index
    %c1016_456 = arith.constant 1016 : index
    %279 = vector.load %arg11[%c0_455, %c1016_456] : memref<4x1152xf32, #tpu.memory_space<vmem>>, vector<4x32xf32>
    %c28_457 = arith.constant 28 : index
    %c224_458 = arith.constant 224 : index
    %280 = vector.load %arg12[%c28_457, %c224_458] : memref<100x512xf32, #tpu.memory_space<vmem>>, vector<4x32xf32>
    tpu.vector_store %arg12[%c28_457, %c224_458], %279 {strides = array<i32>} : memref<100x512xf32, #tpu.memory_space<vmem>>, vector<4x32xf32>,
    %c0_459 = arith.constant 0 : index
    %c592_460 = arith.constant 592 : index
    %281 = vector.load %arg11[%c0_459, %c592_460] : memref<4x1152xf32, #tpu.memory_space<vmem>>, vector<4x32xf32>
    %c32_461 = arith.constant 32 : index
    %c128_462 = arith.constant 128 : index
    %282 = vector.load %arg12[%c32_461, %c128_462] : memref<100x512xf32, #tpu.memory_space<vmem>>, vector<4x32xf32>
    tpu.vector_store %arg12[%c32_461, %c128_462], %281 {strides = array<i32>} : memref<100x512xf32, #tpu.memory_space<vmem>>, vector<4x32xf32>,
    %c0_463 = arith.constant 0 : index
    %c640_464 = arith.constant 640 : index
    %283 = vector.load %arg11[%c0_463, %c640_464] : memref<4x1152xf32, #tpu.memory_space<vmem>>, vector<4x32xf32>
    %c32_465 = arith.constant 32 : index
    %c160_466 = arith.constant 160 : index
    %284 = vector.load %arg12[%c32_465, %c160_466] : memref<100x512xf32, #tpu.memory_space<vmem>>, vector<4x32xf32>
    tpu.vector_store %arg12[%c32_465, %c160_466], %283 {strides = array<i32>} : memref<100x512xf32, #tpu.memory_space<vmem>>, vector<4x32xf32>,
    %c0_467 = arith.constant 0 : index
    %c688_468 = arith.constant 688 : index
    %285 = vector.load %arg11[%c0_467, %c688_468] : memref<4x1152xf32, #tpu.memory_space<vmem>>, vector<4x32xf32>
    %c32_469 = arith.constant 32 : index
    %c192_470 = arith.constant 192 : index
    %286 = vector.load %arg12[%c32_469, %c192_470] : memref<100x512xf32, #tpu.memory_space<vmem>>, vector<4x32xf32>
    tpu.vector_store %arg12[%c32_469, %c192_470], %285 {strides = array<i32>} : memref<100x512xf32, #tpu.memory_space<vmem>>, vector<4x32xf32>,
    %c0_471 = arith.constant 0 : index
    %c736_472 = arith.constant 736 : index
    %287 = vector.load %arg11[%c0_471, %c736_472] : memref<4x1152xf32, #tpu.memory_space<vmem>>, vector<4x32xf32>
    %c32_473 = arith.constant 32 : index
    %c224_474 = arith.constant 224 : index
    %288 = vector.load %arg12[%c32_473, %c224_474] : memref<100x512xf32, #tpu.memory_space<vmem>>, vector<4x32xf32>
    tpu.vector_store %arg12[%c32_473, %c224_474], %287 {strides = array<i32>} : memref<100x512xf32, #tpu.memory_space<vmem>>, vector<4x32xf32>,
    %c0_475 = arith.constant 0 : index
    %c880 = arith.constant 880 : index
    %289 = vector.load %arg11[%c0_475, %c880] : memref<4x1152xf32, #tpu.memory_space<vmem>>, vector<4x32xf32>
    %c36_476 = arith.constant 36 : index
    %c128_477 = arith.constant 128 : index
    %290 = vector.load %arg12[%c36_476, %c128_477] : memref<100x512xf32, #tpu.memory_space<vmem>>, vector<4x32xf32>
    tpu.vector_store %arg12[%c36_476, %c128_477], %289 {strides = array<i32>} : memref<100x512xf32, #tpu.memory_space<vmem>>, vector<4x32xf32>,
    %c0_478 = arith.constant 0 : index
    %c928 = arith.constant 928 : index
    %291 = vector.load %arg11[%c0_478, %c928] : memref<4x1152xf32, #tpu.memory_space<vmem>>, vector<4x32xf32>
    %c36_479 = arith.constant 36 : index
    %c160_480 = arith.constant 160 : index
    %292 = vector.load %arg12[%c36_479, %c160_480] : memref<100x512xf32, #tpu.memory_space<vmem>>, vector<4x32xf32>
    tpu.vector_store %arg12[%c36_479, %c160_480], %291 {strides = array<i32>} : memref<100x512xf32, #tpu.memory_space<vmem>>, vector<4x32xf32>,
    %c0_481 = arith.constant 0 : index
    %c976 = arith.constant 976 : index
    %293 = vector.load %arg11[%c0_481, %c976] : memref<4x1152xf32, #tpu.memory_space<vmem>>, vector<4x32xf32>
    %c36_482 = arith.constant 36 : index
    %c192_483 = arith.constant 192 : index
    %294 = vector.load %arg12[%c36_482, %c192_483] : memref<100x512xf32, #tpu.memory_space<vmem>>, vector<4x32xf32>
    tpu.vector_store %arg12[%c36_482, %c192_483], %293 {strides = array<i32>} : memref<100x512xf32, #tpu.memory_space<vmem>>, vector<4x32xf32>,
    %c0_484 = arith.constant 0 : index
    %c1024 = arith.constant 1024 : index
    %295 = vector.load %arg11[%c0_484, %c1024] : memref<4x1152xf32, #tpu.memory_space<vmem>>, vector<4x32xf32>
    %c36_485 = arith.constant 36 : index
    %c224_486 = arith.constant 224 : index
    %296 = vector.load %arg12[%c36_485, %c224_486] : memref<100x512xf32, #tpu.memory_space<vmem>>, vector<4x32xf32>
    tpu.vector_store %arg12[%c36_485, %c224_486], %295 {strides = array<i32>} : memref<100x512xf32, #tpu.memory_space<vmem>>, vector<4x32xf32>,
    %c0_487 = arith.constant 0 : index
    %c336_488 = arith.constant 336 : index
    %297 = vector.load %arg11[%c0_487, %c336_488] : memref<4x1152xf32, #tpu.memory_space<vmem>>, vector<4x32xf32>
    %c40_489 = arith.constant 40 : index
    %c128_490 = arith.constant 128 : index
    %298 = vector.load %arg12[%c40_489, %c128_490] : memref<100x512xf32, #tpu.memory_space<vmem>>, vector<4x32xf32>
    tpu.vector_store %arg12[%c40_489, %c128_490], %297 {strides = array<i32>} : memref<100x512xf32, #tpu.memory_space<vmem>>, vector<4x32xf32>,
    %c0_491 = arith.constant 0 : index
    %c384_492 = arith.constant 384 : index
    %299 = vector.load %arg11[%c0_491, %c384_492] : memref<4x1152xf32, #tpu.memory_space<vmem>>, vector<4x32xf32>
    %c40_493 = arith.constant 40 : index
    %c160_494 = arith.constant 160 : index
    %300 = vector.load %arg12[%c40_493, %c160_494] : memref<100x512xf32, #tpu.memory_space<vmem>>, vector<4x32xf32>
    tpu.vector_store %arg12[%c40_493, %c160_494], %299 {strides = array<i32>} : memref<100x512xf32, #tpu.memory_space<vmem>>, vector<4x32xf32>,
    %c0_495 = arith.constant 0 : index
    %c432_496 = arith.constant 432 : index
    %301 = vector.load %arg11[%c0_495, %c432_496] : memref<4x1152xf32, #tpu.memory_space<vmem>>, vector<4x32xf32>
    %c40_497 = arith.constant 40 : index
    %c192_498 = arith.constant 192 : index
    %302 = vector.load %arg12[%c40_497, %c192_498] : memref<100x512xf32, #tpu.memory_space<vmem>>, vector<4x32xf32>
    tpu.vector_store %arg12[%c40_497, %c192_498], %301 {strides = array<i32>} : memref<100x512xf32, #tpu.memory_space<vmem>>, vector<4x32xf32>,
    %c0_499 = arith.constant 0 : index
    %c480_500 = arith.constant 480 : index
    %303 = vector.load %arg11[%c0_499, %c480_500] : memref<4x1152xf32, #tpu.memory_space<vmem>>, vector<4x32xf32>
    %c40_501 = arith.constant 40 : index
    %c224_502 = arith.constant 224 : index
    %304 = vector.load %arg12[%c40_501, %c224_502] : memref<100x512xf32, #tpu.memory_space<vmem>>, vector<4x32xf32>
    tpu.vector_store %arg12[%c40_501, %c224_502], %303 {strides = array<i32>} : memref<100x512xf32, #tpu.memory_space<vmem>>, vector<4x32xf32>,
    %c0_503 = arith.constant 0 : index
    %c56_504 = arith.constant 56 : index
    %305 = vector.load %arg11[%c0_503, %c56_504] : memref<4x1152xf32, #tpu.memory_space<vmem>>, vector<4x32xf32>
    %c44_505 = arith.constant 44 : index
    %c128_506 = arith.constant 128 : index
    %306 = vector.load %arg12[%c44_505, %c128_506] : memref<100x512xf32, #tpu.memory_space<vmem>>, vector<4x32xf32>
    tpu.vector_store %arg12[%c44_505, %c128_506], %305 {strides = array<i32>} : memref<100x512xf32, #tpu.memory_space<vmem>>, vector<4x32xf32>,
    %c0_507 = arith.constant 0 : index
    %c104_508 = arith.constant 104 : index
    %307 = vector.load %arg11[%c0_507, %c104_508] : memref<4x1152xf32, #tpu.memory_space<vmem>>, vector<4x32xf32>
    %c44_509 = arith.constant 44 : index
    %c160_510 = arith.constant 160 : index
    %308 = vector.load %arg12[%c44_509, %c160_510] : memref<100x512xf32, #tpu.memory_space<vmem>>, vector<4x32xf32>
    tpu.vector_store %arg12[%c44_509, %c160_510], %307 {strides = array<i32>} : memref<100x512xf32, #tpu.memory_space<vmem>>, vector<4x32xf32>,
    %c0_511 = arith.constant 0 : index
    %c152_512 = arith.constant 152 : index
    %309 = vector.load %arg11[%c0_511, %c152_512] : memref<4x1152xf32, #tpu.memory_space<vmem>>, vector<4x32xf32>
    %c44_513 = arith.constant 44 : index
    %c192_514 = arith.constant 192 : index
    %310 = vector.load %arg12[%c44_513, %c192_514] : memref<100x512xf32, #tpu.memory_space<vmem>>, vector<4x32xf32>
    tpu.vector_store %arg12[%c44_513, %c192_514], %309 {strides = array<i32>} : memref<100x512xf32, #tpu.memory_space<vmem>>, vector<4x32xf32>,
    %c0_515 = arith.constant 0 : index
    %c200_516 = arith.constant 200 : index
    %311 = vector.load %arg11[%c0_515, %c200_516] : memref<4x1152xf32, #tpu.memory_space<vmem>>, vector<4x32xf32>
    %c44_517 = arith.constant 44 : index
    %c224_518 = arith.constant 224 : index
    %312 = vector.load %arg12[%c44_517, %c224_518] : memref<100x512xf32, #tpu.memory_space<vmem>>, vector<4x32xf32>
    tpu.vector_store %arg12[%c44_517, %c224_518], %311 {strides = array<i32>} : memref<100x512xf32, #tpu.memory_space<vmem>>, vector<4x32xf32>,
    %c0_519 = arith.constant 0 : index
    %c344_520 = arith.constant 344 : index
    %313 = vector.load %arg11[%c0_519, %c344_520] : memref<4x1152xf32, #tpu.memory_space<vmem>>, vector<4x32xf32>
    %c48_521 = arith.constant 48 : index
    %c128_522 = arith.constant 128 : index
    %314 = vector.load %arg12[%c48_521, %c128_522] : memref<100x512xf32, #tpu.memory_space<vmem>>, vector<4x32xf32>
    tpu.vector_store %arg12[%c48_521, %c128_522], %313 {strides = array<i32>} : memref<100x512xf32, #tpu.memory_space<vmem>>, vector<4x32xf32>,
    %c0_523 = arith.constant 0 : index
    %c392_524 = arith.constant 392 : index
    %315 = vector.load %arg11[%c0_523, %c392_524] : memref<4x1152xf32, #tpu.memory_space<vmem>>, vector<4x32xf32>
    %c48_525 = arith.constant 48 : index
    %c160_526 = arith.constant 160 : index
    %316 = vector.load %arg12[%c48_525, %c160_526] : memref<100x512xf32, #tpu.memory_space<vmem>>, vector<4x32xf32>
    tpu.vector_store %arg12[%c48_525, %c160_526], %315 {strides = array<i32>} : memref<100x512xf32, #tpu.memory_space<vmem>>, vector<4x32xf32>,
    %c0_527 = arith.constant 0 : index
    %c440_528 = arith.constant 440 : index
    %317 = vector.load %arg11[%c0_527, %c440_528] : memref<4x1152xf32, #tpu.memory_space<vmem>>, vector<4x32xf32>
    %c48_529 = arith.constant 48 : index
    %c192_530 = arith.constant 192 : index
    %318 = vector.load %arg12[%c48_529, %c192_530] : memref<100x512xf32, #tpu.memory_space<vmem>>, vector<4x32xf32>
    tpu.vector_store %arg12[%c48_529, %c192_530], %317 {strides = array<i32>} : memref<100x512xf32, #tpu.memory_space<vmem>>, vector<4x32xf32>,
    %c0_531 = arith.constant 0 : index
    %c488_532 = arith.constant 488 : index
    %319 = vector.load %arg11[%c0_531, %c488_532] : memref<4x1152xf32, #tpu.memory_space<vmem>>, vector<4x32xf32>
    %c48_533 = arith.constant 48 : index
    %c224_534 = arith.constant 224 : index
    %320 = vector.load %arg12[%c48_533, %c224_534] : memref<100x512xf32, #tpu.memory_space<vmem>>, vector<4x32xf32>
    tpu.vector_store %arg12[%c48_533, %c224_534], %319 {strides = array<i32>} : memref<100x512xf32, #tpu.memory_space<vmem>>, vector<4x32xf32>,
    %c0_535 = arith.constant 0 : index
    %c64_536 = arith.constant 64 : index
    %321 = vector.load %arg11[%c0_535, %c64_536] : memref<4x1152xf32, #tpu.memory_space<vmem>>, vector<4x32xf32>
    %c52_537 = arith.constant 52 : index
    %c128_538 = arith.constant 128 : index
    %322 = vector.load %arg12[%c52_537, %c128_538] : memref<100x512xf32, #tpu.memory_space<vmem>>, vector<4x32xf32>
    tpu.vector_store %arg12[%c52_537, %c128_538], %321 {strides = array<i32>} : memref<100x512xf32, #tpu.memory_space<vmem>>, vector<4x32xf32>,
    %c0_539 = arith.constant 0 : index
    %c112_540 = arith.constant 112 : index
    %323 = vector.load %arg11[%c0_539, %c112_540] : memref<4x1152xf32, #tpu.memory_space<vmem>>, vector<4x32xf32>
    %c52_541 = arith.constant 52 : index
    %c160_542 = arith.constant 160 : index
    %324 = vector.load %arg12[%c52_541, %c160_542] : memref<100x512xf32, #tpu.memory_space<vmem>>, vector<4x32xf32>
    tpu.vector_store %arg12[%c52_541, %c160_542], %323 {strides = array<i32>} : memref<100x512xf32, #tpu.memory_space<vmem>>, vector<4x32xf32>,
    %c0_543 = arith.constant 0 : index
    %c160_544 = arith.constant 160 : index
    %325 = vector.load %arg11[%c0_543, %c160_544] : memref<4x1152xf32, #tpu.memory_space<vmem>>, vector<4x32xf32>
    %c52_545 = arith.constant 52 : index
    %c192_546 = arith.constant 192 : index
    %326 = vector.load %arg12[%c52_545, %c192_546] : memref<100x512xf32, #tpu.memory_space<vmem>>, vector<4x32xf32>
    tpu.vector_store %arg12[%c52_545, %c192_546], %325 {strides = array<i32>} : memref<100x512xf32, #tpu.memory_space<vmem>>, vector<4x32xf32>,
    %c0_547 = arith.constant 0 : index
    %c208_548 = arith.constant 208 : index
    %327 = vector.load %arg11[%c0_547, %c208_548] : memref<4x1152xf32, #tpu.memory_space<vmem>>, vector<4x32xf32>
    %c52_549 = arith.constant 52 : index
    %c224_550 = arith.constant 224 : index
    %328 = vector.load %arg12[%c52_549, %c224_550] : memref<100x512xf32, #tpu.memory_space<vmem>>, vector<4x32xf32>
    tpu.vector_store %arg12[%c52_549, %c224_550], %327 {strides = array<i32>} : memref<100x512xf32, #tpu.memory_space<vmem>>, vector<4x32xf32>,
    %c0_551 = arith.constant 0 : index
    %c352_552 = arith.constant 352 : index
    %329 = vector.load %arg11[%c0_551, %c352_552] : memref<4x1152xf32, #tpu.memory_space<vmem>>, vector<4x32xf32>
    %c56_553 = arith.constant 56 : index
    %c128_554 = arith.constant 128 : index
    %330 = vector.load %arg12[%c56_553, %c128_554] : memref<100x512xf32, #tpu.memory_space<vmem>>, vector<4x32xf32>
    tpu.vector_store %arg12[%c56_553, %c128_554], %329 {strides = array<i32>} : memref<100x512xf32, #tpu.memory_space<vmem>>, vector<4x32xf32>,
    %c0_555 = arith.constant 0 : index
    %c400_556 = arith.constant 400 : index
    %331 = vector.load %arg11[%c0_555, %c400_556] : memref<4x1152xf32, #tpu.memory_space<vmem>>, vector<4x32xf32>
    %c56_557 = arith.constant 56 : index
    %c160_558 = arith.constant 160 : index
    %332 = vector.load %arg12[%c56_557, %c160_558] : memref<100x512xf32, #tpu.memory_space<vmem>>, vector<4x32xf32>
    tpu.vector_store %arg12[%c56_557, %c160_558], %331 {strides = array<i32>} : memref<100x512xf32, #tpu.memory_space<vmem>>, vector<4x32xf32>,
    %c0_559 = arith.constant 0 : index
    %c448_560 = arith.constant 448 : index
    %333 = vector.load %arg11[%c0_559, %c448_560] : memref<4x1152xf32, #tpu.memory_space<vmem>>, vector<4x32xf32>
    %c56_561 = arith.constant 56 : index
    %c192_562 = arith.constant 192 : index
    %334 = vector.load %arg12[%c56_561, %c192_562] : memref<100x512xf32, #tpu.memory_space<vmem>>, vector<4x32xf32>
    tpu.vector_store %arg12[%c56_561, %c192_562], %333 {strides = array<i32>} : memref<100x512xf32, #tpu.memory_space<vmem>>, vector<4x32xf32>,
    %c0_563 = arith.constant 0 : index
    %c496 = arith.constant 496 : index
    %335 = vector.load %arg11[%c0_563, %c496] : memref<4x1152xf32, #tpu.memory_space<vmem>>, vector<4x32xf32>
    %c56_564 = arith.constant 56 : index
    %c224_565 = arith.constant 224 : index
    %336 = vector.load %arg12[%c56_564, %c224_565] : memref<100x512xf32, #tpu.memory_space<vmem>>, vector<4x32xf32>
    tpu.vector_store %arg12[%c56_564, %c224_565], %335 {strides = array<i32>} : memref<100x512xf32, #tpu.memory_space<vmem>>, vector<4x32xf32>,
    %c0_566 = arith.constant 0 : index
    %c912_567 = arith.constant 912 : index
    %337 = vector.load %arg11[%c0_566, %c912_567] : memref<4x1152xf32, #tpu.memory_space<vmem>>, vector<4x32xf32>
    %c60_568 = arith.constant 60 : index
    %c128_569 = arith.constant 128 : index
    %338 = vector.load %arg12[%c60_568, %c128_569] : memref<100x512xf32, #tpu.memory_space<vmem>>, vector<4x32xf32>
    tpu.vector_store %arg12[%c60_568, %c128_569], %337 {strides = array<i32>} : memref<100x512xf32, #tpu.memory_space<vmem>>, vector<4x32xf32>,
    %c0_570 = arith.constant 0 : index
    %c960_571 = arith.constant 960 : index
    %339 = vector.load %arg11[%c0_570, %c960_571] : memref<4x1152xf32, #tpu.memory_space<vmem>>, vector<4x32xf32>
    %c60_572 = arith.constant 60 : index
    %c160_573 = arith.constant 160 : index
    %340 = vector.load %arg12[%c60_572, %c160_573] : memref<100x512xf32, #tpu.memory_space<vmem>>, vector<4x32xf32>
    tpu.vector_store %arg12[%c60_572, %c160_573], %339 {strides = array<i32>} : memref<100x512xf32, #tpu.memory_space<vmem>>, vector<4x32xf32>,
    %c0_574 = arith.constant 0 : index
    %c1008_575 = arith.constant 1008 : index
    %341 = vector.load %arg11[%c0_574, %c1008_575] : memref<4x1152xf32, #tpu.memory_space<vmem>>, vector<4x32xf32>
    %c60_576 = arith.constant 60 : index
    %c192_577 = arith.constant 192 : index
    %342 = vector.load %arg12[%c60_576, %c192_577] : memref<100x512xf32, #tpu.memory_space<vmem>>, vector<4x32xf32>
    tpu.vector_store %arg12[%c60_576, %c192_577], %341 {strides = array<i32>} : memref<100x512xf32, #tpu.memory_space<vmem>>, vector<4x32xf32>,
    %c0_578 = arith.constant 0 : index
    %c1056_579 = arith.constant 1056 : index
    %343 = vector.load %arg11[%c0_578, %c1056_579] : memref<4x1152xf32, #tpu.memory_space<vmem>>, vector<4x32xf32>
    %c60_580 = arith.constant 60 : index
    %c224_581 = arith.constant 224 : index
    %344 = vector.load %arg12[%c60_580, %c224_581] : memref<100x512xf32, #tpu.memory_space<vmem>>, vector<4x32xf32>
    tpu.vector_store %arg12[%c60_580, %c224_581], %343 {strides = array<i32>} : memref<100x512xf32, #tpu.memory_space<vmem>>, vector<4x32xf32>,
    %c0_582 = arith.constant 0 : index
    %c632_583 = arith.constant 632 : index
    %345 = vector.load %arg11[%c0_582, %c632_583] : memref<4x1152xf32, #tpu.memory_space<vmem>>, vector<4x32xf32>
    %c64_584 = arith.constant 64 : index
    %c128_585 = arith.constant 128 : index
    %346 = vector.load %arg12[%c64_584, %c128_585] : memref<100x512xf32, #tpu.memory_space<vmem>>, vector<4x32xf32>
    tpu.vector_store %arg12[%c64_584, %c128_585], %345 {strides = array<i32>} : memref<100x512xf32, #tpu.memory_space<vmem>>, vector<4x32xf32>,
    %c0_586 = arith.constant 0 : index
    %c680_587 = arith.constant 680 : index
    %347 = vector.load %arg11[%c0_586, %c680_587] : memref<4x1152xf32, #tpu.memory_space<vmem>>, vector<4x32xf32>
    %c64_588 = arith.constant 64 : index
    %c160_589 = arith.constant 160 : index
    %348 = vector.load %arg12[%c64_588, %c160_589] : memref<100x512xf32, #tpu.memory_space<vmem>>, vector<4x32xf32>
    tpu.vector_store %arg12[%c64_588, %c160_589], %347 {strides = array<i32>} : memref<100x512xf32, #tpu.memory_space<vmem>>, vector<4x32xf32>,
    %c0_590 = arith.constant 0 : index
    %c728_591 = arith.constant 728 : index
    %349 = vector.load %arg11[%c0_590, %c728_591] : memref<4x1152xf32, #tpu.memory_space<vmem>>, vector<4x32xf32>
    %c64_592 = arith.constant 64 : index
    %c192_593 = arith.constant 192 : index
    %350 = vector.load %arg12[%c64_592, %c192_593] : memref<100x512xf32, #tpu.memory_space<vmem>>, vector<4x32xf32>
    tpu.vector_store %arg12[%c64_592, %c192_593], %349 {strides = array<i32>} : memref<100x512xf32, #tpu.memory_space<vmem>>, vector<4x32xf32>,
    %c0_594 = arith.constant 0 : index
    %c776_595 = arith.constant 776 : index
    %351 = vector.load %arg11[%c0_594, %c776_595] : memref<4x1152xf32, #tpu.memory_space<vmem>>, vector<4x32xf32>
    %c64_596 = arith.constant 64 : index
    %c224_597 = arith.constant 224 : index
    %352 = vector.load %arg12[%c64_596, %c224_597] : memref<100x512xf32, #tpu.memory_space<vmem>>, vector<4x32xf32>
    tpu.vector_store %arg12[%c64_596, %c224_597], %351 {strides = array<i32>} : memref<100x512xf32, #tpu.memory_space<vmem>>, vector<4x32xf32>,
    %c0_598 = arith.constant 0 : index
    %c920_599 = arith.constant 920 : index
    %353 = vector.load %arg11[%c0_598, %c920_599] : memref<4x1152xf32, #tpu.memory_space<vmem>>, vector<4x32xf32>
    %c68_600 = arith.constant 68 : index
    %c128_601 = arith.constant 128 : index
    %354 = vector.load %arg12[%c68_600, %c128_601] : memref<100x512xf32, #tpu.memory_space<vmem>>, vector<4x32xf32>
    tpu.vector_store %arg12[%c68_600, %c128_601], %353 {strides = array<i32>} : memref<100x512xf32, #tpu.memory_space<vmem>>, vector<4x32xf32>,
    %c0_602 = arith.constant 0 : index
    %c968_603 = arith.constant 968 : index
    %355 = vector.load %arg11[%c0_602, %c968_603] : memref<4x1152xf32, #tpu.memory_space<vmem>>, vector<4x32xf32>
    %c68_604 = arith.constant 68 : index
    %c160_605 = arith.constant 160 : index
    %356 = vector.load %arg12[%c68_604, %c160_605] : memref<100x512xf32, #tpu.memory_space<vmem>>, vector<4x32xf32>
    tpu.vector_store %arg12[%c68_604, %c160_605], %355 {strides = array<i32>} : memref<100x512xf32, #tpu.memory_space<vmem>>, vector<4x32xf32>,
    %c0_606 = arith.constant 0 : index
    %c1016_607 = arith.constant 1016 : index
    %357 = vector.load %arg11[%c0_606, %c1016_607] : memref<4x1152xf32, #tpu.memory_space<vmem>>, vector<4x32xf32>
    %c68_608 = arith.constant 68 : index
    %c192_609 = arith.constant 192 : index
    %358 = vector.load %arg12[%c68_608, %c192_609] : memref<100x512xf32, #tpu.memory_space<vmem>>, vector<4x32xf32>
    tpu.vector_store %arg12[%c68_608, %c192_609], %357 {strides = array<i32>} : memref<100x512xf32, #tpu.memory_space<vmem>>, vector<4x32xf32>,
    %c0_610 = arith.constant 0 : index
    %c1064_611 = arith.constant 1064 : index
    %359 = vector.load %arg11[%c0_610, %c1064_611] : memref<4x1152xf32, #tpu.memory_space<vmem>>, vector<4x32xf32>
    %c68_612 = arith.constant 68 : index
    %c224_613 = arith.constant 224 : index
    %360 = vector.load %arg12[%c68_612, %c224_613] : memref<100x512xf32, #tpu.memory_space<vmem>>, vector<4x32xf32>
    tpu.vector_store %arg12[%c68_612, %c224_613], %359 {strides = array<i32>} : memref<100x512xf32, #tpu.memory_space<vmem>>, vector<4x32xf32>,
    %c0_614 = arith.constant 0 : index
    %c640_615 = arith.constant 640 : index
    %361 = vector.load %arg11[%c0_614, %c640_615] : memref<4x1152xf32, #tpu.memory_space<vmem>>, vector<4x32xf32>
    %c72_616 = arith.constant 72 : index
    %c128_617 = arith.constant 128 : index
    %362 = vector.load %arg12[%c72_616, %c128_617] : memref<100x512xf32, #tpu.memory_space<vmem>>, vector<4x32xf32>
    tpu.vector_store %arg12[%c72_616, %c128_617], %361 {strides = array<i32>} : memref<100x512xf32, #tpu.memory_space<vmem>>, vector<4x32xf32>,
    %c0_618 = arith.constant 0 : index
    %c688_619 = arith.constant 688 : index
    %363 = vector.load %arg11[%c0_618, %c688_619] : memref<4x1152xf32, #tpu.memory_space<vmem>>, vector<4x32xf32>
    %c72_620 = arith.constant 72 : index
    %c160_621 = arith.constant 160 : index
    %364 = vector.load %arg12[%c72_620, %c160_621] : memref<100x512xf32, #tpu.memory_space<vmem>>, vector<4x32xf32>
    tpu.vector_store %arg12[%c72_620, %c160_621], %363 {strides = array<i32>} : memref<100x512xf32, #tpu.memory_space<vmem>>, vector<4x32xf32>,
    %c0_622 = arith.constant 0 : index
    %c736_623 = arith.constant 736 : index
    %365 = vector.load %arg11[%c0_622, %c736_623] : memref<4x1152xf32, #tpu.memory_space<vmem>>, vector<4x32xf32>
    %c72_624 = arith.constant 72 : index
    %c192_625 = arith.constant 192 : index
    %366 = vector.load %arg12[%c72_624, %c192_625] : memref<100x512xf32, #tpu.memory_space<vmem>>, vector<4x32xf32>
    tpu.vector_store %arg12[%c72_624, %c192_625], %365 {strides = array<i32>} : memref<100x512xf32, #tpu.memory_space<vmem>>, vector<4x32xf32>,
    %c0_626 = arith.constant 0 : index
    %c784_627 = arith.constant 784 : index
    %367 = vector.load %arg11[%c0_626, %c784_627] : memref<4x1152xf32, #tpu.memory_space<vmem>>, vector<4x32xf32>
    %c72_628 = arith.constant 72 : index
    %c224_629 = arith.constant 224 : index
    %368 = vector.load %arg12[%c72_628, %c224_629] : memref<100x512xf32, #tpu.memory_space<vmem>>, vector<4x32xf32>
    tpu.vector_store %arg12[%c72_628, %c224_629], %367 {strides = array<i32>} : memref<100x512xf32, #tpu.memory_space<vmem>>, vector<4x32xf32>,
    %c0_630 = arith.constant 0 : index
    %c928_631 = arith.constant 928 : index
    %369 = vector.load %arg11[%c0_630, %c928_631] : memref<4x1152xf32, #tpu.memory_space<vmem>>, vector<4x32xf32>
    %c76_632 = arith.constant 76 : index
    %c128_633 = arith.constant 128 : index
    %370 = vector.load %arg12[%c76_632, %c128_633] : memref<100x512xf32, #tpu.memory_space<vmem>>, vector<4x32xf32>
    tpu.vector_store %arg12[%c76_632, %c128_633], %369 {strides = array<i32>} : memref<100x512xf32, #tpu.memory_space<vmem>>, vector<4x32xf32>,
    %c0_634 = arith.constant 0 : index
    %c976_635 = arith.constant 976 : index
    %371 = vector.load %arg11[%c0_634, %c976_635] : memref<4x1152xf32, #tpu.memory_space<vmem>>, vector<4x32xf32>
    %c76_636 = arith.constant 76 : index
    %c160_637 = arith.constant 160 : index
    %372 = vector.load %arg12[%c76_636, %c160_637] : memref<100x512xf32, #tpu.memory_space<vmem>>, vector<4x32xf32>
    tpu.vector_store %arg12[%c76_636, %c160_637], %371 {strides = array<i32>} : memref<100x512xf32, #tpu.memory_space<vmem>>, vector<4x32xf32>,
    %c0_638 = arith.constant 0 : index
    %c1024_639 = arith.constant 1024 : index
    %373 = vector.load %arg11[%c0_638, %c1024_639] : memref<4x1152xf32, #tpu.memory_space<vmem>>, vector<4x32xf32>
    %c76_640 = arith.constant 76 : index
    %c192_641 = arith.constant 192 : index
    %374 = vector.load %arg12[%c76_640, %c192_641] : memref<100x512xf32, #tpu.memory_space<vmem>>, vector<4x32xf32>
    tpu.vector_store %arg12[%c76_640, %c192_641], %373 {strides = array<i32>} : memref<100x512xf32, #tpu.memory_space<vmem>>, vector<4x32xf32>,
    %c0_642 = arith.constant 0 : index
    %c1072 = arith.constant 1072 : index
    %375 = vector.load %arg11[%c0_642, %c1072] : memref<4x1152xf32, #tpu.memory_space<vmem>>, vector<4x32xf32>
    %c76_643 = arith.constant 76 : index
    %c224_644 = arith.constant 224 : index
    %376 = vector.load %arg12[%c76_643, %c224_644] : memref<100x512xf32, #tpu.memory_space<vmem>>, vector<4x32xf32>
    tpu.vector_store %arg12[%c76_643, %c224_644], %375 {strides = array<i32>} : memref<100x512xf32, #tpu.memory_space<vmem>>, vector<4x32xf32>,
    %c0_645 = arith.constant 0 : index
    %c384_646 = arith.constant 384 : index
    %377 = vector.load %arg11[%c0_645, %c384_646] : memref<4x1152xf32, #tpu.memory_space<vmem>>, vector<4x32xf32>
    %c80_647 = arith.constant 80 : index
    %c128_648 = arith.constant 128 : index
    %378 = vector.load %arg12[%c80_647, %c128_648] : memref<100x512xf32, #tpu.memory_space<vmem>>, vector<4x32xf32>
    tpu.vector_store %arg12[%c80_647, %c128_648], %377 {strides = array<i32>} : memref<100x512xf32, #tpu.memory_space<vmem>>, vector<4x32xf32>,
    %c0_649 = arith.constant 0 : index
    %c432_650 = arith.constant 432 : index
    %379 = vector.load %arg11[%c0_649, %c432_650] : memref<4x1152xf32, #tpu.memory_space<vmem>>, vector<4x32xf32>
    %c80_651 = arith.constant 80 : index
    %c160_652 = arith.constant 160 : index
    %380 = vector.load %arg12[%c80_651, %c160_652] : memref<100x512xf32, #tpu.memory_space<vmem>>, vector<4x32xf32>
    tpu.vector_store %arg12[%c80_651, %c160_652], %379 {strides = array<i32>} : memref<100x512xf32, #tpu.memory_space<vmem>>, vector<4x32xf32>,
    %c0_653 = arith.constant 0 : index
    %c480_654 = arith.constant 480 : index
    %381 = vector.load %arg11[%c0_653, %c480_654] : memref<4x1152xf32, #tpu.memory_space<vmem>>, vector<4x32xf32>
    %c80_655 = arith.constant 80 : index
    %c192_656 = arith.constant 192 : index
    %382 = vector.load %arg12[%c80_655, %c192_656] : memref<100x512xf32, #tpu.memory_space<vmem>>, vector<4x32xf32>
    tpu.vector_store %arg12[%c80_655, %c192_656], %381 {strides = array<i32>} : memref<100x512xf32, #tpu.memory_space<vmem>>, vector<4x32xf32>,
    %c0_657 = arith.constant 0 : index
    %c528_658 = arith.constant 528 : index
    %383 = vector.load %arg11[%c0_657, %c528_658] : memref<4x1152xf32, #tpu.memory_space<vmem>>, vector<4x32xf32>
    %c80_659 = arith.constant 80 : index
    %c224_660 = arith.constant 224 : index
    %384 = vector.load %arg12[%c80_659, %c224_660] : memref<100x512xf32, #tpu.memory_space<vmem>>, vector<4x32xf32>
    tpu.vector_store %arg12[%c80_659, %c224_660], %383 {strides = array<i32>} : memref<100x512xf32, #tpu.memory_space<vmem>>, vector<4x32xf32>,
    %c0_661 = arith.constant 0 : index
    %c104_662 = arith.constant 104 : index
    %385 = vector.load %arg11[%c0_661, %c104_662] : memref<4x1152xf32, #tpu.memory_space<vmem>>, vector<4x32xf32>
    %c84_663 = arith.constant 84 : index
    %c128_664 = arith.constant 128 : index
    %386 = vector.load %arg12[%c84_663, %c128_664] : memref<100x512xf32, #tpu.memory_space<vmem>>, vector<4x32xf32>
    tpu.vector_store %arg12[%c84_663, %c128_664], %385 {strides = array<i32>} : memref<100x512xf32, #tpu.memory_space<vmem>>, vector<4x32xf32>,
    %c0_665 = arith.constant 0 : index
    %c152_666 = arith.constant 152 : index
    %387 = vector.load %arg11[%c0_665, %c152_666] : memref<4x1152xf32, #tpu.memory_space<vmem>>, vector<4x32xf32>
    %c84_667 = arith.constant 84 : index
    %c160_668 = arith.constant 160 : index
    %388 = vector.load %arg12[%c84_667, %c160_668] : memref<100x512xf32, #tpu.memory_space<vmem>>, vector<4x32xf32>
    tpu.vector_store %arg12[%c84_667, %c160_668], %387 {strides = array<i32>} : memref<100x512xf32, #tpu.memory_space<vmem>>, vector<4x32xf32>,
    %c0_669 = arith.constant 0 : index
    %c200_670 = arith.constant 200 : index
    %389 = vector.load %arg11[%c0_669, %c200_670] : memref<4x1152xf32, #tpu.memory_space<vmem>>, vector<4x32xf32>
    %c84_671 = arith.constant 84 : index
    %c192_672 = arith.constant 192 : index
    %390 = vector.load %arg12[%c84_671, %c192_672] : memref<100x512xf32, #tpu.memory_space<vmem>>, vector<4x32xf32>
    tpu.vector_store %arg12[%c84_671, %c192_672], %389 {strides = array<i32>} : memref<100x512xf32, #tpu.memory_space<vmem>>, vector<4x32xf32>,
    %c0_673 = arith.constant 0 : index
    %c248_674 = arith.constant 248 : index
    %391 = vector.load %arg11[%c0_673, %c248_674] : memref<4x1152xf32, #tpu.memory_space<vmem>>, vector<4x32xf32>
    %c84_675 = arith.constant 84 : index
    %c224_676 = arith.constant 224 : index
    %392 = vector.load %arg12[%c84_675, %c224_676] : memref<100x512xf32, #tpu.memory_space<vmem>>, vector<4x32xf32>
    tpu.vector_store %arg12[%c84_675, %c224_676], %391 {strides = array<i32>} : memref<100x512xf32, #tpu.memory_space<vmem>>, vector<4x32xf32>,
    %c0_677 = arith.constant 0 : index
    %c392_678 = arith.constant 392 : index
    %393 = vector.load %arg11[%c0_677, %c392_678] : memref<4x1152xf32, #tpu.memory_space<vmem>>, vector<4x32xf32>
    %c88_679 = arith.constant 88 : index
    %c128_680 = arith.constant 128 : index
    %394 = vector.load %arg12[%c88_679, %c128_680] : memref<100x512xf32, #tpu.memory_space<vmem>>, vector<4x32xf32>
    tpu.vector_store %arg12[%c88_679, %c128_680], %393 {strides = array<i32>} : memref<100x512xf32, #tpu.memory_space<vmem>>, vector<4x32xf32>,
    %c0_681 = arith.constant 0 : index
    %c440_682 = arith.constant 440 : index
    %395 = vector.load %arg11[%c0_681, %c440_682] : memref<4x1152xf32, #tpu.memory_space<vmem>>, vector<4x32xf32>
    %c88_683 = arith.constant 88 : index
    %c160_684 = arith.constant 160 : index
    %396 = vector.load %arg12[%c88_683, %c160_684] : memref<100x512xf32, #tpu.memory_space<vmem>>, vector<4x32xf32>
    tpu.vector_store %arg12[%c88_683, %c160_684], %395 {strides = array<i32>} : memref<100x512xf32, #tpu.memory_space<vmem>>, vector<4x32xf32>,
    %c0_685 = arith.constant 0 : index
    %c488_686 = arith.constant 488 : index
    %397 = vector.load %arg11[%c0_685, %c488_686] : memref<4x1152xf32, #tpu.memory_space<vmem>>, vector<4x32xf32>
    %c88_687 = arith.constant 88 : index
    %c192_688 = arith.constant 192 : index
    %398 = vector.load %arg12[%c88_687, %c192_688] : memref<100x512xf32, #tpu.memory_space<vmem>>, vector<4x32xf32>
    tpu.vector_store %arg12[%c88_687, %c192_688], %397 {strides = array<i32>} : memref<100x512xf32, #tpu.memory_space<vmem>>, vector<4x32xf32>,
    %c0_689 = arith.constant 0 : index
    %c536_690 = arith.constant 536 : index
    %399 = vector.load %arg11[%c0_689, %c536_690] : memref<4x1152xf32, #tpu.memory_space<vmem>>, vector<4x32xf32>
    %c88_691 = arith.constant 88 : index
    %c224_692 = arith.constant 224 : index
    %400 = vector.load %arg12[%c88_691, %c224_692] : memref<100x512xf32, #tpu.memory_space<vmem>>, vector<4x32xf32>
    tpu.vector_store %arg12[%c88_691, %c224_692], %399 {strides = array<i32>} : memref<100x512xf32, #tpu.memory_space<vmem>>, vector<4x32xf32>,
    %c0_693 = arith.constant 0 : index
    %c112_694 = arith.constant 112 : index
    %401 = vector.load %arg11[%c0_693, %c112_694] : memref<4x1152xf32, #tpu.memory_space<vmem>>, vector<4x32xf32>
    %c92_695 = arith.constant 92 : index
    %c128_696 = arith.constant 128 : index
    %402 = vector.load %arg12[%c92_695, %c128_696] : memref<100x512xf32, #tpu.memory_space<vmem>>, vector<4x32xf32>
    tpu.vector_store %arg12[%c92_695, %c128_696], %401 {strides = array<i32>} : memref<100x512xf32, #tpu.memory_space<vmem>>, vector<4x32xf32>,
    %c0_697 = arith.constant 0 : index
    %c160_698 = arith.constant 160 : index
    %403 = vector.load %arg11[%c0_697, %c160_698] : memref<4x1152xf32, #tpu.memory_space<vmem>>, vector<4x32xf32>
    %c92_699 = arith.constant 92 : index
    %c160_700 = arith.constant 160 : index
    %404 = vector.load %arg12[%c92_699, %c160_700] : memref<100x512xf32, #tpu.memory_space<vmem>>, vector<4x32xf32>
    tpu.vector_store %arg12[%c92_699, %c160_700], %403 {strides = array<i32>} : memref<100x512xf32, #tpu.memory_space<vmem>>, vector<4x32xf32>,
    %c0_701 = arith.constant 0 : index
    %c208_702 = arith.constant 208 : index
    %405 = vector.load %arg11[%c0_701, %c208_702] : memref<4x1152xf32, #tpu.memory_space<vmem>>, vector<4x32xf32>
    %c92_703 = arith.constant 92 : index
    %c192_704 = arith.constant 192 : index
    %406 = vector.load %arg12[%c92_703, %c192_704] : memref<100x512xf32, #tpu.memory_space<vmem>>, vector<4x32xf32>
    tpu.vector_store %arg12[%c92_703, %c192_704], %405 {strides = array<i32>} : memref<100x512xf32, #tpu.memory_space<vmem>>, vector<4x32xf32>,
    %c0_705 = arith.constant 0 : index
    %c256_706 = arith.constant 256 : index
    %407 = vector.load %arg11[%c0_705, %c256_706] : memref<4x1152xf32, #tpu.memory_space<vmem>>, vector<4x32xf32>
    %c92_707 = arith.constant 92 : index
    %c224_708 = arith.constant 224 : index
    %408 = vector.load %arg12[%c92_707, %c224_708] : memref<100x512xf32, #tpu.memory_space<vmem>>, vector<4x32xf32>
    tpu.vector_store %arg12[%c92_707, %c224_708], %407 {strides = array<i32>} : memref<100x512xf32, #tpu.memory_space<vmem>>, vector<4x32xf32>,
    %c0_709 = arith.constant 0 : index
    %c400_710 = arith.constant 400 : index
    %409 = vector.load %arg11[%c0_709, %c400_710] : memref<4x1152xf32, #tpu.memory_space<vmem>>, vector<4x32xf32>
    %c96_711 = arith.constant 96 : index
    %c128_712 = arith.constant 128 : index
    %410 = vector.load %arg12[%c96_711, %c128_712] : memref<100x512xf32, #tpu.memory_space<vmem>>, vector<4x32xf32>
    tpu.vector_store %arg12[%c96_711, %c128_712], %409 {strides = array<i32>} : memref<100x512xf32, #tpu.memory_space<vmem>>, vector<4x32xf32>,
    %c0_713 = arith.constant 0 : index
    %c448_714 = arith.constant 448 : index
    %411 = vector.load %arg11[%c0_713, %c448_714] : memref<4x1152xf32, #tpu.memory_space<vmem>>, vector<4x32xf32>
    %c96_715 = arith.constant 96 : index
    %c160_716 = arith.constant 160 : index
    %412 = vector.load %arg12[%c96_715, %c160_716] : memref<100x512xf32, #tpu.memory_space<vmem>>, vector<4x32xf32>
    tpu.vector_store %arg12[%c96_715, %c160_716], %411 {strides = array<i32>} : memref<100x512xf32, #tpu.memory_space<vmem>>, vector<4x32xf32>,
    %c0_717 = arith.constant 0 : index
    %c496_718 = arith.constant 496 : index
    %413 = vector.load %arg11[%c0_717, %c496_718] : memref<4x1152xf32, #tpu.memory_space<vmem>>, vector<4x32xf32>
    %c96_719 = arith.constant 96 : index
    %c192_720 = arith.constant 192 : index
    %414 = vector.load %arg12[%c96_719, %c192_720] : memref<100x512xf32, #tpu.memory_space<vmem>>, vector<4x32xf32>
    tpu.vector_store %arg12[%c96_719, %c192_720], %413 {strides = array<i32>} : memref<100x512xf32, #tpu.memory_space<vmem>>, vector<4x32xf32>,
    %c0_721 = arith.constant 0 : index
    %c544 = arith.constant 544 : index
    %415 = vector.load %arg11[%c0_721, %c544] : memref<4x1152xf32, #tpu.memory_space<vmem>>, vector<4x32xf32>
    %c96_722 = arith.constant 96 : index
    %c224_723 = arith.constant 224 : index
    %416 = vector.load %arg12[%c96_722, %c224_723] : memref<100x512xf32, #tpu.memory_space<vmem>>, vector<4x32xf32>
    tpu.vector_store %arg12[%c96_722, %c224_723], %415 {strides = array<i32>} : memref<100x512xf32, #tpu.memory_space<vmem>>, vector<4x32xf32>,
    %c0_724 = arith.constant 0 : index
    %c576_725 = arith.constant 576 : index
    %417 = vector.load %arg11[%c0_724, %c576_725] : memref<4x1152xf32, #tpu.memory_space<vmem>>, vector<4x32xf32>
    %c0_726 = arith.constant 0 : index
    %c256_727 = arith.constant 256 : index
    %418 = vector.load %arg12[%c0_726, %c256_727] : memref<100x512xf32, #tpu.memory_space<vmem>>, vector<4x32xf32>
    tpu.vector_store %arg12[%c0_726, %c256_727], %417 {strides = array<i32>} : memref<100x512xf32, #tpu.memory_space<vmem>>, vector<4x32xf32>,
    %c0_728 = arith.constant 0 : index
    %c624_729 = arith.constant 624 : index
    %419 = vector.load %arg11[%c0_728, %c624_729] : memref<4x1152xf32, #tpu.memory_space<vmem>>, vector<4x32xf32>
    %c0_730 = arith.constant 0 : index
    %c288_731 = arith.constant 288 : index
    %420 = vector.load %arg12[%c0_730, %c288_731] : memref<100x512xf32, #tpu.memory_space<vmem>>, vector<4x32xf32>
    tpu.vector_store %arg12[%c0_730, %c288_731], %419 {strides = array<i32>} : memref<100x512xf32, #tpu.memory_space<vmem>>, vector<4x32xf32>,
    %c0_732 = arith.constant 0 : index
    %c672_733 = arith.constant 672 : index
    %421 = vector.load %arg11[%c0_732, %c672_733] : memref<4x1152xf32, #tpu.memory_space<vmem>>, vector<4x32xf32>
    %c0_734 = arith.constant 0 : index
    %c320 = arith.constant 320 : index
    %422 = vector.load %arg12[%c0_734, %c320] : memref<100x512xf32, #tpu.memory_space<vmem>>, vector<4x32xf32>
    tpu.vector_store %arg12[%c0_734, %c320], %421 {strides = array<i32>} : memref<100x512xf32, #tpu.memory_space<vmem>>, vector<4x32xf32>,
    %c0_735 = arith.constant 0 : index
    %c720_736 = arith.constant 720 : index
    %423 = vector.load %arg11[%c0_735, %c720_736] : memref<4x1152xf32, #tpu.memory_space<vmem>>, vector<4x32xf32>
    %c0_737 = arith.constant 0 : index
    %c352_738 = arith.constant 352 : index
    %424 = vector.load %arg12[%c0_737, %c352_738] : memref<100x512xf32, #tpu.memory_space<vmem>>, vector<4x32xf32>
    tpu.vector_store %arg12[%c0_737, %c352_738], %423 {strides = array<i32>} : memref<100x512xf32, #tpu.memory_space<vmem>>, vector<4x32xf32>,
    %c0_739 = arith.constant 0 : index
    %c864_740 = arith.constant 864 : index
    %425 = vector.load %arg11[%c0_739, %c864_740] : memref<4x1152xf32, #tpu.memory_space<vmem>>, vector<4x32xf32>
    %c4_741 = arith.constant 4 : index
    %c256_742 = arith.constant 256 : index
    %426 = vector.load %arg12[%c4_741, %c256_742] : memref<100x512xf32, #tpu.memory_space<vmem>>, vector<4x32xf32>
    tpu.vector_store %arg12[%c4_741, %c256_742], %425 {strides = array<i32>} : memref<100x512xf32, #tpu.memory_space<vmem>>, vector<4x32xf32>,
    %c0_743 = arith.constant 0 : index
    %c912_744 = arith.constant 912 : index
    %427 = vector.load %arg11[%c0_743, %c912_744] : memref<4x1152xf32, #tpu.memory_space<vmem>>, vector<4x32xf32>
    %c4_745 = arith.constant 4 : index
    %c288_746 = arith.constant 288 : index
    %428 = vector.load %arg12[%c4_745, %c288_746] : memref<100x512xf32, #tpu.memory_space<vmem>>, vector<4x32xf32>
    tpu.vector_store %arg12[%c4_745, %c288_746], %427 {strides = array<i32>} : memref<100x512xf32, #tpu.memory_space<vmem>>, vector<4x32xf32>,
    %c0_747 = arith.constant 0 : index
    %c960_748 = arith.constant 960 : index
    %429 = vector.load %arg11[%c0_747, %c960_748] : memref<4x1152xf32, #tpu.memory_space<vmem>>, vector<4x32xf32>
    %c4_749 = arith.constant 4 : index
    %c320_750 = arith.constant 320 : index
    %430 = vector.load %arg12[%c4_749, %c320_750] : memref<100x512xf32, #tpu.memory_space<vmem>>, vector<4x32xf32>
    tpu.vector_store %arg12[%c4_749, %c320_750], %429 {strides = array<i32>} : memref<100x512xf32, #tpu.memory_space<vmem>>, vector<4x32xf32>,
    %c0_751 = arith.constant 0 : index
    %c1008_752 = arith.constant 1008 : index
    %431 = vector.load %arg11[%c0_751, %c1008_752] : memref<4x1152xf32, #tpu.memory_space<vmem>>, vector<4x32xf32>
    %c4_753 = arith.constant 4 : index
    %c352_754 = arith.constant 352 : index
    %432 = vector.load %arg12[%c4_753, %c352_754] : memref<100x512xf32, #tpu.memory_space<vmem>>, vector<4x32xf32>
    tpu.vector_store %arg12[%c4_753, %c352_754], %431 {strides = array<i32>} : memref<100x512xf32, #tpu.memory_space<vmem>>, vector<4x32xf32>,
    %c0_755 = arith.constant 0 : index
    %c584_756 = arith.constant 584 : index
    %433 = vector.load %arg11[%c0_755, %c584_756] : memref<4x1152xf32, #tpu.memory_space<vmem>>, vector<4x32xf32>
    %c8_757 = arith.constant 8 : index
    %c256_758 = arith.constant 256 : index
    %434 = vector.load %arg12[%c8_757, %c256_758] : memref<100x512xf32, #tpu.memory_space<vmem>>, vector<4x32xf32>
    tpu.vector_store %arg12[%c8_757, %c256_758], %433 {strides = array<i32>} : memref<100x512xf32, #tpu.memory_space<vmem>>, vector<4x32xf32>,
    %c0_759 = arith.constant 0 : index
    %c632_760 = arith.constant 632 : index
    %435 = vector.load %arg11[%c0_759, %c632_760] : memref<4x1152xf32, #tpu.memory_space<vmem>>, vector<4x32xf32>
    %c8_761 = arith.constant 8 : index
    %c288_762 = arith.constant 288 : index
    %436 = vector.load %arg12[%c8_761, %c288_762] : memref<100x512xf32, #tpu.memory_space<vmem>>, vector<4x32xf32>
    tpu.vector_store %arg12[%c8_761, %c288_762], %435 {strides = array<i32>} : memref<100x512xf32, #tpu.memory_space<vmem>>, vector<4x32xf32>,
    %c0_763 = arith.constant 0 : index
    %c680_764 = arith.constant 680 : index
    %437 = vector.load %arg11[%c0_763, %c680_764] : memref<4x1152xf32, #tpu.memory_space<vmem>>, vector<4x32xf32>
    %c8_765 = arith.constant 8 : index
    %c320_766 = arith.constant 320 : index
    %438 = vector.load %arg12[%c8_765, %c320_766] : memref<100x512xf32, #tpu.memory_space<vmem>>, vector<4x32xf32>
    tpu.vector_store %arg12[%c8_765, %c320_766], %437 {strides = array<i32>} : memref<100x512xf32, #tpu.memory_space<vmem>>, vector<4x32xf32>,
    %c0_767 = arith.constant 0 : index
    %c728_768 = arith.constant 728 : index
    %439 = vector.load %arg11[%c0_767, %c728_768] : memref<4x1152xf32, #tpu.memory_space<vmem>>, vector<4x32xf32>
    %c8_769 = arith.constant 8 : index
    %c352_770 = arith.constant 352 : index
    %440 = vector.load %arg12[%c8_769, %c352_770] : memref<100x512xf32, #tpu.memory_space<vmem>>, vector<4x32xf32>
    tpu.vector_store %arg12[%c8_769, %c352_770], %439 {strides = array<i32>} : memref<100x512xf32, #tpu.memory_space<vmem>>, vector<4x32xf32>,
    %c0_771 = arith.constant 0 : index
    %c872_772 = arith.constant 872 : index
    %441 = vector.load %arg11[%c0_771, %c872_772] : memref<4x1152xf32, #tpu.memory_space<vmem>>, vector<4x32xf32>
    %c12_773 = arith.constant 12 : index
    %c256_774 = arith.constant 256 : index
    %442 = vector.load %arg12[%c12_773, %c256_774] : memref<100x512xf32, #tpu.memory_space<vmem>>, vector<4x32xf32>
    tpu.vector_store %arg12[%c12_773, %c256_774], %441 {strides = array<i32>} : memref<100x512xf32, #tpu.memory_space<vmem>>, vector<4x32xf32>,
    %c0_775 = arith.constant 0 : index
    %c920_776 = arith.constant 920 : index
    %443 = vector.load %arg11[%c0_775, %c920_776] : memref<4x1152xf32, #tpu.memory_space<vmem>>, vector<4x32xf32>
    %c12_777 = arith.constant 12 : index
    %c288_778 = arith.constant 288 : index
    %444 = vector.load %arg12[%c12_777, %c288_778] : memref<100x512xf32, #tpu.memory_space<vmem>>, vector<4x32xf32>
    tpu.vector_store %arg12[%c12_777, %c288_778], %443 {strides = array<i32>} : memref<100x512xf32, #tpu.memory_space<vmem>>, vector<4x32xf32>,
    %c0_779 = arith.constant 0 : index
    %c968_780 = arith.constant 968 : index
    %445 = vector.load %arg11[%c0_779, %c968_780] : memref<4x1152xf32, #tpu.memory_space<vmem>>, vector<4x32xf32>
    %c12_781 = arith.constant 12 : index
    %c320_782 = arith.constant 320 : index
    %446 = vector.load %arg12[%c12_781, %c320_782] : memref<100x512xf32, #tpu.memory_space<vmem>>, vector<4x32xf32>
    tpu.vector_store %arg12[%c12_781, %c320_782], %445 {strides = array<i32>} : memref<100x512xf32, #tpu.memory_space<vmem>>, vector<4x32xf32>,
    %c0_783 = arith.constant 0 : index
    %c1016_784 = arith.constant 1016 : index
    %447 = vector.load %arg11[%c0_783, %c1016_784] : memref<4x1152xf32, #tpu.memory_space<vmem>>, vector<4x32xf32>
    %c12_785 = arith.constant 12 : index
    %c352_786 = arith.constant 352 : index
    %448 = vector.load %arg12[%c12_785, %c352_786] : memref<100x512xf32, #tpu.memory_space<vmem>>, vector<4x32xf32>
    tpu.vector_store %arg12[%c12_785, %c352_786], %447 {strides = array<i32>} : memref<100x512xf32, #tpu.memory_space<vmem>>, vector<4x32xf32>,
    %c0_787 = arith.constant 0 : index
    %c592_788 = arith.constant 592 : index
    %449 = vector.load %arg11[%c0_787, %c592_788] : memref<4x1152xf32, #tpu.memory_space<vmem>>, vector<4x32xf32>
    %c16_789 = arith.constant 16 : index
    %c256_790 = arith.constant 256 : index
    %450 = vector.load %arg12[%c16_789, %c256_790] : memref<100x512xf32, #tpu.memory_space<vmem>>, vector<4x32xf32>
    tpu.vector_store %arg12[%c16_789, %c256_790], %449 {strides = array<i32>} : memref<100x512xf32, #tpu.memory_space<vmem>>, vector<4x32xf32>,
    %c0_791 = arith.constant 0 : index
    %c640_792 = arith.constant 640 : index
    %451 = vector.load %arg11[%c0_791, %c640_792] : memref<4x1152xf32, #tpu.memory_space<vmem>>, vector<4x32xf32>
    %c16_793 = arith.constant 16 : index
    %c288_794 = arith.constant 288 : index
    %452 = vector.load %arg12[%c16_793, %c288_794] : memref<100x512xf32, #tpu.memory_space<vmem>>, vector<4x32xf32>
    tpu.vector_store %arg12[%c16_793, %c288_794], %451 {strides = array<i32>} : memref<100x512xf32, #tpu.memory_space<vmem>>, vector<4x32xf32>,
    %c0_795 = arith.constant 0 : index
    %c688_796 = arith.constant 688 : index
    %453 = vector.load %arg11[%c0_795, %c688_796] : memref<4x1152xf32, #tpu.memory_space<vmem>>, vector<4x32xf32>
    %c16_797 = arith.constant 16 : index
    %c320_798 = arith.constant 320 : index
    %454 = vector.load %arg12[%c16_797, %c320_798] : memref<100x512xf32, #tpu.memory_space<vmem>>, vector<4x32xf32>
    tpu.vector_store %arg12[%c16_797, %c320_798], %453 {strides = array<i32>} : memref<100x512xf32, #tpu.memory_space<vmem>>, vector<4x32xf32>,
    %c0_799 = arith.constant 0 : index
    %c736_800 = arith.constant 736 : index
    %455 = vector.load %arg11[%c0_799, %c736_800] : memref<4x1152xf32, #tpu.memory_space<vmem>>, vector<4x32xf32>
    %c16_801 = arith.constant 16 : index
    %c352_802 = arith.constant 352 : index
    %456 = vector.load %arg12[%c16_801, %c352_802] : memref<100x512xf32, #tpu.memory_space<vmem>>, vector<4x32xf32>
    tpu.vector_store %arg12[%c16_801, %c352_802], %455 {strides = array<i32>} : memref<100x512xf32, #tpu.memory_space<vmem>>, vector<4x32xf32>,
    %c0_803 = arith.constant 0 : index
    %c48_804 = arith.constant 48 : index
    %457 = vector.load %arg11[%c0_803, %c48_804] : memref<4x1152xf32, #tpu.memory_space<vmem>>, vector<4x32xf32>
    %c20_805 = arith.constant 20 : index
    %c256_806 = arith.constant 256 : index
    %458 = vector.load %arg12[%c20_805, %c256_806] : memref<100x512xf32, #tpu.memory_space<vmem>>, vector<4x32xf32>
    tpu.vector_store %arg12[%c20_805, %c256_806], %457 {strides = array<i32>} : memref<100x512xf32, #tpu.memory_space<vmem>>, vector<4x32xf32>,
    %c0_807 = arith.constant 0 : index
    %c96_808 = arith.constant 96 : index
    %459 = vector.load %arg11[%c0_807, %c96_808] : memref<4x1152xf32, #tpu.memory_space<vmem>>, vector<4x32xf32>
    %c20_809 = arith.constant 20 : index
    %c288_810 = arith.constant 288 : index
    %460 = vector.load %arg12[%c20_809, %c288_810] : memref<100x512xf32, #tpu.memory_space<vmem>>, vector<4x32xf32>
    tpu.vector_store %arg12[%c20_809, %c288_810], %459 {strides = array<i32>} : memref<100x512xf32, #tpu.memory_space<vmem>>, vector<4x32xf32>,
    %c0_811 = arith.constant 0 : index
    %c144_812 = arith.constant 144 : index
    %461 = vector.load %arg11[%c0_811, %c144_812] : memref<4x1152xf32, #tpu.memory_space<vmem>>, vector<4x32xf32>
    %c20_813 = arith.constant 20 : index
    %c320_814 = arith.constant 320 : index
    %462 = vector.load %arg12[%c20_813, %c320_814] : memref<100x512xf32, #tpu.memory_space<vmem>>, vector<4x32xf32>
    tpu.vector_store %arg12[%c20_813, %c320_814], %461 {strides = array<i32>} : memref<100x512xf32, #tpu.memory_space<vmem>>, vector<4x32xf32>,
    %c0_815 = arith.constant 0 : index
    %c192_816 = arith.constant 192 : index
    %463 = vector.load %arg11[%c0_815, %c192_816] : memref<4x1152xf32, #tpu.memory_space<vmem>>, vector<4x32xf32>
    %c20_817 = arith.constant 20 : index
    %c352_818 = arith.constant 352 : index
    %464 = vector.load %arg12[%c20_817, %c352_818] : memref<100x512xf32, #tpu.memory_space<vmem>>, vector<4x32xf32>
    tpu.vector_store %arg12[%c20_817, %c352_818], %463 {strides = array<i32>} : memref<100x512xf32, #tpu.memory_space<vmem>>, vector<4x32xf32>,
    %c0_819 = arith.constant 0 : index
    %c336_820 = arith.constant 336 : index
    %465 = vector.load %arg11[%c0_819, %c336_820] : memref<4x1152xf32, #tpu.memory_space<vmem>>, vector<4x32xf32>
    %c24_821 = arith.constant 24 : index
    %c256_822 = arith.constant 256 : index
    %466 = vector.load %arg12[%c24_821, %c256_822] : memref<100x512xf32, #tpu.memory_space<vmem>>, vector<4x32xf32>
    tpu.vector_store %arg12[%c24_821, %c256_822], %465 {strides = array<i32>} : memref<100x512xf32, #tpu.memory_space<vmem>>, vector<4x32xf32>,
    %c0_823 = arith.constant 0 : index
    %c384_824 = arith.constant 384 : index
    %467 = vector.load %arg11[%c0_823, %c384_824] : memref<4x1152xf32, #tpu.memory_space<vmem>>, vector<4x32xf32>
    %c24_825 = arith.constant 24 : index
    %c288_826 = arith.constant 288 : index
    %468 = vector.load %arg12[%c24_825, %c288_826] : memref<100x512xf32, #tpu.memory_space<vmem>>, vector<4x32xf32>
    tpu.vector_store %arg12[%c24_825, %c288_826], %467 {strides = array<i32>} : memref<100x512xf32, #tpu.memory_space<vmem>>, vector<4x32xf32>,
    %c0_827 = arith.constant 0 : index
    %c432_828 = arith.constant 432 : index
    %469 = vector.load %arg11[%c0_827, %c432_828] : memref<4x1152xf32, #tpu.memory_space<vmem>>, vector<4x32xf32>
    %c24_829 = arith.constant 24 : index
    %c320_830 = arith.constant 320 : index
    %470 = vector.load %arg12[%c24_829, %c320_830] : memref<100x512xf32, #tpu.memory_space<vmem>>, vector<4x32xf32>
    tpu.vector_store %arg12[%c24_829, %c320_830], %469 {strides = array<i32>} : memref<100x512xf32, #tpu.memory_space<vmem>>, vector<4x32xf32>,
    %c0_831 = arith.constant 0 : index
    %c480_832 = arith.constant 480 : index
    %471 = vector.load %arg11[%c0_831, %c480_832] : memref<4x1152xf32, #tpu.memory_space<vmem>>, vector<4x32xf32>
    %c24_833 = arith.constant 24 : index
    %c352_834 = arith.constant 352 : index
    %472 = vector.load %arg12[%c24_833, %c352_834] : memref<100x512xf32, #tpu.memory_space<vmem>>, vector<4x32xf32>
    tpu.vector_store %arg12[%c24_833, %c352_834], %471 {strides = array<i32>} : memref<100x512xf32, #tpu.memory_space<vmem>>, vector<4x32xf32>,
    %c0_835 = arith.constant 0 : index
    %c56_836 = arith.constant 56 : index
    %473 = vector.load %arg11[%c0_835, %c56_836] : memref<4x1152xf32, #tpu.memory_space<vmem>>, vector<4x32xf32>
    %c28_837 = arith.constant 28 : index
    %c256_838 = arith.constant 256 : index
    %474 = vector.load %arg12[%c28_837, %c256_838] : memref<100x512xf32, #tpu.memory_space<vmem>>, vector<4x32xf32>
    tpu.vector_store %arg12[%c28_837, %c256_838], %473 {strides = array<i32>} : memref<100x512xf32, #tpu.memory_space<vmem>>, vector<4x32xf32>,
    %c0_839 = arith.constant 0 : index
    %c104_840 = arith.constant 104 : index
    %475 = vector.load %arg11[%c0_839, %c104_840] : memref<4x1152xf32, #tpu.memory_space<vmem>>, vector<4x32xf32>
    %c28_841 = arith.constant 28 : index
    %c288_842 = arith.constant 288 : index
    %476 = vector.load %arg12[%c28_841, %c288_842] : memref<100x512xf32, #tpu.memory_space<vmem>>, vector<4x32xf32>
    tpu.vector_store %arg12[%c28_841, %c288_842], %475 {strides = array<i32>} : memref<100x512xf32, #tpu.memory_space<vmem>>, vector<4x32xf32>,
    %c0_843 = arith.constant 0 : index
    %c152_844 = arith.constant 152 : index
    %477 = vector.load %arg11[%c0_843, %c152_844] : memref<4x1152xf32, #tpu.memory_space<vmem>>, vector<4x32xf32>
    %c28_845 = arith.constant 28 : index
    %c320_846 = arith.constant 320 : index
    %478 = vector.load %arg12[%c28_845, %c320_846] : memref<100x512xf32, #tpu.memory_space<vmem>>, vector<4x32xf32>
    tpu.vector_store %arg12[%c28_845, %c320_846], %477 {strides = array<i32>} : memref<100x512xf32, #tpu.memory_space<vmem>>, vector<4x32xf32>,
    %c0_847 = arith.constant 0 : index
    %c200_848 = arith.constant 200 : index
    %479 = vector.load %arg11[%c0_847, %c200_848] : memref<4x1152xf32, #tpu.memory_space<vmem>>, vector<4x32xf32>
    %c28_849 = arith.constant 28 : index
    %c352_850 = arith.constant 352 : index
    %480 = vector.load %arg12[%c28_849, %c352_850] : memref<100x512xf32, #tpu.memory_space<vmem>>, vector<4x32xf32>
    tpu.vector_store %arg12[%c28_849, %c352_850], %479 {strides = array<i32>} : memref<100x512xf32, #tpu.memory_space<vmem>>, vector<4x32xf32>,
    %c0_851 = arith.constant 0 : index
    %c344_852 = arith.constant 344 : index
    %481 = vector.load %arg11[%c0_851, %c344_852] : memref<4x1152xf32, #tpu.memory_space<vmem>>, vector<4x32xf32>
    %c32_853 = arith.constant 32 : index
    %c256_854 = arith.constant 256 : index
    %482 = vector.load %arg12[%c32_853, %c256_854] : memref<100x512xf32, #tpu.memory_space<vmem>>, vector<4x32xf32>
    tpu.vector_store %arg12[%c32_853, %c256_854], %481 {strides = array<i32>} : memref<100x512xf32, #tpu.memory_space<vmem>>, vector<4x32xf32>,
    %c0_855 = arith.constant 0 : index
    %c392_856 = arith.constant 392 : index
    %483 = vector.load %arg11[%c0_855, %c392_856] : memref<4x1152xf32, #tpu.memory_space<vmem>>, vector<4x32xf32>
    %c32_857 = arith.constant 32 : index
    %c288_858 = arith.constant 288 : index
    %484 = vector.load %arg12[%c32_857, %c288_858] : memref<100x512xf32, #tpu.memory_space<vmem>>, vector<4x32xf32>
    tpu.vector_store %arg12[%c32_857, %c288_858], %483 {strides = array<i32>} : memref<100x512xf32, #tpu.memory_space<vmem>>, vector<4x32xf32>,
    %c0_859 = arith.constant 0 : index
    %c440_860 = arith.constant 440 : index
    %485 = vector.load %arg11[%c0_859, %c440_860] : memref<4x1152xf32, #tpu.memory_space<vmem>>, vector<4x32xf32>
    %c32_861 = arith.constant 32 : index
    %c320_862 = arith.constant 320 : index
    %486 = vector.load %arg12[%c32_861, %c320_862] : memref<100x512xf32, #tpu.memory_space<vmem>>, vector<4x32xf32>
    tpu.vector_store %arg12[%c32_861, %c320_862], %485 {strides = array<i32>} : memref<100x512xf32, #tpu.memory_space<vmem>>, vector<4x32xf32>,
    %c0_863 = arith.constant 0 : index
    %c488_864 = arith.constant 488 : index
    %487 = vector.load %arg11[%c0_863, %c488_864] : memref<4x1152xf32, #tpu.memory_space<vmem>>, vector<4x32xf32>
    %c32_865 = arith.constant 32 : index
    %c352_866 = arith.constant 352 : index
    %488 = vector.load %arg12[%c32_865, %c352_866] : memref<100x512xf32, #tpu.memory_space<vmem>>, vector<4x32xf32>
    tpu.vector_store %arg12[%c32_865, %c352_866], %487 {strides = array<i32>} : memref<100x512xf32, #tpu.memory_space<vmem>>, vector<4x32xf32>,
    %c0_867 = arith.constant 0 : index
    %c64_868 = arith.constant 64 : index
    %489 = vector.load %arg11[%c0_867, %c64_868] : memref<4x1152xf32, #tpu.memory_space<vmem>>, vector<4x32xf32>
    %c36_869 = arith.constant 36 : index
    %c256_870 = arith.constant 256 : index
    %490 = vector.load %arg12[%c36_869, %c256_870] : memref<100x512xf32, #tpu.memory_space<vmem>>, vector<4x32xf32>
    tpu.vector_store %arg12[%c36_869, %c256_870], %489 {strides = array<i32>} : memref<100x512xf32, #tpu.memory_space<vmem>>, vector<4x32xf32>,
    %c0_871 = arith.constant 0 : index
    %c112_872 = arith.constant 112 : index
    %491 = vector.load %arg11[%c0_871, %c112_872] : memref<4x1152xf32, #tpu.memory_space<vmem>>, vector<4x32xf32>
    %c36_873 = arith.constant 36 : index
    %c288_874 = arith.constant 288 : index
    %492 = vector.load %arg12[%c36_873, %c288_874] : memref<100x512xf32, #tpu.memory_space<vmem>>, vector<4x32xf32>
    tpu.vector_store %arg12[%c36_873, %c288_874], %491 {strides = array<i32>} : memref<100x512xf32, #tpu.memory_space<vmem>>, vector<4x32xf32>,
    %c0_875 = arith.constant 0 : index
    %c160_876 = arith.constant 160 : index
    %493 = vector.load %arg11[%c0_875, %c160_876] : memref<4x1152xf32, #tpu.memory_space<vmem>>, vector<4x32xf32>
    %c36_877 = arith.constant 36 : index
    %c320_878 = arith.constant 320 : index
    %494 = vector.load %arg12[%c36_877, %c320_878] : memref<100x512xf32, #tpu.memory_space<vmem>>, vector<4x32xf32>
    tpu.vector_store %arg12[%c36_877, %c320_878], %493 {strides = array<i32>} : memref<100x512xf32, #tpu.memory_space<vmem>>, vector<4x32xf32>,
    %c0_879 = arith.constant 0 : index
    %c208_880 = arith.constant 208 : index
    %495 = vector.load %arg11[%c0_879, %c208_880] : memref<4x1152xf32, #tpu.memory_space<vmem>>, vector<4x32xf32>
    %c36_881 = arith.constant 36 : index
    %c352_882 = arith.constant 352 : index
    %496 = vector.load %arg12[%c36_881, %c352_882] : memref<100x512xf32, #tpu.memory_space<vmem>>, vector<4x32xf32>
    tpu.vector_store %arg12[%c36_881, %c352_882], %495 {strides = array<i32>} : memref<100x512xf32, #tpu.memory_space<vmem>>, vector<4x32xf32>,
    %c0_883 = arith.constant 0 : index
    %c624_884 = arith.constant 624 : index
    %497 = vector.load %arg11[%c0_883, %c624_884] : memref<4x1152xf32, #tpu.memory_space<vmem>>, vector<4x32xf32>
    %c40_885 = arith.constant 40 : index
    %c256_886 = arith.constant 256 : index
    %498 = vector.load %arg12[%c40_885, %c256_886] : memref<100x512xf32, #tpu.memory_space<vmem>>, vector<4x32xf32>
    tpu.vector_store %arg12[%c40_885, %c256_886], %497 {strides = array<i32>} : memref<100x512xf32, #tpu.memory_space<vmem>>, vector<4x32xf32>,
    %c0_887 = arith.constant 0 : index
    %c672_888 = arith.constant 672 : index
    %499 = vector.load %arg11[%c0_887, %c672_888] : memref<4x1152xf32, #tpu.memory_space<vmem>>, vector<4x32xf32>
    %c40_889 = arith.constant 40 : index
    %c288_890 = arith.constant 288 : index
    %500 = vector.load %arg12[%c40_889, %c288_890] : memref<100x512xf32, #tpu.memory_space<vmem>>, vector<4x32xf32>
    tpu.vector_store %arg12[%c40_889, %c288_890], %499 {strides = array<i32>} : memref<100x512xf32, #tpu.memory_space<vmem>>, vector<4x32xf32>,
    %c0_891 = arith.constant 0 : index
    %c720_892 = arith.constant 720 : index
    %501 = vector.load %arg11[%c0_891, %c720_892] : memref<4x1152xf32, #tpu.memory_space<vmem>>, vector<4x32xf32>
    %c40_893 = arith.constant 40 : index
    %c320_894 = arith.constant 320 : index
    %502 = vector.load %arg12[%c40_893, %c320_894] : memref<100x512xf32, #tpu.memory_space<vmem>>, vector<4x32xf32>
    tpu.vector_store %arg12[%c40_893, %c320_894], %501 {strides = array<i32>} : memref<100x512xf32, #tpu.memory_space<vmem>>, vector<4x32xf32>,
    %c0_895 = arith.constant 0 : index
    %c768_896 = arith.constant 768 : index
    %503 = vector.load %arg11[%c0_895, %c768_896] : memref<4x1152xf32, #tpu.memory_space<vmem>>, vector<4x32xf32>
    %c40_897 = arith.constant 40 : index
    %c352_898 = arith.constant 352 : index
    %504 = vector.load %arg12[%c40_897, %c352_898] : memref<100x512xf32, #tpu.memory_space<vmem>>, vector<4x32xf32>
    tpu.vector_store %arg12[%c40_897, %c352_898], %503 {strides = array<i32>} : memref<100x512xf32, #tpu.memory_space<vmem>>, vector<4x32xf32>,
    %c0_899 = arith.constant 0 : index
    %c912_900 = arith.constant 912 : index
    %505 = vector.load %arg11[%c0_899, %c912_900] : memref<4x1152xf32, #tpu.memory_space<vmem>>, vector<4x32xf32>
    %c44_901 = arith.constant 44 : index
    %c256_902 = arith.constant 256 : index
    %506 = vector.load %arg12[%c44_901, %c256_902] : memref<100x512xf32, #tpu.memory_space<vmem>>, vector<4x32xf32>
    tpu.vector_store %arg12[%c44_901, %c256_902], %505 {strides = array<i32>} : memref<100x512xf32, #tpu.memory_space<vmem>>, vector<4x32xf32>,
    %c0_903 = arith.constant 0 : index
    %c960_904 = arith.constant 960 : index
    %507 = vector.load %arg11[%c0_903, %c960_904] : memref<4x1152xf32, #tpu.memory_space<vmem>>, vector<4x32xf32>
    %c44_905 = arith.constant 44 : index
    %c288_906 = arith.constant 288 : index
    %508 = vector.load %arg12[%c44_905, %c288_906] : memref<100x512xf32, #tpu.memory_space<vmem>>, vector<4x32xf32>
    tpu.vector_store %arg12[%c44_905, %c288_906], %507 {strides = array<i32>} : memref<100x512xf32, #tpu.memory_space<vmem>>, vector<4x32xf32>,
    %c0_907 = arith.constant 0 : index
    %c1008_908 = arith.constant 1008 : index
    %509 = vector.load %arg11[%c0_907, %c1008_908] : memref<4x1152xf32, #tpu.memory_space<vmem>>, vector<4x32xf32>
    %c44_909 = arith.constant 44 : index
    %c320_910 = arith.constant 320 : index
    %510 = vector.load %arg12[%c44_909, %c320_910] : memref<100x512xf32, #tpu.memory_space<vmem>>, vector<4x32xf32>
    tpu.vector_store %arg12[%c44_909, %c320_910], %509 {strides = array<i32>} : memref<100x512xf32, #tpu.memory_space<vmem>>, vector<4x32xf32>,
    %c0_911 = arith.constant 0 : index
    %c1056_912 = arith.constant 1056 : index
    %511 = vector.load %arg11[%c0_911, %c1056_912] : memref<4x1152xf32, #tpu.memory_space<vmem>>, vector<4x32xf32>
    %c44_913 = arith.constant 44 : index
    %c352_914 = arith.constant 352 : index
    %512 = vector.load %arg12[%c44_913, %c352_914] : memref<100x512xf32, #tpu.memory_space<vmem>>, vector<4x32xf32>
    tpu.vector_store %arg12[%c44_913, %c352_914], %511 {strides = array<i32>} : memref<100x512xf32, #tpu.memory_space<vmem>>, vector<4x32xf32>,
    %c0_915 = arith.constant 0 : index
    %c632_916 = arith.constant 632 : index
    %513 = vector.load %arg11[%c0_915, %c632_916] : memref<4x1152xf32, #tpu.memory_space<vmem>>, vector<4x32xf32>
    %c48_917 = arith.constant 48 : index
    %c256_918 = arith.constant 256 : index
    %514 = vector.load %arg12[%c48_917, %c256_918] : memref<100x512xf32, #tpu.memory_space<vmem>>, vector<4x32xf32>
    tpu.vector_store %arg12[%c48_917, %c256_918], %513 {strides = array<i32>} : memref<100x512xf32, #tpu.memory_space<vmem>>, vector<4x32xf32>,
    %c0_919 = arith.constant 0 : index
    %c680_920 = arith.constant 680 : index
    %515 = vector.load %arg11[%c0_919, %c680_920] : memref<4x1152xf32, #tpu.memory_space<vmem>>, vector<4x32xf32>
    %c48_921 = arith.constant 48 : index
    %c288_922 = arith.constant 288 : index
    %516 = vector.load %arg12[%c48_921, %c288_922] : memref<100x512xf32, #tpu.memory_space<vmem>>, vector<4x32xf32>
    tpu.vector_store %arg12[%c48_921, %c288_922], %515 {strides = array<i32>} : memref<100x512xf32, #tpu.memory_space<vmem>>, vector<4x32xf32>,
    %c0_923 = arith.constant 0 : index
    %c728_924 = arith.constant 728 : index
    %517 = vector.load %arg11[%c0_923, %c728_924] : memref<4x1152xf32, #tpu.memory_space<vmem>>, vector<4x32xf32>
    %c48_925 = arith.constant 48 : index
    %c320_926 = arith.constant 320 : index
    %518 = vector.load %arg12[%c48_925, %c320_926] : memref<100x512xf32, #tpu.memory_space<vmem>>, vector<4x32xf32>
    tpu.vector_store %arg12[%c48_925, %c320_926], %517 {strides = array<i32>} : memref<100x512xf32, #tpu.memory_space<vmem>>, vector<4x32xf32>,
    %c0_927 = arith.constant 0 : index
    %c776_928 = arith.constant 776 : index
    %519 = vector.load %arg11[%c0_927, %c776_928] : memref<4x1152xf32, #tpu.memory_space<vmem>>, vector<4x32xf32>
    %c48_929 = arith.constant 48 : index
    %c352_930 = arith.constant 352 : index
    %520 = vector.load %arg12[%c48_929, %c352_930] : memref<100x512xf32, #tpu.memory_space<vmem>>, vector<4x32xf32>
    tpu.vector_store %arg12[%c48_929, %c352_930], %519 {strides = array<i32>} : memref<100x512xf32, #tpu.memory_space<vmem>>, vector<4x32xf32>,
    %c0_931 = arith.constant 0 : index
    %c920_932 = arith.constant 920 : index
    %521 = vector.load %arg11[%c0_931, %c920_932] : memref<4x1152xf32, #tpu.memory_space<vmem>>, vector<4x32xf32>
    %c52_933 = arith.constant 52 : index
    %c256_934 = arith.constant 256 : index
    %522 = vector.load %arg12[%c52_933, %c256_934] : memref<100x512xf32, #tpu.memory_space<vmem>>, vector<4x32xf32>
    tpu.vector_store %arg12[%c52_933, %c256_934], %521 {strides = array<i32>} : memref<100x512xf32, #tpu.memory_space<vmem>>, vector<4x32xf32>,
    %c0_935 = arith.constant 0 : index
    %c968_936 = arith.constant 968 : index
    %523 = vector.load %arg11[%c0_935, %c968_936] : memref<4x1152xf32, #tpu.memory_space<vmem>>, vector<4x32xf32>
    %c52_937 = arith.constant 52 : index
    %c288_938 = arith.constant 288 : index
    %524 = vector.load %arg12[%c52_937, %c288_938] : memref<100x512xf32, #tpu.memory_space<vmem>>, vector<4x32xf32>
    tpu.vector_store %arg12[%c52_937, %c288_938], %523 {strides = array<i32>} : memref<100x512xf32, #tpu.memory_space<vmem>>, vector<4x32xf32>,
    %c0_939 = arith.constant 0 : index
    %c1016_940 = arith.constant 1016 : index
    %525 = vector.load %arg11[%c0_939, %c1016_940] : memref<4x1152xf32, #tpu.memory_space<vmem>>, vector<4x32xf32>
    %c52_941 = arith.constant 52 : index
    %c320_942 = arith.constant 320 : index
    %526 = vector.load %arg12[%c52_941, %c320_942] : memref<100x512xf32, #tpu.memory_space<vmem>>, vector<4x32xf32>
    tpu.vector_store %arg12[%c52_941, %c320_942], %525 {strides = array<i32>} : memref<100x512xf32, #tpu.memory_space<vmem>>, vector<4x32xf32>,
    %c0_943 = arith.constant 0 : index
    %c1064_944 = arith.constant 1064 : index
    %527 = vector.load %arg11[%c0_943, %c1064_944] : memref<4x1152xf32, #tpu.memory_space<vmem>>, vector<4x32xf32>
    %c52_945 = arith.constant 52 : index
    %c352_946 = arith.constant 352 : index
    %528 = vector.load %arg12[%c52_945, %c352_946] : memref<100x512xf32, #tpu.memory_space<vmem>>, vector<4x32xf32>
    tpu.vector_store %arg12[%c52_945, %c352_946], %527 {strides = array<i32>} : memref<100x512xf32, #tpu.memory_space<vmem>>, vector<4x32xf32>,
    %c0_947 = arith.constant 0 : index
    %c640_948 = arith.constant 640 : index
    %529 = vector.load %arg11[%c0_947, %c640_948] : memref<4x1152xf32, #tpu.memory_space<vmem>>, vector<4x32xf32>
    %c56_949 = arith.constant 56 : index
    %c256_950 = arith.constant 256 : index
    %530 = vector.load %arg12[%c56_949, %c256_950] : memref<100x512xf32, #tpu.memory_space<vmem>>, vector<4x32xf32>
    tpu.vector_store %arg12[%c56_949, %c256_950], %529 {strides = array<i32>} : memref<100x512xf32, #tpu.memory_space<vmem>>, vector<4x32xf32>,
    %c0_951 = arith.constant 0 : index
    %c688_952 = arith.constant 688 : index
    %531 = vector.load %arg11[%c0_951, %c688_952] : memref<4x1152xf32, #tpu.memory_space<vmem>>, vector<4x32xf32>
    %c56_953 = arith.constant 56 : index
    %c288_954 = arith.constant 288 : index
    %532 = vector.load %arg12[%c56_953, %c288_954] : memref<100x512xf32, #tpu.memory_space<vmem>>, vector<4x32xf32>
    tpu.vector_store %arg12[%c56_953, %c288_954], %531 {strides = array<i32>} : memref<100x512xf32, #tpu.memory_space<vmem>>, vector<4x32xf32>,
    %c0_955 = arith.constant 0 : index
    %c736_956 = arith.constant 736 : index
    %533 = vector.load %arg11[%c0_955, %c736_956] : memref<4x1152xf32, #tpu.memory_space<vmem>>, vector<4x32xf32>
    %c56_957 = arith.constant 56 : index
    %c320_958 = arith.constant 320 : index
    %534 = vector.load %arg12[%c56_957, %c320_958] : memref<100x512xf32, #tpu.memory_space<vmem>>, vector<4x32xf32>
    tpu.vector_store %arg12[%c56_957, %c320_958], %533 {strides = array<i32>} : memref<100x512xf32, #tpu.memory_space<vmem>>, vector<4x32xf32>,
    %c0_959 = arith.constant 0 : index
    %c784_960 = arith.constant 784 : index
    %535 = vector.load %arg11[%c0_959, %c784_960] : memref<4x1152xf32, #tpu.memory_space<vmem>>, vector<4x32xf32>
    %c56_961 = arith.constant 56 : index
    %c352_962 = arith.constant 352 : index
    %536 = vector.load %arg12[%c56_961, %c352_962] : memref<100x512xf32, #tpu.memory_space<vmem>>, vector<4x32xf32>
    tpu.vector_store %arg12[%c56_961, %c352_962], %535 {strides = array<i32>} : memref<100x512xf32, #tpu.memory_space<vmem>>, vector<4x32xf32>,
    %c0_963 = arith.constant 0 : index
    %c96_964 = arith.constant 96 : index
    %537 = vector.load %arg11[%c0_963, %c96_964] : memref<4x1152xf32, #tpu.memory_space<vmem>>, vector<4x32xf32>
    %c60_965 = arith.constant 60 : index
    %c256_966 = arith.constant 256 : index
    %538 = vector.load %arg12[%c60_965, %c256_966] : memref<100x512xf32, #tpu.memory_space<vmem>>, vector<4x32xf32>
    tpu.vector_store %arg12[%c60_965, %c256_966], %537 {strides = array<i32>} : memref<100x512xf32, #tpu.memory_space<vmem>>, vector<4x32xf32>,
    %c0_967 = arith.constant 0 : index
    %c144_968 = arith.constant 144 : index
    %539 = vector.load %arg11[%c0_967, %c144_968] : memref<4x1152xf32, #tpu.memory_space<vmem>>, vector<4x32xf32>
    %c60_969 = arith.constant 60 : index
    %c288_970 = arith.constant 288 : index
    %540 = vector.load %arg12[%c60_969, %c288_970] : memref<100x512xf32, #tpu.memory_space<vmem>>, vector<4x32xf32>
    tpu.vector_store %arg12[%c60_969, %c288_970], %539 {strides = array<i32>} : memref<100x512xf32, #tpu.memory_space<vmem>>, vector<4x32xf32>,
    %c0_971 = arith.constant 0 : index
    %c192_972 = arith.constant 192 : index
    %541 = vector.load %arg11[%c0_971, %c192_972] : memref<4x1152xf32, #tpu.memory_space<vmem>>, vector<4x32xf32>
    %c60_973 = arith.constant 60 : index
    %c320_974 = arith.constant 320 : index
    %542 = vector.load %arg12[%c60_973, %c320_974] : memref<100x512xf32, #tpu.memory_space<vmem>>, vector<4x32xf32>
    tpu.vector_store %arg12[%c60_973, %c320_974], %541 {strides = array<i32>} : memref<100x512xf32, #tpu.memory_space<vmem>>, vector<4x32xf32>,
    %c0_975 = arith.constant 0 : index
    %c240_976 = arith.constant 240 : index
    %543 = vector.load %arg11[%c0_975, %c240_976] : memref<4x1152xf32, #tpu.memory_space<vmem>>, vector<4x32xf32>
    %c60_977 = arith.constant 60 : index
    %c352_978 = arith.constant 352 : index
    %544 = vector.load %arg12[%c60_977, %c352_978] : memref<100x512xf32, #tpu.memory_space<vmem>>, vector<4x32xf32>
    tpu.vector_store %arg12[%c60_977, %c352_978], %543 {strides = array<i32>} : memref<100x512xf32, #tpu.memory_space<vmem>>, vector<4x32xf32>,
    %c0_979 = arith.constant 0 : index
    %c384_980 = arith.constant 384 : index
    %545 = vector.load %arg11[%c0_979, %c384_980] : memref<4x1152xf32, #tpu.memory_space<vmem>>, vector<4x32xf32>
    %c64_981 = arith.constant 64 : index
    %c256_982 = arith.constant 256 : index
    %546 = vector.load %arg12[%c64_981, %c256_982] : memref<100x512xf32, #tpu.memory_space<vmem>>, vector<4x32xf32>
    tpu.vector_store %arg12[%c64_981, %c256_982], %545 {strides = array<i32>} : memref<100x512xf32, #tpu.memory_space<vmem>>, vector<4x32xf32>,
    %c0_983 = arith.constant 0 : index
    %c432_984 = arith.constant 432 : index
    %547 = vector.load %arg11[%c0_983, %c432_984] : memref<4x1152xf32, #tpu.memory_space<vmem>>, vector<4x32xf32>
    %c64_985 = arith.constant 64 : index
    %c288_986 = arith.constant 288 : index
    %548 = vector.load %arg12[%c64_985, %c288_986] : memref<100x512xf32, #tpu.memory_space<vmem>>, vector<4x32xf32>
    tpu.vector_store %arg12[%c64_985, %c288_986], %547 {strides = array<i32>} : memref<100x512xf32, #tpu.memory_space<vmem>>, vector<4x32xf32>,
    %c0_987 = arith.constant 0 : index
    %c480_988 = arith.constant 480 : index
    %549 = vector.load %arg11[%c0_987, %c480_988] : memref<4x1152xf32, #tpu.memory_space<vmem>>, vector<4x32xf32>
    %c64_989 = arith.constant 64 : index
    %c320_990 = arith.constant 320 : index
    %550 = vector.load %arg12[%c64_989, %c320_990] : memref<100x512xf32, #tpu.memory_space<vmem>>, vector<4x32xf32>
    tpu.vector_store %arg12[%c64_989, %c320_990], %549 {strides = array<i32>} : memref<100x512xf32, #tpu.memory_space<vmem>>, vector<4x32xf32>,
    %c0_991 = arith.constant 0 : index
    %c528_992 = arith.constant 528 : index
    %551 = vector.load %arg11[%c0_991, %c528_992] : memref<4x1152xf32, #tpu.memory_space<vmem>>, vector<4x32xf32>
    %c64_993 = arith.constant 64 : index
    %c352_994 = arith.constant 352 : index
    %552 = vector.load %arg12[%c64_993, %c352_994] : memref<100x512xf32, #tpu.memory_space<vmem>>, vector<4x32xf32>
    tpu.vector_store %arg12[%c64_993, %c352_994], %551 {strides = array<i32>} : memref<100x512xf32, #tpu.memory_space<vmem>>, vector<4x32xf32>,
    %c0_995 = arith.constant 0 : index
    %c104_996 = arith.constant 104 : index
    %553 = vector.load %arg11[%c0_995, %c104_996] : memref<4x1152xf32, #tpu.memory_space<vmem>>, vector<4x32xf32>
    %c68_997 = arith.constant 68 : index
    %c256_998 = arith.constant 256 : index
    %554 = vector.load %arg12[%c68_997, %c256_998] : memref<100x512xf32, #tpu.memory_space<vmem>>, vector<4x32xf32>
    tpu.vector_store %arg12[%c68_997, %c256_998], %553 {strides = array<i32>} : memref<100x512xf32, #tpu.memory_space<vmem>>, vector<4x32xf32>,
    %c0_999 = arith.constant 0 : index
    %c152_1000 = arith.constant 152 : index
    %555 = vector.load %arg11[%c0_999, %c152_1000] : memref<4x1152xf32, #tpu.memory_space<vmem>>, vector<4x32xf32>
    %c68_1001 = arith.constant 68 : index
    %c288_1002 = arith.constant 288 : index
    %556 = vector.load %arg12[%c68_1001, %c288_1002] : memref<100x512xf32, #tpu.memory_space<vmem>>, vector<4x32xf32>
    tpu.vector_store %arg12[%c68_1001, %c288_1002], %555 {strides = array<i32>} : memref<100x512xf32, #tpu.memory_space<vmem>>, vector<4x32xf32>,
    %c0_1003 = arith.constant 0 : index
    %c200_1004 = arith.constant 200 : index
    %557 = vector.load %arg11[%c0_1003, %c200_1004] : memref<4x1152xf32, #tpu.memory_space<vmem>>, vector<4x32xf32>
    %c68_1005 = arith.constant 68 : index
    %c320_1006 = arith.constant 320 : index
    %558 = vector.load %arg12[%c68_1005, %c320_1006] : memref<100x512xf32, #tpu.memory_space<vmem>>, vector<4x32xf32>
    tpu.vector_store %arg12[%c68_1005, %c320_1006], %557 {strides = array<i32>} : memref<100x512xf32, #tpu.memory_space<vmem>>, vector<4x32xf32>,
    %c0_1007 = arith.constant 0 : index
    %c248_1008 = arith.constant 248 : index
    %559 = vector.load %arg11[%c0_1007, %c248_1008] : memref<4x1152xf32, #tpu.memory_space<vmem>>, vector<4x32xf32>
    %c68_1009 = arith.constant 68 : index
    %c352_1010 = arith.constant 352 : index
    %560 = vector.load %arg12[%c68_1009, %c352_1010] : memref<100x512xf32, #tpu.memory_space<vmem>>, vector<4x32xf32>
    tpu.vector_store %arg12[%c68_1009, %c352_1010], %559 {strides = array<i32>} : memref<100x512xf32, #tpu.memory_space<vmem>>, vector<4x32xf32>,
    %c0_1011 = arith.constant 0 : index
    %c392_1012 = arith.constant 392 : index
    %561 = vector.load %arg11[%c0_1011, %c392_1012] : memref<4x1152xf32, #tpu.memory_space<vmem>>, vector<4x32xf32>
    %c72_1013 = arith.constant 72 : index
    %c256_1014 = arith.constant 256 : index
    %562 = vector.load %arg12[%c72_1013, %c256_1014] : memref<100x512xf32, #tpu.memory_space<vmem>>, vector<4x32xf32>
    tpu.vector_store %arg12[%c72_1013, %c256_1014], %561 {strides = array<i32>} : memref<100x512xf32, #tpu.memory_space<vmem>>, vector<4x32xf32>,
    %c0_1015 = arith.constant 0 : index
    %c440_1016 = arith.constant 440 : index
    %563 = vector.load %arg11[%c0_1015, %c440_1016] : memref<4x1152xf32, #tpu.memory_space<vmem>>, vector<4x32xf32>
    %c72_1017 = arith.constant 72 : index
    %c288_1018 = arith.constant 288 : index
    %564 = vector.load %arg12[%c72_1017, %c288_1018] : memref<100x512xf32, #tpu.memory_space<vmem>>, vector<4x32xf32>
    tpu.vector_store %arg12[%c72_1017, %c288_1018], %563 {strides = array<i32>} : memref<100x512xf32, #tpu.memory_space<vmem>>, vector<4x32xf32>,
    %c0_1019 = arith.constant 0 : index
    %c488_1020 = arith.constant 488 : index
    %565 = vector.load %arg11[%c0_1019, %c488_1020] : memref<4x1152xf32, #tpu.memory_space<vmem>>, vector<4x32xf32>
    %c72_1021 = arith.constant 72 : index
    %c320_1022 = arith.constant 320 : index
    %566 = vector.load %arg12[%c72_1021, %c320_1022] : memref<100x512xf32, #tpu.memory_space<vmem>>, vector<4x32xf32>
    tpu.vector_store %arg12[%c72_1021, %c320_1022], %565 {strides = array<i32>} : memref<100x512xf32, #tpu.memory_space<vmem>>, vector<4x32xf32>,
    %c0_1023 = arith.constant 0 : index
    %c536_1024 = arith.constant 536 : index
    %567 = vector.load %arg11[%c0_1023, %c536_1024] : memref<4x1152xf32, #tpu.memory_space<vmem>>, vector<4x32xf32>
    %c72_1025 = arith.constant 72 : index
    %c352_1026 = arith.constant 352 : index
    %568 = vector.load %arg12[%c72_1025, %c352_1026] : memref<100x512xf32, #tpu.memory_space<vmem>>, vector<4x32xf32>
    tpu.vector_store %arg12[%c72_1025, %c352_1026], %567 {strides = array<i32>} : memref<100x512xf32, #tpu.memory_space<vmem>>, vector<4x32xf32>,
    %c0_1027 = arith.constant 0 : index
    %c112_1028 = arith.constant 112 : index
    %569 = vector.load %arg11[%c0_1027, %c112_1028] : memref<4x1152xf32, #tpu.memory_space<vmem>>, vector<4x32xf32>
    %c76_1029 = arith.constant 76 : index
    %c256_1030 = arith.constant 256 : index
    %570 = vector.load %arg12[%c76_1029, %c256_1030] : memref<100x512xf32, #tpu.memory_space<vmem>>, vector<4x32xf32>
    tpu.vector_store %arg12[%c76_1029, %c256_1030], %569 {strides = array<i32>} : memref<100x512xf32, #tpu.memory_space<vmem>>, vector<4x32xf32>,
    %c0_1031 = arith.constant 0 : index
    %c160_1032 = arith.constant 160 : index
    %571 = vector.load %arg11[%c0_1031, %c160_1032] : memref<4x1152xf32, #tpu.memory_space<vmem>>, vector<4x32xf32>
    %c76_1033 = arith.constant 76 : index
    %c288_1034 = arith.constant 288 : index
    %572 = vector.load %arg12[%c76_1033, %c288_1034] : memref<100x512xf32, #tpu.memory_space<vmem>>, vector<4x32xf32>
    tpu.vector_store %arg12[%c76_1033, %c288_1034], %571 {strides = array<i32>} : memref<100x512xf32, #tpu.memory_space<vmem>>, vector<4x32xf32>,
    %c0_1035 = arith.constant 0 : index
    %c208_1036 = arith.constant 208 : index
    %573 = vector.load %arg11[%c0_1035, %c208_1036] : memref<4x1152xf32, #tpu.memory_space<vmem>>, vector<4x32xf32>
    %c76_1037 = arith.constant 76 : index
    %c320_1038 = arith.constant 320 : index
    %574 = vector.load %arg12[%c76_1037, %c320_1038] : memref<100x512xf32, #tpu.memory_space<vmem>>, vector<4x32xf32>
    tpu.vector_store %arg12[%c76_1037, %c320_1038], %573 {strides = array<i32>} : memref<100x512xf32, #tpu.memory_space<vmem>>, vector<4x32xf32>,
    %c0_1039 = arith.constant 0 : index
    %c256_1040 = arith.constant 256 : index
    %575 = vector.load %arg11[%c0_1039, %c256_1040] : memref<4x1152xf32, #tpu.memory_space<vmem>>, vector<4x32xf32>
    %c76_1041 = arith.constant 76 : index
    %c352_1042 = arith.constant 352 : index
    %576 = vector.load %arg12[%c76_1041, %c352_1042] : memref<100x512xf32, #tpu.memory_space<vmem>>, vector<4x32xf32>
    tpu.vector_store %arg12[%c76_1041, %c352_1042], %575 {strides = array<i32>} : memref<100x512xf32, #tpu.memory_space<vmem>>, vector<4x32xf32>,
    %c0_1043 = arith.constant 0 : index
    %c672_1044 = arith.constant 672 : index
    %577 = vector.load %arg11[%c0_1043, %c672_1044] : memref<4x1152xf32, #tpu.memory_space<vmem>>, vector<4x32xf32>
    %c80_1045 = arith.constant 80 : index
    %c256_1046 = arith.constant 256 : index
    %578 = vector.load %arg12[%c80_1045, %c256_1046] : memref<100x512xf32, #tpu.memory_space<vmem>>, vector<4x32xf32>
    tpu.vector_store %arg12[%c80_1045, %c256_1046], %577 {strides = array<i32>} : memref<100x512xf32, #tpu.memory_space<vmem>>, vector<4x32xf32>,
    %c0_1047 = arith.constant 0 : index
    %c720_1048 = arith.constant 720 : index
    %579 = vector.load %arg11[%c0_1047, %c720_1048] : memref<4x1152xf32, #tpu.memory_space<vmem>>, vector<4x32xf32>
    %c80_1049 = arith.constant 80 : index
    %c288_1050 = arith.constant 288 : index
    %580 = vector.load %arg12[%c80_1049, %c288_1050] : memref<100x512xf32, #tpu.memory_space<vmem>>, vector<4x32xf32>
    tpu.vector_store %arg12[%c80_1049, %c288_1050], %579 {strides = array<i32>} : memref<100x512xf32, #tpu.memory_space<vmem>>, vector<4x32xf32>,
    %c0_1051 = arith.constant 0 : index
    %c768_1052 = arith.constant 768 : index
    %581 = vector.load %arg11[%c0_1051, %c768_1052] : memref<4x1152xf32, #tpu.memory_space<vmem>>, vector<4x32xf32>
    %c80_1053 = arith.constant 80 : index
    %c320_1054 = arith.constant 320 : index
    %582 = vector.load %arg12[%c80_1053, %c320_1054] : memref<100x512xf32, #tpu.memory_space<vmem>>, vector<4x32xf32>
    tpu.vector_store %arg12[%c80_1053, %c320_1054], %581 {strides = array<i32>} : memref<100x512xf32, #tpu.memory_space<vmem>>, vector<4x32xf32>,
    %c0_1055 = arith.constant 0 : index
    %c816 = arith.constant 816 : index
    %583 = vector.load %arg11[%c0_1055, %c816] : memref<4x1152xf32, #tpu.memory_space<vmem>>, vector<4x32xf32>
    %c80_1056 = arith.constant 80 : index
    %c352_1057 = arith.constant 352 : index
    %584 = vector.load %arg12[%c80_1056, %c352_1057] : memref<100x512xf32, #tpu.memory_space<vmem>>, vector<4x32xf32>
    tpu.vector_store %arg12[%c80_1056, %c352_1057], %583 {strides = array<i32>} : memref<100x512xf32, #tpu.memory_space<vmem>>, vector<4x32xf32>,
    %c0_1058 = arith.constant 0 : index
    %c960_1059 = arith.constant 960 : index
    %585 = vector.load %arg11[%c0_1058, %c960_1059] : memref<4x1152xf32, #tpu.memory_space<vmem>>, vector<4x32xf32>
    %c84_1060 = arith.constant 84 : index
    %c256_1061 = arith.constant 256 : index
    %586 = vector.load %arg12[%c84_1060, %c256_1061] : memref<100x512xf32, #tpu.memory_space<vmem>>, vector<4x32xf32>
    tpu.vector_store %arg12[%c84_1060, %c256_1061], %585 {strides = array<i32>} : memref<100x512xf32, #tpu.memory_space<vmem>>, vector<4x32xf32>,
    %c0_1062 = arith.constant 0 : index
    %c1008_1063 = arith.constant 1008 : index
    %587 = vector.load %arg11[%c0_1062, %c1008_1063] : memref<4x1152xf32, #tpu.memory_space<vmem>>, vector<4x32xf32>
    %c84_1064 = arith.constant 84 : index
    %c288_1065 = arith.constant 288 : index
    %588 = vector.load %arg12[%c84_1064, %c288_1065] : memref<100x512xf32, #tpu.memory_space<vmem>>, vector<4x32xf32>
    tpu.vector_store %arg12[%c84_1064, %c288_1065], %587 {strides = array<i32>} : memref<100x512xf32, #tpu.memory_space<vmem>>, vector<4x32xf32>,
    %c0_1066 = arith.constant 0 : index
    %c1056_1067 = arith.constant 1056 : index
    %589 = vector.load %arg11[%c0_1066, %c1056_1067] : memref<4x1152xf32, #tpu.memory_space<vmem>>, vector<4x32xf32>
    %c84_1068 = arith.constant 84 : index
    %c320_1069 = arith.constant 320 : index
    %590 = vector.load %arg12[%c84_1068, %c320_1069] : memref<100x512xf32, #tpu.memory_space<vmem>>, vector<4x32xf32>
    tpu.vector_store %arg12[%c84_1068, %c320_1069], %589 {strides = array<i32>} : memref<100x512xf32, #tpu.memory_space<vmem>>, vector<4x32xf32>,
    %c0_1070 = arith.constant 0 : index
    %c1104 = arith.constant 1104 : index
    %591 = vector.load %arg11[%c0_1070, %c1104] : memref<4x1152xf32, #tpu.memory_space<vmem>>, vector<4x32xf32>
    %c84_1071 = arith.constant 84 : index
    %c352_1072 = arith.constant 352 : index
    %592 = vector.load %arg12[%c84_1071, %c352_1072] : memref<100x512xf32, #tpu.memory_space<vmem>>, vector<4x32xf32>
    tpu.vector_store %arg12[%c84_1071, %c352_1072], %591 {strides = array<i32>} : memref<100x512xf32, #tpu.memory_space<vmem>>, vector<4x32xf32>,
    %c0_1073 = arith.constant 0 : index
    %c680_1074 = arith.constant 680 : index
    %593 = vector.load %arg11[%c0_1073, %c680_1074] : memref<4x1152xf32, #tpu.memory_space<vmem>>, vector<4x32xf32>
    %c88_1075 = arith.constant 88 : index
    %c256_1076 = arith.constant 256 : index
    %594 = vector.load %arg12[%c88_1075, %c256_1076] : memref<100x512xf32, #tpu.memory_space<vmem>>, vector<4x32xf32>
    tpu.vector_store %arg12[%c88_1075, %c256_1076], %593 {strides = array<i32>} : memref<100x512xf32, #tpu.memory_space<vmem>>, vector<4x32xf32>,
    %c0_1077 = arith.constant 0 : index
    %c728_1078 = arith.constant 728 : index
    %595 = vector.load %arg11[%c0_1077, %c728_1078] : memref<4x1152xf32, #tpu.memory_space<vmem>>, vector<4x32xf32>
    %c88_1079 = arith.constant 88 : index
    %c288_1080 = arith.constant 288 : index
    %596 = vector.load %arg12[%c88_1079, %c288_1080] : memref<100x512xf32, #tpu.memory_space<vmem>>, vector<4x32xf32>
    tpu.vector_store %arg12[%c88_1079, %c288_1080], %595 {strides = array<i32>} : memref<100x512xf32, #tpu.memory_space<vmem>>, vector<4x32xf32>,
    %c0_1081 = arith.constant 0 : index
    %c776_1082 = arith.constant 776 : index
    %597 = vector.load %arg11[%c0_1081, %c776_1082] : memref<4x1152xf32, #tpu.memory_space<vmem>>, vector<4x32xf32>
    %c88_1083 = arith.constant 88 : index
    %c320_1084 = arith.constant 320 : index
    %598 = vector.load %arg12[%c88_1083, %c320_1084] : memref<100x512xf32, #tpu.memory_space<vmem>>, vector<4x32xf32>
    tpu.vector_store %arg12[%c88_1083, %c320_1084], %597 {strides = array<i32>} : memref<100x512xf32, #tpu.memory_space<vmem>>, vector<4x32xf32>,
    %c0_1085 = arith.constant 0 : index
    %c824 = arith.constant 824 : index
    %599 = vector.load %arg11[%c0_1085, %c824] : memref<4x1152xf32, #tpu.memory_space<vmem>>, vector<4x32xf32>
    %c88_1086 = arith.constant 88 : index
    %c352_1087 = arith.constant 352 : index
    %600 = vector.load %arg12[%c88_1086, %c352_1087] : memref<100x512xf32, #tpu.memory_space<vmem>>, vector<4x32xf32>
    tpu.vector_store %arg12[%c88_1086, %c352_1087], %599 {strides = array<i32>} : memref<100x512xf32, #tpu.memory_space<vmem>>, vector<4x32xf32>,
    %c0_1088 = arith.constant 0 : index
    %c968_1089 = arith.constant 968 : index
    %601 = vector.load %arg11[%c0_1088, %c968_1089] : memref<4x1152xf32, #tpu.memory_space<vmem>>, vector<4x32xf32>
    %c92_1090 = arith.constant 92 : index
    %c256_1091 = arith.constant 256 : index
    %602 = vector.load %arg12[%c92_1090, %c256_1091] : memref<100x512xf32, #tpu.memory_space<vmem>>, vector<4x32xf32>
    tpu.vector_store %arg12[%c92_1090, %c256_1091], %601 {strides = array<i32>} : memref<100x512xf32, #tpu.memory_space<vmem>>, vector<4x32xf32>,
    %c0_1092 = arith.constant 0 : index
    %c1016_1093 = arith.constant 1016 : index
    %603 = vector.load %arg11[%c0_1092, %c1016_1093] : memref<4x1152xf32, #tpu.memory_space<vmem>>, vector<4x32xf32>
    %c92_1094 = arith.constant 92 : index
    %c288_1095 = arith.constant 288 : index
    %604 = vector.load %arg12[%c92_1094, %c288_1095] : memref<100x512xf32, #tpu.memory_space<vmem>>, vector<4x32xf32>
    tpu.vector_store %arg12[%c92_1094, %c288_1095], %603 {strides = array<i32>} : memref<100x512xf32, #tpu.memory_space<vmem>>, vector<4x32xf32>,
    %c0_1096 = arith.constant 0 : index
    %c1064_1097 = arith.constant 1064 : index
    %605 = vector.load %arg11[%c0_1096, %c1064_1097] : memref<4x1152xf32, #tpu.memory_space<vmem>>, vector<4x32xf32>
    %c92_1098 = arith.constant 92 : index
    %c320_1099 = arith.constant 320 : index
    %606 = vector.load %arg12[%c92_1098, %c320_1099] : memref<100x512xf32, #tpu.memory_space<vmem>>, vector<4x32xf32>
    tpu.vector_store %arg12[%c92_1098, %c320_1099], %605 {strides = array<i32>} : memref<100x512xf32, #tpu.memory_space<vmem>>, vector<4x32xf32>,
    %c0_1100 = arith.constant 0 : index
    %c1112 = arith.constant 1112 : index
    %607 = vector.load %arg11[%c0_1100, %c1112] : memref<4x1152xf32, #tpu.memory_space<vmem>>, vector<4x32xf32>
    %c92_1101 = arith.constant 92 : index
    %c352_1102 = arith.constant 352 : index
    %608 = vector.load %arg12[%c92_1101, %c352_1102] : memref<100x512xf32, #tpu.memory_space<vmem>>, vector<4x32xf32>
    tpu.vector_store %arg12[%c92_1101, %c352_1102], %607 {strides = array<i32>} : memref<100x512xf32, #tpu.memory_space<vmem>>, vector<4x32xf32>,
    %c0_1103 = arith.constant 0 : index
    %c688_1104 = arith.constant 688 : index
    %609 = vector.load %arg11[%c0_1103, %c688_1104] : memref<4x1152xf32, #tpu.memory_space<vmem>>, vector<4x32xf32>
    %c96_1105 = arith.constant 96 : index
    %c256_1106 = arith.constant 256 : index
    %610 = vector.load %arg12[%c96_1105, %c256_1106] : memref<100x512xf32, #tpu.memory_space<vmem>>, vector<4x32xf32>
    tpu.vector_store %arg12[%c96_1105, %c256_1106], %609 {strides = array<i32>} : memref<100x512xf32, #tpu.memory_space<vmem>>, vector<4x32xf32>,
    %c0_1107 = arith.constant 0 : index
    %c736_1108 = arith.constant 736 : index
    %611 = vector.load %arg11[%c0_1107, %c736_1108] : memref<4x1152xf32, #tpu.memory_space<vmem>>, vector<4x32xf32>
    %c96_1109 = arith.constant 96 : index
    %c288_1110 = arith.constant 288 : index
    %612 = vector.load %arg12[%c96_1109, %c288_1110] : memref<100x512xf32, #tpu.memory_space<vmem>>, vector<4x32xf32>
    tpu.vector_store %arg12[%c96_1109, %c288_1110], %611 {strides = array<i32>} : memref<100x512xf32, #tpu.memory_space<vmem>>, vector<4x32xf32>,
    %c0_1111 = arith.constant 0 : index
    %c784_1112 = arith.constant 784 : index
    %613 = vector.load %arg11[%c0_1111, %c784_1112] : memref<4x1152xf32, #tpu.memory_space<vmem>>, vector<4x32xf32>
    %c96_1113 = arith.constant 96 : index
    %c320_1114 = arith.constant 320 : index
    %614 = vector.load %arg12[%c96_1113, %c320_1114] : memref<100x512xf32, #tpu.memory_space<vmem>>, vector<4x32xf32>
    tpu.vector_store %arg12[%c96_1113, %c320_1114], %613 {strides = array<i32>} : memref<100x512xf32, #tpu.memory_space<vmem>>, vector<4x32xf32>,
    %c0_1115 = arith.constant 0 : index
    %c832 = arith.constant 832 : index
    %615 = vector.load %arg11[%c0_1115, %c832] : memref<4x1152xf32, #tpu.memory_space<vmem>>, vector<4x32xf32>
    %c96_1116 = arith.constant 96 : index
    %c352_1117 = arith.constant 352 : index
    %616 = vector.load %arg12[%c96_1116, %c352_1117] : memref<100x512xf32, #tpu.memory_space<vmem>>, vector<4x32xf32>
    tpu.vector_store %arg12[%c96_1116, %c352_1117], %615 {strides = array<i32>} : memref<100x512xf32, #tpu.memory_space<vmem>>, vector<4x32xf32>,
    %c0_1118 = arith.constant 0 : index
    %c864_1119 = arith.constant 864 : index
    %617 = vector.load %arg11[%c0_1118, %c864_1119] : memref<4x1152xf32, #tpu.memory_space<vmem>>, vector<4x32xf32>
    %c0_1120 = arith.constant 0 : index
    %c384_1121 = arith.constant 384 : index
    %618 = vector.load %arg12[%c0_1120, %c384_1121] : memref<100x512xf32, #tpu.memory_space<vmem>>, vector<4x32xf32>
    tpu.vector_store %arg12[%c0_1120, %c384_1121], %617 {strides = array<i32>} : memref<100x512xf32, #tpu.memory_space<vmem>>, vector<4x32xf32>,
    %c0_1122 = arith.constant 0 : index
    %c912_1123 = arith.constant 912 : index
    %619 = vector.load %arg11[%c0_1122, %c912_1123] : memref<4x1152xf32, #tpu.memory_space<vmem>>, vector<4x32xf32>
    %c0_1124 = arith.constant 0 : index
    %c416 = arith.constant 416 : index
    %620 = vector.load %arg12[%c0_1124, %c416] : memref<100x512xf32, #tpu.memory_space<vmem>>, vector<4x32xf32>
    tpu.vector_store %arg12[%c0_1124, %c416], %619 {strides = array<i32>} : memref<100x512xf32, #tpu.memory_space<vmem>>, vector<4x32xf32>,
    %c0_1125 = arith.constant 0 : index
    %c960_1126 = arith.constant 960 : index
    %621 = vector.load %arg11[%c0_1125, %c960_1126] : memref<4x1152xf32, #tpu.memory_space<vmem>>, vector<4x32xf32>
    %c0_1127 = arith.constant 0 : index
    %c448_1128 = arith.constant 448 : index
    %622 = vector.load %arg12[%c0_1127, %c448_1128] : memref<100x512xf32, #tpu.memory_space<vmem>>, vector<4x32xf32>
    tpu.vector_store %arg12[%c0_1127, %c448_1128], %621 {strides = array<i32>} : memref<100x512xf32, #tpu.memory_space<vmem>>, vector<4x32xf32>,
    %c0_1129 = arith.constant 0 : index
    %c1008_1130 = arith.constant 1008 : index
    %623 = vector.load %arg11[%c0_1129, %c1008_1130] : memref<4x1152xf32, #tpu.memory_space<vmem>>, vector<4x32xf32>
    %c0_1131 = arith.constant 0 : index
    %c480_1132 = arith.constant 480 : index
    %624 = vector.load %arg12[%c0_1131, %c480_1132] : memref<100x512xf32, #tpu.memory_space<vmem>>, vector<4x32xf32>
    tpu.vector_store %arg12[%c0_1131, %c480_1132], %623 {strides = array<i32>} : memref<100x512xf32, #tpu.memory_space<vmem>>, vector<4x32xf32>,
    %c0_1133 = arith.constant 0 : index
    %c584_1134 = arith.constant 584 : index
    %625 = vector.load %arg11[%c0_1133, %c584_1134] : memref<4x1152xf32, #tpu.memory_space<vmem>>, vector<4x32xf32>
    %c4_1135 = arith.constant 4 : index
    %c384_1136 = arith.constant 384 : index
    %626 = vector.load %arg12[%c4_1135, %c384_1136] : memref<100x512xf32, #tpu.memory_space<vmem>>, vector<4x32xf32>
    tpu.vector_store %arg12[%c4_1135, %c384_1136], %625 {strides = array<i32>} : memref<100x512xf32, #tpu.memory_space<vmem>>, vector<4x32xf32>,
    %c0_1137 = arith.constant 0 : index
    %c632_1138 = arith.constant 632 : index
    %627 = vector.load %arg11[%c0_1137, %c632_1138] : memref<4x1152xf32, #tpu.memory_space<vmem>>, vector<4x32xf32>
    %c4_1139 = arith.constant 4 : index
    %c416_1140 = arith.constant 416 : index
    %628 = vector.load %arg12[%c4_1139, %c416_1140] : memref<100x512xf32, #tpu.memory_space<vmem>>, vector<4x32xf32>
    tpu.vector_store %arg12[%c4_1139, %c416_1140], %627 {strides = array<i32>} : memref<100x512xf32, #tpu.memory_space<vmem>>, vector<4x32xf32>,
    %c0_1141 = arith.constant 0 : index
    %c680_1142 = arith.constant 680 : index
    %629 = vector.load %arg11[%c0_1141, %c680_1142] : memref<4x1152xf32, #tpu.memory_space<vmem>>, vector<4x32xf32>
    %c4_1143 = arith.constant 4 : index
    %c448_1144 = arith.constant 448 : index
    %630 = vector.load %arg12[%c4_1143, %c448_1144] : memref<100x512xf32, #tpu.memory_space<vmem>>, vector<4x32xf32>
    tpu.vector_store %arg12[%c4_1143, %c448_1144], %629 {strides = array<i32>} : memref<100x512xf32, #tpu.memory_space<vmem>>, vector<4x32xf32>,
    %c0_1145 = arith.constant 0 : index
    %c728_1146 = arith.constant 728 : index
    %631 = vector.load %arg11[%c0_1145, %c728_1146] : memref<4x1152xf32, #tpu.memory_space<vmem>>, vector<4x32xf32>
    %c4_1147 = arith.constant 4 : index
    %c480_1148 = arith.constant 480 : index
    %632 = vector.load %arg12[%c4_1147, %c480_1148] : memref<100x512xf32, #tpu.memory_space<vmem>>, vector<4x32xf32>
    tpu.vector_store %arg12[%c4_1147, %c480_1148], %631 {strides = array<i32>} : memref<100x512xf32, #tpu.memory_space<vmem>>, vector<4x32xf32>,
    %c0_1149 = arith.constant 0 : index
    %c872_1150 = arith.constant 872 : index
    %633 = vector.load %arg11[%c0_1149, %c872_1150] : memref<4x1152xf32, #tpu.memory_space<vmem>>, vector<4x32xf32>
    %c8_1151 = arith.constant 8 : index
    %c384_1152 = arith.constant 384 : index
    %634 = vector.load %arg12[%c8_1151, %c384_1152] : memref<100x512xf32, #tpu.memory_space<vmem>>, vector<4x32xf32>
    tpu.vector_store %arg12[%c8_1151, %c384_1152], %633 {strides = array<i32>} : memref<100x512xf32, #tpu.memory_space<vmem>>, vector<4x32xf32>,
    %c0_1153 = arith.constant 0 : index
    %c920_1154 = arith.constant 920 : index
    %635 = vector.load %arg11[%c0_1153, %c920_1154] : memref<4x1152xf32, #tpu.memory_space<vmem>>, vector<4x32xf32>
    %c8_1155 = arith.constant 8 : index
    %c416_1156 = arith.constant 416 : index
    %636 = vector.load %arg12[%c8_1155, %c416_1156] : memref<100x512xf32, #tpu.memory_space<vmem>>, vector<4x32xf32>
    tpu.vector_store %arg12[%c8_1155, %c416_1156], %635 {strides = array<i32>} : memref<100x512xf32, #tpu.memory_space<vmem>>, vector<4x32xf32>,
    %c0_1157 = arith.constant 0 : index
    %c968_1158 = arith.constant 968 : index
    %637 = vector.load %arg11[%c0_1157, %c968_1158] : memref<4x1152xf32, #tpu.memory_space<vmem>>, vector<4x32xf32>
    %c8_1159 = arith.constant 8 : index
    %c448_1160 = arith.constant 448 : index
    %638 = vector.load %arg12[%c8_1159, %c448_1160] : memref<100x512xf32, #tpu.memory_space<vmem>>, vector<4x32xf32>
    tpu.vector_store %arg12[%c8_1159, %c448_1160], %637 {strides = array<i32>} : memref<100x512xf32, #tpu.memory_space<vmem>>, vector<4x32xf32>,
    %c0_1161 = arith.constant 0 : index
    %c1016_1162 = arith.constant 1016 : index
    %639 = vector.load %arg11[%c0_1161, %c1016_1162] : memref<4x1152xf32, #tpu.memory_space<vmem>>, vector<4x32xf32>
    %c8_1163 = arith.constant 8 : index
    %c480_1164 = arith.constant 480 : index
    %640 = vector.load %arg12[%c8_1163, %c480_1164] : memref<100x512xf32, #tpu.memory_space<vmem>>, vector<4x32xf32>
    tpu.vector_store %arg12[%c8_1163, %c480_1164], %639 {strides = array<i32>} : memref<100x512xf32, #tpu.memory_space<vmem>>, vector<4x32xf32>,
    %c0_1165 = arith.constant 0 : index
    %c592_1166 = arith.constant 592 : index
    %641 = vector.load %arg11[%c0_1165, %c592_1166] : memref<4x1152xf32, #tpu.memory_space<vmem>>, vector<4x32xf32>
    %c12_1167 = arith.constant 12 : index
    %c384_1168 = arith.constant 384 : index
    %642 = vector.load %arg12[%c12_1167, %c384_1168] : memref<100x512xf32, #tpu.memory_space<vmem>>, vector<4x32xf32>
    tpu.vector_store %arg12[%c12_1167, %c384_1168], %641 {strides = array<i32>} : memref<100x512xf32, #tpu.memory_space<vmem>>, vector<4x32xf32>,
    %c0_1169 = arith.constant 0 : index
    %c640_1170 = arith.constant 640 : index
    %643 = vector.load %arg11[%c0_1169, %c640_1170] : memref<4x1152xf32, #tpu.memory_space<vmem>>, vector<4x32xf32>
    %c12_1171 = arith.constant 12 : index
    %c416_1172 = arith.constant 416 : index
    %644 = vector.load %arg12[%c12_1171, %c416_1172] : memref<100x512xf32, #tpu.memory_space<vmem>>, vector<4x32xf32>
    tpu.vector_store %arg12[%c12_1171, %c416_1172], %643 {strides = array<i32>} : memref<100x512xf32, #tpu.memory_space<vmem>>, vector<4x32xf32>,
    %c0_1173 = arith.constant 0 : index
    %c688_1174 = arith.constant 688 : index
    %645 = vector.load %arg11[%c0_1173, %c688_1174] : memref<4x1152xf32, #tpu.memory_space<vmem>>, vector<4x32xf32>
    %c12_1175 = arith.constant 12 : index
    %c448_1176 = arith.constant 448 : index
    %646 = vector.load %arg12[%c12_1175, %c448_1176] : memref<100x512xf32, #tpu.memory_space<vmem>>, vector<4x32xf32>
    tpu.vector_store %arg12[%c12_1175, %c448_1176], %645 {strides = array<i32>} : memref<100x512xf32, #tpu.memory_space<vmem>>, vector<4x32xf32>,
    %c0_1177 = arith.constant 0 : index
    %c736_1178 = arith.constant 736 : index
    %647 = vector.load %arg11[%c0_1177, %c736_1178] : memref<4x1152xf32, #tpu.memory_space<vmem>>, vector<4x32xf32>
    %c12_1179 = arith.constant 12 : index
    %c480_1180 = arith.constant 480 : index
    %648 = vector.load %arg12[%c12_1179, %c480_1180] : memref<100x512xf32, #tpu.memory_space<vmem>>, vector<4x32xf32>
    tpu.vector_store %arg12[%c12_1179, %c480_1180], %647 {strides = array<i32>} : memref<100x512xf32, #tpu.memory_space<vmem>>, vector<4x32xf32>,
    %c0_1181 = arith.constant 0 : index
    %c880_1182 = arith.constant 880 : index
    %649 = vector.load %arg11[%c0_1181, %c880_1182] : memref<4x1152xf32, #tpu.memory_space<vmem>>, vector<4x32xf32>
    %c16_1183 = arith.constant 16 : index
    %c384_1184 = arith.constant 384 : index
    %650 = vector.load %arg12[%c16_1183, %c384_1184] : memref<100x512xf32, #tpu.memory_space<vmem>>, vector<4x32xf32>
    tpu.vector_store %arg12[%c16_1183, %c384_1184], %649 {strides = array<i32>} : memref<100x512xf32, #tpu.memory_space<vmem>>, vector<4x32xf32>,
    %c0_1185 = arith.constant 0 : index
    %c928_1186 = arith.constant 928 : index
    %651 = vector.load %arg11[%c0_1185, %c928_1186] : memref<4x1152xf32, #tpu.memory_space<vmem>>, vector<4x32xf32>
    %c16_1187 = arith.constant 16 : index
    %c416_1188 = arith.constant 416 : index
    %652 = vector.load %arg12[%c16_1187, %c416_1188] : memref<100x512xf32, #tpu.memory_space<vmem>>, vector<4x32xf32>
    tpu.vector_store %arg12[%c16_1187, %c416_1188], %651 {strides = array<i32>} : memref<100x512xf32, #tpu.memory_space<vmem>>, vector<4x32xf32>,
    %c0_1189 = arith.constant 0 : index
    %c976_1190 = arith.constant 976 : index
    %653 = vector.load %arg11[%c0_1189, %c976_1190] : memref<4x1152xf32, #tpu.memory_space<vmem>>, vector<4x32xf32>
    %c16_1191 = arith.constant 16 : index
    %c448_1192 = arith.constant 448 : index
    %654 = vector.load %arg12[%c16_1191, %c448_1192] : memref<100x512xf32, #tpu.memory_space<vmem>>, vector<4x32xf32>
    tpu.vector_store %arg12[%c16_1191, %c448_1192], %653 {strides = array<i32>} : memref<100x512xf32, #tpu.memory_space<vmem>>, vector<4x32xf32>,
    %c0_1193 = arith.constant 0 : index
    %c1024_1194 = arith.constant 1024 : index
    %655 = vector.load %arg11[%c0_1193, %c1024_1194] : memref<4x1152xf32, #tpu.memory_space<vmem>>, vector<4x32xf32>
    %c16_1195 = arith.constant 16 : index
    %c480_1196 = arith.constant 480 : index
    %656 = vector.load %arg12[%c16_1195, %c480_1196] : memref<100x512xf32, #tpu.memory_space<vmem>>, vector<4x32xf32>
    tpu.vector_store %arg12[%c16_1195, %c480_1196], %655 {strides = array<i32>} : memref<100x512xf32, #tpu.memory_space<vmem>>, vector<4x32xf32>,
    %c0_1197 = arith.constant 0 : index
    %c336_1198 = arith.constant 336 : index
    %657 = vector.load %arg11[%c0_1197, %c336_1198] : memref<4x1152xf32, #tpu.memory_space<vmem>>, vector<4x32xf32>
    %c20_1199 = arith.constant 20 : index
    %c384_1200 = arith.constant 384 : index
    %658 = vector.load %arg12[%c20_1199, %c384_1200] : memref<100x512xf32, #tpu.memory_space<vmem>>, vector<4x32xf32>
    tpu.vector_store %arg12[%c20_1199, %c384_1200], %657 {strides = array<i32>} : memref<100x512xf32, #tpu.memory_space<vmem>>, vector<4x32xf32>,
    %c0_1201 = arith.constant 0 : index
    %c384_1202 = arith.constant 384 : index
    %659 = vector.load %arg11[%c0_1201, %c384_1202] : memref<4x1152xf32, #tpu.memory_space<vmem>>, vector<4x32xf32>
    %c20_1203 = arith.constant 20 : index
    %c416_1204 = arith.constant 416 : index
    %660 = vector.load %arg12[%c20_1203, %c416_1204] : memref<100x512xf32, #tpu.memory_space<vmem>>, vector<4x32xf32>
    tpu.vector_store %arg12[%c20_1203, %c416_1204], %659 {strides = array<i32>} : memref<100x512xf32, #tpu.memory_space<vmem>>, vector<4x32xf32>,
    %c0_1205 = arith.constant 0 : index
    %c432_1206 = arith.constant 432 : index
    %661 = vector.load %arg11[%c0_1205, %c432_1206] : memref<4x1152xf32, #tpu.memory_space<vmem>>, vector<4x32xf32>
    %c20_1207 = arith.constant 20 : index
    %c448_1208 = arith.constant 448 : index
    %662 = vector.load %arg12[%c20_1207, %c448_1208] : memref<100x512xf32, #tpu.memory_space<vmem>>, vector<4x32xf32>
    tpu.vector_store %arg12[%c20_1207, %c448_1208], %661 {strides = array<i32>} : memref<100x512xf32, #tpu.memory_space<vmem>>, vector<4x32xf32>,
    %c0_1209 = arith.constant 0 : index
    %c480_1210 = arith.constant 480 : index
    %663 = vector.load %arg11[%c0_1209, %c480_1210] : memref<4x1152xf32, #tpu.memory_space<vmem>>, vector<4x32xf32>
    %c20_1211 = arith.constant 20 : index
    %c480_1212 = arith.constant 480 : index
    %664 = vector.load %arg12[%c20_1211, %c480_1212] : memref<100x512xf32, #tpu.memory_space<vmem>>, vector<4x32xf32>
    tpu.vector_store %arg12[%c20_1211, %c480_1212], %663 {strides = array<i32>} : memref<100x512xf32, #tpu.memory_space<vmem>>, vector<4x32xf32>,
    %c0_1213 = arith.constant 0 : index
    %c56_1214 = arith.constant 56 : index
    %665 = vector.load %arg11[%c0_1213, %c56_1214] : memref<4x1152xf32, #tpu.memory_space<vmem>>, vector<4x32xf32>
    %c24_1215 = arith.constant 24 : index
    %c384_1216 = arith.constant 384 : index
    %666 = vector.load %arg12[%c24_1215, %c384_1216] : memref<100x512xf32, #tpu.memory_space<vmem>>, vector<4x32xf32>
    tpu.vector_store %arg12[%c24_1215, %c384_1216], %665 {strides = array<i32>} : memref<100x512xf32, #tpu.memory_space<vmem>>, vector<4x32xf32>,
    %c0_1217 = arith.constant 0 : index
    %c104_1218 = arith.constant 104 : index
    %667 = vector.load %arg11[%c0_1217, %c104_1218] : memref<4x1152xf32, #tpu.memory_space<vmem>>, vector<4x32xf32>
    %c24_1219 = arith.constant 24 : index
    %c416_1220 = arith.constant 416 : index
    %668 = vector.load %arg12[%c24_1219, %c416_1220] : memref<100x512xf32, #tpu.memory_space<vmem>>, vector<4x32xf32>
    tpu.vector_store %arg12[%c24_1219, %c416_1220], %667 {strides = array<i32>} : memref<100x512xf32, #tpu.memory_space<vmem>>, vector<4x32xf32>,
    %c0_1221 = arith.constant 0 : index
    %c152_1222 = arith.constant 152 : index
    %669 = vector.load %arg11[%c0_1221, %c152_1222] : memref<4x1152xf32, #tpu.memory_space<vmem>>, vector<4x32xf32>
    %c24_1223 = arith.constant 24 : index
    %c448_1224 = arith.constant 448 : index
    %670 = vector.load %arg12[%c24_1223, %c448_1224] : memref<100x512xf32, #tpu.memory_space<vmem>>, vector<4x32xf32>
    tpu.vector_store %arg12[%c24_1223, %c448_1224], %669 {strides = array<i32>} : memref<100x512xf32, #tpu.memory_space<vmem>>, vector<4x32xf32>,
    %c0_1225 = arith.constant 0 : index
    %c200_1226 = arith.constant 200 : index
    %671 = vector.load %arg11[%c0_1225, %c200_1226] : memref<4x1152xf32, #tpu.memory_space<vmem>>, vector<4x32xf32>
    %c24_1227 = arith.constant 24 : index
    %c480_1228 = arith.constant 480 : index
    %672 = vector.load %arg12[%c24_1227, %c480_1228] : memref<100x512xf32, #tpu.memory_space<vmem>>, vector<4x32xf32>
    tpu.vector_store %arg12[%c24_1227, %c480_1228], %671 {strides = array<i32>} : memref<100x512xf32, #tpu.memory_space<vmem>>, vector<4x32xf32>,
    %c0_1229 = arith.constant 0 : index
    %c344_1230 = arith.constant 344 : index
    %673 = vector.load %arg11[%c0_1229, %c344_1230] : memref<4x1152xf32, #tpu.memory_space<vmem>>, vector<4x32xf32>
    %c28_1231 = arith.constant 28 : index
    %c384_1232 = arith.constant 384 : index
    %674 = vector.load %arg12[%c28_1231, %c384_1232] : memref<100x512xf32, #tpu.memory_space<vmem>>, vector<4x32xf32>
    tpu.vector_store %arg12[%c28_1231, %c384_1232], %673 {strides = array<i32>} : memref<100x512xf32, #tpu.memory_space<vmem>>, vector<4x32xf32>,
    %c0_1233 = arith.constant 0 : index
    %c392_1234 = arith.constant 392 : index
    %675 = vector.load %arg11[%c0_1233, %c392_1234] : memref<4x1152xf32, #tpu.memory_space<vmem>>, vector<4x32xf32>
    %c28_1235 = arith.constant 28 : index
    %c416_1236 = arith.constant 416 : index
    %676 = vector.load %arg12[%c28_1235, %c416_1236] : memref<100x512xf32, #tpu.memory_space<vmem>>, vector<4x32xf32>
    tpu.vector_store %arg12[%c28_1235, %c416_1236], %675 {strides = array<i32>} : memref<100x512xf32, #tpu.memory_space<vmem>>, vector<4x32xf32>,
    %c0_1237 = arith.constant 0 : index
    %c440_1238 = arith.constant 440 : index
    %677 = vector.load %arg11[%c0_1237, %c440_1238] : memref<4x1152xf32, #tpu.memory_space<vmem>>, vector<4x32xf32>
    %c28_1239 = arith.constant 28 : index
    %c448_1240 = arith.constant 448 : index
    %678 = vector.load %arg12[%c28_1239, %c448_1240] : memref<100x512xf32, #tpu.memory_space<vmem>>, vector<4x32xf32>
    tpu.vector_store %arg12[%c28_1239, %c448_1240], %677 {strides = array<i32>} : memref<100x512xf32, #tpu.memory_space<vmem>>, vector<4x32xf32>,
    %c0_1241 = arith.constant 0 : index
    %c488_1242 = arith.constant 488 : index
    %679 = vector.load %arg11[%c0_1241, %c488_1242] : memref<4x1152xf32, #tpu.memory_space<vmem>>, vector<4x32xf32>
    %c28_1243 = arith.constant 28 : index
    %c480_1244 = arith.constant 480 : index
    %680 = vector.load %arg12[%c28_1243, %c480_1244] : memref<100x512xf32, #tpu.memory_space<vmem>>, vector<4x32xf32>
    tpu.vector_store %arg12[%c28_1243, %c480_1244], %679 {strides = array<i32>} : memref<100x512xf32, #tpu.memory_space<vmem>>, vector<4x32xf32>,
    %c0_1245 = arith.constant 0 : index
    %c64_1246 = arith.constant 64 : index
    %681 = vector.load %arg11[%c0_1245, %c64_1246] : memref<4x1152xf32, #tpu.memory_space<vmem>>, vector<4x32xf32>
    %c32_1247 = arith.constant 32 : index
    %c384_1248 = arith.constant 384 : index
    %682 = vector.load %arg12[%c32_1247, %c384_1248] : memref<100x512xf32, #tpu.memory_space<vmem>>, vector<4x32xf32>
    tpu.vector_store %arg12[%c32_1247, %c384_1248], %681 {strides = array<i32>} : memref<100x512xf32, #tpu.memory_space<vmem>>, vector<4x32xf32>,
    %c0_1249 = arith.constant 0 : index
    %c112_1250 = arith.constant 112 : index
    %683 = vector.load %arg11[%c0_1249, %c112_1250] : memref<4x1152xf32, #tpu.memory_space<vmem>>, vector<4x32xf32>
    %c32_1251 = arith.constant 32 : index
    %c416_1252 = arith.constant 416 : index
    %684 = vector.load %arg12[%c32_1251, %c416_1252] : memref<100x512xf32, #tpu.memory_space<vmem>>, vector<4x32xf32>
    tpu.vector_store %arg12[%c32_1251, %c416_1252], %683 {strides = array<i32>} : memref<100x512xf32, #tpu.memory_space<vmem>>, vector<4x32xf32>,
    %c0_1253 = arith.constant 0 : index
    %c160_1254 = arith.constant 160 : index
    %685 = vector.load %arg11[%c0_1253, %c160_1254] : memref<4x1152xf32, #tpu.memory_space<vmem>>, vector<4x32xf32>
    %c32_1255 = arith.constant 32 : index
    %c448_1256 = arith.constant 448 : index
    %686 = vector.load %arg12[%c32_1255, %c448_1256] : memref<100x512xf32, #tpu.memory_space<vmem>>, vector<4x32xf32>
    tpu.vector_store %arg12[%c32_1255, %c448_1256], %685 {strides = array<i32>} : memref<100x512xf32, #tpu.memory_space<vmem>>, vector<4x32xf32>,
    %c0_1257 = arith.constant 0 : index
    %c208_1258 = arith.constant 208 : index
    %687 = vector.load %arg11[%c0_1257, %c208_1258] : memref<4x1152xf32, #tpu.memory_space<vmem>>, vector<4x32xf32>
    %c32_1259 = arith.constant 32 : index
    %c480_1260 = arith.constant 480 : index
    %688 = vector.load %arg12[%c32_1259, %c480_1260] : memref<100x512xf32, #tpu.memory_space<vmem>>, vector<4x32xf32>
    tpu.vector_store %arg12[%c32_1259, %c480_1260], %687 {strides = array<i32>} : memref<100x512xf32, #tpu.memory_space<vmem>>, vector<4x32xf32>,
    %c0_1261 = arith.constant 0 : index
    %c352_1262 = arith.constant 352 : index
    %689 = vector.load %arg11[%c0_1261, %c352_1262] : memref<4x1152xf32, #tpu.memory_space<vmem>>, vector<4x32xf32>
    %c36_1263 = arith.constant 36 : index
    %c384_1264 = arith.constant 384 : index
    %690 = vector.load %arg12[%c36_1263, %c384_1264] : memref<100x512xf32, #tpu.memory_space<vmem>>, vector<4x32xf32>
    tpu.vector_store %arg12[%c36_1263, %c384_1264], %689 {strides = array<i32>} : memref<100x512xf32, #tpu.memory_space<vmem>>, vector<4x32xf32>,
    %c0_1265 = arith.constant 0 : index
    %c400_1266 = arith.constant 400 : index
    %691 = vector.load %arg11[%c0_1265, %c400_1266] : memref<4x1152xf32, #tpu.memory_space<vmem>>, vector<4x32xf32>
    %c36_1267 = arith.constant 36 : index
    %c416_1268 = arith.constant 416 : index
    %692 = vector.load %arg12[%c36_1267, %c416_1268] : memref<100x512xf32, #tpu.memory_space<vmem>>, vector<4x32xf32>
    tpu.vector_store %arg12[%c36_1267, %c416_1268], %691 {strides = array<i32>} : memref<100x512xf32, #tpu.memory_space<vmem>>, vector<4x32xf32>,
    %c0_1269 = arith.constant 0 : index
    %c448_1270 = arith.constant 448 : index
    %693 = vector.load %arg11[%c0_1269, %c448_1270] : memref<4x1152xf32, #tpu.memory_space<vmem>>, vector<4x32xf32>
    %c36_1271 = arith.constant 36 : index
    %c448_1272 = arith.constant 448 : index
    %694 = vector.load %arg12[%c36_1271, %c448_1272] : memref<100x512xf32, #tpu.memory_space<vmem>>, vector<4x32xf32>
    tpu.vector_store %arg12[%c36_1271, %c448_1272], %693 {strides = array<i32>} : memref<100x512xf32, #tpu.memory_space<vmem>>, vector<4x32xf32>,
    %c0_1273 = arith.constant 0 : index
    %c496_1274 = arith.constant 496 : index
    %695 = vector.load %arg11[%c0_1273, %c496_1274] : memref<4x1152xf32, #tpu.memory_space<vmem>>, vector<4x32xf32>
    %c36_1275 = arith.constant 36 : index
    %c480_1276 = arith.constant 480 : index
    %696 = vector.load %arg12[%c36_1275, %c480_1276] : memref<100x512xf32, #tpu.memory_space<vmem>>, vector<4x32xf32>
    tpu.vector_store %arg12[%c36_1275, %c480_1276], %695 {strides = array<i32>} : memref<100x512xf32, #tpu.memory_space<vmem>>, vector<4x32xf32>,
    %c0_1277 = arith.constant 0 : index
    %c912_1278 = arith.constant 912 : index
    %697 = vector.load %arg11[%c0_1277, %c912_1278] : memref<4x1152xf32, #tpu.memory_space<vmem>>, vector<4x32xf32>
    %c40_1279 = arith.constant 40 : index
    %c384_1280 = arith.constant 384 : index
    %698 = vector.load %arg12[%c40_1279, %c384_1280] : memref<100x512xf32, #tpu.memory_space<vmem>>, vector<4x32xf32>
    tpu.vector_store %arg12[%c40_1279, %c384_1280], %697 {strides = array<i32>} : memref<100x512xf32, #tpu.memory_space<vmem>>, vector<4x32xf32>,
    %c0_1281 = arith.constant 0 : index
    %c960_1282 = arith.constant 960 : index
    %699 = vector.load %arg11[%c0_1281, %c960_1282] : memref<4x1152xf32, #tpu.memory_space<vmem>>, vector<4x32xf32>
    %c40_1283 = arith.constant 40 : index
    %c416_1284 = arith.constant 416 : index
    %700 = vector.load %arg12[%c40_1283, %c416_1284] : memref<100x512xf32, #tpu.memory_space<vmem>>, vector<4x32xf32>
    tpu.vector_store %arg12[%c40_1283, %c416_1284], %699 {strides = array<i32>} : memref<100x512xf32, #tpu.memory_space<vmem>>, vector<4x32xf32>,
    %c0_1285 = arith.constant 0 : index
    %c1008_1286 = arith.constant 1008 : index
    %701 = vector.load %arg11[%c0_1285, %c1008_1286] : memref<4x1152xf32, #tpu.memory_space<vmem>>, vector<4x32xf32>
    %c40_1287 = arith.constant 40 : index
    %c448_1288 = arith.constant 448 : index
    %702 = vector.load %arg12[%c40_1287, %c448_1288] : memref<100x512xf32, #tpu.memory_space<vmem>>, vector<4x32xf32>
    tpu.vector_store %arg12[%c40_1287, %c448_1288], %701 {strides = array<i32>} : memref<100x512xf32, #tpu.memory_space<vmem>>, vector<4x32xf32>,
    %c0_1289 = arith.constant 0 : index
    %c1056_1290 = arith.constant 1056 : index
    %703 = vector.load %arg11[%c0_1289, %c1056_1290] : memref<4x1152xf32, #tpu.memory_space<vmem>>, vector<4x32xf32>
    %c40_1291 = arith.constant 40 : index
    %c480_1292 = arith.constant 480 : index
    %704 = vector.load %arg12[%c40_1291, %c480_1292] : memref<100x512xf32, #tpu.memory_space<vmem>>, vector<4x32xf32>
    tpu.vector_store %arg12[%c40_1291, %c480_1292], %703 {strides = array<i32>} : memref<100x512xf32, #tpu.memory_space<vmem>>, vector<4x32xf32>,
    %c0_1293 = arith.constant 0 : index
    %c632_1294 = arith.constant 632 : index
    %705 = vector.load %arg11[%c0_1293, %c632_1294] : memref<4x1152xf32, #tpu.memory_space<vmem>>, vector<4x32xf32>
    %c44_1295 = arith.constant 44 : index
    %c384_1296 = arith.constant 384 : index
    %706 = vector.load %arg12[%c44_1295, %c384_1296] : memref<100x512xf32, #tpu.memory_space<vmem>>, vector<4x32xf32>
    tpu.vector_store %arg12[%c44_1295, %c384_1296], %705 {strides = array<i32>} : memref<100x512xf32, #tpu.memory_space<vmem>>, vector<4x32xf32>,
    %c0_1297 = arith.constant 0 : index
    %c680_1298 = arith.constant 680 : index
    %707 = vector.load %arg11[%c0_1297, %c680_1298] : memref<4x1152xf32, #tpu.memory_space<vmem>>, vector<4x32xf32>
    %c44_1299 = arith.constant 44 : index
    %c416_1300 = arith.constant 416 : index
    %708 = vector.load %arg12[%c44_1299, %c416_1300] : memref<100x512xf32, #tpu.memory_space<vmem>>, vector<4x32xf32>
    tpu.vector_store %arg12[%c44_1299, %c416_1300], %707 {strides = array<i32>} : memref<100x512xf32, #tpu.memory_space<vmem>>, vector<4x32xf32>,
    %c0_1301 = arith.constant 0 : index
    %c728_1302 = arith.constant 728 : index
    %709 = vector.load %arg11[%c0_1301, %c728_1302] : memref<4x1152xf32, #tpu.memory_space<vmem>>, vector<4x32xf32>
    %c44_1303 = arith.constant 44 : index
    %c448_1304 = arith.constant 448 : index
    %710 = vector.load %arg12[%c44_1303, %c448_1304] : memref<100x512xf32, #tpu.memory_space<vmem>>, vector<4x32xf32>
    tpu.vector_store %arg12[%c44_1303, %c448_1304], %709 {strides = array<i32>} : memref<100x512xf32, #tpu.memory_space<vmem>>, vector<4x32xf32>,
    %c0_1305 = arith.constant 0 : index
    %c776_1306 = arith.constant 776 : index
    %711 = vector.load %arg11[%c0_1305, %c776_1306] : memref<4x1152xf32, #tpu.memory_space<vmem>>, vector<4x32xf32>
    %c44_1307 = arith.constant 44 : index
    %c480_1308 = arith.constant 480 : index
    %712 = vector.load %arg12[%c44_1307, %c480_1308] : memref<100x512xf32, #tpu.memory_space<vmem>>, vector<4x32xf32>
    tpu.vector_store %arg12[%c44_1307, %c480_1308], %711 {strides = array<i32>} : memref<100x512xf32, #tpu.memory_space<vmem>>, vector<4x32xf32>,
    %c0_1309 = arith.constant 0 : index
    %c920_1310 = arith.constant 920 : index
    %713 = vector.load %arg11[%c0_1309, %c920_1310] : memref<4x1152xf32, #tpu.memory_space<vmem>>, vector<4x32xf32>
    %c48_1311 = arith.constant 48 : index
    %c384_1312 = arith.constant 384 : index
    %714 = vector.load %arg12[%c48_1311, %c384_1312] : memref<100x512xf32, #tpu.memory_space<vmem>>, vector<4x32xf32>
    tpu.vector_store %arg12[%c48_1311, %c384_1312], %713 {strides = array<i32>} : memref<100x512xf32, #tpu.memory_space<vmem>>, vector<4x32xf32>,
    %c0_1313 = arith.constant 0 : index
    %c968_1314 = arith.constant 968 : index
    %715 = vector.load %arg11[%c0_1313, %c968_1314] : memref<4x1152xf32, #tpu.memory_space<vmem>>, vector<4x32xf32>
    %c48_1315 = arith.constant 48 : index
    %c416_1316 = arith.constant 416 : index
    %716 = vector.load %arg12[%c48_1315, %c416_1316] : memref<100x512xf32, #tpu.memory_space<vmem>>, vector<4x32xf32>
    tpu.vector_store %arg12[%c48_1315, %c416_1316], %715 {strides = array<i32>} : memref<100x512xf32, #tpu.memory_space<vmem>>, vector<4x32xf32>,
    %c0_1317 = arith.constant 0 : index
    %c1016_1318 = arith.constant 1016 : index
    %717 = vector.load %arg11[%c0_1317, %c1016_1318] : memref<4x1152xf32, #tpu.memory_space<vmem>>, vector<4x32xf32>
    %c48_1319 = arith.constant 48 : index
    %c448_1320 = arith.constant 448 : index
    %718 = vector.load %arg12[%c48_1319, %c448_1320] : memref<100x512xf32, #tpu.memory_space<vmem>>, vector<4x32xf32>
    tpu.vector_store %arg12[%c48_1319, %c448_1320], %717 {strides = array<i32>} : memref<100x512xf32, #tpu.memory_space<vmem>>, vector<4x32xf32>,
    %c0_1321 = arith.constant 0 : index
    %c1064_1322 = arith.constant 1064 : index
    %719 = vector.load %arg11[%c0_1321, %c1064_1322] : memref<4x1152xf32, #tpu.memory_space<vmem>>, vector<4x32xf32>
    %c48_1323 = arith.constant 48 : index
    %c480_1324 = arith.constant 480 : index
    %720 = vector.load %arg12[%c48_1323, %c480_1324] : memref<100x512xf32, #tpu.memory_space<vmem>>, vector<4x32xf32>
    tpu.vector_store %arg12[%c48_1323, %c480_1324], %719 {strides = array<i32>} : memref<100x512xf32, #tpu.memory_space<vmem>>, vector<4x32xf32>,
    %c0_1325 = arith.constant 0 : index
    %c640_1326 = arith.constant 640 : index
    %721 = vector.load %arg11[%c0_1325, %c640_1326] : memref<4x1152xf32, #tpu.memory_space<vmem>>, vector<4x32xf32>
    %c52_1327 = arith.constant 52 : index
    %c384_1328 = arith.constant 384 : index
    %722 = vector.load %arg12[%c52_1327, %c384_1328] : memref<100x512xf32, #tpu.memory_space<vmem>>, vector<4x32xf32>
    tpu.vector_store %arg12[%c52_1327, %c384_1328], %721 {strides = array<i32>} : memref<100x512xf32, #tpu.memory_space<vmem>>, vector<4x32xf32>,
    %c0_1329 = arith.constant 0 : index
    %c688_1330 = arith.constant 688 : index
    %723 = vector.load %arg11[%c0_1329, %c688_1330] : memref<4x1152xf32, #tpu.memory_space<vmem>>, vector<4x32xf32>
    %c52_1331 = arith.constant 52 : index
    %c416_1332 = arith.constant 416 : index
    %724 = vector.load %arg12[%c52_1331, %c416_1332] : memref<100x512xf32, #tpu.memory_space<vmem>>, vector<4x32xf32>
    tpu.vector_store %arg12[%c52_1331, %c416_1332], %723 {strides = array<i32>} : memref<100x512xf32, #tpu.memory_space<vmem>>, vector<4x32xf32>,
    %c0_1333 = arith.constant 0 : index
    %c736_1334 = arith.constant 736 : index
    %725 = vector.load %arg11[%c0_1333, %c736_1334] : memref<4x1152xf32, #tpu.memory_space<vmem>>, vector<4x32xf32>
    %c52_1335 = arith.constant 52 : index
    %c448_1336 = arith.constant 448 : index
    %726 = vector.load %arg12[%c52_1335, %c448_1336] : memref<100x512xf32, #tpu.memory_space<vmem>>, vector<4x32xf32>
    tpu.vector_store %arg12[%c52_1335, %c448_1336], %725 {strides = array<i32>} : memref<100x512xf32, #tpu.memory_space<vmem>>, vector<4x32xf32>,
    %c0_1337 = arith.constant 0 : index
    %c784_1338 = arith.constant 784 : index
    %727 = vector.load %arg11[%c0_1337, %c784_1338] : memref<4x1152xf32, #tpu.memory_space<vmem>>, vector<4x32xf32>
    %c52_1339 = arith.constant 52 : index
    %c480_1340 = arith.constant 480 : index
    %728 = vector.load %arg12[%c52_1339, %c480_1340] : memref<100x512xf32, #tpu.memory_space<vmem>>, vector<4x32xf32>
    tpu.vector_store %arg12[%c52_1339, %c480_1340], %727 {strides = array<i32>} : memref<100x512xf32, #tpu.memory_space<vmem>>, vector<4x32xf32>,
    %c0_1341 = arith.constant 0 : index
    %c928_1342 = arith.constant 928 : index
    %729 = vector.load %arg11[%c0_1341, %c928_1342] : memref<4x1152xf32, #tpu.memory_space<vmem>>, vector<4x32xf32>
    %c56_1343 = arith.constant 56 : index
    %c384_1344 = arith.constant 384 : index
    %730 = vector.load %arg12[%c56_1343, %c384_1344] : memref<100x512xf32, #tpu.memory_space<vmem>>, vector<4x32xf32>
    tpu.vector_store %arg12[%c56_1343, %c384_1344], %729 {strides = array<i32>} : memref<100x512xf32, #tpu.memory_space<vmem>>, vector<4x32xf32>,
    %c0_1345 = arith.constant 0 : index
    %c976_1346 = arith.constant 976 : index
    %731 = vector.load %arg11[%c0_1345, %c976_1346] : memref<4x1152xf32, #tpu.memory_space<vmem>>, vector<4x32xf32>
    %c56_1347 = arith.constant 56 : index
    %c416_1348 = arith.constant 416 : index
    %732 = vector.load %arg12[%c56_1347, %c416_1348] : memref<100x512xf32, #tpu.memory_space<vmem>>, vector<4x32xf32>
    tpu.vector_store %arg12[%c56_1347, %c416_1348], %731 {strides = array<i32>} : memref<100x512xf32, #tpu.memory_space<vmem>>, vector<4x32xf32>,
    %c0_1349 = arith.constant 0 : index
    %c1024_1350 = arith.constant 1024 : index
    %733 = vector.load %arg11[%c0_1349, %c1024_1350] : memref<4x1152xf32, #tpu.memory_space<vmem>>, vector<4x32xf32>
    %c56_1351 = arith.constant 56 : index
    %c448_1352 = arith.constant 448 : index
    %734 = vector.load %arg12[%c56_1351, %c448_1352] : memref<100x512xf32, #tpu.memory_space<vmem>>, vector<4x32xf32>
    tpu.vector_store %arg12[%c56_1351, %c448_1352], %733 {strides = array<i32>} : memref<100x512xf32, #tpu.memory_space<vmem>>, vector<4x32xf32>,
    %c0_1353 = arith.constant 0 : index
    %c1072_1354 = arith.constant 1072 : index
    %735 = vector.load %arg11[%c0_1353, %c1072_1354] : memref<4x1152xf32, #tpu.memory_space<vmem>>, vector<4x32xf32>
    %c56_1355 = arith.constant 56 : index
    %c480_1356 = arith.constant 480 : index
    %736 = vector.load %arg12[%c56_1355, %c480_1356] : memref<100x512xf32, #tpu.memory_space<vmem>>, vector<4x32xf32>
    tpu.vector_store %arg12[%c56_1355, %c480_1356], %735 {strides = array<i32>} : memref<100x512xf32, #tpu.memory_space<vmem>>, vector<4x32xf32>,
    %c0_1357 = arith.constant 0 : index
    %c384_1358 = arith.constant 384 : index
    %737 = vector.load %arg11[%c0_1357, %c384_1358] : memref<4x1152xf32, #tpu.memory_space<vmem>>, vector<4x32xf32>
    %c60_1359 = arith.constant 60 : index
    %c384_1360 = arith.constant 384 : index
    %738 = vector.load %arg12[%c60_1359, %c384_1360] : memref<100x512xf32, #tpu.memory_space<vmem>>, vector<4x32xf32>
    tpu.vector_store %arg12[%c60_1359, %c384_1360], %737 {strides = array<i32>} : memref<100x512xf32, #tpu.memory_space<vmem>>, vector<4x32xf32>,
    %c0_1361 = arith.constant 0 : index
    %c432_1362 = arith.constant 432 : index
    %739 = vector.load %arg11[%c0_1361, %c432_1362] : memref<4x1152xf32, #tpu.memory_space<vmem>>, vector<4x32xf32>
    %c60_1363 = arith.constant 60 : index
    %c416_1364 = arith.constant 416 : index
    %740 = vector.load %arg12[%c60_1363, %c416_1364] : memref<100x512xf32, #tpu.memory_space<vmem>>, vector<4x32xf32>
    tpu.vector_store %arg12[%c60_1363, %c416_1364], %739 {strides = array<i32>} : memref<100x512xf32, #tpu.memory_space<vmem>>, vector<4x32xf32>,
    %c0_1365 = arith.constant 0 : index
    %c480_1366 = arith.constant 480 : index
    %741 = vector.load %arg11[%c0_1365, %c480_1366] : memref<4x1152xf32, #tpu.memory_space<vmem>>, vector<4x32xf32>
    %c60_1367 = arith.constant 60 : index
    %c448_1368 = arith.constant 448 : index
    %742 = vector.load %arg12[%c60_1367, %c448_1368] : memref<100x512xf32, #tpu.memory_space<vmem>>, vector<4x32xf32>
    tpu.vector_store %arg12[%c60_1367, %c448_1368], %741 {strides = array<i32>} : memref<100x512xf32, #tpu.memory_space<vmem>>, vector<4x32xf32>,
    %c0_1369 = arith.constant 0 : index
    %c528_1370 = arith.constant 528 : index
    %743 = vector.load %arg11[%c0_1369, %c528_1370] : memref<4x1152xf32, #tpu.memory_space<vmem>>, vector<4x32xf32>
    %c60_1371 = arith.constant 60 : index
    %c480_1372 = arith.constant 480 : index
    %744 = vector.load %arg12[%c60_1371, %c480_1372] : memref<100x512xf32, #tpu.memory_space<vmem>>, vector<4x32xf32>
    tpu.vector_store %arg12[%c60_1371, %c480_1372], %743 {strides = array<i32>} : memref<100x512xf32, #tpu.memory_space<vmem>>, vector<4x32xf32>,
    %c0_1373 = arith.constant 0 : index
    %c104_1374 = arith.constant 104 : index
    %745 = vector.load %arg11[%c0_1373, %c104_1374] : memref<4x1152xf32, #tpu.memory_space<vmem>>, vector<4x32xf32>
    %c64_1375 = arith.constant 64 : index
    %c384_1376 = arith.constant 384 : index
    %746 = vector.load %arg12[%c64_1375, %c384_1376] : memref<100x512xf32, #tpu.memory_space<vmem>>, vector<4x32xf32>
    tpu.vector_store %arg12[%c64_1375, %c384_1376], %745 {strides = array<i32>} : memref<100x512xf32, #tpu.memory_space<vmem>>, vector<4x32xf32>,
    %c0_1377 = arith.constant 0 : index
    %c152_1378 = arith.constant 152 : index
    %747 = vector.load %arg11[%c0_1377, %c152_1378] : memref<4x1152xf32, #tpu.memory_space<vmem>>, vector<4x32xf32>
    %c64_1379 = arith.constant 64 : index
    %c416_1380 = arith.constant 416 : index
    %748 = vector.load %arg12[%c64_1379, %c416_1380] : memref<100x512xf32, #tpu.memory_space<vmem>>, vector<4x32xf32>
    tpu.vector_store %arg12[%c64_1379, %c416_1380], %747 {strides = array<i32>} : memref<100x512xf32, #tpu.memory_space<vmem>>, vector<4x32xf32>,
    %c0_1381 = arith.constant 0 : index
    %c200_1382 = arith.constant 200 : index
    %749 = vector.load %arg11[%c0_1381, %c200_1382] : memref<4x1152xf32, #tpu.memory_space<vmem>>, vector<4x32xf32>
    %c64_1383 = arith.constant 64 : index
    %c448_1384 = arith.constant 448 : index
    %750 = vector.load %arg12[%c64_1383, %c448_1384] : memref<100x512xf32, #tpu.memory_space<vmem>>, vector<4x32xf32>
    tpu.vector_store %arg12[%c64_1383, %c448_1384], %749 {strides = array<i32>} : memref<100x512xf32, #tpu.memory_space<vmem>>, vector<4x32xf32>,
    %c0_1385 = arith.constant 0 : index
    %c248_1386 = arith.constant 248 : index
    %751 = vector.load %arg11[%c0_1385, %c248_1386] : memref<4x1152xf32, #tpu.memory_space<vmem>>, vector<4x32xf32>
    %c64_1387 = arith.constant 64 : index
    %c480_1388 = arith.constant 480 : index
    %752 = vector.load %arg12[%c64_1387, %c480_1388] : memref<100x512xf32, #tpu.memory_space<vmem>>, vector<4x32xf32>
    tpu.vector_store %arg12[%c64_1387, %c480_1388], %751 {strides = array<i32>} : memref<100x512xf32, #tpu.memory_space<vmem>>, vector<4x32xf32>,
    %c0_1389 = arith.constant 0 : index
    %c392_1390 = arith.constant 392 : index
    %753 = vector.load %arg11[%c0_1389, %c392_1390] : memref<4x1152xf32, #tpu.memory_space<vmem>>, vector<4x32xf32>
    %c68_1391 = arith.constant 68 : index
    %c384_1392 = arith.constant 384 : index
    %754 = vector.load %arg12[%c68_1391, %c384_1392] : memref<100x512xf32, #tpu.memory_space<vmem>>, vector<4x32xf32>
    tpu.vector_store %arg12[%c68_1391, %c384_1392], %753 {strides = array<i32>} : memref<100x512xf32, #tpu.memory_space<vmem>>, vector<4x32xf32>,
    %c0_1393 = arith.constant 0 : index
    %c440_1394 = arith.constant 440 : index
    %755 = vector.load %arg11[%c0_1393, %c440_1394] : memref<4x1152xf32, #tpu.memory_space<vmem>>, vector<4x32xf32>
    %c68_1395 = arith.constant 68 : index
    %c416_1396 = arith.constant 416 : index
    %756 = vector.load %arg12[%c68_1395, %c416_1396] : memref<100x512xf32, #tpu.memory_space<vmem>>, vector<4x32xf32>
    tpu.vector_store %arg12[%c68_1395, %c416_1396], %755 {strides = array<i32>} : memref<100x512xf32, #tpu.memory_space<vmem>>, vector<4x32xf32>,
    %c0_1397 = arith.constant 0 : index
    %c488_1398 = arith.constant 488 : index
    %757 = vector.load %arg11[%c0_1397, %c488_1398] : memref<4x1152xf32, #tpu.memory_space<vmem>>, vector<4x32xf32>
    %c68_1399 = arith.constant 68 : index
    %c448_1400 = arith.constant 448 : index
    %758 = vector.load %arg12[%c68_1399, %c448_1400] : memref<100x512xf32, #tpu.memory_space<vmem>>, vector<4x32xf32>
    tpu.vector_store %arg12[%c68_1399, %c448_1400], %757 {strides = array<i32>} : memref<100x512xf32, #tpu.memory_space<vmem>>, vector<4x32xf32>,
    %c0_1401 = arith.constant 0 : index
    %c536_1402 = arith.constant 536 : index
    %759 = vector.load %arg11[%c0_1401, %c536_1402] : memref<4x1152xf32, #tpu.memory_space<vmem>>, vector<4x32xf32>
    %c68_1403 = arith.constant 68 : index
    %c480_1404 = arith.constant 480 : index
    %760 = vector.load %arg12[%c68_1403, %c480_1404] : memref<100x512xf32, #tpu.memory_space<vmem>>, vector<4x32xf32>
    tpu.vector_store %arg12[%c68_1403, %c480_1404], %759 {strides = array<i32>} : memref<100x512xf32, #tpu.memory_space<vmem>>, vector<4x32xf32>,
    %c0_1405 = arith.constant 0 : index
    %c112_1406 = arith.constant 112 : index
    %761 = vector.load %arg11[%c0_1405, %c112_1406] : memref<4x1152xf32, #tpu.memory_space<vmem>>, vector<4x32xf32>
    %c72_1407 = arith.constant 72 : index
    %c384_1408 = arith.constant 384 : index
    %762 = vector.load %arg12[%c72_1407, %c384_1408] : memref<100x512xf32, #tpu.memory_space<vmem>>, vector<4x32xf32>
    tpu.vector_store %arg12[%c72_1407, %c384_1408], %761 {strides = array<i32>} : memref<100x512xf32, #tpu.memory_space<vmem>>, vector<4x32xf32>,
    %c0_1409 = arith.constant 0 : index
    %c160_1410 = arith.constant 160 : index
    %763 = vector.load %arg11[%c0_1409, %c160_1410] : memref<4x1152xf32, #tpu.memory_space<vmem>>, vector<4x32xf32>
    %c72_1411 = arith.constant 72 : index
    %c416_1412 = arith.constant 416 : index
    %764 = vector.load %arg12[%c72_1411, %c416_1412] : memref<100x512xf32, #tpu.memory_space<vmem>>, vector<4x32xf32>
    tpu.vector_store %arg12[%c72_1411, %c416_1412], %763 {strides = array<i32>} : memref<100x512xf32, #tpu.memory_space<vmem>>, vector<4x32xf32>,
    %c0_1413 = arith.constant 0 : index
    %c208_1414 = arith.constant 208 : index
    %765 = vector.load %arg11[%c0_1413, %c208_1414] : memref<4x1152xf32, #tpu.memory_space<vmem>>, vector<4x32xf32>
    %c72_1415 = arith.constant 72 : index
    %c448_1416 = arith.constant 448 : index
    %766 = vector.load %arg12[%c72_1415, %c448_1416] : memref<100x512xf32, #tpu.memory_space<vmem>>, vector<4x32xf32>
    tpu.vector_store %arg12[%c72_1415, %c448_1416], %765 {strides = array<i32>} : memref<100x512xf32, #tpu.memory_space<vmem>>, vector<4x32xf32>,
    %c0_1417 = arith.constant 0 : index
    %c256_1418 = arith.constant 256 : index
    %767 = vector.load %arg11[%c0_1417, %c256_1418] : memref<4x1152xf32, #tpu.memory_space<vmem>>, vector<4x32xf32>
    %c72_1419 = arith.constant 72 : index
    %c480_1420 = arith.constant 480 : index
    %768 = vector.load %arg12[%c72_1419, %c480_1420] : memref<100x512xf32, #tpu.memory_space<vmem>>, vector<4x32xf32>
    tpu.vector_store %arg12[%c72_1419, %c480_1420], %767 {strides = array<i32>} : memref<100x512xf32, #tpu.memory_space<vmem>>, vector<4x32xf32>,
    %c0_1421 = arith.constant 0 : index
    %c400_1422 = arith.constant 400 : index
    %769 = vector.load %arg11[%c0_1421, %c400_1422] : memref<4x1152xf32, #tpu.memory_space<vmem>>, vector<4x32xf32>
    %c76_1423 = arith.constant 76 : index
    %c384_1424 = arith.constant 384 : index
    %770 = vector.load %arg12[%c76_1423, %c384_1424] : memref<100x512xf32, #tpu.memory_space<vmem>>, vector<4x32xf32>
    tpu.vector_store %arg12[%c76_1423, %c384_1424], %769 {strides = array<i32>} : memref<100x512xf32, #tpu.memory_space<vmem>>, vector<4x32xf32>,
    %c0_1425 = arith.constant 0 : index
    %c448_1426 = arith.constant 448 : index
    %771 = vector.load %arg11[%c0_1425, %c448_1426] : memref<4x1152xf32, #tpu.memory_space<vmem>>, vector<4x32xf32>
    %c76_1427 = arith.constant 76 : index
    %c416_1428 = arith.constant 416 : index
    %772 = vector.load %arg12[%c76_1427, %c416_1428] : memref<100x512xf32, #tpu.memory_space<vmem>>, vector<4x32xf32>
    tpu.vector_store %arg12[%c76_1427, %c416_1428], %771 {strides = array<i32>} : memref<100x512xf32, #tpu.memory_space<vmem>>, vector<4x32xf32>,
    %c0_1429 = arith.constant 0 : index
    %c496_1430 = arith.constant 496 : index
    %773 = vector.load %arg11[%c0_1429, %c496_1430] : memref<4x1152xf32, #tpu.memory_space<vmem>>, vector<4x32xf32>
    %c76_1431 = arith.constant 76 : index
    %c448_1432 = arith.constant 448 : index
    %774 = vector.load %arg12[%c76_1431, %c448_1432] : memref<100x512xf32, #tpu.memory_space<vmem>>, vector<4x32xf32>
    tpu.vector_store %arg12[%c76_1431, %c448_1432], %773 {strides = array<i32>} : memref<100x512xf32, #tpu.memory_space<vmem>>, vector<4x32xf32>,
    %c0_1433 = arith.constant 0 : index
    %c544_1434 = arith.constant 544 : index
    %775 = vector.load %arg11[%c0_1433, %c544_1434] : memref<4x1152xf32, #tpu.memory_space<vmem>>, vector<4x32xf32>
    %c76_1435 = arith.constant 76 : index
    %c480_1436 = arith.constant 480 : index
    %776 = vector.load %arg12[%c76_1435, %c480_1436] : memref<100x512xf32, #tpu.memory_space<vmem>>, vector<4x32xf32>
    tpu.vector_store %arg12[%c76_1435, %c480_1436], %775 {strides = array<i32>} : memref<100x512xf32, #tpu.memory_space<vmem>>, vector<4x32xf32>,
    %c0_1437 = arith.constant 0 : index
    %c960_1438 = arith.constant 960 : index
    %777 = vector.load %arg11[%c0_1437, %c960_1438] : memref<4x1152xf32, #tpu.memory_space<vmem>>, vector<4x32xf32>
    %c80_1439 = arith.constant 80 : index
    %c384_1440 = arith.constant 384 : index
    %778 = vector.load %arg12[%c80_1439, %c384_1440] : memref<100x512xf32, #tpu.memory_space<vmem>>, vector<4x32xf32>
    tpu.vector_store %arg12[%c80_1439, %c384_1440], %777 {strides = array<i32>} : memref<100x512xf32, #tpu.memory_space<vmem>>, vector<4x32xf32>,
    %c0_1441 = arith.constant 0 : index
    %c1008_1442 = arith.constant 1008 : index
    %779 = vector.load %arg11[%c0_1441, %c1008_1442] : memref<4x1152xf32, #tpu.memory_space<vmem>>, vector<4x32xf32>
    %c80_1443 = arith.constant 80 : index
    %c416_1444 = arith.constant 416 : index
    %780 = vector.load %arg12[%c80_1443, %c416_1444] : memref<100x512xf32, #tpu.memory_space<vmem>>, vector<4x32xf32>
    tpu.vector_store %arg12[%c80_1443, %c416_1444], %779 {strides = array<i32>} : memref<100x512xf32, #tpu.memory_space<vmem>>, vector<4x32xf32>,
    %c0_1445 = arith.constant 0 : index
    %c1056_1446 = arith.constant 1056 : index
    %781 = vector.load %arg11[%c0_1445, %c1056_1446] : memref<4x1152xf32, #tpu.memory_space<vmem>>, vector<4x32xf32>
    %c80_1447 = arith.constant 80 : index
    %c448_1448 = arith.constant 448 : index
    %782 = vector.load %arg12[%c80_1447, %c448_1448] : memref<100x512xf32, #tpu.memory_space<vmem>>, vector<4x32xf32>
    tpu.vector_store %arg12[%c80_1447, %c448_1448], %781 {strides = array<i32>} : memref<100x512xf32, #tpu.memory_space<vmem>>, vector<4x32xf32>,
    %c0_1449 = arith.constant 0 : index
    %c1104_1450 = arith.constant 1104 : index
    %783 = vector.load %arg11[%c0_1449, %c1104_1450] : memref<4x1152xf32, #tpu.memory_space<vmem>>, vector<4x32xf32>
    %c80_1451 = arith.constant 80 : index
    %c480_1452 = arith.constant 480 : index
    %784 = vector.load %arg12[%c80_1451, %c480_1452] : memref<100x512xf32, #tpu.memory_space<vmem>>, vector<4x32xf32>
    tpu.vector_store %arg12[%c80_1451, %c480_1452], %783 {strides = array<i32>} : memref<100x512xf32, #tpu.memory_space<vmem>>, vector<4x32xf32>,
    %c0_1453 = arith.constant 0 : index
    %c680_1454 = arith.constant 680 : index
    %785 = vector.load %arg11[%c0_1453, %c680_1454] : memref<4x1152xf32, #tpu.memory_space<vmem>>, vector<4x32xf32>
    %c84_1455 = arith.constant 84 : index
    %c384_1456 = arith.constant 384 : index
    %786 = vector.load %arg12[%c84_1455, %c384_1456] : memref<100x512xf32, #tpu.memory_space<vmem>>, vector<4x32xf32>
    tpu.vector_store %arg12[%c84_1455, %c384_1456], %785 {strides = array<i32>} : memref<100x512xf32, #tpu.memory_space<vmem>>, vector<4x32xf32>,
    %c0_1457 = arith.constant 0 : index
    %c728_1458 = arith.constant 728 : index
    %787 = vector.load %arg11[%c0_1457, %c728_1458] : memref<4x1152xf32, #tpu.memory_space<vmem>>, vector<4x32xf32>
    %c84_1459 = arith.constant 84 : index
    %c416_1460 = arith.constant 416 : index
    %788 = vector.load %arg12[%c84_1459, %c416_1460] : memref<100x512xf32, #tpu.memory_space<vmem>>, vector<4x32xf32>
    tpu.vector_store %arg12[%c84_1459, %c416_1460], %787 {strides = array<i32>} : memref<100x512xf32, #tpu.memory_space<vmem>>, vector<4x32xf32>,
    %c0_1461 = arith.constant 0 : index
    %c776_1462 = arith.constant 776 : index
    %789 = vector.load %arg11[%c0_1461, %c776_1462] : memref<4x1152xf32, #tpu.memory_space<vmem>>, vector<4x32xf32>
    %c84_1463 = arith.constant 84 : index
    %c448_1464 = arith.constant 448 : index
    %790 = vector.load %arg12[%c84_1463, %c448_1464] : memref<100x512xf32, #tpu.memory_space<vmem>>, vector<4x32xf32>
    tpu.vector_store %arg12[%c84_1463, %c448_1464], %789 {strides = array<i32>} : memref<100x512xf32, #tpu.memory_space<vmem>>, vector<4x32xf32>,
    %c0_1465 = arith.constant 0 : index
    %c824_1466 = arith.constant 824 : index
    %791 = vector.load %arg11[%c0_1465, %c824_1466] : memref<4x1152xf32, #tpu.memory_space<vmem>>, vector<4x32xf32>
    %c84_1467 = arith.constant 84 : index
    %c480_1468 = arith.constant 480 : index
    %792 = vector.load %arg12[%c84_1467, %c480_1468] : memref<100x512xf32, #tpu.memory_space<vmem>>, vector<4x32xf32>
    tpu.vector_store %arg12[%c84_1467, %c480_1468], %791 {strides = array<i32>} : memref<100x512xf32, #tpu.memory_space<vmem>>, vector<4x32xf32>,
    %c0_1469 = arith.constant 0 : index
    %c968_1470 = arith.constant 968 : index
    %793 = vector.load %arg11[%c0_1469, %c968_1470] : memref<4x1152xf32, #tpu.memory_space<vmem>>, vector<4x32xf32>
    %c88_1471 = arith.constant 88 : index
    %c384_1472 = arith.constant 384 : index
    %794 = vector.load %arg12[%c88_1471, %c384_1472] : memref<100x512xf32, #tpu.memory_space<vmem>>, vector<4x32xf32>
    tpu.vector_store %arg12[%c88_1471, %c384_1472], %793 {strides = array<i32>} : memref<100x512xf32, #tpu.memory_space<vmem>>, vector<4x32xf32>,
    %c0_1473 = arith.constant 0 : index
    %c1016_1474 = arith.constant 1016 : index
    %795 = vector.load %arg11[%c0_1473, %c1016_1474] : memref<4x1152xf32, #tpu.memory_space<vmem>>, vector<4x32xf32>
    %c88_1475 = arith.constant 88 : index
    %c416_1476 = arith.constant 416 : index
    %796 = vector.load %arg12[%c88_1475, %c416_1476] : memref<100x512xf32, #tpu.memory_space<vmem>>, vector<4x32xf32>
    tpu.vector_store %arg12[%c88_1475, %c416_1476], %795 {strides = array<i32>} : memref<100x512xf32, #tpu.memory_space<vmem>>, vector<4x32xf32>,
    %c0_1477 = arith.constant 0 : index
    %c1064_1478 = arith.constant 1064 : index
    %797 = vector.load %arg11[%c0_1477, %c1064_1478] : memref<4x1152xf32, #tpu.memory_space<vmem>>, vector<4x32xf32>
    %c88_1479 = arith.constant 88 : index
    %c448_1480 = arith.constant 448 : index
    %798 = vector.load %arg12[%c88_1479, %c448_1480] : memref<100x512xf32, #tpu.memory_space<vmem>>, vector<4x32xf32>
    tpu.vector_store %arg12[%c88_1479, %c448_1480], %797 {strides = array<i32>} : memref<100x512xf32, #tpu.memory_space<vmem>>, vector<4x32xf32>,
    %c0_1481 = arith.constant 0 : index
    %c1112_1482 = arith.constant 1112 : index
    %799 = vector.load %arg11[%c0_1481, %c1112_1482] : memref<4x1152xf32, #tpu.memory_space<vmem>>, vector<4x32xf32>
    %c88_1483 = arith.constant 88 : index
    %c480_1484 = arith.constant 480 : index
    %800 = vector.load %arg12[%c88_1483, %c480_1484] : memref<100x512xf32, #tpu.memory_space<vmem>>, vector<4x32xf32>
    tpu.vector_store %arg12[%c88_1483, %c480_1484], %799 {strides = array<i32>} : memref<100x512xf32, #tpu.memory_space<vmem>>, vector<4x32xf32>,
    %c0_1485 = arith.constant 0 : index
    %c688_1486 = arith.constant 688 : index
    %801 = vector.load %arg11[%c0_1485, %c688_1486] : memref<4x1152xf32, #tpu.memory_space<vmem>>, vector<4x32xf32>
    %c92_1487 = arith.constant 92 : index
    %c384_1488 = arith.constant 384 : index
    %802 = vector.load %arg12[%c92_1487, %c384_1488] : memref<100x512xf32, #tpu.memory_space<vmem>>, vector<4x32xf32>
    tpu.vector_store %arg12[%c92_1487, %c384_1488], %801 {strides = array<i32>} : memref<100x512xf32, #tpu.memory_space<vmem>>, vector<4x32xf32>,
    %c0_1489 = arith.constant 0 : index
    %c736_1490 = arith.constant 736 : index
    %803 = vector.load %arg11[%c0_1489, %c736_1490] : memref<4x1152xf32, #tpu.memory_space<vmem>>, vector<4x32xf32>
    %c92_1491 = arith.constant 92 : index
    %c416_1492 = arith.constant 416 : index
    %804 = vector.load %arg12[%c92_1491, %c416_1492] : memref<100x512xf32, #tpu.memory_space<vmem>>, vector<4x32xf32>
    tpu.vector_store %arg12[%c92_1491, %c416_1492], %803 {strides = array<i32>} : memref<100x512xf32, #tpu.memory_space<vmem>>, vector<4x32xf32>,
    %c0_1493 = arith.constant 0 : index
    %c784_1494 = arith.constant 784 : index
    %805 = vector.load %arg11[%c0_1493, %c784_1494] : memref<4x1152xf32, #tpu.memory_space<vmem>>, vector<4x32xf32>
    %c92_1495 = arith.constant 92 : index
    %c448_1496 = arith.constant 448 : index
    %806 = vector.load %arg12[%c92_1495, %c448_1496] : memref<100x512xf32, #tpu.memory_space<vmem>>, vector<4x32xf32>
    tpu.vector_store %arg12[%c92_1495, %c448_1496], %805 {strides = array<i32>} : memref<100x512xf32, #tpu.memory_space<vmem>>, vector<4x32xf32>,
    %c0_1497 = arith.constant 0 : index
    %c832_1498 = arith.constant 832 : index
    %807 = vector.load %arg11[%c0_1497, %c832_1498] : memref<4x1152xf32, #tpu.memory_space<vmem>>, vector<4x32xf32>
    %c92_1499 = arith.constant 92 : index
    %c480_1500 = arith.constant 480 : index
    %808 = vector.load %arg12[%c92_1499, %c480_1500] : memref<100x512xf32, #tpu.memory_space<vmem>>, vector<4x32xf32>
    tpu.vector_store %arg12[%c92_1499, %c480_1500], %807 {strides = array<i32>} : memref<100x512xf32, #tpu.memory_space<vmem>>, vector<4x32xf32>,
    %c0_1501 = arith.constant 0 : index
    %c976_1502 = arith.constant 976 : index
    %809 = vector.load %arg11[%c0_1501, %c976_1502] : memref<4x1152xf32, #tpu.memory_space<vmem>>, vector<4x32xf32>
    %c96_1503 = arith.constant 96 : index
    %c384_1504 = arith.constant 384 : index
    %810 = vector.load %arg12[%c96_1503, %c384_1504] : memref<100x512xf32, #tpu.memory_space<vmem>>, vector<4x32xf32>
    tpu.vector_store %arg12[%c96_1503, %c384_1504], %809 {strides = array<i32>} : memref<100x512xf32, #tpu.memory_space<vmem>>, vector<4x32xf32>,
    %c0_1505 = arith.constant 0 : index
    %c1024_1506 = arith.constant 1024 : index
    %811 = vector.load %arg11[%c0_1505, %c1024_1506] : memref<4x1152xf32, #tpu.memory_space<vmem>>, vector<4x32xf32>
    %c96_1507 = arith.constant 96 : index
    %c416_1508 = arith.constant 416 : index
    %812 = vector.load %arg12[%c96_1507, %c416_1508] : memref<100x512xf32, #tpu.memory_space<vmem>>, vector<4x32xf32>
    tpu.vector_store %arg12[%c96_1507, %c416_1508], %811 {strides = array<i32>} : memref<100x512xf32, #tpu.memory_space<vmem>>, vector<4x32xf32>,
    %c0_1509 = arith.constant 0 : index
    %c1072_1510 = arith.constant 1072 : index
    %813 = vector.load %arg11[%c0_1509, %c1072_1510] : memref<4x1152xf32, #tpu.memory_space<vmem>>, vector<4x32xf32>
    %c96_1511 = arith.constant 96 : index
    %c448_1512 = arith.constant 448 : index
    %814 = vector.load %arg12[%c96_1511, %c448_1512] : memref<100x512xf32, #tpu.memory_space<vmem>>, vector<4x32xf32>
    tpu.vector_store %arg12[%c96_1511, %c448_1512], %813 {strides = array<i32>} : memref<100x512xf32, #tpu.memory_space<vmem>>, vector<4x32xf32>,
    %c0_1513 = arith.constant 0 : index
    %c1120 = arith.constant 1120 : index
    %815 = vector.load %arg11[%c0_1513, %c1120] : memref<4x1152xf32, #tpu.memory_space<vmem>>, vector<4x32xf32>
    %c96_1514 = arith.constant 96 : index
    %c480_1515 = arith.constant 480 : index
    %816 = vector.load %arg12[%c96_1514, %c480_1515] : memref<100x512xf32, #tpu.memory_space<vmem>>, vector<4x32xf32>
    tpu.vector_store %arg12[%c96_1514, %c480_1515], %815 {strides = array<i32>} : memref<100x512xf32, #tpu.memory_space<vmem>>, vector<4x32xf32>,
    %c0_1516 = arith.constant 0 : index
    %c0_1517 = arith.constant 0 : index
    %817 = vector.load %arg4[%c0_1516, %c0_1517] : memref<8x100xf32, #tpu.memory_space<vmem>>, vector<8x100xf32>
    %c0_1518 = arith.constant 0 : index
    %c0_1519 = arith.constant 0 : index
    %818 = vector.load %arg12[%c0_1518, %c0_1519] : memref<100x512xf32, #tpu.memory_space<vmem>>, vector<100x512xf32>
    %cst_1520 = arith.constant dense<0.000000e+00> : vector<8x512xf32>
    %819 = tpu.matmul %817, %818, %cst_1520 {dimension_numbers = #tpu.dot_dimension_numbers<[1], [0], [0], [1], [0, 0, 1, 1], [], []>} : vector<8x100xf32>, vector<100x512xf32>, vector<8x512xf32> -> vector<8x512xf32>
    %820 = vector.extract_strided_slice %819 {offsets = [0, 0], sizes = [8, 128], strides = [1, 1]} : vector<8x512xf32> to vector<8x128xf32>
    %821 = vector.extract_strided_slice %819 {offsets = [0, 128], sizes = [8, 128], strides = [1, 1]} : vector<8x512xf32> to vector<8x128xf32>
    %822 = arith.maximumf %820, %821 : vector<8x128xf32>
    %823 = vector.extract_strided_slice %819 {offsets = [0, 256], sizes = [8, 128], strides = [1, 1]} : vector<8x512xf32> to vector<8x128xf32>
    %824 = vector.extract_strided_slice %819 {offsets = [0, 384], sizes = [8, 128], strides = [1, 1]} : vector<8x512xf32> to vector<8x128xf32>
    %825 = arith.maximumf %823, %824 : vector<8x128xf32>
    %826 = arith.maximumf %822, %825 : vector<8x128xf32>
    %c0_1521 = arith.constant 0 : index
    %c0_1522 = arith.constant 0 : index
    %827 = vector.load %arg5[%c0_1521, %c0_1522] : memref<8x1xf32, #tpu.memory_space<vmem>>, vector<8x1xf32>
    %828 = vector.broadcast %827 : vector<8x1xf32> to vector<8x128xf32>
    %829 = arith.addf %826, %828 : vector<8x128xf32>
    %cst_1523 = arith.constant 0.000000e+00 : f32
    %830 = vector.broadcast %cst_1523 : f32 to vector<8x128xf32>
    %831 = arith.maximumf %829, %830 : vector<8x128xf32>
    %c0_1524 = arith.constant 0 : index
    %c0_1525 = arith.constant 0 : index
    %832 = vector.load %arg13[%c0_1524, %c0_1525] : memref<8x128xf32, #tpu.memory_space<vmem>>, vector<8x128xf32>
    tpu.vector_store %arg13[%c0_1524, %c0_1525], %831 {strides = array<i32>} : memref<8x128xf32, #tpu.memory_space<vmem>>, vector<8x128xf32>,
    %c0_1526 = arith.constant 0 : index
    %c0_1527 = arith.constant 0 : index
    %833 = vector.load %arg13[%c0_1526, %c0_1527] : memref<8x128xf32, #tpu.memory_space<vmem>>, vector<8x8xf32>
    %c0_1528 = arith.constant 0 : index
    %c8_1529 = arith.constant 8 : index
    %834 = vector.load %arg13[%c0_1528, %c8_1529] : memref<8x128xf32, #tpu.memory_space<vmem>>, vector<8x8xf32>
    %c0_1530 = arith.constant 0 : index
    %c16_1531 = arith.constant 16 : index
    %835 = vector.load %arg13[%c0_1530, %c16_1531] : memref<8x128xf32, #tpu.memory_space<vmem>>, vector<8x8xf32>
    %c0_1532 = arith.constant 0 : index
    %c24_1533 = arith.constant 24 : index
    %836 = vector.load %arg13[%c0_1532, %c24_1533] : memref<8x128xf32, #tpu.memory_space<vmem>>, vector<8x8xf32>
    %c0_1534 = arith.constant 0 : index
    %c32_1535 = arith.constant 32 : index
    %837 = vector.load %arg13[%c0_1534, %c32_1535] : memref<8x128xf32, #tpu.memory_space<vmem>>, vector<8x8xf32>
    %c0_1536 = arith.constant 0 : index
    %c40_1537 = arith.constant 40 : index
    %838 = vector.load %arg13[%c0_1536, %c40_1537] : memref<8x128xf32, #tpu.memory_space<vmem>>, vector<8x8xf32>
    %c0_1538 = arith.constant 0 : index
    %c48_1539 = arith.constant 48 : index
    %839 = vector.load %arg13[%c0_1538, %c48_1539] : memref<8x128xf32, #tpu.memory_space<vmem>>, vector<8x8xf32>
    %c0_1540 = arith.constant 0 : index
    %c56_1541 = arith.constant 56 : index
    %840 = vector.load %arg13[%c0_1540, %c56_1541] : memref<8x128xf32, #tpu.memory_space<vmem>>, vector<8x8xf32>
    %c0_1542 = arith.constant 0 : index
    %c64_1543 = arith.constant 64 : index
    %841 = vector.load %arg13[%c0_1542, %c64_1543] : memref<8x128xf32, #tpu.memory_space<vmem>>, vector<8x8xf32>
    %c0_1544 = arith.constant 0 : index
    %c72_1545 = arith.constant 72 : index
    %842 = vector.load %arg13[%c0_1544, %c72_1545] : memref<8x128xf32, #tpu.memory_space<vmem>>, vector<8x8xf32>
    %c0_1546 = arith.constant 0 : index
    %c80_1547 = arith.constant 80 : index
    %843 = vector.load %arg13[%c0_1546, %c80_1547] : memref<8x128xf32, #tpu.memory_space<vmem>>, vector<8x8xf32>
    %c0_1548 = arith.constant 0 : index
    %c88_1549 = arith.constant 88 : index
    %844 = vector.load %arg13[%c0_1548, %c88_1549] : memref<8x128xf32, #tpu.memory_space<vmem>>, vector<8x8xf32>
    %c0_1550 = arith.constant 0 : index
    %c96_1551 = arith.constant 96 : index
    %845 = vector.load %arg13[%c0_1550, %c96_1551] : memref<8x128xf32, #tpu.memory_space<vmem>>, vector<8x8xf32>
    %c0_1552 = arith.constant 0 : index
    %c104_1553 = arith.constant 104 : index
    %846 = vector.load %arg13[%c0_1552, %c104_1553] : memref<8x128xf32, #tpu.memory_space<vmem>>, vector<8x8xf32>
    %c0_1554 = arith.constant 0 : index
    %c112_1555 = arith.constant 112 : index
    %847 = vector.load %arg13[%c0_1554, %c112_1555] : memref<8x128xf32, #tpu.memory_space<vmem>>, vector<8x8xf32>
    %c0_1556 = arith.constant 0 : index
    %c120 = arith.constant 120 : index
    %848 = vector.load %arg13[%c0_1556, %c120] : memref<8x128xf32, #tpu.memory_space<vmem>>, vector<8x8xf32>
    %849 = tpu.concatenate %833, %834, %835, %836, %837, %838, %839, %840, %841, %842, %843, %844, %845, %846, %847, %848 in 0 : vector<8x8xf32>, vector<8x8xf32>, vector<8x8xf32>, vector<8x8xf32>, vector<8x8xf32>, vector<8x8xf32>, vector<8x8xf32>, vector<8x8xf32>, vector<8x8xf32>, vector<8x8xf32>, vector<8x8xf32>, vector<8x8xf32>, vector<8x8xf32>, vector<8x8xf32>, vector<8x8xf32>, vector<8x8xf32> -> vector<128x8xf32>
    %850 = tpu.transpose %849, [1, 0] : vector<128x8xf32> -> vector<8x128xf32>
    %c0_1557 = arith.constant 0 : index
    %c0_1558 = arith.constant 0 : index
    %851 = vector.load %arg6[%c0_1557, %c0_1558] : memref<128x128xf32, #tpu.memory_space<vmem>>, vector<128x128xf32>
    %cst_1559 = arith.constant dense<0.000000e+00> : vector<8x128xf32>
    %852 = tpu.matmul %850, %851, %cst_1559 {dimension_numbers = #tpu.dot_dimension_numbers<[1], [0], [0], [1], [0, 0, 1, 1], [], []>} : vector<8x128xf32>, vector<128x128xf32>, vector<8x128xf32> -> vector<8x128xf32>
    %c0_1560 = arith.constant 0 : index
    %c0_1561 = arith.constant 0 : index
    %853 = vector.load %arg7[%c0_1560, %c0_1561] : memref<1x128xf32, #tpu.memory_space<vmem>>, vector<1x128xf32>
    %854 = vector.broadcast %853 : vector<1x128xf32> to vector<8x128xf32>
    %855 = arith.addf %852, %854 : vector<8x128xf32>
    %cst_1562 = arith.constant 0.000000e+00 : f32
    %856 = vector.broadcast %cst_1562 : f32 to vector<8x128xf32>
    %857 = arith.maximumf %855, %856 : vector<8x128xf32>
    %c0_1563 = arith.constant 0 : index
    %c0_1564 = arith.constant 0 : index
    %858 = vector.load %arg8[%c0_1563, %c0_1564] : memref<128x128xf32, #tpu.memory_space<vmem>>, vector<128x128xf32>
    %cst_1565 = arith.constant dense<0.000000e+00> : vector<8x128xf32>
    %859 = tpu.matmul %857, %858, %cst_1565 {dimension_numbers = #tpu.dot_dimension_numbers<[1], [0], [0], [1], [0, 0, 1, 1], [], []>} : vector<8x128xf32>, vector<128x128xf32>, vector<8x128xf32> -> vector<8x128xf32>
    %c0_1566 = arith.constant 0 : index
    %c0_1567 = arith.constant 0 : index
    %860 = vector.load %arg9[%c0_1566, %c0_1567] : memref<1x128xf32, #tpu.memory_space<vmem>>, vector<1x128xf32>
    %861 = vector.broadcast %860 : vector<1x128xf32> to vector<8x128xf32>
    %862 = arith.addf %859, %861 : vector<8x128xf32>
    %c0_1568 = arith.constant 0 : index
    %c0_1569 = arith.constant 0 : index
    %863 = vector.load %arg10[%c0_1568, %c0_1569] : memref<8x128xf32, #tpu.memory_space<vmem>>, vector<8x128xf32>
    tpu.vector_store %arg10[%c0_1568, %c0_1569], %862 {strides = array<i32>} : memref<8x128xf32, #tpu.memory_space<vmem>>, vector<8x128xf32>,
    return
  }
  func.func @transform_0(%arg0: i32) -> (i32, i32, i32) {
    %c0_i32 = arith.constant 0 : i32
    %c0_i32_0 = arith.constant 0 : i32
    %c0_i32_1 = arith.constant 0 : i32
    return %arg0, %c0_i32, %c0_i32_0 : i32, i32, i32
  }
  func.func @transform_1(%arg0: i32) -> (i32, i32) {
    %c0_i32 = arith.constant 0 : i32
    %c0_i32_0 = arith.constant 0 : i32
    %c0_i32_1 = arith.constant 0 : i32
    return %c0_i32, %c0_i32_0 : i32, i32
  }
  func.func @transform_2(%arg0: i32) -> (i32, i32) {
    %c0_i32 = arith.constant 0 : i32
    %c0_i32_0 = arith.constant 0 : i32
    %c0_i32_1 = arith.constant 0 : i32
    return %c0_i32, %c0_i32_0 : i32, i32
  }
  func.func @transform_3(%arg0: i32) -> (i32, i32) {
    %c0_i32 = arith.constant 0 : i32
    %c0_i32_0 = arith.constant 0 : i32
    %c0_i32_1 = arith.constant 0 : i32
    return %c0_i32, %c0_i32_0 : i32, i32
  }
  func.func @transform_4(%arg0: i32) -> (i32, i32) {
    %c0_i32 = arith.constant 0 : i32
    %c0_i32_0 = arith.constant 0 : i32
    %c0_i32_1 = arith.constant 0 : i32
    return %c0_i32, %c0_i32_0 : i32, i32
  }
  func.func @transform_5(%arg0: i32) -> (i32, i32) {
    %c0_i32 = arith.constant 0 : i32
    %c0_i32_0 = arith.constant 0 : i32
    %c0_i32_1 = arith.constant 0 : i32
    return %c0_i32, %c0_i32_0 : i32, i32
  }
  func.func @transform_6(%arg0: i32) -> (i32, i32) {
    %c0_i32 = arith.constant 0 : i32
    %c0_i32_0 = arith.constant 0 : i32
    %c0_i32_1 = arith.constant 0 : i32
    return %c0_i32, %c0_i32_0 : i32, i32
  }
  func.func @transform_7(%arg0: i32) -> (i32, i32) {
    %c0_i32 = arith.constant 0 : i32
    %c0_i32_0 = arith.constant 0 : i32
    %c0_i32_1 = arith.constant 0 : i32
    return %c0_i32, %c0_i32_0 : i32, i32
  }
  func.func @transform_8(%arg0: i32) -> (i32, i32) {
    %c0_i32 = arith.constant 0 : i32
    %c0_i32_0 = arith.constant 0 : i32
    %c0_i32_1 = arith.constant 0 : i32
    return %c0_i32, %c0_i32_0 : i32, i32
  }
  func.func @transform_9(%arg0: i32) -> (i32, i32) {
    %c0_i32 = arith.constant 0 : i32
    %c0_i32_0 = arith.constant 0 : i32
    return %arg0, %c0_i32 : i32, i32
  }
}

</mosaic_0001>

<bundles_post_ra>
// kernel: lenet_forward.1
= control target key start
LH: loop header
LB: loop body
LE: loop exit
PB: predicated region body
PF: predicated region fallthrough
CT: control target
= control target key end

     0   :  { %s7930_s0 = inlined_call_operand.vmem [shape: f32[2,25,4608], index: 0, kind: input, shape index: {}]   ;;  %s7931_s1 = inlined_call_operand.vmem [shape: f32[4,25], index: 1, kind: input, shape index: {}]   ;;  %s7932_s2 = inlined_call_operand.vmem [shape: f32[4,1], index: 2, kind: input, shape index: {}]   ;;  %s7933_s3 = inlined_call_operand.vmem [shape: f32[8,100], index: 3, kind: input, shape index: {}]   ;;  %s7934_s4 = inlined_call_operand.vmem [shape: f32[8,1], index: 4, kind: input, shape index: {}]   ;;  %s7935_s5 = inlined_call_operand.vmem [shape: f32[128,128], index: 5, kind: input, shape index: {}]   ;;  %s7936_s6 = inlined_call_operand.vmem [shape: f32[1,128], index: 6, kind: input, shape index: {}]   ;;  %s7937_s7 = inlined_call_operand.vmem [shape: f32[128,128], index: 7, kind: input, shape index: {}]   ;;  %s7938_s8 = inlined_call_operand.vmem [shape: f32[1,128], index: 8, kind: input, shape index: {}]   ;;  %s7939_s9 = inlined_call_operand.hbm [shape: f32[16,128], index: 9, kind: output, shape index: {}]  }
   0x1   :  { %7975 = sst [smem:[#allocation10_spill]] %s7930_s0 }
   0x2   :  { %7976 = sst [smem:[#allocation11_spill]] %s7931_s1 }
   0x3   :  { %7977 = sst [smem:[#allocation12_spill]] %s7932_s2 }
   0x4   :  { %14 = vsyncpa [#allocation6], 0 }
   0x5   :  { %16 = vsyncpa [#allocation6 + $0x1], 0  ;;  %s6099_s30 = smov 0   ;;  %s6101_s10 = smov 0  }
   0x6   :  { %s6103_s11 = smov 0   ;;  %s6105_s12 = smov 0  }
   0x7 LB: > { %7978 = sst [smem:[#allocation8_spill]] %s6022_s11  ;;  %s6120_s13 = sadd.s32 4294967295, %s6026_s12   ;;  %s6026_s12 = sphi %s6105_s12, %s8017_s12   ;;  %s6022_s11 = sphi %s6103_s11, %s8014_s11   ;;  %s6018_s10 = sphi %s6101_s10, %s8016_s10   ;;  %s6014_s30 = sphi %s6099_s30, %s8015_s30  }
   0x8   : > { %s5277_s14 = sadd.s32 4294967294, %s6026_s12   ;;  %s6124_s15 = sadd.s32 1, %s6026_s12  }
   0x9   : > { %s223_s16 = sadd.s32 1, %s6022_s11  ;;  %s220_s17 = ssub.s32 %s6026_s12, %s6124_s15 }
   0xa   : > { %p233_p0 = scmp.ne.s32.totalorder %s6022_s11, %s6018_s10  ;;  %p221_p1 = scmp.eq.s32.totalorder %s220_s17, 0 }
   0xb   : > { %p234_p2 = scmp.eq.s32.totalorder %s6120_s13, 1  ;;  %p239_p3 = scmp.ne.s32.totalorder %s6018_s10, %s6014_s30 }
   0xc   : > { %p240_p4 = scmp.eq.s32.totalorder %s5277_s14, 1  ;;  %p5280_p7 = scmp.ge.s32.totalorder %s6026_s12, 1 }
   0xd   : > { %s6135_s18 = scalar_select %p221_p1, %s6022_s11, %s223_s16  }
   0xe   : > { %p6137_p5 = por %p234_p2, %p233_p0  ;;  %p6141_p6 = por %p240_p4, %p239_p3 }
   0xf   : > { %7979 = sst [smem:[#allocation9_spill]] %s6135_s18  ;;  %p290_p8 = scmp.lt.s32.totalorder %s6026_s12, 3 }
  0x11   : > { %p291_p9 = pnand %p5280_p7, %p290_p8 }
  0x12   : > { %p326_p10 = scmp.lt.s32.totalorder (!%p291_p9), %s6120_s13, 1  ;;  %v6028_v0 = vmov (!%p291_p9), 0.0   ;;  %s7982_s2 = sld [smem:[#allocation12_spill]] (!%p291_p9)  ;;  %v6029_v2 = vmov (!%p291_p9), 0   ;;  %vm480_vm0 = vcmask (!%p291_p9), 1040384   ;;  %vm6030_vm1 = vmmov (!%p291_p9), 1  }
  0x13   : > { %294 = sbr.rel (%p291_p9) target bundleno = 2239 (0x8bf), region = 56  ;;  %653 = vmatprep.mubr.f32.mxu0 (!%p291_p9), %v6028_v0  ;;  %724 = vmatprep.mubr.f32.mxu1 (!%p291_p9), %v6028_v0  ;;  %s7983_s0 = sld [smem:[#allocation10_spill]] (!%p291_p9)  ;;  %vm6159_vm2 = vmpackc.low (!%p291_p9), %vm480_vm0, %vm6030_vm1  ;;  %vm476_vm3 = vcmask (!%p291_p9), 203776   ;;  %vm1940_vm4 = vcmask (!%p291_p9), 257024   ;;  %vm1969_vm5 = vcmask (!%p291_p9), 261124   ;;  %vm1947_vm6 = vcmask (!%p291_p9), 519424  }
  0x14   : > { %5789 = vset.pattern.permute.xlu0 (!%p291_p9), %v6029_v2  ;;  %5790 = vset.pattern.permute.xlu1 (!%p291_p9), %v6029_v2  ;;  %s7986_s1 = sld [smem:[#allocation11_spill]] (!%p291_p9)  ;;  %s7950_s14 = smov (!%p291_p9), 96   ;;  %vm1954_vm7 = vcmask (!%p291_p9), 781824   ;;  %vm1961_vm8 = vcmask (!%p291_p9), 1044224   ;;  %vm2071_vm9 = vcmask (!%p291_p9), 654336   ;;  %vm7959_vm10 = vcmask (!%p291_p9), 719872  }
  0x15   : > { %s7946_s16 = smov (!%p291_p9), 112   ;;  %s7952_s17 = smov (!%p291_p9), 80   ;;  %vm1977_vm11 = vcmask (!%p291_p9), 523524   ;;  %vm1985_vm12 = vcmask (!%p291_p9), 785924   ;;  %vm1993_vm13 = vcmask (!%p291_p9), 1048324   ;;  %vm2293_vm14 = vcmask (!%p291_p9), 457728  }
  0x16   : > { %s7944_s21 = smov (!%p291_p9), 120   ;;  %s7940_s22 = smov (!%p291_p9), 104   ;;  %vm2095_vm15 = vcmask (!%p291_p9), 392192   ;;  %vm7958_vm0 = vcmask (!%p291_p9), 326656   ;;  %vm2337_vm1 = vcmask (!%p291_p9), 982016  }
  0x17   : > { %s7956_s25 = smov (!%p291_p9), 64   ;;  %s7954_s26 = smov (!%p291_p9), 56  }
  0x18   : > { %v1894_v1 = vld [vmem:[%s7982_s2] sm:$0xf] (!%p291_p9)  ;;  %s7961_s28 = smov (!%p291_p9), 24   ;;  %s7971_s29 = smov (!%p291_p9), 48  }
  0x19   : > { %1897 = vperm.xlu0 (!%p291_p9), %5789, %v1894_v1   ;;  %s8001_s2 = smov (!%p291_p9), 48   ;;  %s323_s11 = sand.u32 (!%p291_p9), 1, %s6018_s10  }
  0x1a   : > { %s327_s23 = scalar_select %p326_p10, %s6120_s13, 1  ;;  %v6188_v30 = vld [vmem:[%s7986_s1] sm:$0xf] }
  0x1b   : > { %s8000_s1 = smov 40   ;;  %s5281_s18 = sshll.u32 %s323_s11, 3 }
  0x1c   : > { %s5729_s24 = smul.u32 1152, %s327_s23  ;;  %s7948_s23 = smov 88  }
  0x1e   : > { %s6157_s27 = scalar_lea.vmem %s7983_s0, %s5729_s24  ;;  %s7942_s24 = smov 72  }
  0x1f   : > { %v333_v4 = vld [vmem:[%s6157_s27 + $0x8] sm:$0xff]  ;;  %v335_v6 = vld [vmem:[%s6157_s27 + $0x18] sm:$0xff]  ;;  %v332_v9 = vld [vmem:[%s6157_s27] sm:$0xff]  ;;  %s7998_s0 = smov 24  }
  0x20   : > { %v369_v5 = vld [vmem:[%s6157_s27 + $0x128] sm:$0xff]  ;;  %v371_v8 = vld [vmem:[%s6157_s27 + $0x138] sm:$0xff]  ;;  %v368_v10 = vld [vmem:[%s6157_s27 + $0x120] sm:$0xff] }
  0x21   : > { %v5453_v7 = vpack.c.bf16 %v369_v5, %v333_v4  ;;  %v5463_v11 = vpack.c.bf16 %v371_v8, %v335_v6  ;;  %v5455_v12 = vpack.c.bf16 %v368_v10, %v332_v9  ;;  %v334_v13 = vld [vmem:[%s6157_s27 + $0x10] sm:$0xff]  ;;  %v405_v15 = vld [vmem:[%s6157_s27 + $0x248] sm:$0xff]  ;;  %v407_v18 = vld [vmem:[%s6157_s27 + $0x258] sm:$0xff] }
  0x22   : > { %v370_v14 = vld [vmem:[%s6157_s27 + $0x130] sm:$0xff]  ;;  %v441_v17 = vld [vmem:[%s6157_s27 + $0x368] sm:$0x1]  ;;  %v443_v19 = vld [vmem:[%s6157_s27 + $0x378] sm:$0x1] }
  0x23   : > { %5454 = vmatprep.subr.bf16.mxu0 %v5453_v7  ;;  %v5465_v16 = vpack.c.bf16 %v370_v14, %v334_v13  ;;  %5464 = vmatprep.subr.bf16.mxu1 %v5463_v11  ;;  %v5457_v20 = vpack.c.bf16 %v441_v17, %v405_v15  ;;  %v5467_v21 = vpack.c.bf16 %v443_v19, %v407_v18  ;;  %v404_v22 = vld [vmem:[%s6157_s27 + $0x240] sm:$0xff]  ;;  %v406_v24 = vld [vmem:[%s6157_s27 + $0x250] sm:$0xff]  ;;  %v337_v27 = vld [vmem:[%s6157_s27 + $0x28] sm:$0xff] }
  0x24   : > { %5456 = vmatpush1.bf16.msra.mxu0 %v5455_v12  ;;  %v440_v23 = vld [vmem:[%s6157_s27 + $0x360] sm:$0x1]  ;;  %v442_v26 = vld [vmem:[%s6157_s27 + $0x370] sm:$0x1]  ;;  %v373_v28 = vld [vmem:[%s6157_s27 + $0x148] sm:$0xff] }
  0x25   : > { %5466 = vmatpush1.bf16.msra.mxu1 %v5465_v16  ;;  %v5460_v25 = vpack.c.bf16 %v440_v23, %v404_v22  ;;  %5459 = vmatprep.subr.msk.bf16.mxu0 %vm6159_vm2, %v5457_v20  ;;  %v5470_v29 = vpack.c.bf16 %v442_v26, %v406_v24  ;;  %v5473_v31 = vpack.c.bf16 %v373_v28, %v337_v27  ;;  %v339_v32 = vld [vmem:[%s6157_s27 + $0x38] sm:$0xff]  ;;  %v336_v34 = vld [vmem:[%s6157_s27 + $0x20] sm:$0xff]  ;;  %v338_v37 = vld [vmem:[%s6157_s27 + $0x30] sm:$0xff] }
  0x26   : > { %5469 = vmatprep.subr.msk.bf16.mxu1 %vm6159_vm2, %v5467_v21  ;;  %v375_v33 = vld [vmem:[%s6157_s27 + $0x158] sm:$0xff]  ;;  %v372_v36 = vld [vmem:[%s6157_s27 + $0x140] sm:$0xff]  ;;  %v374_v38 = vld [vmem:[%s6157_s27 + $0x150] sm:$0xff] }
  0x27   : > { %v5483_v35 = vpack.c.bf16 %v375_v33, %v339_v32  ;;  %v5475_v39 = vpack.c.bf16 %v372_v36, %v336_v34  ;;  %v409_v40 = vld [vmem:[%s6157_s27 + $0x268] sm:$0xff]  ;;  %v411_v42 = vld [vmem:[%s6157_s27 + $0x278] sm:$0xff]  ;;  %v5485_v43 = vpack.c.bf16 %v374_v38, %v338_v37  ;;  %v408_v46 = vld [vmem:[%s6157_s27 + $0x260] sm:$0xff] }
  0x28   : > { %5462 = vmatpush1.bf16.msk.msra.mxu0 %vm6159_vm2, %v5460_v25  ;;  %v445_v41 = vld [vmem:[%s6157_s27 + $0x388] sm:$0x1]  ;;  %v447_v45 = vld [vmem:[%s6157_s27 + $0x398] sm:$0x1]  ;;  %v444_v47 = vld [vmem:[%s6157_s27 + $0x380] sm:$0x1] }
  0x29   : > { %5472 = vmatpush1.bf16.msk.msra.mxu1 %vm6159_vm2, %v5470_v29  ;;  %5474 = vmatprep.subr.bf16.mxu0 %v5473_v31  ;;  %v5477_v44 = vpack.c.bf16 %v445_v41, %v409_v40  ;;  %v5487_v48 = vpack.c.bf16 %v447_v45, %v411_v42  ;;  %v410_v49 = vld [vmem:[%s6157_s27 + $0x270] sm:$0xff]  ;;  %v341_v51 = vld [vmem:[%s6157_s27 + $0x48] sm:$0xff]  ;;  %v343_v53 = vld [vmem:[%s6157_s27 + $0x58] sm:$0xff]  ;;  %v5480_v55 = vpack.c.bf16 %v444_v47, %v408_v46 }
  0x2a   : > { %5484 = vmatprep.subr.bf16.mxu1 %v5483_v35  ;;  %v446_v50 = vld [vmem:[%s6157_s27 + $0x390] sm:$0x1]  ;;  %v377_v52 = vld [vmem:[%s6157_s27 + $0x168] sm:$0xff]  ;;  %v379_v54 = vld [vmem:[%s6157_s27 + $0x178] sm:$0xff] }
  0x2b   : > { %5285 = vmatmul.mubr.msk.f32.vlgmr.msra.gmra.mrb[0].mxu0 %vm476_vm3, %v6188_v30  ;;  %v5490_v56 = vpack.c.bf16 %v446_v50, %v410_v49  ;;  %v5493_v57 = vpack.c.bf16 %v377_v52, %v341_v51  ;;  %v340_v58 = vld [vmem:[%s6157_s27 + $0x40] sm:$0xff]  ;;  %v342_v60 = vld [vmem:[%s6157_s27 + $0x50] sm:$0xff]  ;;  %v5503_v61 = vpack.c.bf16 %v379_v54, %v343_v53  ;;  %v413_v63 = vld [vmem:[%s6157_s27 + $0x288] sm:$0xff] }
  0x2c   : > { %5288 = vmatmul.mubr.msk.f32.vlgmr.msra.gmra.mrb[0].mxu1 %vm476_vm3, %v6188_v30  ;;  %5476 = vmatpush1.bf16.msra.mxu0 %v5475_v39  ;;  %v376_v59 = vld [vmem:[%s6157_s27 + $0x160] sm:$0xff]  ;;  %v378_v62 = vld [vmem:[%s6157_s27 + $0x170] sm:$0xff]  ;;  %v449_v1 = vld [vmem:[%s6157_s27 + $0x3a8] sm:$0x1] }
  0x2d   : > { %5486 = vmatpush1.bf16.msra.mxu1 %v5485_v43  ;;  %5479 = vmatprep.subr.msk.bf16.mxu0 %vm6159_vm2, %v5477_v44  ;;  %v415_v2 = vld [vmem:[%s6157_s27 + $0x298] sm:$0xff]  ;;  %v5495_v5 = vpack.c.bf16 %v376_v59, %v340_v58  ;;  %v5505_v6 = vpack.c.bf16 %v378_v62, %v342_v60  ;;  %v5497_v7 = vpack.c.bf16 %v449_v1, %v413_v63  ;;  %v412_v8 = vld [vmem:[%s6157_s27 + $0x280] sm:$0xff]  ;;  %v414_v10 = vld [vmem:[%s6157_s27 + $0x290] sm:$0xff] }
  0x2e   : > { %5489 = vmatprep.subr.msk.bf16.mxu1 %vm6159_vm2, %v5487_v48  ;;  %795 = vmatprep.mubr.f32.mxu0 %v6028_v0  ;;  %v451_v4 = vld [vmem:[%s6157_s27 + $0x3b8] sm:$0x1]  ;;  %v448_v9 = vld [vmem:[%s6157_s27 + $0x3a0] sm:$0x1]  ;;  %v450_v12 = vld [vmem:[%s6157_s27 + $0x3b0] sm:$0x1] }
  0x2f   : > { %866 = vmatprep.mubr.f32.mxu1 %v6028_v0  ;;  %v5507_v11 = vpack.c.bf16 %v451_v4, %v415_v2  ;;  %v345_v13 = vld [vmem:[%s6157_s27 + $0x68] sm:$0xff]  ;;  %v347_v15 = vld [vmem:[%s6157_s27 + $0x78] sm:$0xff]  ;;  %v5500_v17 = vpack.c.bf16 %v448_v9, %v412_v8  ;;  %v5510_v18 = vpack.c.bf16 %v450_v12, %v414_v10  ;;  %v344_v20 = vld [vmem:[%s6157_s27 + $0x60] sm:$0xff] }
  0x30   : > { %5482 = vmatpush1.bf16.msk.msra.mxu0 %vm6159_vm2, %v5480_v55  ;;  %v381_v14 = vld [vmem:[%s6157_s27 + $0x188] sm:$0xff]  ;;  %v383_v16 = vld [vmem:[%s6157_s27 + $0x198] sm:$0xff]  ;;  %v380_v21 = vld [vmem:[%s6157_s27 + $0x180] sm:$0xff] }
  0x31   : > { %5492 = vmatpush1.bf16.msk.msra.mxu1 %vm6159_vm2, %v5490_v56  ;;  %5494 = vmatprep.subr.bf16.mxu0 %v5493_v57  ;;  %v5513_v19 = vpack.c.bf16 %v381_v14, %v345_v13  ;;  %v346_v22 = vld [vmem:[%s6157_s27 + $0x70] sm:$0xff]  ;;  %v5523_v23 = vpack.c.bf16 %v383_v16, %v347_v15  ;;  %v417_v25 = vld [vmem:[%s6157_s27 + $0x2a8] sm:$0xff]  ;;  %v419_v27 = vld [vmem:[%s6157_s27 + $0x2b8] sm:$0xff]  ;;  %v5515_v29 = vpack.c.bf16 %v380_v21, %v344_v20 }
  0x32   : > { %5504 = vmatprep.subr.bf16.mxu1 %v5503_v61  ;;  %v382_v24 = vld [vmem:[%s6157_s27 + $0x190] sm:$0xff]  ;;  %v453_v26 = vld [vmem:[%s6157_s27 + $0x3c8] sm:$0x1]  ;;  %v455_v28 = vld [vmem:[%s6157_s27 + $0x3d8] sm:$0x1] }
  0x33   : > { %5291 = vmatmul.mubr.msk.f32.vlgmr.msra.gmra.mrb[2].mxu0 %vm476_vm3, %v6188_v30  ;;  %v5525_v31 = vpack.c.bf16 %v382_v24, %v346_v22  ;;  %v5517_v32 = vpack.c.bf16 %v453_v26, %v417_v25  ;;  %v416_v33 = vld [vmem:[%s6157_s27 + $0x2a0] sm:$0xff]  ;;  %v418_v35 = vld [vmem:[%s6157_s27 + $0x2b0] sm:$0xff]  ;;  %v5527_v36 = vpack.c.bf16 %v455_v28, %v419_v27  ;;  %v349_v38 = vld [vmem:[%s6157_s27 + $0x88] sm:$0xff] }
  0x34   : > { %5294 = vmatmul.mubr.msk.f32.vlgmr.msra.gmra.mrb[2].mxu1 %vm476_vm3, %v6188_v30  ;;  %5496 = vmatpush1.bf16.msra.mxu0 %v5495_v5  ;;  %v452_v34 = vld [vmem:[%s6157_s27 + $0x3c0] sm:$0x1]  ;;  %v454_v37 = vld [vmem:[%s6157_s27 + $0x3d0] sm:$0x1]  ;;  %v385_v39 = vld [vmem:[%s6157_s27 + $0x1a8] sm:$0xff] }
  0x35   : > { %5506 = vmatpush1.bf16.msra.mxu1 %v5505_v6  ;;  %5499 = vmatprep.subr.msk.bf16.mxu0 %vm6159_vm2, %v5497_v7  ;;  %v351_v40 = vld [vmem:[%s6157_s27 + $0x98] sm:$0xff]  ;;  %v5520_v42 = vpack.c.bf16 %v452_v34, %v416_v33  ;;  %v5530_v43 = vpack.c.bf16 %v454_v37, %v418_v35  ;;  %v5533_v44 = vpack.c.bf16 %v385_v39, %v349_v38  ;;  %v348_v45 = vld [vmem:[%s6157_s27 + $0x80] sm:$0xff]  ;;  %v350_v47 = vld [vmem:[%s6157_s27 + $0x90] sm:$0xff] }
  0x36   : > { %5509 = vmatprep.subr.msk.bf16.mxu1 %vm6159_vm2, %v5507_v11  ;;  %937 = vmatprep.mubr.f32.mxu0 %v6028_v0  ;;  %v387_v41 = vld [vmem:[%s6157_s27 + $0x1b8] sm:$0xff]  ;;  %v384_v46 = vld [vmem:[%s6157_s27 + $0x1a0] sm:$0xff]  ;;  %v386_v49 = vld [vmem:[%s6157_s27 + $0x1b0] sm:$0xff] }
  0x37   : > { %1008 = vmatprep.mubr.f32.mxu1 %v6028_v0  ;;  %v5543_v48 = vpack.c.bf16 %v387_v41, %v351_v40  ;;  %v421_v50 = vld [vmem:[%s6157_s27 + $0x2c8] sm:$0xff]  ;;  %v423_v52 = vld [vmem:[%s6157_s27 + $0x2d8] sm:$0xff]  ;;  %v5535_v54 = vpack.c.bf16 %v384_v46, %v348_v45  ;;  %v5545_v55 = vpack.c.bf16 %v386_v49, %v350_v47  ;;  %v420_v57 = vld [vmem:[%s6157_s27 + $0x2c0] sm:$0xff] }
  0x38   : > { %5502 = vmatpush1.bf16.msk.msra.mxu0 %vm6159_vm2, %v5500_v17  ;;  %v457_v51 = vld [vmem:[%s6157_s27 + $0x3e8] sm:$0x1]  ;;  %v459_v53 = vld [vmem:[%s6157_s27 + $0x3f8] sm:$0x1]  ;;  %v456_v58 = vld [vmem:[%s6157_s27 + $0x3e0] sm:$0x1] }
  0x39   : > { %5512 = vmatpush1.bf16.msk.msra.mxu1 %vm6159_vm2, %v5510_v18  ;;  %5514 = vmatprep.subr.bf16.mxu0 %v5513_v19  ;;  %v5537_v56 = vpack.c.bf16 %v457_v51, %v421_v50  ;;  %v422_v59 = vld [vmem:[%s6157_s27 + $0x2d0] sm:$0xff]  ;;  %v5547_v60 = vpack.c.bf16 %v459_v53, %v423_v52  ;;  %v353_v62 = vld [vmem:[%s6157_s27 + $0xa8] sm:$0xff]  ;;  %v355_v1 = vld [vmem:[%s6157_s27 + $0xb8] sm:$0xff]  ;;  %v5540_v4 = vpack.c.bf16 %v456_v58, %v420_v57 }
  0x3a   : > { %5524 = vmatprep.subr.bf16.mxu1 %v5523_v23  ;;  %v458_v61 = vld [vmem:[%s6157_s27 + $0x3f0] sm:$0x1]  ;;  %v389_v63 = vld [vmem:[%s6157_s27 + $0x1c8] sm:$0xff]  ;;  %v391_v2 = vld [vmem:[%s6157_s27 + $0x1d8] sm:$0xff] }
  0x3b   : > { %5297 = vmatmul.mubr.msk.f32.vlgmr.msra.gmra.mrb[4].mxu0 %vm476_vm3, %v6188_v30  ;;  %v5550_v5 = vpack.c.bf16 %v458_v61, %v422_v59  ;;  %v5553_v6 = vpack.c.bf16 %v389_v63, %v353_v62  ;;  %v352_v7 = vld [vmem:[%s6157_s27 + $0xa0] sm:$0xff]  ;;  %v354_v9 = vld [vmem:[%s6157_s27 + $0xb0] sm:$0xff]  ;;  %v5563_v10 = vpack.c.bf16 %v391_v2, %v355_v1  ;;  %v425_v12 = vld [vmem:[%s6157_s27 + $0x2e8] sm:$0xff] }
  0x3c   : > { %5300 = vmatmul.mubr.msk.f32.vlgmr.msra.gmra.mrb[4].mxu1 %vm476_vm3, %v6188_v30  ;;  %5516 = vmatpush1.bf16.msra.mxu0 %v5515_v29  ;;  %v388_v8 = vld [vmem:[%s6157_s27 + $0x1c0] sm:$0xff]  ;;  %v390_v11 = vld [vmem:[%s6157_s27 + $0x1d0] sm:$0xff]  ;;  %v461_v13 = vld [vmem:[%s6157_s27 + $0x408] sm:$0x1] }
  0x3d   : > { %5526 = vmatpush1.bf16.msra.mxu1 %v5525_v31  ;;  %5519 = vmatprep.subr.msk.bf16.mxu0 %vm6159_vm2, %v5517_v32  ;;  %v427_v14 = vld [vmem:[%s6157_s27 + $0x2f8] sm:$0xff]  ;;  %v5555_v16 = vpack.c.bf16 %v388_v8, %v352_v7  ;;  %v5565_v17 = vpack.c.bf16 %v390_v11, %v354_v9  ;;  %v5557_v18 = vpack.c.bf16 %v461_v13, %v425_v12  ;;  %v424_v19 = vld [vmem:[%s6157_s27 + $0x2e0] sm:$0xff]  ;;  %v426_v21 = vld [vmem:[%s6157_s27 + $0x2f0] sm:$0xff] }
  0x3e   : > { %5529 = vmatprep.subr.msk.bf16.mxu1 %vm6159_vm2, %v5527_v36  ;;  %1079 = vmatprep.mubr.f32.mxu0 %v6028_v0  ;;  %v463_v15 = vld [vmem:[%s6157_s27 + $0x418] sm:$0x1]  ;;  %v460_v20 = vld [vmem:[%s6157_s27 + $0x400] sm:$0x1]  ;;  %v462_v23 = vld [vmem:[%s6157_s27 + $0x410] sm:$0x1] }
  0x3f   : > { %1150 = vmatprep.mubr.f32.mxu1 %v6028_v0  ;;  %v5567_v22 = vpack.c.bf16 %v463_v15, %v427_v14  ;;  %v357_v24 = vld [vmem:[%s6157_s27 + $0xc8] sm:$0xff]  ;;  %v359_v26 = vld [vmem:[%s6157_s27 + $0xd8] sm:$0xff]  ;;  %v5560_v28 = vpack.c.bf16 %v460_v20, %v424_v19  ;;  %v5570_v29 = vpack.c.bf16 %v462_v23, %v426_v21  ;;  %v356_v32 = vld [vmem:[%s6157_s27 + $0xc0] sm:$0xff] }
  0x40   : > { %5522 = vmatpush1.bf16.msk.msra.mxu0 %vm6159_vm2, %v5520_v42  ;;  %v393_v25 = vld [vmem:[%s6157_s27 + $0x1e8] sm:$0xff]  ;;  %v395_v27 = vld [vmem:[%s6157_s27 + $0x1f8] sm:$0xff]  ;;  %v392_v33 = vld [vmem:[%s6157_s27 + $0x1e0] sm:$0xff] }
  0x41   : > { %5532 = vmatpush1.bf16.msk.msra.mxu1 %vm6159_vm2, %v5530_v43  ;;  %5534 = vmatprep.subr.bf16.mxu0 %v5533_v44  ;;  %v5573_v31 = vpack.c.bf16 %v393_v25, %v357_v24  ;;  %v358_v34 = vld [vmem:[%s6157_s27 + $0xd0] sm:$0xff]  ;;  %v5583_v35 = vpack.c.bf16 %v395_v27, %v359_v26  ;;  %v429_v37 = vld [vmem:[%s6157_s27 + $0x308] sm:$0xff]  ;;  %v431_v39 = vld [vmem:[%s6157_s27 + $0x318] sm:$0xff]  ;;  %v5575_v41 = vpack.c.bf16 %v392_v33, %v356_v32 }
  0x42   : > { %5544 = vmatprep.subr.bf16.mxu1 %v5543_v48  ;;  %v394_v36 = vld [vmem:[%s6157_s27 + $0x1f0] sm:$0xff]  ;;  %v465_v38 = vld [vmem:[%s6157_s27 + $0x428] sm:$0x1]  ;;  %v467_v40 = vld [vmem:[%s6157_s27 + $0x438] sm:$0x1] }
  0x43   : > { %5303 = vmatmul.mubr.msk.f32.vlgmr.msra.gmra.mrb[6].mxu0 %vm476_vm3, %v6188_v30  ;;  %v5585_v42 = vpack.c.bf16 %v394_v36, %v358_v34  ;;  %v5577_v43 = vpack.c.bf16 %v465_v38, %v429_v37  ;;  %v428_v44 = vld [vmem:[%s6157_s27 + $0x300] sm:$0xff]  ;;  %v430_v46 = vld [vmem:[%s6157_s27 + $0x310] sm:$0xff]  ;;  %v5587_v47 = vpack.c.bf16 %v467_v40, %v431_v39  ;;  %v361_v49 = vld [vmem:[%s6157_s27 + $0xe8] sm:$0xff] }
  0x44   : > { %5306 = vmatmul.mubr.msk.f32.vlgmr.msra.gmra.mrb[6].mxu1 %vm476_vm3, %v6188_v30  ;;  %5536 = vmatpush1.bf16.msra.mxu0 %v5535_v54  ;;  %v464_v45 = vld [vmem:[%s6157_s27 + $0x420] sm:$0x1]  ;;  %v466_v48 = vld [vmem:[%s6157_s27 + $0x430] sm:$0x1]  ;;  %v397_v50 = vld [vmem:[%s6157_s27 + $0x208] sm:$0xff] }
  0x45   : > { %5546 = vmatpush1.bf16.msra.mxu1 %v5545_v55  ;;  %5539 = vmatprep.subr.msk.bf16.mxu0 %vm6159_vm2, %v5537_v56  ;;  %v363_v51 = vld [vmem:[%s6157_s27 + $0xf8] sm:$0xff]  ;;  %v5580_v53 = vpack.c.bf16 %v464_v45, %v428_v44  ;;  %v5590_v54 = vpack.c.bf16 %v466_v48, %v430_v46  ;;  %v5593_v55 = vpack.c.bf16 %v397_v50, %v361_v49  ;;  %v360_v56 = vld [vmem:[%s6157_s27 + $0xe0] sm:$0xff]  ;;  %v362_v58 = vld [vmem:[%s6157_s27 + $0xf0] sm:$0xff] }
  0x46   : > { %5549 = vmatprep.subr.msk.bf16.mxu1 %vm6159_vm2, %v5547_v60  ;;  %1221 = vmatprep.mubr.f32.mxu0 %v6028_v0  ;;  %v399_v52 = vld [vmem:[%s6157_s27 + $0x218] sm:$0xff]  ;;  %v396_v57 = vld [vmem:[%s6157_s27 + $0x200] sm:$0xff]  ;;  %v398_v60 = vld [vmem:[%s6157_s27 + $0x210] sm:$0xff] }
  0x47   : > { %1292 = vmatprep.mubr.f32.mxu1 %v6028_v0  ;;  %v5603_v59 = vpack.c.bf16 %v399_v52, %v363_v51  ;;  %v433_v61 = vld [vmem:[%s6157_s27 + $0x328] sm:$0xff]  ;;  %v435_v63 = vld [vmem:[%s6157_s27 + $0x338] sm:$0xff]  ;;  %v5595_v2 = vpack.c.bf16 %v396_v57, %v360_v56  ;;  %v468_v7 = vld [vmem:[%s6157_s27 + $0x440] sm:$0x1] }
  0x48   : > { %5542 = vmatpush1.bf16.msk.msra.mxu0 %vm6159_vm2, %v5540_v4  ;;  %v469_v62 = vld [vmem:[%s6157_s27 + $0x448] sm:$0x1]  ;;  %v471_v1 = vld [vmem:[%s6157_s27 + $0x458] sm:$0x1]  ;;  %v5605_v4 = vpack.c.bf16 %v398_v60, %v362_v58  ;;  %v434_v8 = vld [vmem:[%s6157_s27 + $0x330] sm:$0xff] }
  0x49   : > { %5552 = vmatpush1.bf16.msk.msra.mxu1 %vm6159_vm2, %v5550_v5  ;;  %5554 = vmatprep.subr.bf16.mxu0 %v5553_v6  ;;  %v5597_v5 = vpack.c.bf16 %v469_v62, %v433_v61  ;;  %v432_v6 = vld [vmem:[%s6157_s27 + $0x320] sm:$0xff]  ;;  %v5607_v9 = vpack.c.bf16 %v471_v1, %v435_v63  ;;  %v365_v11 = vld [vmem:[%s6157_s27 + $0x108] sm:$0xff]  ;;  %v367_v13 = vld [vmem:[%s6157_s27 + $0x118] sm:$0xff] }
  0x4a   : > { %5564 = vmatprep.subr.bf16.mxu1 %v5563_v10  ;;  %v470_v10 = vld [vmem:[%s6157_s27 + $0x450] sm:$0x1]  ;;  %v401_v12 = vld [vmem:[%s6157_s27 + $0x228] sm:$0xff]  ;;  %v403_v14 = vld [vmem:[%s6157_s27 + $0x238] sm:$0xff]  ;;  %v5600_v15 = vpack.c.bf16 %v468_v7, %v432_v6 }
  0x4b   : > { %5309 = vmatmul.mubr.msk.f32.vlgmr.msra.gmra.mrb[8].mxu0 %vm476_vm3, %v6188_v30  ;;  %v400_v19 = vld [vmem:[%s6157_s27 + $0x220] sm:$0xff]  ;;  %v366_v20 = vld [vmem:[%s6157_s27 + $0x110] sm:$0xff]  ;;  %v5623_v21 = vpack.c.bf16 %v403_v14, %v367_v13  ;;  %v437_v23 = vld [vmem:[%s6157_s27 + $0x348] sm:$0xff] }
  0x4c   : > { %5312 = vmatmul.mubr.msk.f32.vlgmr.msra.gmra.mrb[8].mxu1 %vm476_vm3, %v6188_v30  ;;  %5556 = vmatpush1.bf16.msra.mxu0 %v5555_v16  ;;  %v5610_v16 = vpack.c.bf16 %v470_v10, %v434_v8  ;;  %v473_v24 = vld [vmem:[%s6157_s27 + $0x468] sm:$0x1]  ;;  %v439_v25 = vld [vmem:[%s6157_s27 + $0x358] sm:$0xff]  ;;  %v472_v32 = vld [vmem:[%s6157_s27 + $0x460] sm:$0x1] }
  0x4d   : > { %5566 = vmatpush1.bf16.msra.mxu1 %v5565_v17  ;;  %5559 = vmatprep.subr.msk.bf16.mxu0 %vm6159_vm2, %v5557_v18  ;;  %v5613_v17 = vpack.c.bf16 %v401_v12, %v365_v11  ;;  %v364_v18 = vld [vmem:[%s6157_s27 + $0x100] sm:$0xff]  ;;  %v475_v26 = vld [vmem:[%s6157_s27 + $0x478] sm:$0x1]  ;;  %v438_v34 = vld [vmem:[%s6157_s27 + $0x350] sm:$0xff] }
  0x4e   : > { %5569 = vmatprep.subr.msk.bf16.mxu1 %vm6159_vm2, %v5567_v22  ;;  %1363 = vmatprep.mubr.f32.mxu0 %v6028_v0  ;;  %v402_v22 = vld [vmem:[%s6157_s27 + $0x230] sm:$0xff]  ;;  %v5615_v27 = vpack.c.bf16 %v400_v19, %v364_v18  ;;  %v5627_v33 = vpack.c.bf16 %v475_v26, %v439_v25 }
  0x4f   : > { %1434 = vmatprep.mubr.f32.mxu1 %v6028_v0 }
  0x50   : > { %5562 = vmatpush1.bf16.msk.msra.mxu0 %vm6159_vm2, %v5560_v28  ;;  %v5625_v28 = vpack.c.bf16 %v402_v22, %v366_v20 }
  0x51   : > { %5572 = vmatpush1.bf16.msk.msra.mxu1 %vm6159_vm2, %v5570_v29  ;;  %5574 = vmatprep.subr.bf16.mxu0 %v5573_v31  ;;  %v5617_v29 = vpack.c.bf16 %v473_v24, %v437_v23  ;;  %v436_v31 = vld [vmem:[%s6157_s27 + $0x340] sm:$0xff] }
  0x52   : > { %5584 = vmatprep.subr.bf16.mxu1 %v5583_v35  ;;  %v474_v35 = vld [vmem:[%s6157_s27 + $0x470] sm:$0x1]  ;;  %v5620_v36 = vpack.c.bf16 %v472_v32, %v436_v31  ;;  %s7969_s27 = smov 40  }
  0x53   : > { %5315 = vmatmul.mubr.msk.f32.vlgmr.msra.gmra.mrb[10].mxu0 %vm476_vm3, %v6188_v30  ;;  %v5630_v37 = vpack.c.bf16 %v474_v35, %v438_v34 }
  0x54   : > { %5318 = vmatmul.mubr.msk.f32.vlgmr.msra.gmra.mrb[10].mxu1 %vm476_vm3, %v6188_v30  ;;  %5576 = vmatpush1.bf16.msra.mxu0 %v5575_v41 }
  0x55   : > { %5586 = vmatpush1.bf16.msra.mxu1 %v5585_v42  ;;  %5579 = vmatprep.subr.msk.bf16.mxu0 %vm6159_vm2, %v5577_v43 }
  0x56   : > { %5589 = vmatprep.subr.msk.bf16.mxu1 %vm6159_vm2, %v5587_v47  ;;  %1505 = vmatprep.mubr.f32.mxu0 %v6028_v0 }
  0x57   : > { %1576 = vmatprep.mubr.f32.mxu1 %v6028_v0 }
  0x58   : > { %5582 = vmatpush1.bf16.msk.msra.mxu0 %vm6159_vm2, %v5580_v53 }
  0x59   : > { %5592 = vmatpush1.bf16.msk.msra.mxu1 %vm6159_vm2, %v5590_v54  ;;  %5594 = vmatprep.subr.bf16.mxu0 %v5593_v55 }
  0x5a   : > { %5604 = vmatprep.subr.bf16.mxu1 %v5603_v59 }
  0x5b   : > { %5321 = vmatmul.mubr.msk.f32.vlgmr.msra.gmra.mrb[12].mxu0 %vm476_vm3, %v6188_v30 }
  0x5c   : > { %5324 = vmatmul.mubr.msk.f32.vlgmr.msra.gmra.mrb[12].mxu1 %vm476_vm3, %v6188_v30  ;;  %5596 = vmatpush1.bf16.msra.mxu0 %v5595_v2 }
  0x5d   : > { %5606 = vmatpush1.bf16.msra.mxu1 %v5605_v4  ;;  %5599 = vmatprep.subr.msk.bf16.mxu0 %vm6159_vm2, %v5597_v5 }
  0x5e   : > { %5609 = vmatprep.subr.msk.bf16.mxu1 %vm6159_vm2, %v5607_v9  ;;  %1647 = vmatprep.mubr.f32.mxu0 %v6028_v0 }
  0x5f   : > { %1718 = vmatprep.mubr.f32.mxu1 %v6028_v0 }
  0x60   : > { %5602 = vmatpush1.bf16.msk.msra.mxu0 %vm6159_vm2, %v5600_v15 }
  0x61   : > { %5612 = vmatpush1.bf16.msk.msra.mxu1 %vm6159_vm2, %v5610_v16  ;;  %5614 = vmatprep.subr.bf16.mxu0 %v5613_v17 }
  0x62   : > { %5624 = vmatprep.subr.bf16.mxu1 %v5623_v21 }
  0x63   : > { %5327 = vmatmul.mubr.msk.f32.vlgmr.msra.gmra.mrb[14].mxu0 %vm476_vm3, %v6188_v30 }
  0x64   : > { %5330 = vmatmul.mubr.msk.f32.vlgmr.msra.gmra.mrb[14].mxu1 %vm476_vm3, %v6188_v30  ;;  %5616 = vmatpush1.bf16.msra.mxu0 %v5615_v27 }
  0x65   : > { %5626 = vmatpush1.bf16.msra.mxu1 %v5625_v28  ;;  %5619 = vmatprep.subr.msk.bf16.mxu0 %vm6159_vm2, %v5617_v29 }
  0x66   : > { %5629 = vmatprep.subr.msk.bf16.mxu1 %vm6159_vm2, %v5627_v33  ;;  %1789 = vmatprep.mubr.f32.mxu0 %v6028_v0 }
  0x67   : > { %1860 = vmatprep.mubr.f32.mxu1 %v6028_v0 }
  0x68   : > { %5622 = vmatpush1.bf16.msk.msra.mxu0 %vm6159_vm2, %v5620_v36 }
  0x69   : > { %5632 = vmatpush1.bf16.msk.msra.mxu1 %vm6159_vm2, %v5630_v37  ;;  %vm7960_vm2 = vcmask 64512  }
  0x6b   : > { %5333 = vmatmul.mubr.msk.f32.vlgmr.msra.gmra.mrb[16].mxu0 %vm476_vm3, %v6188_v30 }
  0x6c   : > { %5336 = vmatmul.mubr.msk.f32.vlgmr.msra.gmra.mrb[16].mxu1 %vm476_vm3, %v6188_v30  ;;  %4847 = vmatprep.mubr.f32.mxu0 %v6028_v0  ;;  %vm2177_vm3 = vcmask 195584  }
  0x6d   : > { %4918 = vmatprep.mubr.f32.mxu1 %v6028_v0 }
  0x98   : > { %v1898_v13 = vpop.permute.xlu0 %1897 }
  0xfe   : > { %v655_v38 = vpop.f32.mrb[0].mxu0 }
  0xff   : > { %v657_v39 = vpop.f32.mrb[1].mxu0  ;;  %v726_v40 = vpop.f32.mrb[0].mxu1 }
 0x100   : > { %v728_v41 = vpop.f32.mrb[1].mxu1 }
 0x106   : > { %v797_v42 = vpop.f32.mrb[2].mxu0 }
 0x107   : > { %v6438_v43 = vpop.f32.mrb[3].mxu0  ;;  %v6440_v44 = vpop.f32.mrb[2].mxu1 }
 0x108   : > { %v6442_v3 = vpop.f32.mrb[3].mxu1 }
 0x10e   : > { %v6444_v45 = vpop.f32.mrb[4].mxu0 }
 0x10f   : > { %v1010_v46 = vpop.f32.mrb[4].mxu1  ;;  %v941_v47 = vpop.f32.mrb[5].mxu0 }
 0x110   : > { %v1868_v30 = vmax.f32 %v657_v39, %v1010_v46  ;;  %v1867_v48 = vmax.f32 %v655_v38, %v941_v47  ;;  %v1012_v49 = vpop.f32.mrb[5].mxu1 }
 0x111   : > { %v1869_v50 = vmax.f32 %v726_v40, %v1012_v49 }
 0x116   : > { %v1081_v51 = vpop.f32.mrb[6].mxu0 }
 0x117   : > { %v1870_v52 = vmax.f32 %v728_v41, %v1081_v51  ;;  %v1152_v53 = vpop.f32.mrb[6].mxu1  ;;  %v1083_v54 = vpop.f32.mrb[7].mxu0 }
 0x118   : > { %v1872_v55 = vmax.f32 %v6438_v43, %v1152_v53  ;;  %v1871_v56 = vmax.f32 %v797_v42, %v1083_v54  ;;  %v1154_v57 = vpop.f32.mrb[7].mxu1 }
 0x119   : > { %v1873_v58 = vmax.f32 %v6440_v44, %v1154_v57 }
 0x11e   : > { %v1223_v59 = vpop.f32.mrb[8].mxu0 }
 0x11f   : > { %v1874_v60 = vmax.f32 %v6442_v3, %v1223_v59  ;;  %v1225_v61 = vpop.f32.mrb[9].mxu0  ;;  %v1294_v62 = vpop.f32.mrb[8].mxu1 }
 0x120   : > { %v1875_v63 = vmax.f32 %v6444_v45, %v1225_v61  ;;  %v1296_v1 = vpop.f32.mrb[9].mxu1 }
 0x126   : > { %v1365_v2 = vpop.f32.mrb[10].mxu0 }
 0x127   : > { %v1367_v4 = vpop.f32.mrb[11].mxu0  ;;  %v1436_v5 = vpop.f32.mrb[10].mxu1 }
 0x128   : > { %v1438_v6 = vpop.f32.mrb[11].mxu1 }
 0x12e   : > { %v1507_v7 = vpop.f32.mrb[12].mxu0 }
 0x12f   : > { %v1578_v8 = vpop.f32.mrb[12].mxu1  ;;  %v1509_v9 = vpop.f32.mrb[13].mxu0 }
 0x130   : > { %v1580_v10 = vpop.f32.mrb[13].mxu1 }
 0x131   : > { %v1876_v11 = vmax.f32 %v1294_v62, %v1580_v10 }
 0x133   : > { %v1885_v12 = vmax.f32 %v1867_v48, %v1876_v11 }
 0x135   : > { %v1900_v22 = vadd.f32 %v1898_v13, %v1885_v12 }
 0x136   : > { %v1649_v14 = vpop.f32.mrb[14].mxu0 }
 0x137   : > { %v1877_v15 = vmax.f32 %v1296_v1, %v1649_v14  ;;  %v1720_v16 = vpop.f32.mrb[14].mxu1  ;;  %v1651_v17 = vpop.f32.mrb[15].mxu0  ;;  %v6450_v31 = vmax.f32 %v1900_v22, 0.0 }
 0x138   : > { %v1879_v18 = vmax.f32 %v1367_v4, %v1720_v16  ;;  %v1878_v19 = vmax.f32 %v1365_v2, %v1651_v17  ;;  %v1722_v20 = vpop.f32.mrb[15].mxu1 }
 0x139   : > { %v1886_v21 = vmax.f32 %v1868_v30, %v1877_v15  ;;  %v1880_v23 = vmax.f32 %v1436_v5, %v1722_v20 }
 0x13a   : > { %v1888_v24 = vmax.f32 %v1870_v52, %v1879_v18  ;;  %v1887_v25 = vmax.f32 %v1869_v50, %v1878_v19 }
 0x13b   : > { %v1901_v26 = vadd.f32 %v1898_v13, %v1886_v21  ;;  %v1889_v27 = vmax.f32 %v1871_v56, %v1880_v23 }
 0x13c   : > { %v1903_v28 = vadd.f32 %v1898_v13, %v1888_v24  ;;  %v1902_v29 = vadd.f32 %v1898_v13, %v1887_v25 }
 0x13d   : > { %v6452_v32 = vmax.f32 %v1901_v26, 0.0  ;;  %v1904_v44 = vadd.f32 %v1898_v13, %v1889_v27 }
 0x13e   : > { %v1912_v33 = vmax.f32 %v1903_v28, 0.0  ;;  %v1911_v34 = vmax.f32 %v1902_v29, 0.0  ;;  %v1791_v35 = vpop.f32.mrb[16].mxu0  ;;  %v5962_v28 = vcombine.low %v6450_v31, %v6450_v31 }
 0x13f   : > { %v6456_v36 = vcombine.low %v6450_v31, %v6452_v32  ;;  %v1881_v37 = vmax.f32 %v1438_v6, %v1791_v35  ;;  %v1862_v38 = vpop.f32.mrb[16].mxu1  ;;  %v1793_v39 = vpop.f32.mrb[17].mxu0  ;;  %v6459_v51 = vmax.f32 %v1904_v44, 0.0  ;;  %v5961_v22 = vcombine.low %v6452_v32, %v6452_v32 }
 0x140   : > { %v1927_v40 = vcombine.low %v1911_v34, %v1912_v33  ;;  %v1883_v41 = vmax.f32 %v1509_v9, %v1862_v38  ;;  %v1882_v42 = vmax.f32 %v1507_v7, %v1793_v39  ;;  %v1864_v43 = vpop.f32.mrb[17].mxu1 }
 0x141   : > { %1934 = vst [vmem:[#allocation2] sm:$0xff] %v6456_v36  ;;  %v1890_v3 = vmax.f32 %v1872_v55, %v1881_v37  ;;  %v1884_v45 = vmax.f32 %v1578_v8, %v1864_v43 }
 0x142   : > { %1935 = vst [vmem:[#allocation2 + $0x8] sm:$0xff] %v1927_v40  ;;  %v1892_v46 = vmax.f32 %v1874_v60, %v1883_v41  ;;  %v1891_v47 = vmax.f32 %v1873_v58, %v1882_v42 }
 0x143   : > { %v1905_v30 = vadd.f32 %v1898_v13, %v1890_v3  ;;  %v1893_v48 = vmax.f32 %v1875_v63, %v1884_v45 }
 0x144   : > { %v1907_v49 = vadd.f32 %v1898_v13, %v1892_v46  ;;  %v1906_v50 = vadd.f32 %v1898_v13, %v1891_v47 }
 0x145   : > { %v1914_v52 = vmax.f32 %v1905_v30, 0.0  ;;  %v1908_v53 = vadd.f32 %v1898_v13, %v1893_v48 }
 0x146   : > { %v1916_v54 = vmax.f32 %v1907_v49, 0.0  ;;  %v1915_v56 = vmax.f32 %v1906_v50, 0.0 }
 0x147   : > { %v6462_v57 = vcombine.low %v6459_v51, %v1914_v52  ;;  %v1917_v59 = vmax.f32 %v1908_v53, 0.0 }
 0x148   : > { %v6464_v61 = vcombine.low %v1915_v56, %v1916_v54  ;;  %v1949_v55 = vld [vmem:[#allocation2] sm:$0xf]  ;;  %v1956_v58 = vld [vmem:[#allocation2 + $0x4] sm:$0xf] }
 0x149   : > { %v1942_v62 = vld [vmem:[#allocation2] sm:$0xf]  ;;  %1936 = vst [vmem:[#allocation2 + $0x10] sm:$0xff] %v6462_v57  ;;  %1938 = vst [vmem:[#allocation2 + $0x20] sm:$0xf] %v1917_v59  ;;  %1951 = vrot.lane.b32.xlu1 %v1949_v55, %s7950_s14 }
 0x14a   : > { %1944 = vrot.lane.b32.xlu0 %v1942_v62, %s7946_s16  ;;  %1937 = vst [vmem:[#allocation2 + $0x18] sm:$0xff] %v6464_v61  ;;  %v1995_v60 = vld [vmem:[#allocation2] sm:$0xf]  ;;  %v2018_v2 = vld [vmem:[#allocation2 + $0x4] sm:$0xf] }
 0x14b   : > { %v2001_v63 = vld [vmem:[#allocation2] sm:$0xf]  ;;  %v2075_v5 = vld [vmem:[#allocation2 + $0x4] sm:$0xf]  ;;  %v2657_v10 = vld [vmem:[#allocation2 + $0x8] sm:$0xf] }
 0x14c   : > { %v2052_v1 = vld [vmem:[#allocation2] sm:$0xf]  ;;  %v4200_v9 = vld [vmem:[#allocation2 + $0x4] sm:$0xf]  ;;  %v2712_v12 = vld [vmem:[#allocation2 + $0x8] sm:$0xf] }
 0x14d   : > { %1958 = vrot.lane.b32.xlu1 %v1956_v58, %s7952_s17  ;;  %v2058_v4 = vld [vmem:[#allocation2] sm:$0xf]  ;;  %v2663_v13 = vld [vmem:[#allocation2 + $0xc] sm:$0xf]  ;;  %v4206_v14 = vld [vmem:[#allocation2 + $0x4] sm:$0xf] }
 0x14e   : > { %1997 = vrot.lane.b32.xlu0 %v1995_v60, %s7944_s21  ;;  %v2236_v6 = vld [vmem:[#allocation2] sm:$0xf]  ;;  %v3503_v15 = vld [vmem:[#allocation2 + $0x8] sm:$0xf]  ;;  %v2773_v16 = vld [vmem:[#allocation2 + $0xc] sm:$0xf] }
 0x14f   : > { %v1939_v7 = vld [vmem:[#allocation2] sm:$0xf]  ;;  %v2651_v17 = vld [vmem:[#allocation2 + $0x8] sm:$0xf]  ;;  %v2779_v18 = vld [vmem:[#allocation2 + $0xc] sm:$0xf] }
 0x150   : > { %1941 = vst.msk [vmem:[#allocation3] sm:$0xf] %vm1940_vm4, %v1939_v7  ;;  %v2230_v8 = vld [vmem:[#allocation2] sm:$0xf]  ;;  %v2706_v19 = vld [vmem:[#allocation2 + $0x8] sm:$0xf] }
 0x151   : > { %2003 = vrot.lane.b32.xlu1 %v2001_v63, %s7940_s22  ;;  %v4184_v11 = vld [vmem:[#allocation2] sm:$0xf]  ;;  %s7965_s22 = smov 32   ;;  %v3515_v20 = vld [vmem:[#allocation2 + $0xc] sm:$0xf] }
 0x152   : > { %2010 = vrot.lane.b32.xlu0 %v6456_v36, %s7948_s23  ;;  %v2718_v21 = vld [vmem:[#allocation2 + $0xc] sm:$0xf]  ;;  %v5791_v24 = vld [vmem:[#allocation2] ss:$0 sps:$4 sm:$0xff]   ;;  %v2761_v27 = vld [vmem:[#allocation2 + $0x8] sm:$0xf] }
 0x153   : > { %v2669_v23 = vld [vmem:[#allocation2 + $0xc] sm:$0xf]  ;;  %v5792_v26 = vld [vmem:[#allocation2] ss:$0 sps:$4 sm:$0xff]   ;;  %v2767_v29 = vld [vmem:[#allocation2 + $0x8] sm:$0xf] }
 0x154   : > { %v2724_v25 = vld [vmem:[#allocation2 + $0xc] sm:$0xf]  ;;  %v5793_v33 = vld [vmem:[#allocation2 + $0x4] ss:$0 sps:$4 sm:$0xff]   ;;  %v2925_v34 = vld [vmem:[#allocation2 + $0x8] sm:$0xf] }
 0x155   : > { %2054 = vrot.lane.b32.xlu1 %v2052_v1, %s7946_s16  ;;  %v3509_v32 = vld [vmem:[#allocation2 + $0xc] sm:$0xf]  ;;  %v5794_v35 = vld [vmem:[#allocation2 + $0x4] ss:$0 sps:$4 sm:$0xff]   ;;  %v5795_v31 = vld [vmem:[#allocation2] ss:$0 sps:$4 sm:$0xff]  }
 0x156   : > { %2020 = vrot.lane.b32.xlu0 %v2018_v2, %s7942_s24  ;;  %v5797_v37 = vld [vmem:[#allocation2] ss:$0 sps:$4 sm:$0xff]   ;;  %v5798_v38 = vld [vmem:[#allocation2 + $0x8] ss:$0 sps:$4 sm:$0xff]   ;;  %v5800_v40 = vld [vmem:[#allocation2 + $0xc] ss:$0 sps:$4 sm:$0xff]  }
 0x157   : > { %v5799_v39 = vld [vmem:[#allocation2] ss:$0 sps:$4 sm:$0xff]   ;;  %v5802_v42 = vld [vmem:[#allocation2 + $0x8] ss:$0 sps:$4 sm:$0xff]   ;;  %v5803_v43 = vld [vmem:[#allocation2 + $0x4] ss:$0 sps:$4 sm:$0xff]  }
 0x158   : > { %v5801_v41 = vld [vmem:[#allocation2] ss:$0 sps:$4 sm:$0xff]   ;;  %v5804_v44 = vld [vmem:[#allocation2 + $0xc] ss:$0 sps:$4 sm:$0xff]   ;;  %v5903_v3 = vld [vmem:[#allocation2 + $0x14] ss:$0 sps:$4 sm:$0xff]  }
 0x159   : > { %2067 = vrot.lane.b32.xlu1 %v6456_v36, %s7952_s17  ;;  %v5904_v45 = vld [vmem:[#allocation2 + $0xc] ss:$0 sps:$4 sm:$0xff]   ;;  %4391 = vst.msk [vmem:[#allocation3 + $0xd8] sm:$0xf0] %vm1969_vm5, %v5903_v3  ;;  %v5805_v46 = vld [vmem:[#allocation2 + $0x4] ss:$0 sps:$4 sm:$0xff]  }
 0x15a   : > { %2060 = vrot.lane.b32.xlu0 %v2058_v4, %s7950_s14  ;;  %4441 = vst.msk [vmem:[#allocation3 + $0xf8] sm:$0xf0] %vm1969_vm5, %v5904_v45  ;;  %v5806_v47 = vld [vmem:[#allocation2 + $0x8] ss:$0 sps:$4 sm:$0xff]   ;;  %v3727_v30 = vld [vmem:[#allocation2 + $0x14] sm:$0xf] }
 0x15b   : > { %3728 = vst.msk [vmem:[#allocation3 + $0xf0] sm:$0xf] %vm1940_vm4, %v3727_v30  ;;  %v5807_v50 = vld [vmem:[#allocation2 + $0x8] ss:$0 sps:$4 sm:$0xff]   ;;  %v5809_v56 = vld [vmem:[#allocation2 + $0xc] ss:$0 sps:$4 sm:$0xff]  }
 0x15c   : > { %v5808_v52 = vld [vmem:[#allocation2 + $0x8] ss:$0 sps:$4 sm:$0xff]   ;;  %v5810_v59 = vld [vmem:[#allocation2 + $0xc] ss:$0 sps:$4 sm:$0xff]   ;;  %v4152_v60 = vld [vmem:[#allocation2 + $0x20] sm:$0xf] }
 0x15d   : > { %2077 = vrot.lane.b32.xlu1 %v2075_v5, %s7956_s25  ;;  %v5811_v58 = vld [vmem:[#allocation2 + $0x8] ss:$0 sps:$4 sm:$0xff]   ;;  %v5812_v2 = vld [vmem:[#allocation2 + $0xc] ss:$0 sps:$4 sm:$0xff]   ;;  %v3149_v4 = vld [vmem:[#allocation2 + $0x14] sm:$0xf] }
 0x15e   : > { %2238 = vrot.lane.b32.xlu0 %v2236_v6, %s7956_s25  ;;  %3150 = vst.msk [vmem:[#allocation3 + $0x128] sm:$0xf] %vm1940_vm4, %v3149_v4  ;;  %v5813_v7 = vld [vmem:[#allocation2 + $0xc] ss:$0 sps:$4 sm:$0xff]  }
 0x161   : > { %2232 = vrot.lane.b32.xlu1 %v2230_v8, %s7952_s17 }
 0x162   : > { %4193 = vrot.lane.b32.xlu0 %v6456_v36, %s7954_s26 }
 0x165   : > { %2694 = vrot.lane.b32.xlu1 %v6456_v36, %s7948_s23 }
 0x166   : > { %4202 = vrot.lane.b32.xlu0 %v4200_v9, %s7969_s27 }
 0x169   : > { %2749 = vrot.lane.b32.xlu1 %v6456_v36, %s7952_s17 }
 0x16a   : > { %2659 = vrot.lane.b32.xlu0 %v2657_v10, %s7952_s17  ;;  %v5814_v10 = vld [vmem:[#allocation2 + $0xc] ss:$0 sps:$4 sm:$0xff]  }
 0x16d   : > { %4186 = vrot.lane.b32.xlu1 %v4184_v11, %s7942_s24  ;;  %v3336_v11 = vld [vmem:[#allocation2 + $0x10] sm:$0xf] }
 0x16e   : > { %2714 = vrot.lane.b32.xlu0 %v2712_v12, %s7942_s24  ;;  %s7967_s24 = smov 16   ;;  %v5933_v12 = vld [vmem:[#allocation2 + $0x14] ss:$0 sps:$4 sm:$0xff]  }
 0x16f   : > { %2492 = vst.msk [vmem:[#allocation3 + $0x120] sm:$0xf0] %vm1969_vm5, %v5933_v12 }
 0x171   : > { %3535 = vrot.lane.b32.xlu1 %v6456_v36, %s7954_s26  ;;  %v5796_v36 = vld [vmem:[#allocation2] ss:$0 sps:$4 sm:$0xff]  }
 0x172   : > { %2665 = vrot.lane.b32.xlu0 %v2663_v13, %s7956_s25  ;;  %v3776_v13 = vld [vmem:[#allocation2 + $0xc] sm:$0xf] }
 0x173   : > { %3777 = vst.msk [vmem:[#allocation3 + $0x110] sm:$0xf] %vm1940_vm4, %v3776_v13 }
 0x175   : > { %4208 = vrot.lane.b32.xlu1 %v4206_v14, %s7961_s28 }
 0x176   : > { %3505 = vrot.lane.b32.xlu0 %v3503_v15, %s7971_s29 }
 0x179   : > { %2653 = vrot.lane.b32.xlu1 %v2651_v17, %s7950_s14  ;;  %v3393_v17 = vld [vmem:[#allocation2 + $0x10] sm:$0xf] }
 0x17a   : > { %2775 = vrot.lane.b32.xlu0 %v2773_v16, %s7971_s29  ;;  %v5815_v16 = vld [vmem:[#allocation2 + $0xc] ss:$0 sps:$4 sm:$0xff]  }
 0x17d   : > { %2708 = vrot.lane.b32.xlu1 %v2706_v19, %s7948_s23 }
 0x17e   : > { %2781 = vrot.lane.b32.xlu0 %v2779_v18, %s7965_s22 }
 0x181   : > { %2720 = vrot.lane.b32.xlu1 %v2718_v21, %s7954_s26 }
 0x182   : > { %3517 = vrot.lane.b32.xlu0 %v3515_v20, %s7967_s24  ;;  %v3409_v20 = vld [vmem:[#allocation2 + $0x14] sm:$0xf] }
 0x185   : > { %2671 = vrot.lane.b32.xlu1 %v2669_v23, %s7971_s29 }
 0x186   : > { %2069 = vrot.lane.b32.xlu0 %v5961_v22, %s7952_s17 }
 0x189   : > { %2726 = vrot.lane.b32.xlu1 %v2724_v25, %s7969_s27  ;;  %v3358_v25 = vld [vmem:[#allocation2 + $0x14] sm:$0xf] }
 0x18a   : > { %2678 = vrot.lane.b32.xlu0 %v5791_v24, %s7944_s21  ;;  %s7987_s21 = smov 72  }
 0x18d   : > { %2763 = vrot.lane.b32.xlu1 %v2761_v27, %s7952_s17 }
 0x18e   : > { %2733 = vrot.lane.b32.xlu0 %v5792_v26, %s7946_s16  ;;  %s7988_s16 = smov 104  }
 0x191   : > { %2769 = vrot.lane.b32.xlu1 %v2767_v29, %s7956_s25  ;;  %v3455_v29 = vld [vmem:[#allocation2 + $0x10] sm:$0xf] }
 0x192   : > { %2692 = vrot.lane.b32.xlu0 %v5962_v28, %s7948_s23 }
 0x195   : > { %3511 = vrot.lane.b32.xlu1 %v3509_v32, %s7965_s22  ;;  %v3197_v32 = vld [vmem:[#allocation2 + $0xc] sm:$0xf] }
 0x196   : > { %2747 = vrot.lane.b32.xlu0 %v5962_v28, %s7952_s17  ;;  %3198 = vst.msk [vmem:[#allocation3 + $0x148] sm:$0xf] %vm1940_vm4, %v3197_v32 }
 0x199   : > { %2927 = vrot.lane.b32.xlu1 %v2925_v34, %s7971_s29 }
 0x19a   : > { %2702 = vrot.lane.b32.xlu0 %v5793_v33, %s7987_s21 }
 0x19d   : > { %2012 = vrot.lane.b32.xlu1 %v5961_v22, %s7948_s23 }
 0x19e   : > { %2757 = vrot.lane.b32.xlu0 %v5794_v35, %s7956_s25  ;;  %v2814_v35 = vld [vmem:[#allocation2 + $0x10] sm:$0xf] }
 0x1a1   : > { %2685 = vrot.lane.b32.xlu1 %v5795_v31, %s7988_s16  ;;  %v3467_v31 = vld [vmem:[#allocation2 + $0x14] sm:$0xf] }
 0x1a2   : > { %3533 = vrot.lane.b32.xlu0 %v5962_v28, %s7954_s26  ;;  %v3352_v28 = vld [vmem:[#allocation2 + $0x14] sm:$0xf] }
 0x1a5   : > { %2740 = vrot.lane.b32.xlu1 %v5797_v37, %s7950_s14 }
 0x1a6   : > { %3485 = vrot.lane.b32.xlu0 %v5796_v36, %s7956_s25  ;;  %v5957_v36 = vld [vmem:[#allocation2 + $0xc] ss:$0 sps:$4 sm:$0xff]  }
 0x1a7   : > { %2542 = vst.msk [vmem:[#allocation3 + $0x140] sm:$0xf0] %vm1969_vm5, %v5957_v36 }
 0x1a9   : > { %4195 = vrot.lane.b32.xlu1 %v5961_v22, %s7954_s26 }
 0x1aa   : > { %1966 = vrot.lane.b32.xlu0 %v5798_v38, %s7950_s14 }
 0x1ad   : > { %3478 = vrot.lane.b32.xlu1 %v5799_v39, %s7952_s17  ;;  %v3415_v39 = vld [vmem:[#allocation2 + $0x14] sm:$0xf] }
 0x1ae   : > { %1982 = vrot.lane.b32.xlu0 %v5800_v40, %s7956_s25  ;;  %v2876_v40 = vld [vmem:[#allocation2 + $0x10] sm:$0xf] }
 0x1b1   : > { %3526 = vrot.lane.b32.xlu1 %v5801_v41, %s7987_s21 }
 0x1b2   : > { %2034 = vrot.lane.b32.xlu0 %v5802_v42, %s7987_s21 }
 0x1b5   : > { %3492 = vrot.lane.b32.xlu1 %v5803_v43, %s7971_s29  ;;  %v2830_v43 = vld [vmem:[#allocation2 + $0x14] sm:$0xf] }
 0x1b6   : > { %2048 = vrot.lane.b32.xlu0 %v5804_v44, %s7969_s27  ;;  %v2119_v44 = vld [vmem:[#allocation2 + $0x1c] sm:$0xf] }
 0x1b9   : > { %3543 = vrot.lane.b32.xlu1 %v5805_v46, %s7969_s27  ;;  %v3461_v46 = vld [vmem:[#allocation2 + $0x14] sm:$0xf] }
 0x1ba   : > { %4161 = vrot.lane.b32.xlu0 %v5806_v47, %s7971_s29 }
 0x1bb   : > { %v1952_v48 = vpop.permute.xlu1 %1951 }
 0x1bc   : > { %v1945_v49 = vpop.permute.xlu0 %1944 }
 0x1bd   : > { %1948 = vst.msk [vmem:[#allocation3] sm:$0xf] %vm1947_vm6, %v1945_v49  ;;  %1974 = vrot.lane.b32.xlu1 %v5807_v50, %s7952_s17  ;;  %v6622_v49 = vld [vmem:[#allocation2 + $0xc] sm:$0xff]  ;;  %v2181_v50 = vld [vmem:[#allocation2 + $0x1c] sm:$0xf]  ;;  %s7990_s17 = smov 112  }
 0x1be   : > { %4215 = vrot.lane.b32.xlu0 %v5808_v52, %s7969_s27  ;;  %1955 = vst.msk [vmem:[#allocation3] sm:$0xf] %vm1954_vm7, %v1952_v48 }
 0x1bf   : > { %v1959_v53 = vpop.permute.xlu1 %1958 }
 0x1c0   : > { %v1998_v54 = vpop.permute.xlu0 %1997  ;;  %1962 = vst.msk [vmem:[#allocation3] sm:$0xf] %vm1961_vm8, %v1959_v53 }
 0x1c1   : > { %2000 = vst.msk [vmem:[#allocation3 + $0x20] sm:$0xf] %vm1940_vm4, %v1998_v54  ;;  %1990 = vrot.lane.b32.xlu1 %v5809_v56, %s7971_s29  ;;  %v2836_v54 = vld [vmem:[#allocation2 + $0x14] sm:$0xf]  ;;  %v6632_v56 = vld [vmem:[#allocation2 + $0x1c] sm:$0xff] }
 0x1c2   : > { %4168 = vrot.lane.b32.xlu0 %v5810_v59, %s7965_s22 }
 0x1c3   : > { %v2004_v55 = vpop.permute.xlu1 %2003 }
 0x1c4   : > { %v6548_v62 = vpop.permute.xlu0 %2010  ;;  %2006 = vst.msk [vmem:[#allocation3 + $0x20] sm:$0xf] %vm1947_vm6, %v2004_v55 }
 0x1c5   : > { %2027 = vrot.lane.b32.xlu1 %v5811_v58, %s7948_s23  ;;  %s7963_s23 = smov 8  }
 0x1c6   : > { %4154 = vrot.lane.b32.xlu0 %v4152_v60, %s7950_s14  ;;  %s7989_s14 = smov 120  }
 0x1c7   : > { %v2055_v63 = vpop.permute.xlu1 %2054 }
 0x1c8   : > { %v6553_v1 = vpop.permute.xlu0 %2020  ;;  %2057 = vst.msk [vmem:[#allocation3 + $0x40] sm:$0xf] %vm1940_vm4, %v2055_v63  ;;  %v4086_v63 = vld [vmem:[#allocation2 + $0x1c] sm:$0xf] }
 0x1c9   : > { %2041 = vrot.lane.b32.xlu1 %v5812_v2, %s7954_s26  ;;  %v2113_v2 = vld [vmem:[#allocation2 + $0x18] sm:$0xf] }
 0x1ca   : > { %2093 = vrot.lane.b32.xlu0 %v6462_v57, %s7971_s29 }
 0x1cb   : > { %v6560_v5 = vpop.permute.xlu1 %2067 }
 0x1cc   : > { %v2061_v6 = vpop.permute.xlu0 %2060 }
 0x1cd   : > { %2063 = vst.msk [vmem:[#allocation3 + $0x40] sm:$0xf] %vm1947_vm6, %v2061_v6  ;;  %4222 = vrot.lane.b32.xlu1 %v5813_v7, %s7961_s28 }
 0x1ce   : > { %4057 = vrot.lane.b32.xlu0 %v6462_v57, %s7969_s27 }
 0x1cf   : > { %v6566_v8 = vpop.permute.xlu1 %2077 }
 0x1d0   : > { %v2239_v9 = vpop.permute.xlu0 %2238 }
 0x1d1   : > { %4175 = vrot.lane.b32.xlu1 %v5814_v10, %s7967_s24 }
 0x1d2   : > { %3338 = vrot.lane.b32.xlu0 %v3336_v11, %s7956_s25 }
 0x1d3   : > { %v2233_v14 = vpop.permute.xlu1 %2232 }
 0x1d4   : > { %v6571_v15 = vpop.permute.xlu0 %4193  ;;  %2235 = vst.msk [vmem:[#allocation3 + $0xa0] sm:$0xf] %vm1940_vm4, %v2233_v14 }
 0x1d5   : > { %2241 = vst.msk [vmem:[#allocation3 + $0xa0] sm:$0xf] %vm1947_vm6, %v2239_v9  ;;  %4229 = vrot.lane.b32.xlu1 %v5815_v16, %s7963_s23 }
 0x1d6   : > { %3395 = vrot.lane.b32.xlu0 %v3393_v17, %s7954_s26 }
 0x1d7   : > { %v6578_v18 = vpop.permute.xlu1 %2694 }
 0x1d8   : > { %v6580_v19 = vpop.permute.xlu0 %4202 }
 0x1d9   : > { %2150 = vrot.lane.b32.xlu1 %v6462_v57, %s7969_s27 }
 0x1da   : > { %3411 = vrot.lane.b32.xlu0 %v3409_v20, %s7961_s28 }
 0x1db   : > { %v6585_v21 = vpop.permute.xlu1 %2749 }
 0x1dc   : > { %v2660_v22 = vpop.permute.xlu0 %2659 }
 0x1dd   : > { %3345 = vrot.lane.b32.xlu1 %v6462_v57, %s7971_s29 }
 0x1de   : > { %2823 = vrot.lane.b32.xlu0 %v6462_v57, %s7969_s27 }
 0x1df   : > { %v4187_v23 = vpop.permute.xlu1 %4186 }
 0x1e0   : > { %v2715_v24 = vpop.permute.xlu0 %2714  ;;  %4189 = vst.msk [vmem:[#allocation3 + $0x78] sm:$0xf] %vm1940_vm4, %v4187_v23 }
 0x1e1   : > { %3402 = vrot.lane.b32.xlu1 %v6462_v57, %s7969_s27 }
 0x1e2   : > { %3360 = vrot.lane.b32.xlu0 %v3358_v25, %s7967_s24 }
 0x1e3   : > { %v6595_v26 = vpop.permute.xlu1 %3535 }
 0x1e4   : > { %v2666_v27 = vpop.permute.xlu0 %2665 }
 0x1e5   : > { %3354 = vrot.lane.b32.xlu1 %v3352_v28, %s7965_s22  ;;  %v5818_v28 = vld [vmem:[#allocation2 + $0x10] ss:$0 sps:$4 sm:$0xff]  }
 0x1e6   : > { %3457 = vrot.lane.b32.xlu0 %v3455_v29, %s7971_s29 }
 0x1e7   : > { %v6600_v33 = vpop.permute.xlu1 %4208 }
 0x1e8   : > { %v3506_v34 = vpop.permute.xlu0 %3505 }
 0x1e9   : > { %3508 = vst.msk [vmem:[#allocation3 + $0x70] sm:$0xf] %vm1940_vm4, %v3506_v34  ;;  %2816 = vrot.lane.b32.xlu1 %v2814_v35, %s7954_s26  ;;  %v5819_v35 = vld [vmem:[#allocation2 + $0x14] ss:$0 sps:$4 sm:$0xff]  }
 0x1ea   : > { %3469 = vrot.lane.b32.xlu0 %v3467_v31, %s7967_s24  ;;  %v6708_v31 = vcombine.low %v6459_v51, %v6459_v51  ;;  %v6718_v51 = vld [vmem:[#allocation2 + $0x18] sm:$0xff] }
 0x1eb   : > { %v2654_v38 = vpop.permute.xlu1 %2653 }
 0x1ec   : > { %v2776_v37 = vpop.permute.xlu0 %2775  ;;  %2656 = vst.msk [vmem:[#allocation3 + $0x8] sm:$0xf] %vm1940_vm4, %v2654_v38 }
 0x1ed   : > { %2662 = vst.msk [vmem:[#allocation3 + $0x8] sm:$0xf] %vm1947_vm6, %v2660_v22  ;;  %3417 = vrot.lane.b32.xlu1 %v3415_v39, %s7963_s23  ;;  %v5820_v39 = vld [vmem:[#allocation2 + $0x14] ss:$0 sps:$4 sm:$0xff]  }
 0x1ee   : > { %2878 = vrot.lane.b32.xlu0 %v2876_v40, %s7971_s29  ;;  %2668 = vst.msk [vmem:[#allocation3 + $0x8] sm:$0xf] %vm1954_vm7, %v2666_v27 }
 0x1ef   : > { %v2709_v42 = vpop.permute.xlu1 %2708 }
 0x1f0   : > { %v2782_v41 = vpop.permute.xlu0 %2781  ;;  %2711 = vst.msk [vmem:[#allocation3 + $0x28] sm:$0xf] %vm1940_vm4, %v2709_v42  ;;  %v5821_v42 = vld [vmem:[#allocation2 + $0x10] ss:$0 sps:$4 sm:$0xff]  }
 0x1f1   : > { %2717 = vst.msk [vmem:[#allocation3 + $0x28] sm:$0xf] %vm1947_vm6, %v2715_v24  ;;  %2832 = vrot.lane.b32.xlu1 %v2830_v43, %s7961_s28  ;;  %v4092_v24 = vld [vmem:[#allocation2 + $0x1c] sm:$0xf] }
 0x1f2   : > { %2121 = vrot.lane.b32.xlu0 %v2119_v44, %s7967_s24  ;;  %v5822_v44 = vld [vmem:[#allocation2 + $0x14] ss:$0 sps:$4 sm:$0xff]  }
 0x1f3   : > { %v2721_v45 = vpop.permute.xlu1 %2720 }
 0x1f4   : > { %v3518_v3 = vpop.permute.xlu0 %3517  ;;  %2723 = vst.msk [vmem:[#allocation3 + $0x28] sm:$0xf] %vm1954_vm7, %v2721_v45 }
 0x1f5   : > { %3463 = vrot.lane.b32.xlu1 %v3461_v46, %s7965_s22 }
 0x1f6   : > { %2173 = vrot.lane.b32.xlu0 %v6464_v61, %s7961_s28 }
 0x1f7   : > { %v2672_v30 = vpop.permute.xlu1 %2671 }
 0x1f8   : > { %v2070_v47 = vpop.permute.xlu0 %2069  ;;  %2674 = vst.msk [vmem:[#allocation3 + $0x8] sm:$0xf] %vm1961_vm8, %v2672_v30  ;;  %v5825_v30 = vld [vmem:[#allocation2 + $0x10] ss:$0 sps:$4 sm:$0xff]  }
 0x1f9   : > { %v2072_v48 = vsel %vm2071_vm9, %v6560_v5, %v2070_v47  ;;  %4238 = vrot.lane.b32.xlu1 %v6622_v49, %s7989_s14  ;;  %v5824_v47 = vld [vmem:[#allocation2 + $0x10] ss:$0 sps:$4 sm:$0xff]  }
 0x1fa   : > { %2074 = vst.msk [vmem:[#allocation3 + $0x40] sm:$0xf] %vm1954_vm7, %v2072_v48  ;;  %2183 = vrot.lane.b32.xlu0 %v2181_v50, %s7963_s23  ;;  %v5960_v48 = vld [vmem:[#allocation2 + $0x10] sm:$0xff] }
 0x1fb   : > { %2080 = vst.msk [vmem:[#allocation3 + $0x40] sm:$0xf] %vm1961_vm8, %v6566_v8  ;;  %v2727_v53 = vpop.permute.xlu1 %2726  ;;  %v2187_v8 = vld [vmem:[#allocation2 + $0x1c] sm:$0xf]  ;;  %v3344_v50 = vcombine.high %v5960_v48, %v5960_v48 }
 0x1fc   : > { %v2679_v52 = vpop.permute.xlu0 %2678  ;;  %2729 = vst.msk [vmem:[#allocation3 + $0x28] sm:$0xf] %vm1961_vm8, %v2727_v53 }
 0x1fd   : > { %2681 = vst.msk [vmem:[#allocation3 + $0x8] sm:$0xf0] %vm1969_vm5, %v2679_v52  ;;  %2838 = vrot.lane.b32.xlu1 %v2836_v54, %s7963_s23  ;;  %v5826_v54 = vld [vmem:[#allocation2 + $0x14] ss:$0 sps:$4 sm:$0xff]  }
 0x1fe   : > { %2196 = vrot.lane.b32.xlu0 %v6632_v56, %s7988_s16 }
 0x1ff   : > { %v2764_v55 = vpop.permute.xlu1 %2763 }
 0x200   : > { %v2734_v59 = vpop.permute.xlu0 %2733  ;;  %2766 = vst.msk [vmem:[#allocation3 + $0x48] sm:$0xf] %vm1940_vm4, %v2764_v55 }
 0x201   : > { %2736 = vst.msk [vmem:[#allocation3 + $0x28] sm:$0xf0] %vm1969_vm5, %v2734_v59  ;;  %4333 = vrot.lane.b32.xlu1 %v6462_v57, %s7963_s23  ;;  %v3521_v57 = vld [vmem:[#allocation2 + $0xc] sm:$0xf] }
 0x202   : > { %3426 = vrot.lane.b32.xlu0 %v6464_v61, %s7961_s28 }
 0x203   : > { %v2770_v60 = vpop.permute.xlu1 %2769 }
 0x204   : > { %v2693_v58 = vpop.permute.xlu0 %2692  ;;  %2772 = vst.msk [vmem:[#allocation3 + $0x48] sm:$0xf] %vm1947_vm6, %v2770_v60  ;;  %v5828_v60 = vld [vmem:[#allocation2 + $0xc] ss:$0 sps:$4 sm:$0xff]  }
 0x205   : > { %2778 = vst.msk [vmem:[#allocation3 + $0x48] sm:$0xf] %vm1954_vm7, %v2776_v37  ;;  %2115 = vrot.lane.b32.xlu1 %v2113_v2, %s7965_s22  ;;  %v2696_v14 = vsel %vm7959_vm10, %v2693_v58, %v6578_v18  ;;  %v4027_v18 = vld [vmem:[#allocation2 + $0x1c] sm:$0xf]  ;;  %v5827_v58 = vld [vmem:[#allocation2 + $0x14] ss:$0 sps:$4 sm:$0xff]  }
 0x206   : > { %4088 = vrot.lane.b32.xlu0 %v4086_v63, %s7963_s23  ;;  %2784 = vst.msk [vmem:[#allocation3 + $0x48] sm:$0xf] %vm1961_vm8, %v2782_v41 }
 0x207   : > { %v3512_v5 = vpop.permute.xlu1 %3511 }
 0x208   : > { %v2748_v4 = vpop.permute.xlu0 %2747  ;;  %3514 = vst.msk [vmem:[#allocation3 + $0x70] sm:$0xf] %vm1947_vm6, %v3512_v5 }
 0x209   : > { %3520 = vst.msk [vmem:[#allocation3 + $0x70] sm:$0xf] %vm1954_vm7, %v3518_v3  ;;  %2130 = vrot.lane.b32.xlu1 %v6632_v56, %s7990_s17  ;;  %v2751_v17 = vsel %vm2071_vm9, %v2748_v4, %v6585_v21  ;;  %v4146_v21 = vld [vmem:[#allocation2 + $0x1c] sm:$0xf]  ;;  %v5823_v3 = vld [vmem:[#allocation2 + $0x14] ss:$0 sps:$4 sm:$0xff]  }
 0x20a   : > { %4038 = vrot.lane.b32.xlu0 %v6632_v56, %s7990_s17  ;;  %3522 = vst.msk [vmem:[#allocation3 + $0x70] sm:$0xf] %vm1961_vm8, %v3521_v57  ;;  %v5829_v4 = vld [vmem:[#allocation2 + $0x14] ss:$0 sps:$4 sm:$0xff]  }
 0x20b   : > { %v2928_v7 = vpop.permute.xlu1 %2927 }
 0x20c   : > { %v2703_v6 = vpop.permute.xlu0 %2702  ;;  %2930 = vst.msk [vmem:[#allocation3 + $0xa8] sm:$0xf] %vm1940_vm4, %v2928_v7 }
 0x20d   : > { %2189 = vrot.lane.b32.xlu1 %v2187_v8, %s7989_s14 }
 0x20e   : > { %4101 = vrot.lane.b32.xlu0 %v6632_v56, %s7988_s16 }
 0x20f   : > { %v2013_v10 = vpop.permute.xlu1 %2012 }
 0x210   : > { %v2758_v9 = vpop.permute.xlu0 %2757  ;;  %v2015_v11 = vsel %vm7959_vm10, %v6548_v62, %v2013_v10  ;;  %v4021_v62 = vld [vmem:[#allocation2 + $0x18] sm:$0xf]  ;;  %v5831_v10 = vld [vmem:[#allocation2 + $0x10] ss:$0 sps:$4 sm:$0xff]   ;;  %vm7973_vm10 = vcmask 850944  }
 0x211   : > { %2017 = vst.msk [vmem:[#allocation3 + $0x20] sm:$0xf] %vm1954_vm7, %v2015_v11  ;;  %4079 = vrot.lane.b32.xlu1 %v6464_v61, %s7961_s28 }
 0x212   : > { %2847 = vrot.lane.b32.xlu0 %v6464_v61, %s7961_s28  ;;  %2023 = vst.msk [vmem:[#allocation3 + $0x20] sm:$0xf] %vm1961_vm8, %v6553_v1 }
 0x213   : > { %v2686_v13 = vpop.permute.xlu1 %2685 }
 0x214   : > { %v3534_v12 = vpop.permute.xlu0 %3533  ;;  %2688 = vst.msk [vmem:[#allocation3 + $0x8] sm:$0xf0] %vm1977_vm11, %v2686_v13  ;;  %v5832_v13 = vld [vmem:[#allocation2 + $0x14] ss:$0 sps:$4 sm:$0xff]  }
 0x215   : > { %2698 = vst.msk [vmem:[#allocation3 + $0x8] sm:$0xf0] %vm1985_vm12, %v2696_v14  ;;  %4023 = vrot.lane.b32.xlu1 %v4021_v62, %s7965_s22  ;;  %v5833_v14 = vld [vmem:[#allocation2 + $0x14] ss:$0 sps:$4 sm:$0xff]   ;;  %v6767_v62 = vcombine.low %v6622_v49, %v6622_v49 }
 0x216   : > { %2809 = vrot.lane.b32.xlu0 %v6632_v56, %s7990_s17  ;;  %2705 = vst.msk [vmem:[#allocation3 + $0x8] sm:$0xf0] %vm1993_vm13, %v2703_v6 }
 0x217   : > { %v2741_v16 = vpop.permute.xlu1 %2740 }
 0x218   : > { %v3486_v1 = vpop.permute.xlu0 %3485  ;;  %2743 = vst.msk [vmem:[#allocation3 + $0x28] sm:$0xf0] %vm1977_vm11, %v2741_v16 }
 0x219   : > { %2753 = vst.msk [vmem:[#allocation3 + $0x28] sm:$0xf0] %vm1985_vm12, %v2751_v17  ;;  %4029 = vrot.lane.b32.xlu1 %v4027_v18, %s7967_s24  ;;  %v2172_v17 = vcombine.high %v6718_v51, %v6718_v51 }
 0x21a   : > { %2871 = vrot.lane.b32.xlu0 %v6632_v56, %s7988_s16  ;;  %2760 = vst.msk [vmem:[#allocation3 + $0x28] sm:$0xf0] %vm1993_vm13, %v2758_v9  ;;  %v5830_v9 = vld [vmem:[#allocation2 + $0x14] ss:$0 sps:$4 sm:$0xff]  }
 0x21b   : > { %v4196_v20 = vpop.permute.xlu1 %4195 }
 0x21c   : > { %v1967_v22 = vpop.permute.xlu0 %1966  ;;  %v4197_v23 = vsel %vm2293_vm14, %v6571_v15, %v4196_v20 }
 0x21d   : > { %1970 = vst.msk [vmem:[#allocation3] sm:$0xf0] %vm1969_vm5, %v1967_v22  ;;  %4094 = vrot.lane.b32.xlu1 %v4092_v24, %s7989_s14  ;;  %v4715_v15 = vld [vmem:[#allocation3 + $0x8] sm:$0xff]  ;;  %v6787_v22 = vcombine.high %v6632_v56, %v6632_v56  ;;  %v3423_v24 = vcombine.low %v6718_v51, %v6718_v51 }
 0x21e   : > { %4199 = vst.msk [vmem:[#allocation3 + $0x78] sm:$0xf] %vm1947_vm6, %v4197_v23  ;;  %4148 = vrot.lane.b32.xlu0 %v4146_v21, %s7990_s17 }
 0x21f   : > { %4205 = vst.msk [vmem:[#allocation3 + $0x78] sm:$0xf] %vm1954_vm7, %v6580_v19  ;;  %v3479_v25 = vpop.permute.xlu1 %3478 }
 0x220   : > { %4211 = vst.msk [vmem:[#allocation3 + $0x78] sm:$0xf] %vm1961_vm8, %v6600_v33  ;;  %v1983_v27 = vpop.permute.xlu0 %1982  ;;  %v3537_v33 = vsel %vm2293_vm14, %v3534_v12, %v6595_v26 }
 0x221   : > { %3481 = vst.msk [vmem:[#allocation3 + $0x50] sm:$0xf0] %vm1969_vm5, %v3479_v25  ;;  %3388 = vrot.lane.b32.xlu1 %v6632_v56, %s7990_s17  ;;  %v4719_v29 = vld [vmem:[#allocation3 + $0x28] sm:$0xff] }
 0x222   : > { %3488 = vst.msk [vmem:[#allocation3 + $0x50] sm:$0xf0] %vm1977_vm11, %v3486_v1  ;;  %2084 = vrot.lane.b32.xlu0 %v5818_v28, %s7956_s25  ;;  %v5633_v32 = vpack.c.bf16 %v4719_v29, %v4715_v15  ;;  %v5834_v29 = vld [vmem:[#allocation2 + $0x1c] ss:$0 sps:$4 sm:$0xff]  }
 0x223   : > { %v3527_v34 = vpop.permute.xlu1 %3526 }
 0x224   : > { %v2035_v19 = vpop.permute.xlu0 %2034  ;;  %3529 = vst.msk [vmem:[#allocation3 + $0x70] sm:$0xf0] %vm1969_vm5, %v3527_v34  ;;  %5634 = vmatprep.subr.bf16.mxu0 %v5633_v32  ;;  %v5835_v32 = vld [vmem:[#allocation2 + $0x18] ss:$0 sps:$4 sm:$0xff]   ;;  %v6808_v34 = vcombine.low %v6632_v56, %v6632_v56 }
 0x225   : > { %3539 = vst.msk [vmem:[#allocation3 + $0x70] sm:$0xf0] %vm1977_vm11, %v3537_v33  ;;  %3450 = vrot.lane.b32.xlu1 %v6632_v56, %s7988_s16  ;;  %v5836_v33 = vld [vmem:[#allocation2 + $0x1c] ss:$0 sps:$4 sm:$0xff]  }
 0x226   : > { %2109 = vrot.lane.b32.xlu0 %v5819_v35, %s7967_s24 }
 0x227   : > { %v3493_v36 = vpop.permute.xlu1 %3492 }
 0x228   : > { %v2049_v37 = vpop.permute.xlu0 %2048  ;;  %3495 = vst.msk [vmem:[#allocation3 + $0x50] sm:$0xf0] %vm1985_vm12, %v3493_v36 }
 0x229   : > { %4137 = vrot.lane.b32.xlu1 %v6464_v61, %s7967_s24 }
 0x22a   : > { %2148 = vrot.lane.b32.xlu0 %v6708_v31, %s7969_s27 }
 0x22b   : > { %v3544_v26 = vpop.permute.xlu1 %3543 }
 0x22c   : > { %v4162_v38 = vpop.permute.xlu0 %4161  ;;  %3546 = vst.msk [vmem:[#allocation3 + $0x70] sm:$0xf0] %vm1985_vm12, %v3544_v26 }
 0x22d   : > { %4164 = vst.msk [vmem:[#allocation3 + $0x58] sm:$0xf0] %vm1969_vm5, %v4162_v38  ;;  %2901 = vrot.lane.b32.xlu1 %v6718_v51, %s7967_s24 }
 0x22e   : > { %2159 = vrot.lane.b32.xlu0 %v5820_v39, %s7961_s28 }
 0x22f   : > { %v1975_v40 = vpop.permute.xlu1 %1974 }
 0x230   : > { %v4216_v41 = vpop.permute.xlu0 %4215  ;;  %1978 = vst.msk [vmem:[#allocation3] sm:$0xf0] %vm1977_vm11, %v1975_v40  ;;  %v5837_v40 = vld [vmem:[#allocation2 + $0x18] ss:$0 sps:$4 sm:$0xff]  }
 0x231   : > { %4218 = vst.msk [vmem:[#allocation3 + $0x78] sm:$0xf0] %vm1969_vm5, %v4216_v41  ;;  %2091 = vrot.lane.b32.xlu1 %v6708_v31, %s7971_s29 }
 0x232   : > { %1986 = vst.msk [vmem:[#allocation3] sm:$0xf0] %vm1985_vm12, %v1983_v27  ;;  %2207 = vrot.lane.b32.xlu0 %v5821_v42, %s7971_s29 }
 0x233   : > { %v1991_v61 = vpop.permute.xlu1 %1990 }
 0x234   : > { %v4169_v43 = vpop.permute.xlu0 %4168  ;;  %1994 = vst.msk [vmem:[#allocation3] sm:$0xf0] %vm1993_vm13, %v1991_v61  ;;  %v5838_v61 = vld [vmem:[#allocation2 + $0x1c] ss:$0 sps:$4 sm:$0xff]  }
 0x235   : > { %4171 = vst.msk [vmem:[#allocation3 + $0x58] sm:$0xf0] %vm1977_vm11, %v4169_v43  ;;  %2102 = vrot.lane.b32.xlu1 %v5823_v3, %s7965_s22  ;;  %v5839_v43 = vld [vmem:[#allocation2 + $0x1c] ss:$0 sps:$4 sm:$0xff]  }
 0x236   : > { %2221 = vrot.lane.b32.xlu0 %v5822_v44, %s7967_s24 }
 0x237   : > { %v2028_v45 = vpop.permute.xlu1 %2027 }
 0x238   : > { %v6732_v46 = vpop.permute.xlu0 %4154  ;;  %2030 = vst.msk [vmem:[#allocation3 + $0x20] sm:$0xf0] %vm1969_vm5, %v2028_v45  ;;  %v5840_v45 = vld [vmem:[#allocation2 + $0x1c] ss:$0 sps:$4 sm:$0xff]  }
 0x239   : > { %2037 = vst.msk [vmem:[#allocation3 + $0x20] sm:$0xf0] %vm1977_vm11, %v2035_v19  ;;  %2141 = vrot.lane.b32.xlu1 %v5825_v30, %s7954_s26  ;;  %v2125_v30 = vld [vmem:[#allocation2 + $0x1c] sm:$0xf] }
 0x23a   : > { %4048 = vrot.lane.b32.xlu0 %v5824_v47, %s7954_s26  ;;  %v5841_v47 = vld [vmem:[#allocation2 + $0x1c] ss:$0 sps:$4 sm:$0xff]  }
 0x23b   : > { %v2042_v52 = vpop.permute.xlu1 %2041  ;;  %v4714_v5 = vld [vmem:[#allocation3] sm:$0xff] }
 0x23c   : > { %v6738_v53 = vpop.permute.xlu0 %2093  ;;  %2044 = vst.msk [vmem:[#allocation3 + $0x20] sm:$0xf0] %vm1985_vm12, %v2042_v52 }
 0x23d   : > { %2051 = vst.msk [vmem:[#allocation3 + $0x20] sm:$0xf0] %vm1993_vm13, %v2049_v37  ;;  %2166 = vrot.lane.b32.xlu1 %v5826_v54, %s7963_s23  ;;  %v3473_v37 = vld [vmem:[#allocation2 + $0x14] sm:$0xf] }
 0x23e   : > { %3347 = vrot.lane.b32.xlu0 %v3344_v50, %s7971_s29 }
 0x23f   : > { %v4223_v59 = vpop.permute.xlu1 %4222 }
 0x240   : > { %v6744_v55 = vpop.permute.xlu0 %4057  ;;  %4225 = vst.msk [vmem:[#allocation3 + $0x78] sm:$0xf0] %vm1977_vm11, %v4223_v59  ;;  %v5842_v59 = vld [vmem:[#allocation2] ss:$0 sps:$4 sm:$0xff]  }
 0x241   : > { %2214 = vrot.lane.b32.xlu1 %v5827_v58, %s7965_s22  ;;  %v6861_v58 = vld [vmem:[#allocation2] sm:$0xff] }
 0x242   : > { %3404 = vrot.lane.b32.xlu0 %v3344_v50, %s7969_s27 }
 0x243   : > { %v4176_v63 = vpop.permute.xlu1 %4175 }
 0x244   : > { %v3339_v2 = vpop.permute.xlu0 %3338  ;;  %4178 = vst.msk [vmem:[#allocation3 + $0x58] sm:$0xf0] %vm1985_vm12, %v4176_v63  ;;  %v4718_v57 = vld [vmem:[#allocation3 + $0x20] sm:$0xff] }
 0x245   : > { %3341 = vst.msk [vmem:[#allocation3 + $0x10] sm:$0xf] %vm1940_vm4, %v3339_v2  ;;  %4055 = vrot.lane.b32.xlu1 %v6708_v31, %s7969_s27  ;;  %v5635_v6 = vpack.c.bf16 %v4718_v57, %v4714_v5  ;;  %v6872_v2 = vcombine.low %v6861_v58, %v6861_v58  ;;  %v5844_v57 = vld [vmem:[#allocation2 + $0x4] ss:$0 sps:$4 sm:$0xff]  }
 0x246   : > { %4183 = vst.msk [vmem:[#allocation3 + $0x58] sm:$0xf0] %vm1993_vm13, %v5828_v60  ;;  %4065 = vrot.lane.b32.xlu0 %v5829_v4, %s7961_s28 }
 0x247   : > { %v4230_v7 = vpop.permute.xlu1 %4229  ;;  %5636 = vmatpush1.bf16.msra.mxu0 %v5635_v6  ;;  %v5845_v6 = vld [vmem:[#allocation2 + $0x4] ss:$0 sps:$4 sm:$0xff]  }
 0x248   : > { %v3396_v8 = vpop.permute.xlu0 %3395  ;;  %4232 = vst.msk [vmem:[#allocation3 + $0x78] sm:$0xf0] %vm1985_vm12, %v4230_v7  ;;  %v6881_v7 = vld [vmem:[#allocation2 + $0x10] sm:$0xff] }
 0x249   : > { %3398 = vst.msk [vmem:[#allocation3 + $0x30] sm:$0xf] %vm1940_vm4, %v3396_v8  ;;  %4111 = vrot.lane.b32.xlu1 %v5831_v10, %s7971_s29  ;;  %v6889_v10 = vcombine.high %v6881_v7, %v6881_v7 }
 0x24a   : > { %4125 = vrot.lane.b32.xlu0 %v5830_v9, %s7967_s24 }
 0x24b   : > { %v6759_v11 = vpop.permute.xlu1 %2150 }
 0x24c   : > { %v6761_v12 = vpop.permute.xlu0 %3411 }
 0x24d   : > { %4118 = vrot.lane.b32.xlu1 %v5833_v14, %s7965_s22 }
 0x24e   : > { %4072 = vrot.lane.b32.xlu0 %v5832_v13, %s7963_s23  ;;  %v4033_v13 = vld [vmem:[#allocation2 + $0x1c] sm:$0xf] }
 0x24f   : > { %v6769_v1 = vpop.permute.xlu1 %3345 }
 0x250   : > { %v6771_v16 = vpop.permute.xlu0 %2823 }
 0x251   : > { %2825 = vrot.lane.b32.xlu1 %v3344_v50, %s7969_s27 }
 0x252   : > { %4236 = vrot.lane.b32.xlu0 %v6767_v62, %s7989_s14 }
 0x253   : > { %v6778_v18 = vpop.permute.xlu1 %3402 }
 0x254   : > { %v6780_v20 = vpop.permute.xlu0 %3360 }
 0x255   : > { %2175 = vrot.lane.b32.xlu1 %v2172_v17, %s7961_s28 }
 0x256   : > { %4331 = vrot.lane.b32.xlu0 %v6708_v31, %s7963_s23 }
 0x257   : > { %v6789_v23 = vpop.permute.xlu1 %3354 }
 0x258   : > { %v3458_v21 = vpop.permute.xlu0 %3457 }
 0x259   : > { %3460 = vst.msk [vmem:[#allocation3 + $0x50] sm:$0xf] %vm1940_vm4, %v3458_v21  ;;  %2198 = vrot.lane.b32.xlu1 %v6787_v22, %s7988_s16  ;;  %v4243_v21 = vld [vmem:[#allocation2] sm:$0xf] }
 0x25a   : > { %2132 = vrot.lane.b32.xlu0 %v6787_v22, %s7990_s17 }
 0x25b   : > { %v2817_v25 = vpop.permute.xlu1 %2816 }
 0x25c   : > { %v3470_v27 = vpop.permute.xlu0 %3469  ;;  %2819 = vst.msk [vmem:[#allocation3 + $0x68] sm:$0xf] %vm1940_vm4, %v2817_v25 }
 0x25d   : > { %3424 = vrot.lane.b32.xlu1 %v3423_v24, %s7961_s28 }
 0x25e   : > { %4081 = vrot.lane.b32.xlu0 %v2172_v17, %s7961_s28 }
 0x25f   : > { %v6801_v28 = vpop.permute.xlu1 %3417 }
 0x260   : > { %v2879_v15 = vpop.permute.xlu0 %2878 }
 0x261   : > { %2881 = vst.msk [vmem:[#allocation3 + $0x88] sm:$0xf] %vm1940_vm4, %v2879_v15  ;;  %3367 = vrot.lane.b32.xlu1 %v5835_v32, %s7965_s22  ;;  %v5847_v15 = vld [vmem:[#allocation2 + $0x8] ss:$0 sps:$4 sm:$0xff]  }
 0x262   : > { %3374 = vrot.lane.b32.xlu0 %v5834_v29, %s7967_s24 }
 0x263   : > { %v6810_v19 = vpop.permute.xlu1 %2832 }
 0x264   : > { %v2122_v35 = vpop.permute.xlu0 %2121 }
 0x265   : > { %3434 = vrot.lane.b32.xlu1 %v5836_v33, %s7963_s23  ;;  %v4300_v33 = vld [vmem:[#allocation2 + $0x1c] sm:$0xf] }
 0x266   : > { %3386 = vrot.lane.b32.xlu0 %v6808_v34, %s7990_s17 }
 0x267   : > { %v3464_v31 = vpop.permute.xlu1 %3463 }
 0x268   : > { %v6815_v36 = vpop.permute.xlu0 %2173  ;;  %3466 = vst.msk [vmem:[#allocation3 + $0x50] sm:$0xf] %vm1947_vm6, %v3464_v31 }
 0x269   : > { %3472 = vst.msk [vmem:[#allocation3 + $0x50] sm:$0xf] %vm1954_vm7, %v3470_v27  ;;  %4040 = vrot.lane.b32.xlu1 %v6787_v22, %s7990_s17 }
 0x26a   : > { %3448 = vrot.lane.b32.xlu0 %v6808_v34, %s7988_s16  ;;  %3474 = vst.msk [vmem:[#allocation3 + $0x50] sm:$0xf] %vm1961_vm8, %v3473_v37 }
 0x26b   : > { %v6824_v26 = vpop.permute.xlu1 %4238 }
 0x26c   : > { %v6826_v38 = vpop.permute.xlu0 %2183 }
 0x26d   : > { %4103 = vrot.lane.b32.xlu1 %v6787_v22, %s7988_s16 }
 0x26e   : > { %4139 = vrot.lane.b32.xlu0 %v2172_v17, %s7967_s24 }
 0x26f   : > { %v6831_v39 = vpop.permute.xlu1 %2838 }
 0x270   : > { %v6833_v51 = vpop.permute.xlu0 %2196 }
 0x271   : > { %2845 = vrot.lane.b32.xlu1 %v3423_v24, %s7961_s28 }
 0x272   : > { %2788 = vrot.lane.b32.xlu0 %v5837_v40, %s7965_s22  ;;  %v2931_v40 = vld [vmem:[#allocation2 + $0xc] sm:$0xf] }
 0x273   : > { %v6837_v41 = vpop.permute.xlu1 %4333 }
 0x274   : > { %v6839_v42 = vpop.permute.xlu0 %3426 }
 0x275   : > { %3441 = vrot.lane.b32.xlu1 %v5839_v43, %s7989_s14 }
 0x276   : > { %2795 = vrot.lane.b32.xlu0 %v5838_v61, %s7967_s24  ;;  %v2882_v61 = vld [vmem:[#allocation2 + $0x14] sm:$0xf] }
 0x277   : > { %v2116_v3 = vpop.permute.xlu1 %2115 }
 0x278   : > { %v6843_v44 = vpop.permute.xlu0 %4088  ;;  %2118 = vst.msk [vmem:[#allocation3 + $0x60] sm:$0xf] %vm1940_vm4, %v2116_v3 }
 0x279   : > { %2124 = vst.msk [vmem:[#allocation3 + $0x60] sm:$0xf] %vm1947_vm6, %v2122_v35  ;;  %2855 = vrot.lane.b32.xlu1 %v5841_v47, %s7963_s23  ;;  %v5848_v35 = vld [vmem:[#allocation2 + $0x8] ss:$0 sps:$4 sm:$0xff]  }
 0x27a   : > { %2862 = vrot.lane.b32.xlu0 %v5840_v45, %s7989_s14  ;;  %2126 = vst.msk [vmem:[#allocation3 + $0x60] sm:$0xf] %vm1954_vm7, %v2125_v30  ;;  %v5849_v45 = vld [vmem:[#allocation2] ss:$0 sps:$4 sm:$0xff]   ;;  %v3554_v47 = vld [vmem:[#allocation2 + $0x8] sm:$0xf] }
 0x27b   : > { %v6852_v50 = vpop.permute.xlu1 %2130 }
 0x27c   : > { %v6850_v48 = vpop.permute.xlu0 %4038 }
 0x27d   : > { %2807 = vrot.lane.b32.xlu1 %v6808_v34, %s7990_s17 }
 0x27e   : > { %2899 = vrot.lane.b32.xlu0 %v3423_v24, %s7967_s24  ;;  %v6906_v24 = vcombine.high %v6861_v58, %v6861_v58 }
 0x27f   : > { %v6859_v54 = vpop.permute.xlu1 %2189 }
 0x280   : > { %v6857_v52 = vpop.permute.xlu0 %4101 }
 0x281   : > { %2869 = vrot.lane.b32.xlu1 %v6808_v34, %s7988_s16 }
 0x282   : > { %2948 = vrot.lane.b32.xlu0 %v5842_v59, %s7987_s21 }
 0x283   : > { %v6868_v63 = vpop.permute.xlu1 %4079 }
 0x284   : > { %v6866_v60 = vpop.permute.xlu0 %2847 }
 0x285   : > { %2955 = vrot.lane.b32.xlu1 %v6872_v2, %s7954_s26 }
 0x286   : > { %2957 = vrot.lane.b32.xlu0 %v6861_v58, %s7954_s26  ;;  %s7991_s26 = smov 80  }
 0x287   : > { %v4024_v5 = vpop.permute.xlu1 %4023 }
 0x288   : > { %v6878_v4 = vpop.permute.xlu0 %2809  ;;  %4026 = vst.msk [vmem:[#allocation3 + $0x18] sm:$0xf] %vm1940_vm4, %v4024_v5 }
 0x289   : > { %3499 = vrot.lane.b32.xlu1 %v5845_v6, %s7965_s22 }
 0x28a   : > { %3550 = vrot.lane.b32.xlu0 %v5844_v57, %s7961_s28 }
 0x28b   : > { %v4030_v9 = vpop.permute.xlu1 %4029 }
 0x28c   : > { %v6885_v8 = vpop.permute.xlu0 %2871  ;;  %4032 = vst.msk [vmem:[#allocation3 + $0x18] sm:$0xf] %vm1947_vm6, %v4030_v9  ;;  %v5850_v9 = vld [vmem:[#allocation2 + $0xc] ss:$0 sps:$4 sm:$0xff]  }
 0x28d   : > { %4034 = vst.msk [vmem:[#allocation3 + $0x18] sm:$0xf] %vm1954_vm7, %v4033_v13  ;;  %3616 = vrot.lane.b32.xlu1 %v6881_v7, %s7967_s24  ;;  %v5851_v13 = vld [vmem:[#allocation2 + $0x1c] ss:$0 sps:$4 sm:$0xff]  }
 0x28e   : > { %3618 = vrot.lane.b32.xlu0 %v6889_v10, %s7967_s24 }
 0x28f   : > { %v6899_v17 = vpop.permute.xlu1 %4094 }
 0x290   : > { %v6897_v14 = vpop.permute.xlu0 %4148 }
 0x291   : > { %4245 = vrot.lane.b32.xlu1 %v4243_v21, %s7956_s25 }
 0x292   : > { %4252 = vrot.lane.b32.xlu0 %v6861_v58, %s7971_s29 }
 0x293   : > { %v6908_v27 = vpop.permute.xlu1 %3388 }
 0x294   : > { %v2085_v25 = vpop.permute.xlu0 %2084 }
 0x295   : > { %2087 = vst.msk [vmem:[#allocation3 + $0x40] sm:$0xf0] %vm1969_vm5, %v2085_v25  ;;  %4254 = vrot.lane.b32.xlu1 %v6906_v24, %s7971_s29 }
 0x296   : > { %4274 = vrot.lane.b32.xlu0 %v5847_v15, %s7965_s22  ;;  %v4306_v15 = vld [vmem:[#allocation2 + $0x1c] sm:$0xf] }
 0x297   : > { %v6914_v32 = vpop.permute.xlu1 %3450 }
 0x298   : > { %v2110_v29 = vpop.permute.xlu0 %2109 }
 0x299   : > { %4302 = vrot.lane.b32.xlu1 %v4300_v33, %s7990_s17  ;;  %v5852_v33 = vld [vmem:[#allocation2 + $0x14] ss:$0 sps:$4 sm:$0xff]  }
 0x29a   : > { %2257 = vrot.lane.b32.xlu0 %v5848_v35, %s7971_s29 }
 0x29b   : > { %v6918_v37 = vpop.permute.xlu1 %4137 }
 0x29c   : > { %v2149_v31 = vpop.permute.xlu0 %2148 }
 0x29d   : > { %2884 = vrot.lane.b32.xlu1 %v2882_v61, %s7965_s22  ;;  %v2153_v25 = vsel %vm7958_vm0, %v2149_v31, %v6759_v11  ;;  %v5854_v61 = vld [vmem:[#allocation2 + $0xc] ss:$0 sps:$4 sm:$0xff]  }
 0x29e   : > { %2933 = vrot.lane.b32.xlu0 %v2931_v40, %s7965_s22 }
 0x29f   : > { %v6922_v3 = vpop.permute.xlu1 %2901 }
 0x2a0   : > { %v2160_v43 = vpop.permute.xlu0 %2159 }
 0x2a1   : > { %3556 = vrot.lane.b32.xlu1 %v3554_v47, %s7969_s27  ;;  %v2937_v47 = vld [vmem:[#allocation2 + $0xc] sm:$0xf] }
 0x2a2   : > { %3585 = vrot.lane.b32.xlu0 %v5849_v45, %s7956_s25  ;;  %s7992_s25 = smov 96   ;;  %v2888_v45 = vld [vmem:[#allocation2 + $0x14] sm:$0xf] }
 0x2a3   : > { %v2092_v59 = vpop.permute.xlu1 %2091 }
 0x2a4   : > { %v2208_v30 = vpop.permute.xlu0 %2207  ;;  %v2096_v5 = vsel %vm2095_vm15, %v2092_v59, %v6738_v53  ;;  %v5856_v59 = vld [vmem:[#allocation2 + $0x4] ss:$0 sps:$4 sm:$0xff]  }
 0x2a5   : > { %2210 = vst.msk [vmem:[#allocation3 + $0x80] sm:$0xf0] %vm1969_vm5, %v2208_v30  ;;  %3592 = vrot.lane.b32.xlu1 %v6872_v2, %s7971_s29 }
 0x2a6   : > { %2098 = vst.msk [vmem:[#allocation3 + $0x40] sm:$0xf0] %vm1977_vm11, %v2096_v5  ;;  %3594 = vrot.lane.b32.xlu0 %v6861_v58, %s7971_s29 }
 0x2a7   : > { %v2103_v6 = vpop.permute.xlu1 %2102 }
 0x2a8   : > { %v2222_v57 = vpop.permute.xlu0 %2221  ;;  %2105 = vst.msk [vmem:[#allocation3 + $0x40] sm:$0xf0] %vm1985_vm12, %v2103_v6  ;;  %v5857_v6 = vld [vmem:[#allocation2 + $0x14] ss:$0 sps:$4 sm:$0xff]  }
 0x2a9   : > { %2112 = vst.msk [vmem:[#allocation3 + $0x40] sm:$0xf0] %vm1993_vm13, %v2110_v29  ;;  %3640 = vrot.lane.b32.xlu1 %v5851_v13, %s7990_s17 }
 0x2aa   : > { %4281 = vrot.lane.b32.xlu0 %v5850_v9, %s7967_s24 }
 0x2ab   : > { %v2142_v21 = vpop.permute.xlu1 %2141 }
 0x2ac   : > { %v4049_v53 = vpop.permute.xlu0 %4048  ;;  %2144 = vst.msk [vmem:[#allocation3 + $0x60] sm:$0xf0] %vm1969_vm5, %v2142_v21 }
 0x2ad   : > { %4051 = vst.msk [vmem:[#allocation3 + $0x18] sm:$0xf0] %vm1969_vm5, %v4049_v53  ;;  %4308 = vrot.lane.b32.xlu1 %v4306_v15, %s7992_s25 }
 0x2ae   : > { %2155 = vst.msk [vmem:[#allocation3 + $0x60] sm:$0xf0] %vm1977_vm11, %v2153_v25  ;;  %4315 = vrot.lane.b32.xlu0 %v6632_v56, %s7991_s26  ;;  %v4259_v25 = vld [vmem:[#allocation2 + $0x4] sm:$0xf] }
 0x2af   : > { %2162 = vst.msk [vmem:[#allocation3 + $0x60] sm:$0xf0] %vm1985_vm12, %v2160_v43  ;;  %v2167_v35 = vpop.permute.xlu1 %2166  ;;  %v5853_v43 = vld [vmem:[#allocation2 + $0x14] ss:$0 sps:$4 sm:$0xff]  }
 0x2b0   : > { %v3348_v29 = vpop.permute.xlu0 %3347  ;;  %2169 = vst.msk [vmem:[#allocation3 + $0x60] sm:$0xf0] %vm1993_vm13, %v2167_v35 }
 0x2b1   : > { %v3349_v11 = vsel %vm2095_vm15, %v6769_v1, %v3348_v29  ;;  %4317 = vrot.lane.b32.xlu1 %v6787_v22, %s7991_s26  ;;  %v5855_v22 = vld [vmem:[#allocation2 + $0x1c] ss:$0 sps:$4 sm:$0xff]   ;;  %v5861_v29 = vld [vmem:[#allocation2 + $0xc] ss:$0 sps:$4 sm:$0xff]  }
 0x2b2   : > { %3351 = vst.msk [vmem:[#allocation3 + $0x10] sm:$0xf] %vm1947_vm6, %v3349_v11  ;;  %4341 = vrot.lane.b32.xlu0 %v5852_v33, %s7989_s14  ;;  %v5863_v11 = vld [vmem:[#allocation2 + $0x1c] ss:$0 sps:$4 sm:$0xff]  }
 0x2b3   : > { %3357 = vst.msk [vmem:[#allocation3 + $0x10] sm:$0xf] %vm1954_vm7, %v6789_v23  ;;  %v2215_v40 = vpop.permute.xlu1 %2214 }
 0x2b4   : > { %3363 = vst.msk [vmem:[#allocation3 + $0x10] sm:$0xf] %vm1961_vm8, %v6780_v20  ;;  %v3405_v31 = vpop.permute.xlu0 %3404 }
 0x2b5   : > { %v3406_v1 = vsel %vm7958_vm0, %v6778_v18, %v3405_v31  ;;  %2217 = vst.msk [vmem:[#allocation3 + $0x80] sm:$0xf0] %vm1977_vm11, %v2215_v40  ;;  %2264 = vrot.lane.b32.xlu1 %v5854_v61, %s7965_s22  ;;  %v7034_v31 = vld [vmem:[#allocation2 + $0xc] sm:$0xff] }
 0x2b6   : > { %3408 = vst.msk [vmem:[#allocation3 + $0x30] sm:$0xf] %vm1947_vm6, %v3406_v1  ;;  %2890 = vrot.lane.b32.xlu0 %v2888_v45, %s7967_s24  ;;  %v5865_v45 = vld [vmem:[#allocation2 + $0x4] ss:$0 sps:$4 sm:$0xff]  }
 0x2b7   : > { %2224 = vst.msk [vmem:[#allocation3 + $0x80] sm:$0xf0] %vm1985_vm12, %v2222_v57  ;;  %v4056_v20 = vpop.permute.xlu1 %4055  ;;  %v5858_v57 = vld [vmem:[#allocation2 + $0x1c] ss:$0 sps:$4 sm:$0xff]  }
 0x2b8   : > { %3414 = vst.msk [vmem:[#allocation3 + $0x30] sm:$0xf] %vm1954_vm7, %v6761_v12  ;;  %v4066_v18 = vpop.permute.xlu0 %4065  ;;  %v4059_v23 = vsel %vm7958_vm0, %v4056_v20, %v6744_v55  ;;  %v3625_v20 = vld [vmem:[#allocation2 + $0x14] sm:$0xf] }
 0x2b9   : > { %2229 = vst.msk [vmem:[#allocation3 + $0x80] sm:$0xf0] %vm1993_vm13, %v5853_v43  ;;  %2914 = vrot.lane.b32.xlu1 %v5855_v22, %s7990_s17 }
 0x2ba   : > { %3420 = vst.msk [vmem:[#allocation3 + $0x30] sm:$0xf] %vm1961_vm8, %v6801_v28  ;;  %2939 = vrot.lane.b32.xlu0 %v2937_v47, %s7967_s24  ;;  %v3560_v28 = vld [vmem:[#allocation2 + $0xc] sm:$0xf] }
 0x2bb   : > { %4061 = vst.msk [vmem:[#allocation3 + $0x18] sm:$0xf0] %vm1977_vm11, %v4059_v23  ;;  %v4112_v30 = vpop.permute.xlu1 %4111 }
 0x2bc   : > { %4068 = vst.msk [vmem:[#allocation3 + $0x18] sm:$0xf0] %vm1985_vm12, %v4066_v18  ;;  %v4126_v12 = vpop.permute.xlu0 %4125 }
 0x2bd   : > { %4114 = vst.msk [vmem:[#allocation3 + $0x38] sm:$0xf0] %vm1969_vm5, %v4112_v30  ;;  %2965 = vrot.lane.b32.xlu1 %v5856_v59, %s7969_s27  ;;  %v4265_v30 = vld [vmem:[#allocation2 + $0x4] sm:$0xf]  ;;  %v4144_v59 = vld [vmem:[#allocation2 + $0x1c] sm:$0xf] }
 0x2be   : > { %3562 = vrot.lane.b32.xlu0 %v3560_v28, %s7961_s28  ;;  %v5866_v28 = vld [vmem:[#allocation2 + $0x18] ss:$0 sps:$4 sm:$0xff]  }
 0x2bf   : > { %v4119_v5 = vpop.permute.xlu1 %4118 }
 0x2c0   : > { %v4073_v55 = vpop.permute.xlu0 %4072  ;;  %4121 = vst.msk [vmem:[#allocation3 + $0x38] sm:$0xf0] %vm1977_vm11, %v4119_v5  ;;  %v5867_v5 = vld [vmem:[#allocation2 + $0x1c] ss:$0 sps:$4 sm:$0xff]  }
 0x2c1   : > { %4075 = vst.msk [vmem:[#allocation3 + $0x18] sm:$0xf0] %vm1993_vm13, %v4073_v55  ;;  %3647 = vrot.lane.b32.xlu1 %v5858_v57, %s7992_s25  ;;  %v2248_v55 = vld [vmem:[#allocation2 + $0x4] sm:$0xf] }
 0x2c2   : > { %4128 = vst.msk [vmem:[#allocation3 + $0x38] sm:$0xf0] %vm1985_vm12, %v4126_v12  ;;  %3654 = vrot.lane.b32.xlu0 %v6808_v34, %s7991_s26  ;;  %v4322_v12 = vld [vmem:[#allocation2 + $0x20] sm:$0xf] }
 0x2c3   : > { %4133 = vst.msk [vmem:[#allocation3 + $0x38] sm:$0xf0] %vm1993_vm13, %v5857_v6  ;;  %v2826_v13 = vpop.permute.xlu1 %2825  ;;  %v2371_v6 = vcombine.low %v6881_v7, %v6881_v7 }
 0x2c4   : > { %v4237_v9 = vpop.permute.xlu0 %4236  ;;  %v2827_v21 = vsel %vm7958_vm0, %v6771_v16, %v2826_v13  ;;  %vm2134_vm0 = vcmask 916480  }
 0x2c5   : > { %v4240_v53 = vsel %vm2337_vm1, %v4237_v9, %v6824_v26  ;;  %2829 = vst.msk [vmem:[#allocation3 + $0x68] sm:$0xf] %vm1947_vm6, %v2827_v21  ;;  %3656 = vrot.lane.b32.xlu1 %v6632_v56, %s7991_s26 }
 0x2c6   : > { %4242 = vst.msk [vmem:[#allocation3 + $0x78] sm:$0xf0] %vm1993_vm13, %v4240_v53  ;;  %4261 = vrot.lane.b32.xlu0 %v4259_v25, %s7965_s22  ;;  %v2976_v25 = vld [vmem:[#allocation2 + $0x8] sm:$0xf] }
 0x2c7   : > { %2835 = vst.msk [vmem:[#allocation3 + $0x68] sm:$0xf] %vm1954_vm7, %v6810_v19  ;;  %v2176_v16 = vpop.permute.xlu1 %2175 }
 0x2c8   : > { %2841 = vst.msk [vmem:[#allocation3 + $0x68] sm:$0xf] %vm1961_vm8, %v6831_v39  ;;  %v4332_v34 = vpop.permute.xlu0 %4331  ;;  %v2178_v15 = vsel %vm2177_vm3, %v6815_v36, %v2176_v16  ;;  %v5859_v36 = vld [vmem:[#allocation2 + $0x14] ss:$0 sps:$4 sm:$0xff]  }
 0x2c9   : > { %v4335_v26 = vsel %vm7960_vm2, %v4332_v34, %v6837_v41  ;;  %2180 = vst.msk [vmem:[#allocation3 + $0x80] sm:$0xf] %vm1940_vm4, %v2178_v15  ;;  %4293 = vrot.lane.b32.xlu1 %v6767_v62, %s7990_s17  ;;  %v2242_v41 = vld [vmem:[#allocation2 + $0x4] sm:$0xf]  ;;  %vm2376_vm2 = vcmask 130048  }
 0x2ca   : > { %4337 = vst.msk [vmem:[#allocation3 + $0xb8] sm:$0xf0] %vm1969_vm5, %v4335_v26  ;;  %4295 = vrot.lane.b32.xlu0 %v6622_v49, %s7990_s17 }
 0x2cb   : > { %2186 = vst.msk [vmem:[#allocation3 + $0x80] sm:$0xf] %vm1947_vm6, %v6826_v38  ;;  %v2199_v19 = vpop.permute.xlu1 %2198 }
 0x2cc   : > { %2192 = vst.msk [vmem:[#allocation3 + $0x80] sm:$0xf] %vm1954_vm7, %v6859_v54  ;;  %v2133_v56 = vpop.permute.xlu0 %2132  ;;  %v2201_v49 = vsel %vm7973_vm10, %v6833_v51, %v2199_v19  ;;  %v5860_v54 = vld [vmem:[#allocation2 + $0x20] ss:$0 sps:$4 sm:$0xff]  }
 0x2cd   : > { %v2135_v39 = vsel %vm2134_vm0, %v6852_v50, %v2133_v56  ;;  %2203 = vst.msk [vmem:[#allocation3 + $0x80] sm:$0xf] %vm1961_vm8, %v2201_v49  ;;  %4348 = vrot.lane.b32.xlu1 %v5859_v36, %s7988_s16 }
 0x2ce   : > { %2137 = vst.msk [vmem:[#allocation3 + $0x60] sm:$0xf] %vm1961_vm8, %v2135_v39  ;;  %2244 = vrot.lane.b32.xlu0 %v2242_v41, %s7971_s29  ;;  %v5879_v39 = vld [vmem:[#allocation2 + $0x1c] ss:$0 sps:$4 sm:$0xff]  }
 0x2cf   : > { %v3425_v38 = vpop.permute.xlu1 %3424  ;;  %v4729_v41 = vld [vmem:[#allocation3 + $0x78] sm:$0xff] }
 0x2d0   : > { %v4082_v62 = vpop.permute.xlu0 %4081  ;;  %v3428_v50 = vsel %vm2177_vm3, %v3425_v38, %v6839_v42  ;;  %v3566_v42 = vld [vmem:[#allocation2 + $0xc] sm:$0xf]  ;;  %v5869_v38 = vld [vmem:[#allocation2 + $0x1c] ss:$0 sps:$4 sm:$0xff]  }
 0x2d1   : > { %v4083_v35 = vsel %vm2177_vm3, %v6868_v63, %v4082_v62  ;;  %3430 = vst.msk [vmem:[#allocation3 + $0x30] sm:$0xf0] %vm1969_vm5, %v3428_v50  ;;  %2271 = vrot.lane.b32.xlu1 %v5861_v29, %s7967_s24  ;;  %v5862_v63 = vld [vmem:[#allocation2 + $0x4] ss:$0 sps:$4 sm:$0xff]   ;;  %v3035_v29 = vld [vmem:[#allocation2 + $0x8] sm:$0xf] }
 0x2d2   : > { %4085 = vst.msk [vmem:[#allocation3 + $0x38] sm:$0xf] %vm1940_vm4, %v4083_v35  ;;  %2921 = vrot.lane.b32.xlu0 %v5860_v54, %s7992_s25  ;;  %v5870_v50 = vld [vmem:[#allocation2 + $0x4] ss:$0 sps:$4 sm:$0xff]  }
 0x2d3   : > { %4091 = vst.msk [vmem:[#allocation3 + $0x38] sm:$0xf] %vm1947_vm6, %v6843_v44  ;;  %v3368_v33 = vpop.permute.xlu1 %3367 }
 0x2d4   : > { %4097 = vst.msk [vmem:[#allocation3 + $0x38] sm:$0xf] %vm1954_vm7, %v6899_v17  ;;  %v3375_v51 = vpop.permute.xlu0 %3374  ;;  %v7042_v17 = vcombine.high %v7034_v31, %v7034_v31 }
 0x2d5   : > { %3370 = vst.msk [vmem:[#allocation3 + $0x10] sm:$0xf0] %vm1969_vm5, %v3368_v33  ;;  %2972 = vrot.lane.b32.xlu1 %v5862_v63, %s7961_s28  ;;  %s7993_s28 = smov 64   ;;  %v3631_v33 = vld [vmem:[#allocation2 + $0x18] sm:$0xf] }
 0x2d6   : > { %3377 = vst.msk [vmem:[#allocation3 + $0x10] sm:$0xf0] %vm1977_vm11, %v3375_v51  ;;  %3568 = vrot.lane.b32.xlu0 %v3566_v42, %s7963_s23  ;;  %s7994_s23 = smov 88   ;;  %v5871_v42 = vld [vmem:[#allocation2 + $0x20] ss:$0 sps:$4 sm:$0xff]  }
 0x2d7   : > { %3382 = vst.msk [vmem:[#allocation3 + $0x10] sm:$0xf0] %vm1985_vm12, %v5863_v11  ;;  %v3435_v40 = vpop.permute.xlu1 %3434  ;;  %v4726_v11 = vld [vmem:[#allocation3 + $0x60] sm:$0xff] }
 0x2d8   : > { %v3387_v44 = vpop.permute.xlu0 %3386  ;;  %3437 = vst.msk [vmem:[#allocation3 + $0x30] sm:$0xf0] %vm1977_vm11, %v3435_v40 }
 0x2d9   : > { %v3390_v61 = vsel %vm2134_vm0, %v3387_v44, %v6908_v27  ;;  %3575 = vrot.lane.b32.xlu1 %v7034_v31, %s7989_s14 }
 0x2da   : > { %3392 = vst.msk [vmem:[#allocation3 + $0x10] sm:$0xf0] %vm1993_vm13, %v3390_v61  ;;  %3577 = vrot.lane.b32.xlu0 %v7042_v17, %s7989_s14 }
 0x2db   : > { %v4041_v43 = vpop.permute.xlu1 %4040 }
 0x2dc   : > { %v3449_v1 = vpop.permute.xlu0 %3448  ;;  %v4042_v18 = vsel %vm2134_vm0, %v6850_v48, %v4041_v43 }
 0x2dd   : > { %4044 = vst.msk [vmem:[#allocation3 + $0x18] sm:$0xf] %vm1961_vm8, %v4042_v18  ;;  %3602 = vrot.lane.b32.xlu1 %v5865_v45, %s7965_s22 }
 0x2de   : > { %3627 = vrot.lane.b32.xlu0 %v3625_v20, %s7990_s17 }
 0x2df   : > { %v4104_v22 = vpop.permute.xlu1 %4103 }
 0x2e0   : > { %v4140_v27 = vpop.permute.xlu0 %4139  ;;  %v4105_v47 = vsel %vm7973_vm10, %v6857_v52, %v4104_v22 }
 0x2e1   : > { %v4141_v23 = vsel %vm2376_vm2, %v6918_v37, %v4140_v27  ;;  %4107 = vst.msk [vmem:[#allocation3 + $0x38] sm:$0xf] %vm1961_vm8, %v4105_v47  ;;  %4267 = vrot.lane.b32.xlu1 %v4265_v30, %s7967_s24  ;;  %v4716_v19 = vld [vmem:[#allocation3 + $0x10] sm:$0xff]  ;;  %v4359_v27 = vld [vmem:[#allocation2 + $0x1c] sm:$0xf] }
 0x2e2   : > { %4143 = vst.msk [vmem:[#allocation3 + $0x58] sm:$0xf] %vm1940_vm4, %v4141_v23  ;;  %4324 = vrot.lane.b32.xlu0 %v4322_v12, %s7993_s28  ;;  %v2280_v30 = vld [vmem:[#allocation2] sm:$0xf] }
 0x2e3   : > { %4145 = vst.msk [vmem:[#allocation3 + $0x58] sm:$0xf] %vm1947_vm6, %v4144_v59  ;;  %v2846_v37 = vpop.permute.xlu1 %2845  ;;  %v4413_v59 = vld [vmem:[#allocation2 + $0x1c] sm:$0xf] }
 0x2e4   : > { %4151 = vst.msk [vmem:[#allocation3 + $0x58] sm:$0xf] %vm1954_vm7, %v6897_v14  ;;  %v2789_v48 = vpop.permute.xlu0 %2788  ;;  %v2849_v52 = vsel %vm2177_vm3, %v2846_v37, %v6866_v60  ;;  %v4717_v60 = vld [vmem:[#allocation3 + $0x18] sm:$0xff] }
 0x2e5   : > { %4157 = vst.msk [vmem:[#allocation3 + $0x58] sm:$0xf] %vm1961_vm8, %v6732_v46  ;;  %4355 = vrot.lane.b32.xlu1 %v5866_v28, %s7994_s23  ;;  %v3452_v46 = vsel %vm7973_vm10, %v3449_v1, %v6914_v32  ;;  %v5868_v32 = vld [vmem:[#allocation2] ss:$0 sps:$4 sm:$0xff]   ;;  %v4722_v1 = vld [vmem:[#allocation3 + $0x40] sm:$0xff] }
 0x2e6   : > { %2791 = vst.msk [vmem:[#allocation3 + $0x48] sm:$0xf0] %vm1969_vm5, %v2789_v48  ;;  %2851 = vst.msk [vmem:[#allocation3 + $0x68] sm:$0xf0] %vm1969_vm5, %v2849_v52  ;;  %2250 = vrot.lane.b32.xlu0 %v2248_v55, %s7965_s22  ;;  %v5639_v43 = vpack.c.bf16 %v4726_v11, %v4722_v1  ;;  %v2988_v11 = vld [vmem:[#allocation2 + $0xc] sm:$0xf] }
 0x2e7   : > { %v3442_v57 = vpop.permute.xlu1 %3441 }
 0x2e8   : > { %v2796_v14 = vpop.permute.xlu0 %2795  ;;  %3444 = vst.msk [vmem:[#allocation3 + $0x30] sm:$0xf0] %vm1985_vm12, %v3442_v57  ;;  %v4721_v9 = vld [vmem:[#allocation3 + $0x38] sm:$0xff] }
 0x2e9   : > { %2798 = vst.msk [vmem:[#allocation3 + $0x48] sm:$0xf0] %vm1977_vm11, %v2796_v14  ;;  %2372 = vrot.lane.b32.xlu1 %v2371_v6, %s7967_s24  ;;  %v5657_v13 = vpack.c.bf16 %v4721_v9, %v4717_v60  ;;  %v2341_v14 = vld [vmem:[#allocation2] sm:$0xf]  ;;  %v3041_v9 = vld [vmem:[#allocation2 + $0xc] sm:$0xf] }
 0x2ea   : > { %2803 = vst.msk [vmem:[#allocation3 + $0x48] sm:$0xf0] %vm1985_vm12, %v5867_v5  ;;  %2374 = vrot.lane.b32.xlu0 %v6881_v7, %s7967_s24  ;;  %v5872_v5 = vld [vmem:[#allocation2 + $0x8] ss:$0 sps:$4 sm:$0xff]  }
 0x2eb   : > { %3454 = vst.msk [vmem:[#allocation3 + $0x30] sm:$0xf0] %vm1993_vm13, %v3452_v46  ;;  %5658 = vmatprep.subr.bf16.mxu1 %v5657_v13  ;;  %v2856_v21 = vpop.permute.xlu1 %2855  ;;  %v2982_v13 = vld [vmem:[#allocation2 + $0xc] sm:$0xf] }
 0x2ec   : > { %v2863_v53 = vpop.permute.xlu0 %2862  ;;  %2858 = vst.msk [vmem:[#allocation3 + $0x68] sm:$0xf0] %vm1977_vm11, %v2856_v21  ;;  %v4725_v26 = vld [vmem:[#allocation3 + $0x58] sm:$0xff] }
 0x2ed   : > { %2865 = vst.msk [vmem:[#allocation3 + $0x68] sm:$0xf0] %vm1985_vm12, %v2863_v53  ;;  %2978 = vrot.lane.b32.xlu1 %v2976_v25, %s7969_s27  ;;  %v5661_v62 = vpack.c.bf16 %v4729_v41, %v4725_v26  ;;  %v7145_v53 = vld [vmem:[#allocation2 + $0x1c] sm:$0xff] }
 0x2ee   : > { %3007 = vrot.lane.b32.xlu0 %v5868_v32, %s7993_s28 }
 0x2ef   : > { %v2808_v16 = vpop.permute.xlu1 %2807 }
 0x2f0   : > { %v2900_v34 = vpop.permute.xlu0 %2899  ;;  %v2811_v56 = vsel %vm2134_vm0, %v2808_v16, %v6878_v4 }
 0x2f1   : > { %v2903_v15 = vsel %vm2376_vm2, %v2900_v34, %v6922_v3  ;;  %2813 = vst.msk [vmem:[#allocation3 + $0x48] sm:$0xf0] %vm1993_vm13, %v2811_v56  ;;  %3014 = vrot.lane.b32.xlu1 %v6872_v2, %s7971_s29  ;;  %v5875_v34 = vld [vmem:[#allocation2 + $0xc] ss:$0 sps:$4 sm:$0xff]  }
 0x2f2   : > { %v4720_v36 = vld [vmem:[#allocation3 + $0x30] sm:$0xff]  ;;  %2905 = vst.msk [vmem:[#allocation3 + $0x88] sm:$0xf0] %vm1969_vm5, %v2903_v15  ;;  %3016 = vrot.lane.b32.xlu0 %v6861_v58, %s7971_s29  ;;  %v5876_v15 = vld [vmem:[#allocation2 + $0x1c] ss:$0 sps:$4 sm:$0xff]  }
 0x2f3   : > { %v5659_v49 = vpack.c.bf16 %v4720_v36, %v4716_v19  ;;  %2910 = vst.msk [vmem:[#allocation3 + $0x88] sm:$0xf0] %vm1977_vm11, %v5879_v39  ;;  %v2870_v4 = vpop.permute.xlu1 %2869  ;;  %v5877_v36 = vld [vmem:[#allocation2] ss:$0 sps:$4 sm:$0xff]   ;;  %v4365_v39 = vld [vmem:[#allocation2 + $0x1c] sm:$0xf] }
 0x2f4   : > { %v2949_v3 = vpop.permute.xlu0 %2948  ;;  %v2873_v54 = vsel %vm7973_vm10, %v2870_v4, %v6885_v8  ;;  %vm8002_vm10 = vcmask 64512  }
 0x2f5   : > { %5660 = vmatpush1.bf16.msra.mxu1 %v5659_v49  ;;  %2951 = vst.msk [vmem:[#allocation3 + $0xa8] sm:$0xf0] %vm1969_vm5, %v2949_v3  ;;  %3037 = vrot.lane.b32.xlu1 %v3035_v29, %s7965_s22  ;;  %s7995_s22 = smov 8   ;;  %v2894_v29 = vld [vmem:[#allocation2 + $0x14] sm:$0xf] }
 0x2f6   : > { %5662 = vmatprep.subr.bf16.mxu1 %v5661_v62  ;;  %2875 = vst.msk [vmem:[#allocation3 + $0x68] sm:$0xf0] %vm1993_vm13, %v2873_v54  ;;  %3062 = vrot.lane.b32.xlu0 %v5869_v38, %s7990_s17  ;;  %v7169_v62 = vcombine.high %v7145_v53, %v7145_v53  ;;  %v5878_v54 = vld [vmem:[#allocation2 + $0x14] ss:$0 sps:$4 sm:$0xff]  }
 0x2f7   : > { %v2956_v35 = vpop.permute.xlu1 %2955 }
 0x2f8   : > { %v2958_v2 = vpop.permute.xlu0 %2957  ;;  %v4723_v44 = vld [vmem:[#allocation3 + $0x48] sm:$0xff] }
 0x2f9   : > { %v2959_v51 = vsel %vm2293_vm14, %v2956_v35, %v2958_v2  ;;  %3609 = vrot.lane.b32.xlu1 %v5870_v50, %s7967_s24  ;;  %s7996_s24 = smov 56   ;;  %v4419_v2 = vld [vmem:[#allocation2 + $0x1c] sm:$0xf] }
 0x2fa   : > { %2961 = vst.msk [vmem:[#allocation3 + $0xa8] sm:$0xf0] %vm1977_vm11, %v2959_v51  ;;  %3633 = vrot.lane.b32.xlu0 %v3631_v33, %s7992_s25  ;;  %v5880_v51 = vld [vmem:[#allocation2 + $0xc] ss:$0 sps:$4 sm:$0xff]  }
 0x2fb   : > { %v3500_v63 = vpop.permute.xlu1 %3499  ;;  %v5881_v33 = vld [vmem:[#allocation2 + $0xc] ss:$0 sps:$4 sm:$0xff]  }
 0x2fc   : > { %v3551_v8 = vpop.permute.xlu0 %3550  ;;  %3502 = vst.msk [vmem:[#allocation3 + $0x50] sm:$0xf0] %vm1993_vm13, %v3500_v63 }
 0x2fd   : > { %3553 = vst.msk [vmem:[#allocation3 + $0x70] sm:$0xf0] %vm1993_vm13, %v3551_v8  ;;  %v4727_v40 = vld [vmem:[#allocation3 + $0x68] sm:$0xff]  ;;  %3664 = vrot.lane.b32.xlu1 %v5871_v42, %s7993_s28 }
 0x2fe   : > { %3671 = vrot.lane.b32.xlu0 %v6881_v7, %s7995_s22  ;;  %v5637_v61 = vpack.c.bf16 %v4727_v40, %v4723_v44  ;;  %v3623_v7 = vld [vmem:[#allocation2 + $0x14] sm:$0xf]  ;;  %v2943_v8 = vld [vmem:[#allocation2 + $0xc] sm:$0xf] }
 0x2ff   : > { %v3617_v18 = vpop.permute.xlu1 %3616 }
 0x300   : > { %v3619_v45 = vpop.permute.xlu0 %3618  ;;  %5638 = vmatprep.subr.bf16.mxu0 %v5637_v61  ;;  %v5882_v61 = vld [vmem:[#allocation2 + $0x4] ss:$0 sps:$4 sm:$0xff]  }
 0x301   : > { %v3620_v20 = vsel %vm2376_vm2, %v3617_v18, %v3619_v45  ;;  %5640 = vmatpush1.bf16.msra.mxu0 %v5639_v43  ;;  %3673 = vrot.lane.b32.xlu1 %v6889_v10, %s7995_s22 }
 0x302   : > { %3622 = vst.msk [vmem:[#allocation3 + $0xb0] sm:$0xf] %vm1940_vm4, %v3620_v20  ;;  %4361 = vrot.lane.b32.xlu0 %v4359_v27, %s7988_s16  ;;  %v5883_v27 = vld [vmem:[#allocation2 + $0x1c] ss:$0 sps:$4 sm:$0xff]  }
 0x303   : > { %3624 = vst.msk [vmem:[#allocation3 + $0xb0] sm:$0xf] %vm1947_vm6, %v3623_v7  ;;  %v4246_v23 = vpop.permute.xlu1 %4245  ;;  %v4724_v47 = vld [vmem:[#allocation3 + $0x50] sm:$0xff] }
 0x304   : > { %v4253_v22 = vpop.permute.xlu0 %4252  ;;  %v4728_v12 = vld [vmem:[#allocation3 + $0x70] sm:$0xff]  ;;  %4248 = vst.msk [vmem:[#allocation3 + $0x98] sm:$0xf] %vm1940_vm4, %v4246_v23 }
 0x305   : > { %v5663_v48 = vpack.c.bf16 %v4728_v12, %v4724_v47  ;;  %4415 = vrot.lane.b32.xlu1 %v4413_v59, %s7992_s25  ;;  %v5884_v12 = vld [vmem:[#allocation2 + $0xc] ss:$0 sps:$4 sm:$0xff]   ;;  %v5885_v59 = vld [vmem:[#allocation2 + $0x4] ss:$0 sps:$4 sm:$0xff]  }
 0x306   : > { %2282 = vrot.lane.b32.xlu0 %v2280_v30, %s7987_s21 }
 0x307   : > { %5664 = vmatpush1.bf16.msra.mxu1 %v5663_v48  ;;  %v4255_v28 = vpop.permute.xlu1 %4254  ;;  %v3729_v48 = vld [vmem:[#allocation2 + $0x14] sm:$0xf] }
 0x308   : > { %v4275_v37 = vpop.permute.xlu0 %4274  ;;  %v4256_v10 = vsel %vm2095_vm15, %v4253_v22, %v4255_v28  ;;  %v3678_v22 = vld [vmem:[#allocation2 + $0x14] sm:$0xf] }
 0x309   : > { %4277 = vst.msk [vmem:[#allocation3 + $0x98] sm:$0xf0] %vm1969_vm5, %v4275_v37  ;;  %2289 = vrot.lane.b32.xlu1 %v6861_v58, %s7996_s24 }
 0x30a   : > { %4258 = vst.msk [vmem:[#allocation3 + $0x98] sm:$0xf] %vm1947_vm6, %v4256_v10  ;;  %2291 = vrot.lane.b32.xlu0 %v6906_v24, %s7996_s24  ;;  %v5886_v10 = vld [vmem:[#allocation2 + $0x14] ss:$0 sps:$4 sm:$0xff]  }
 0x30b   : > { %v4303_v55 = vpop.permute.xlu1 %4302 }
 0x30c   : > { %v2258_v52 = vpop.permute.xlu0 %2257  ;;  %4305 = vst.msk [vmem:[#allocation3 + $0xb8] sm:$0xf] %vm1940_vm4, %v4303_v55 }
 0x30d   : > { %2260 = vst.msk [vmem:[#allocation3 + $0xa0] sm:$0xf0] %vm1969_vm5, %v2258_v52  ;;  %2312 = vrot.lane.b32.xlu1 %v5872_v5, %s7969_s27  ;;  %s7997_s27 = smov 16   ;;  %v4425_v52 = vld [vmem:[#allocation2 + $0x20] sm:$0xf] }
 0x30e   : > { %2343 = vrot.lane.b32.xlu0 %v2341_v14, %s7993_s28  ;;  %v5887_v14 = vld [vmem:[#allocation2 + $0xc] ss:$0 sps:$4 sm:$0xff]  }
 0x30f   : > { %v2885_v6 = vpop.permute.xlu1 %2884 }
 0x310   : > { %v2934_v57 = vpop.permute.xlu0 %2933  ;;  %2887 = vst.msk [vmem:[#allocation3 + $0x88] sm:$0xf] %vm1947_vm6, %v2885_v6  ;;  %v2297_v6 = vld [vmem:[#allocation2 + $0x4] sm:$0xf] }
 0x311   : > { %2936 = vst.msk [vmem:[#allocation3 + $0xa8] sm:$0xf] %vm1947_vm6, %v2934_v57  ;;  %2350 = vrot.lane.b32.xlu1 %v6861_v58, %s7971_s29  ;;  %v5874_v58 = vld [vmem:[#allocation2 + $0x1c] ss:$0 sps:$4 sm:$0xff]  }
 0x312   : > { %2352 = vrot.lane.b32.xlu0 %v6906_v24, %s7971_s29  ;;  %v7151_v24 = vcombine.low %v7145_v53, %v7145_v53  ;;  %s7999_s29 = smov 32  }
 0x313   : > { %v3557_v60 = vpop.permute.xlu1 %3556 }
 0x314   : > { %v3586_v46 = vpop.permute.xlu0 %3585  ;;  %3559 = vst.msk [vmem:[#allocation3 + $0x90] sm:$0xf] %vm1940_vm4, %v3557_v60 }
 0x315   : > { %3588 = vst.msk [vmem:[#allocation3 + $0x90] sm:$0xf0] %vm1969_vm5, %v3586_v46  ;;  %2984 = vrot.lane.b32.xlu1 %v2982_v13, %s7998_s0  ;;  %v5888_v13 = vld [vmem:[#allocation2 + $0xc] ss:$0 sps:$4 sm:$0xff]  }
 0x316   : > { %3043 = vrot.lane.b32.xlu0 %v3041_v9, %s7997_s27  ;;  %v2332_v9 = vcombine.low %v7034_v31, %v7034_v31 }
 0x317   : > { %v3593_v32 = vpop.permute.xlu1 %3592 }
 0x318   : > { %v3595_v21 = vpop.permute.xlu0 %3594 }
 0x319   : > { %v3596_v25 = vsel %vm2095_vm15, %v3593_v32, %v3595_v21  ;;  %3069 = vrot.lane.b32.xlu1 %v5874_v58, %s7992_s25 }
 0x31a   : > { %3598 = vst.msk [vmem:[#allocation3 + $0x90] sm:$0xf0] %vm1977_vm11, %v3596_v25  ;;  %3076 = vrot.lane.b32.xlu0 %v7151_v24, %s7991_s26 }
 0x31b   : > { %v3641_v26 = vpop.permute.xlu1 %3640 }
 0x31c   : > { %v4282_v16 = vpop.permute.xlu0 %4281  ;;  %3643 = vst.msk [vmem:[#allocation3 + $0xb0] sm:$0xf0] %vm1969_vm5, %v3641_v26 }
 0x31d   : > { %4284 = vst.msk [vmem:[#allocation3 + $0x98] sm:$0xf0] %vm1977_vm11, %v4282_v16  ;;  %3078 = vrot.lane.b32.xlu1 %v7145_v53, %s7991_s26  ;;  %v2357_v16 = vld [vmem:[#allocation2 + $0x4] sm:$0xf] }
 0x31e   : > { %4289 = vst.msk [vmem:[#allocation3 + $0x98] sm:$0xf0] %vm1985_vm12, %v5875_v34  ;;  %3699 = vrot.lane.b32.xlu0 %v5876_v15, %s7988_s16 }
 0x31f   : > { %v4309_v19 = vpop.permute.xlu1 %4308 }
 0x320   : > { %v4316_v56 = vpop.permute.xlu0 %4315  ;;  %4311 = vst.msk [vmem:[#allocation3 + $0xb8] sm:$0xf] %vm1947_vm6, %v4309_v19  ;;  %v5890_v19 = vld [vmem:[#allocation2 + $0x14] ss:$0 sps:$4 sm:$0xff]  }
 0x321   : > { %3750 = vrot.lane.b32.xlu1 %v5877_v36, %s7999_s29 }
 0x322   : > { %4367 = vrot.lane.b32.xlu0 %v4365_v39, %s7994_s23 }
 0x323   : > { %v4318_v41 = vpop.permute.xlu1 %4317 }
 0x324   : > { %v4342_v49 = vpop.permute.xlu0 %4341  ;;  %v4319_v3 = vsel %vm2071_vm9, %v4316_v56, %v4318_v41  ;;  %v5889_v56 = vld [vmem:[#allocation2 + $0x4] ss:$0 sps:$4 sm:$0xff]  }
 0x325   : > { %4344 = vst.msk [vmem:[#allocation3 + $0xb8] sm:$0xf0] %vm1977_vm11, %v4342_v49  ;;  %4374 = vrot.lane.b32.xlu1 %v7145_v53, %s7987_s21  ;;  %v5892_v49 = vld [vmem:[#allocation2 + $0x20] ss:$0 sps:$4 sm:$0xff]  }
 0x326   : > { %4321 = vst.msk [vmem:[#allocation3 + $0xb8] sm:$0xf] %vm1954_vm7, %v4319_v3  ;;  %4376 = vrot.lane.b32.xlu0 %v7169_v62, %s7987_s21  ;;  %v7243_v3 = vld [vmem:[#allocation2 + $0x10] sm:$0xff] }
 0x327   : > { %v2265_v38 = vpop.permute.xlu1 %2264 }
 0x328   : > { %v2891_v4 = vpop.permute.xlu0 %2890  ;;  %2267 = vst.msk [vmem:[#allocation3 + $0xa0] sm:$0xf0] %vm1977_vm11, %v2265_v38  ;;  %v3092_v38 = vcombine.high %v7243_v3, %v7243_v3 }
 0x329   : > { %2893 = vst.msk [vmem:[#allocation3 + $0x88] sm:$0xf] %vm1954_vm7, %v2891_v4  ;;  %4395 = vrot.lane.b32.xlu1 %v5878_v54, %s7990_s17  ;;  %v4730_v4 = vld [vmem:[#allocation3 + $0x80] sm:$0xff] }
 0x32a   : > { %2895 = vst.msk [vmem:[#allocation3 + $0x88] sm:$0xf] %vm1961_vm8, %v2894_v29  ;;  %4421 = vrot.lane.b32.xlu0 %v4419_v2, %s7991_s26 }
 0x32b   : > { %v2915_v50 = vpop.permute.xlu1 %2914 }
 0x32c   : > { %v2940_v35 = vpop.permute.xlu0 %2939  ;;  %2917 = vst.msk [vmem:[#allocation3 + $0x88] sm:$0xf0] %vm1985_vm12, %v2915_v50 }
 0x32d   : > { %2942 = vst.msk [vmem:[#allocation3 + $0xa8] sm:$0xf] %vm1954_vm7, %v2940_v35  ;;  %4445 = vrot.lane.b32.xlu1 %v5881_v33, %s7990_s17 }
 0x32e   : > { %2944 = vst.msk [vmem:[#allocation3 + $0xa8] sm:$0xf] %vm1961_vm8, %v2943_v8  ;;  %2319 = vrot.lane.b32.xlu0 %v5880_v51, %s7998_s0  ;;  %v3684_v51 = vld [vmem:[#allocation2 + $0x14] sm:$0xf] }
 0x32f   : > { %v2966_v42 = vpop.permute.xlu1 %2965 }
 0x330   : > { %v3563_v63 = vpop.permute.xlu0 %3562  ;;  %2968 = vst.msk [vmem:[#allocation3 + $0xa8] sm:$0xf0] %vm1985_vm12, %v2966_v42 }
 0x331   : > { %3565 = vst.msk [vmem:[#allocation3 + $0x90] sm:$0xf] %vm1947_vm6, %v3563_v63  ;;  %2990 = vrot.lane.b32.xlu1 %v2988_v11, %s7995_s22  ;;  %v7254_v63 = vld [vmem:[#allocation2 + $0x4] sm:$0xff] }
 0x332   : > { %2997 = vrot.lane.b32.xlu0 %v7034_v31, %s7989_s14 }
 0x333   : > { %v3648_v40 = vpop.permute.xlu1 %3647 }
 0x334   : > { %v3655_v44 = vpop.permute.xlu0 %3654  ;;  %3650 = vst.msk [vmem:[#allocation3 + $0xb0] sm:$0xf0] %vm1977_vm11, %v3648_v40 }
 0x335   : > { %2999 = vrot.lane.b32.xlu1 %v7042_v17, %s7989_s14 }
 0x336   : > { %3024 = vrot.lane.b32.xlu0 %v5882_v61, %s7999_s29  ;;  %v3735_v61 = vld [vmem:[#allocation2 + $0x14] sm:$0xf] }
 0x337   : > { %v3657_v43 = vpop.permute.xlu1 %3656 }
 0x338   : > { %v4262_v1 = vpop.permute.xlu0 %4261  ;;  %v3658_v45 = vsel %vm2071_vm9, %v3655_v44, %v3657_v43  ;;  %v7260_v44 = vcombine.low %v7254_v63, %v7254_v63 }
 0x339   : > { %4264 = vst.msk [vmem:[#allocation3 + $0x98] sm:$0xf] %vm1954_vm7, %v4262_v1  ;;  %3052 = vrot.lane.b32.xlu1 %v7034_v31, %s7990_s17 }
 0x33a   : > { %3660 = vst.msk [vmem:[#allocation3 + $0xb0] sm:$0xf0] %vm1985_vm12, %v3658_v45  ;;  %3054 = vrot.lane.b32.xlu0 %v7042_v17, %s7990_s17  ;;  %v4381_v45 = vld [vmem:[#allocation2 + $0x20] sm:$0xf] }
 0x33b   : > { %v4294_v20 = vpop.permute.xlu1 %4293 }
 0x33c   : > { %v4296_v18 = vpop.permute.xlu0 %4295 }
 0x33d   : > { %v4297_v7 = vsel %vm2134_vm0, %v4294_v20, %v4296_v18  ;;  %3680 = vrot.lane.b32.xlu1 %v3678_v22, %s7989_s14 }
 0x33e   : > { %4299 = vst.msk [vmem:[#allocation3 + $0x98] sm:$0xf0] %vm1993_vm13, %v4297_v7  ;;  %3706 = vrot.lane.b32.xlu0 %v5883_v27, %s7994_s23  ;;  %v5894_v27 = vld [vmem:[#allocation2 + $0x18] ss:$0 sps:$4 sm:$0xff]   ;;  %v4431_v7 = vld [vmem:[#allocation2 + $0x20] sm:$0xf] }
 0x33f   : > { %v4349_v47 = vpop.permute.xlu1 %4348 }
 0x340   : > { %v2245_v23 = vpop.permute.xlu0 %2244  ;;  %4351 = vst.msk [vmem:[#allocation3 + $0xb8] sm:$0xf0] %vm1985_vm12, %v4349_v47  ;;  %v5896_v47 = vld [vmem:[#allocation2 + $0x10] ss:$0 sps:$4 sm:$0xff]  }
 0x341   : > { %2247 = vst.msk [vmem:[#allocation3 + $0xa0] sm:$0xf] %vm1954_vm7, %v2245_v23  ;;  %3713 = vrot.lane.b32.xlu1 %v7151_v24, %s7987_s21 }
 0x342   : > { %3715 = vrot.lane.b32.xlu0 %v7145_v53, %s7987_s21 }
 0x343   : > { %v2272_v30 = vpop.permute.xlu1 %2271 }
 0x344   : > { %v2922_v17 = vpop.permute.xlu0 %2921  ;;  %2274 = vst.msk [vmem:[#allocation3 + $0xa0] sm:$0xf0] %vm1985_vm12, %v2272_v30 }
 0x345   : > { %2924 = vst.msk [vmem:[#allocation3 + $0x88] sm:$0xf0] %vm1993_vm13, %v2922_v17  ;;  %2279 = vst.msk [vmem:[#allocation3 + $0xa0] sm:$0xf0] %vm1993_vm13, %v5884_v12  ;;  %3731 = vrot.lane.b32.xlu1 %v3729_v48, %s7990_s17  ;;  %v7277_v17 = vld [vmem:[#allocation2] sm:$0xff] }
 0x346   : > { %3757 = vrot.lane.b32.xlu0 %v5885_v59, %s7997_s27  ;;  %v7284_v12 = vcombine.high %v7277_v17, %v7277_v17 }
 0x347   : > { %v2973_v28 = vpop.permute.xlu1 %2972 }
 0x348   : > { %v3569_v37 = vpop.permute.xlu0 %3568  ;;  %2975 = vst.msk [vmem:[#allocation3 + $0xa8] sm:$0xf0] %vm1993_vm13, %v2973_v28 }
 0x349   : > { %3571 = vst.msk [vmem:[#allocation3 + $0x90] sm:$0xf] %vm1954_vm7, %v3569_v37  ;;  %4402 = vrot.lane.b32.xlu1 %v5886_v10, %s7992_s25 }
 0x34a   : > { %4427 = vrot.lane.b32.xlu0 %v4425_v52, %s7993_s28 }
 0x34b   : > { %v3576_v5 = vpop.permute.xlu1 %3575 }
 0x34c   : > { %v3578_v55 = vpop.permute.xlu0 %3577  ;;  %v4731_v21 = vld [vmem:[#allocation3 + $0x88] sm:$0xff] }
 0x34d   : > { %v3579_v57 = vsel %vm2337_vm1, %v3576_v5, %v3578_v55  ;;  %4452 = vrot.lane.b32.xlu1 %v5887_v14, %s7992_s25  ;;  %v2303_v55 = vld [vmem:[#allocation2 + $0x4] sm:$0xf] }
 0x34e   : > { %3581 = vst.msk [vmem:[#allocation3 + $0x90] sm:$0xf] %vm1961_vm8, %v3579_v57  ;;  %2299 = vrot.lane.b32.xlu0 %v2297_v6, %s8000_s1  ;;  %v5897_v6 = vld [vmem:[#allocation2 + $0x18] ss:$0 sps:$4 sm:$0xff]  }
 0x34f   : > { %v3603_v60 = vpop.permute.xlu1 %3602  ;;  %v4735_v32 = vld [vmem:[#allocation3 + $0xa8] sm:$0xff] }
 0x350   : > { %v3628_v46 = vpop.permute.xlu0 %3627  ;;  %3605 = vst.msk [vmem:[#allocation3 + $0x90] sm:$0xf0] %vm1985_vm12, %v3603_v60  ;;  %v5641_v58 = vpack.c.bf16 %v4735_v32, %v4731_v21  ;;  %v2363_v60 = vld [vmem:[#allocation2 + $0x4] sm:$0xf]  ;;  %v2429_v21 = vcombine.low %v7243_v3, %v7243_v3 }
 0x351   : > { %3630 = vst.msk [vmem:[#allocation3 + $0xb0] sm:$0xf] %vm1954_vm7, %v3628_v46  ;;  %2326 = vrot.lane.b32.xlu1 %v5888_v13, %s7995_s22 }
 0x352   : > { %2333 = vrot.lane.b32.xlu0 %v2332_v9, %s7989_s14  ;;  %5642 = vmatprep.subr.bf16.mxu0 %v5641_v58 }
 0x353   : > { %v4268_v34 = vpop.permute.xlu1 %4267 }
 0x354   : > { %v4325_v25 = vpop.permute.xlu0 %4324  ;;  %4270 = vst.msk [vmem:[#allocation3 + $0x98] sm:$0xf] %vm1961_vm8, %v4268_v34  ;;  %v5899_v34 = vld [vmem:[#allocation2 + $0x1c] ss:$0 sps:$4 sm:$0xff]  }
 0x355   : > { %4327 = vst.msk [vmem:[#allocation3 + $0xb8] sm:$0xf] %vm1961_vm8, %v4325_v25  ;;  %2335 = vrot.lane.b32.xlu1 %v7034_v31, %s7989_s14  ;;  %v5913_v31 = vld [vmem:[#allocation2 + $0x14] ss:$0 sps:$4 sm:$0xff]   ;;  %v5898_v25 = vld [vmem:[#allocation2 + $0x1c] ss:$0 sps:$4 sm:$0xff]  }
 0x356   : > { %2359 = vrot.lane.b32.xlu0 %v2357_v16, %s7999_s29 }
 0x357   : > { %v4356_v15 = vpop.permute.xlu1 %4355 }
 0x358   : > { %v2251_v26 = vpop.permute.xlu0 %2250  ;;  %4358 = vst.msk [vmem:[#allocation3 + $0xb8] sm:$0xf0] %vm1993_vm13, %v4356_v15 }
 0x359   : > { %2253 = vst.msk [vmem:[#allocation3 + $0xa0] sm:$0xf] %vm1961_vm8, %v2251_v26  ;;  %2388 = vrot.lane.b32.xlu1 %v5890_v19, %s7990_s17  ;;  %v3047_v19 = vld [vmem:[#allocation2 + $0xc] sm:$0xf] }
 0x35a   : > { %3031 = vrot.lane.b32.xlu0 %v5889_v56, %s7997_s27  ;;  %v5900_v56 = vld [vmem:[#allocation2 + $0x20] ss:$0 sps:$4 sm:$0xff]  }
 0x35b   : > { %v2373_v39 = vpop.permute.xlu1 %2372  ;;  %v4733_v35 = vld [vmem:[#allocation3 + $0x98] sm:$0xff] }
 0x35c   : > { %v2375_v36 = vpop.permute.xlu0 %2374 }
 0x35d   : > { %v2377_v41 = vsel %vm2376_vm2, %v2373_v39, %v2375_v36  ;;  %3086 = vrot.lane.b32.xlu1 %v5892_v49, %s7993_s28  ;;  %v3690_v36 = vld [vmem:[#allocation2 + $0x18] sm:$0xf] }
 0x35e   : > { %2379 = vst.msk [vmem:[#allocation3 + $0xe0] sm:$0xf0] %vm1969_vm5, %v2377_v41  ;;  %3093 = vrot.lane.b32.xlu0 %v7243_v3, %s7995_s22  ;;  %v7320_v41 = vcombine.low %v7277_v17, %v7277_v17 }
 0x35f   : > { %2384 = vst.msk [vmem:[#allocation3 + $0xe0] sm:$0xf0] %vm1977_vm11, %v5913_v31  ;;  %v2979_v29 = vpop.permute.xlu1 %2978  ;;  %v4737_v50 = vld [vmem:[#allocation3 + $0xb8] sm:$0xff] }
 0x360   : > { %v3008_v54 = vpop.permute.xlu0 %3007  ;;  %v4734_v2 = vld [vmem:[#allocation3 + $0xa0] sm:$0xff]  ;;  %2981 = vst.msk [vmem:[#allocation3 + $0xc8] sm:$0xf] %vm1940_vm4, %v2979_v29  ;;  %v5665_v8 = vpack.c.bf16 %v4737_v50, %v4733_v35 }
 0x361   : > { %3010 = vst.msk [vmem:[#allocation3 + $0xc8] sm:$0xf0] %vm1969_vm5, %v3008_v54  ;;  %v5643_v33 = vpack.c.bf16 %v4734_v2, %v4730_v4  ;;  %3095 = vrot.lane.b32.xlu1 %v3092_v38, %s7995_s22  ;;  %v5901_v2 = vld [vmem:[#allocation2 + $0xc] ss:$0 sps:$4 sm:$0xff]  }
 0x362   : > { %3686 = vrot.lane.b32.xlu0 %v3684_v51, %s7988_s16  ;;  %5666 = vmatprep.subr.bf16.mxu1 %v5665_v8  ;;  %v5902_v51 = vld [vmem:[#allocation2 + $0xc] ss:$0 sps:$4 sm:$0xff]   ;;  %v2399_v8 = vld [vmem:[#allocation2 + $0x1c] sm:$0xf] }
 0x363   : > { %5644 = vmatpush1.bf16.msra.mxu0 %v5643_v33  ;;  %v3015_v11 = vpop.permute.xlu1 %3014 }
 0x364   : > { %v3017_v42 = vpop.permute.xlu0 %3016 }
 0x365   : > { %v3018_v40 = vsel %vm2095_vm15, %v3015_v11, %v3017_v42  ;;  %3737 = vrot.lane.b32.xlu1 %v3735_v61, %s7992_s25  ;;  %v2459_v61 = vld [vmem:[#allocation2 + $0x1c] sm:$0xf] }
 0x366   : > { %3020 = vst.msk [vmem:[#allocation3 + $0xc8] sm:$0xf0] %vm1977_vm11, %v3018_v40  ;;  %3769 = vrot.lane.b32.xlu0 %v7260_v44, %s7990_s17  ;;  %v3100_v40 = vld [vmem:[#allocation2 + $0x14] sm:$0xf] }
 0x367   : > { %v3038_v43 = vpop.permute.xlu1 %3037 }
 0x368   : > { %v3063_v1 = vpop.permute.xlu0 %3062  ;;  %3040 = vst.msk [vmem:[#allocation3 + $0xe8] sm:$0xf] %vm1940_vm4, %v3038_v43 }
 0x369   : > { %3065 = vst.msk [vmem:[#allocation3 + $0xe8] sm:$0xf0] %vm1969_vm5, %v3063_v1  ;;  %3771 = vrot.lane.b32.xlu1 %v7254_v63, %s7990_s17 }
 0x36a   : > { %4383 = vrot.lane.b32.xlu0 %v4381_v45, %s7996_s24  ;;  %v5905_v45 = vld [vmem:[#allocation2 + $0x1c] ss:$0 sps:$4 sm:$0xff]  }
 0x36b   : > { %v3610_v20 = vpop.permute.xlu1 %3609 }
 0x36c   : > { %v3634_v18 = vpop.permute.xlu0 %3633  ;;  %3612 = vst.msk [vmem:[#allocation3 + $0x90] sm:$0xf0] %vm1993_vm13, %v3610_v20 }
 0x36d   : > { %3636 = vst.msk [vmem:[#allocation3 + $0xb0] sm:$0xf] %vm1961_vm8, %v3634_v18  ;;  %4409 = vrot.lane.b32.xlu1 %v5894_v27, %s7991_s26  ;;  %v3151_v27 = vld [vmem:[#allocation2 + $0x14] sm:$0xf] }
 0x36e   : > { %4433 = vrot.lane.b32.xlu0 %v4431_v7, %s8001_s2 }
 0x36f   : > { %v3665_v23 = vpop.permute.xlu1 %3664 }
 0x370   : > { %v3672_v22 = vpop.permute.xlu0 %3671  ;;  %3667 = vst.msk [vmem:[#allocation3 + $0xb0] sm:$0xf0] %vm1993_vm13, %v3665_v23  ;;  %v5906_v23 = vld [vmem:[#allocation2 + $0x1c] ss:$0 sps:$4 sm:$0xff]  }
 0x371   : > { %4459 = vrot.lane.b32.xlu1 %v5896_v47, %s7991_s26 }
 0x372   : > { %4466 = vrot.lane.b32.xlu0 %v7277_v17, %s7998_s0 }
 0x373   : > { %v3674_v59 = vpop.permute.xlu1 %3673  ;;  %v4732_v10 = vld [vmem:[#allocation3 + $0x90] sm:$0xff] }
 0x374   : > { %v4362_v30 = vpop.permute.xlu0 %4361  ;;  %v3675_v48 = vsel %vm8002_vm10, %v3672_v22, %v3674_v59  ;;  %vm2478_vm10 = vcmask 588800  }
 0x375   : > { %4364 = vst.msk [vmem:[#allocation3 + $0xd8] sm:$0xf] %vm1940_vm4, %v4362_v30  ;;  %3677 = vst.msk [vmem:[#allocation3 + $0xd0] sm:$0xf] %vm1940_vm4, %v3675_v48  ;;  %4468 = vrot.lane.b32.xlu1 %v7284_v12, %s7998_s0  ;;  %v5907_v48 = vld [vmem:[#allocation2 + $0xc] ss:$0 sps:$4 sm:$0xff]  }
 0x376   : > { %4529 = vrot.lane.b32.xlu0 %v7277_v17, %s7997_s27 }
 0x377   : > { %v4416_v28 = vpop.permute.xlu1 %4415  ;;  %v4736_v52 = vld [vmem:[#allocation3 + $0xb0] sm:$0xff] }
 0x378   : > { %v2283_v37 = vpop.permute.xlu0 %2282  ;;  %4418 = vst.msk [vmem:[#allocation3 + $0xf8] sm:$0xf] %vm1940_vm4, %v4416_v28  ;;  %v5667_v5 = vpack.c.bf16 %v4736_v52, %v4732_v10  ;;  %v4473_v28 = vld [vmem:[#allocation2 + $0x4] sm:$0xf]  ;;  %v7361_v10 = vld [vmem:[#allocation2 + $0xc] sm:$0xff] }
 0x379   : > { %2285 = vst.msk [vmem:[#allocation3 + $0xc0] sm:$0xf] %vm1940_vm4, %v2283_v37  ;;  %4531 = vrot.lane.b32.xlu1 %v7284_v12, %s7997_s27 }
 0x37a   : > { %2305 = vrot.lane.b32.xlu0 %v2303_v55, %s7998_s0  ;;  %5668 = vmatpush1.bf16.msra.mxu1 %v5667_v5  ;;  %v7368_v5 = vcombine.low %v7361_v10, %v7361_v10 }
 0x37b   : > { %v2290_v57 = vpop.permute.xlu1 %2289 }
 0x37c   : > { %v2292_v14 = vpop.permute.xlu0 %2291 }
 0x37d   : > { %v2294_v46 = vsel %vm2293_vm14, %v2290_v57, %v2292_v14  ;;  %2365 = vrot.lane.b32.xlu1 %v2363_v60, %s7997_s27  ;;  %v5910_v60 = vld [vmem:[#allocation2 + $0x4] ss:$0 sps:$4 sm:$0xff]   ;;  %vm8003_vm14 = vcmask 64512  }
 0x37e   : > { %2296 = vst.msk [vmem:[#allocation3 + $0xc0] sm:$0xf] %vm1947_vm6, %v2294_v46  ;;  %2395 = vrot.lane.b32.xlu0 %v5897_v6, %s7992_s25  ;;  %v5909_v6 = vld [vmem:[#allocation2 + $0xc] ss:$0 sps:$4 sm:$0xff]  }
 0x37f   : > { %v2313_v13 = vpop.permute.xlu1 %2312 }
 0x380   : > { %v2344_v9 = vpop.permute.xlu0 %2343  ;;  %2315 = vst.msk [vmem:[#allocation3 + $0xc0] sm:$0xf0] %vm1969_vm5, %v2313_v13 }
 0x381   : > { %2346 = vst.msk [vmem:[#allocation3 + $0xe0] sm:$0xf] %vm1940_vm4, %v2344_v9  ;;  %2430 = vrot.lane.b32.xlu1 %v2429_v21, %s7995_s22  ;;  %v2405_v21 = vld [vmem:[#allocation2 + $0x1c] sm:$0xf] }
 0x382   : > { %2432 = vrot.lane.b32.xlu0 %v7243_v3, %s7995_s22  ;;  %v3741_v3 = vld [vmem:[#allocation2 + $0x18] sm:$0xf] }
 0x383   : > { %v2351_v58 = vpop.permute.xlu1 %2350 }
 0x384   : > { %v2353_v32 = vpop.permute.xlu0 %2352 }
 0x385   : > { %v2354_v16 = vsel %vm2095_vm15, %v2351_v58, %v2353_v32  ;;  %3121 = vrot.lane.b32.xlu1 %v5899_v34, %s7988_s16 }
 0x386   : > { %2356 = vst.msk [vmem:[#allocation3 + $0xe0] sm:$0xf] %vm1947_vm6, %v2354_v16  ;;  %3172 = vrot.lane.b32.xlu0 %v5898_v25, %s7992_s25  ;;  %v5911_v16 = vld [vmem:[#allocation2 + $0x14] ss:$0 sps:$4 sm:$0xff]  }
 0x387   : > { %v2985_v15 = vpop.permute.xlu1 %2984 }
 0x388   : > { %v3044_v26 = vpop.permute.xlu0 %3043  ;;  %2987 = vst.msk [vmem:[#allocation3 + $0xc8] sm:$0xf] %vm1947_vm6, %v2985_v15 }
 0x389   : > { %3046 = vst.msk [vmem:[#allocation3 + $0xe8] sm:$0xf] %vm1947_vm6, %v3044_v26  ;;  %3692 = vrot.lane.b32.xlu1 %v3690_v36, %s7994_s23  ;;  %v2465_v26 = vld [vmem:[#allocation2 + $0x1c] sm:$0xf] }
 0x38a   : > { %3048 = vst.msk [vmem:[#allocation3 + $0xe8] sm:$0xf] %vm1954_vm7, %v3047_v19  ;;  %3723 = vrot.lane.b32.xlu0 %v5900_v56, %s7996_s24 }
 0x38b   : > { %v3070_v49 = vpop.permute.xlu1 %3069 }
 0x38c   : > { %v3077_v39 = vpop.permute.xlu0 %3076  ;;  %3072 = vst.msk [vmem:[#allocation3 + $0xe8] sm:$0xf0] %vm1977_vm11, %v3070_v49 }
 0x38d   : > { %3743 = vrot.lane.b32.xlu1 %v3741_v3, %s7991_s26  ;;  %v3106_v3 = vld [vmem:[#allocation2 + $0x14] sm:$0xf] }
 0x38e   : > { %3799 = vrot.lane.b32.xlu0 %v7320_v41, %s7998_s0 }
 0x38f   : > { %v3079_v4 = vpop.permute.xlu1 %3078 }
 0x390   : > { %v3700_v31 = vpop.permute.xlu0 %3699  ;;  %v3080_v38 = vsel %vm2071_vm9, %v3077_v39, %v3079_v4  ;;  %v5912_v39 = vld [vmem:[#allocation2 + $0x14] ss:$0 sps:$4 sm:$0xff]  }
 0x391   : > { %3702 = vst.msk [vmem:[#allocation3 + $0xd0] sm:$0xf0] %vm1969_vm5, %v3700_v31  ;;  %3801 = vrot.lane.b32.xlu1 %v7277_v17, %s7998_s0 }
 0x392   : > { %3082 = vst.msk [vmem:[#allocation3 + $0xe8] sm:$0xf0] %vm1985_vm12, %v3080_v38  ;;  %3861 = vrot.lane.b32.xlu0 %v7320_v41, %s7997_s27 }
 0x393   : > { %v3751_v29 = vpop.permute.xlu1 %3750 }
 0x394   : > { %v4368_v54 = vpop.permute.xlu0 %4367  ;;  %3753 = vst.msk [vmem:[#allocation3 + $0xf0] sm:$0xf0] %vm1969_vm5, %v3751_v29  ;;  %v5915_v29 = vld [vmem:[#allocation2 + $0x4] ss:$0 sps:$4 sm:$0xff]  }
 0x395   : > { %4370 = vst.msk [vmem:[#allocation3 + $0xd8] sm:$0xf] %vm1947_vm6, %v4368_v54  ;;  %3863 = vrot.lane.b32.xlu1 %v7277_v17, %s7997_s27 }
 0x396   : > { %4498 = vrot.lane.b32.xlu0 %v5901_v2, %s7989_s14  ;;  %v3778_v2 = vld [vmem:[#allocation2 + $0xc] sm:$0xf] }
 0x397   : > { %v4375_v50 = vpop.permute.xlu1 %4374 }
 0x398   : > { %v4377_v35 = vpop.permute.xlu0 %4376 }
 0x399   : > { %v4378_v33 = vsel %vm2478_vm10, %v4375_v50, %v4377_v35  ;;  %4553 = vrot.lane.b32.xlu1 %v5902_v51, %s7990_s17 }
 0x39a   : > { %4380 = vst.msk [vmem:[#allocation3 + $0xd8] sm:$0xf] %vm1954_vm7, %v4378_v33  ;;  %2401 = vrot.lane.b32.xlu0 %v2399_v8, %s7990_s17  ;;  %v3836_v33 = vld [vmem:[#allocation2 + $0xc] sm:$0xf]  ;;  %v7422_v8 = vcombine.high %v7361_v10, %v7361_v10 }
 0x39b   : > { %v4396_v11 = vpop.permute.xlu1 %4395 }
 0x39c   : > { %v4422_v42 = vpop.permute.xlu0 %4421  ;;  %4398 = vst.msk [vmem:[#allocation3 + $0xd8] sm:$0xf0] %vm1977_vm11, %v4396_v11 }
 0x39d   : > { %4424 = vst.msk [vmem:[#allocation3 + $0xf8] sm:$0xf] %vm1947_vm6, %v4422_v42  ;;  %2461 = vrot.lane.b32.xlu1 %v2459_v61, %s7988_s16 }
 0x39e   : > { %3102 = vrot.lane.b32.xlu0 %v3100_v40, %s7989_s14 }
 0x39f   : > { %v4446_v43 = vpop.permute.xlu1 %4445 }
 0x3a0   : > { %v2320_v1 = vpop.permute.xlu0 %2319  ;;  %4448 = vst.msk [vmem:[#allocation3 + $0xf8] sm:$0xf0] %vm1977_vm11, %v4446_v43 }
 0x3a1   : > { %2322 = vst.msk [vmem:[#allocation3 + $0xc0] sm:$0xf0] %vm1977_vm11, %v2320_v1  ;;  %3128 = vrot.lane.b32.xlu1 %v5905_v45, %s7994_s23  ;;  %v4479_v1 = vld [vmem:[#allocation2 + $0x4] sm:$0xf] }
 0x3a2   : > { %3135 = vrot.lane.b32.xlu0 %v7151_v24, %s7987_s21  ;;  %v3830_v24 = vld [vmem:[#allocation2 + $0xc] sm:$0xf] }
 0x3a3   : > { %v2991_v20 = vpop.permute.xlu1 %2990 }
 0x3a4   : > { %v2998_v18 = vpop.permute.xlu0 %2997  ;;  %2993 = vst.msk [vmem:[#allocation3 + $0xc8] sm:$0xf] %vm1954_vm7, %v2991_v20  ;;  %v4487_v20 = vcombine.high %v7254_v63, %v7254_v63 }
 0x3a5   : > { %3137 = vrot.lane.b32.xlu1 %v7145_v53, %s7987_s21 }
 0x3a6   : > { %3153 = vrot.lane.b32.xlu0 %v3151_v27, %s7990_s17 }
 0x3a7   : > { %v3000_v22 = vpop.permute.xlu1 %2999 }
 0x3a8   : > { %v3025_v7 = vpop.permute.xlu0 %3024  ;;  %v3001_v47 = vsel %vm2337_vm1, %v2998_v18, %v3000_v22 }
 0x3a9   : > { %3027 = vst.msk [vmem:[#allocation3 + $0xc8] sm:$0xf0] %vm1985_vm12, %v3025_v7  ;;  %3179 = vrot.lane.b32.xlu1 %v5906_v23, %s7991_s26  ;;  %v5916_v23 = vld [vmem:[#allocation2 + $0x14] ss:$0 sps:$4 sm:$0xff]  }
 0x3aa   : > { %3003 = vst.msk [vmem:[#allocation3 + $0xc8] sm:$0xf] %vm1961_vm8, %v3001_v47  ;;  %3832 = vrot.lane.b32.xlu0 %v3830_v24, %s7989_s14  ;;  %v4538_v47 = vld [vmem:[#allocation2 + $0x4] sm:$0xf] }
 0x3ab   : > { %v3053_v59 = vpop.permute.xlu1 %3052 }
 0x3ac   : > { %v3055_v30 = vpop.permute.xlu0 %3054 }
 0x3ad   : > { %v3056_v37 = vsel %vm2134_vm0, %v3053_v59, %v3055_v30  ;;  %4475 = vrot.lane.b32.xlu1 %v4473_v28, %s7995_s22  ;;  %v5917_v59 = vld [vmem:[#allocation2 + $0x14] ss:$0 sps:$4 sm:$0xff]  }
 0x3ae   : > { %3058 = vst.msk [vmem:[#allocation3 + $0xe8] sm:$0xf] %vm1961_vm8, %v3056_v37  ;;  %4505 = vrot.lane.b32.xlu0 %v5907_v48, %s7988_s16  ;;  %v3112_v48 = vld [vmem:[#allocation2 + $0x18] sm:$0xf] }
 0x3af   : > { %v3681_v55 = vpop.permute.xlu1 %3680 }
 0x3b0   : > { %v3707_v52 = vpop.permute.xlu0 %3706  ;;  %3683 = vst.msk [vmem:[#allocation3 + $0xd0] sm:$0xf] %vm1947_vm6, %v3681_v55 }
 0x3b1   : > { %3709 = vst.msk [vmem:[#allocation3 + $0xd0] sm:$0xf0] %vm1977_vm11, %v3707_v52  ;;  %4512 = vrot.lane.b32.xlu1 %v7368_v5, %s7994_s23  ;;  %v5918_v52 = vld [vmem:[#allocation2 + $0x20] ss:$0 sps:$4 sm:$0xff]  }
 0x3b2   : > { %4514 = vrot.lane.b32.xlu0 %v7361_v10, %s7994_s23 }
 0x3b3   : > { %v3714_v57 = vpop.permute.xlu1 %3713 }
 0x3b4   : > { %v3716_v14 = vpop.permute.xlu0 %3715 }
 0x3b5   : > { %v3717_v46 = vsel %vm2478_vm10, %v3714_v57, %v3716_v14  ;;  %4560 = vrot.lane.b32.xlu1 %v5909_v6, %s7992_s25  ;;  %v3163_v14 = vld [vmem:[#allocation2 + $0x18] sm:$0xf] }
 0x3b6   : > { %3719 = vst.msk [vmem:[#allocation3 + $0xd0] sm:$0xf0] %vm1985_vm12, %v3717_v46  ;;  %4567 = vrot.lane.b32.xlu0 %v7368_v5, %s7991_s26  ;;  %v5919_v46 = vld [vmem:[#allocation2 + $0x20] ss:$0 sps:$4 sm:$0xff]  }
 0x3b7   : > { %v3732_v13 = vpop.permute.xlu1 %3731 }
 0x3b8   : > { %v3758_v9 = vpop.permute.xlu0 %3757  ;;  %3734 = vst.msk [vmem:[#allocation3 + $0xf0] sm:$0xf] %vm1947_vm6, %v3732_v13 }
 0x3b9   : > { %3760 = vst.msk [vmem:[#allocation3 + $0xf0] sm:$0xf0] %vm1977_vm11, %v3758_v9  ;;  %4569 = vrot.lane.b32.xlu1 %v7361_v10, %s7991_s26 }
 0x3ba   : > { %3765 = vst.msk [vmem:[#allocation3 + $0xf0] sm:$0xf0] %vm1985_vm12, %v5910_v60  ;;  %2407 = vrot.lane.b32.xlu0 %v2405_v21, %s7992_s25 }
 0x3bb   : > { %v4403_v58 = vpop.permute.xlu1 %4402 }
 0x3bc   : > { %v4428_v32 = vpop.permute.xlu0 %4427  ;;  %4405 = vst.msk [vmem:[#allocation3 + $0xd8] sm:$0xf0] %vm1985_vm12, %v4403_v58 }
 0x3bd   : > { %4430 = vst.msk [vmem:[#allocation3 + $0xf8] sm:$0xf] %vm1954_vm7, %v4428_v32  ;;  %2414 = vrot.lane.b32.xlu1 %v7145_v53, %s7991_s26  ;;  %v4536_v32 = vld [vmem:[#allocation2 + $0x4] sm:$0xf] }
 0x3be   : > { %2416 = vrot.lane.b32.xlu0 %v7169_v62, %s7991_s26 }
 0x3bf   : > { %v4453_v34 = vpop.permute.xlu1 %4452 }
 0x3c0   : > { %v2300_v25 = vpop.permute.xlu0 %2299  ;;  %4455 = vst.msk [vmem:[#allocation3 + $0xf8] sm:$0xf0] %vm1985_vm12, %v4453_v34 }
 0x3c1   : > { %2302 = vst.msk [vmem:[#allocation3 + $0xc0] sm:$0xf] %vm1954_vm7, %v2300_v25  ;;  %2441 = vrot.lane.b32.xlu1 %v5911_v16, %s7989_s14 }
 0x3c2   : > { %2467 = vrot.lane.b32.xlu0 %v2465_v26, %s7994_s23 }
 0x3c3   : > { %v2327_v56 = vpop.permute.xlu1 %2326 }
 0x3c4   : > { %v2334_v15 = vpop.permute.xlu0 %2333  ;;  %2329 = vst.msk [vmem:[#allocation3 + $0xc0] sm:$0xf0] %vm1985_vm12, %v2327_v56 }
 0x3c5   : > { %2474 = vrot.lane.b32.xlu1 %v7145_v53, %s7987_s21  ;;  %v3157_v53 = vld [vmem:[#allocation2 + $0x14] sm:$0xf] }
 0x3c6   : > { %2476 = vrot.lane.b32.xlu0 %v7169_v62, %s7987_s21  ;;  %v5914_v62 = vld [vmem:[#allocation2 + $0x20] ss:$0 sps:$4 sm:$0xff]  }
 0x3c7   : > { %v2336_v36 = vpop.permute.xlu1 %2335 }
 0x3c8   : > { %v2360_v19 = vpop.permute.xlu0 %2359  ;;  %v2338_v49 = vsel %vm2337_vm1, %v2334_v15, %v2336_v36  ;;  %vm8004_vm1 = vmmov %vm8003_vm14  ;;  %v3784_v15 = vld [vmem:[#allocation2 + $0xc] sm:$0xf]  ;;  %v5920_v36 = vld [vmem:[#allocation2 + $0x4] ss:$0 sps:$4 sm:$0xff]  }
 0x3c9   : > { %2362 = vst.msk [vmem:[#allocation3 + $0xe0] sm:$0xf] %vm1954_vm7, %v2360_v19  ;;  %2496 = vrot.lane.b32.xlu1 %v5912_v39, %s7990_s17 }
 0x3ca   : > { %2340 = vst.msk [vmem:[#allocation3 + $0xc0] sm:$0xf0] %vm1993_vm13, %v2338_v49  ;;  %3108 = vrot.lane.b32.xlu0 %v3106_v3, %s7988_s16 }
 0x3cb   : > { %v2389_v4 = vpop.permute.xlu1 %2388 }
 0x3cc   : > { %v3032_v31 = vpop.permute.xlu0 %3031  ;;  %2391 = vst.msk [vmem:[#allocation3 + $0xe0] sm:$0xf0] %vm1985_vm12, %v2389_v4  ;;  %v5921_v4 = vld [vmem:[#allocation2 + $0x4] ss:$0 sps:$4 sm:$0xff]  }
 0x3cd   : > { %3034 = vst.msk [vmem:[#allocation3 + $0xc8] sm:$0xf0] %vm1993_vm13, %v3032_v31  ;;  %3159 = vrot.lane.b32.xlu1 %v3157_v53, %s7992_s25 }
 0x3ce   : > { %3186 = vrot.lane.b32.xlu0 %v5914_v62, %s7993_s28 }
 0x3cf   : > { %v3087_v54 = vpop.permute.xlu1 %3086 }
 0x3d0   : > { %v3094_v38 = vpop.permute.xlu0 %3093  ;;  %3089 = vst.msk [vmem:[#allocation3 + $0xe8] sm:$0xf0] %vm1993_vm13, %v3087_v54 }
 0x3d1   : > { %3780 = vrot.lane.b32.xlu1 %v3778_v2, %s7990_s17  ;;  %v5923_v2 = vld [vmem:[#allocation2 + $0x10] ss:$0 sps:$4 sm:$0xff]  }
 0x3d2   : > { %3809 = vrot.lane.b32.xlu0 %v5915_v29, %s7995_s22 }
 0x3d3   : > { %v3096_v50 = vpop.permute.xlu1 %3095 }
 0x3d4   : > { %v3687_v35 = vpop.permute.xlu0 %3686  ;;  %v3097_v51 = vsel %vm8003_vm14, %v3094_v38, %v3096_v50  ;;  %v4739_v40 = vld [vmem:[#allocation3 + $0xc8] sm:$0xff]  ;;  %v2421_v50 = vld [vmem:[#allocation2 + $0x20] sm:$0xf]  ;;  %vm8005_vm14 = vcmask 719872  }
 0x3d5   : > { %3689 = vst.msk [vmem:[#allocation3 + $0xd0] sm:$0xf] %vm1954_vm7, %v3687_v35  ;;  %3838 = vrot.lane.b32.xlu1 %v3836_v33, %s7988_s16  ;;  %v5922_v38 = vld [vmem:[#allocation2 + $0x10] ss:$0 sps:$4 sm:$0xff]   ;;  %v5924_v33 = vld [vmem:[#allocation2 + $0x18] ss:$0 sps:$4 sm:$0xff]  }
 0x3d6   : > { %3099 = vst.msk [vmem:[#allocation3 + $0x108] sm:$0xf] %vm1940_vm4, %v3097_v51  ;;  %3845 = vrot.lane.b32.xlu0 %v7361_v10, %s7994_s23 }
 0x3d7   : > { %v3738_v11 = vpop.permute.xlu1 %3737  ;;  %v4743_v61 = vld [vmem:[#allocation3 + $0xe8] sm:$0xff] }
 0x3d8   : > { %v3770_v42 = vpop.permute.xlu0 %3769  ;;  %3740 = vst.msk [vmem:[#allocation3 + $0xf0] sm:$0xf] %vm1954_vm7, %v3738_v11  ;;  %v5645_v43 = vpack.c.bf16 %v4743_v61, %v4739_v40  ;;  %v2482_v61 = vld [vmem:[#allocation2 + $0x20] sm:$0xf] }
 0x3d9   : > { %3847 = vrot.lane.b32.xlu1 %v7422_v8, %s7994_s23 }
 0x3da   : > { %4481 = vrot.lane.b32.xlu0 %v4479_v1, %s7989_s14  ;;  %5646 = vmatprep.subr.bf16.mxu0 %v5645_v43  ;;  %v5944_v43 = vld [vmem:[#allocation2 + $0x4] ss:$0 sps:$4 sm:$0xff]  }
 0x3db   : > { %v3772_v18 = vpop.permute.xlu1 %3771 }
 0x3dc   : > { %v4384_v45 = vpop.permute.xlu0 %4383  ;;  %v3773_v27 = vsel %vm2134_vm0, %v3770_v42, %v3772_v18 }
 0x3dd   : > { %4386 = vst.msk [vmem:[#allocation3 + $0xd8] sm:$0xf] %vm1961_vm8, %v4384_v45  ;;  %4488 = vrot.lane.b32.xlu1 %v7254_v63, %s7988_s16 }
 0x3de   : > { %3775 = vst.msk [vmem:[#allocation3 + $0xf0] sm:$0xf0] %vm1993_vm13, %v3773_v27  ;;  %4490 = vrot.lane.b32.xlu0 %v4487_v20, %s7988_s16  ;;  %v5925_v20 = vld [vmem:[#allocation2 + $0x18] ss:$0 sps:$4 sm:$0xff]  }
 0x3df   : > { %v4410_v22 = vpop.permute.xlu1 %4409 }
 0x3e0   : > { %v4434_v7 = vpop.permute.xlu0 %4433  ;;  %4412 = vst.msk [vmem:[#allocation3 + $0xd8] sm:$0xf0] %vm1993_vm13, %v4410_v22  ;;  %v3251_v22 = vld [vmem:[#allocation2 + $0xc] sm:$0xf] }
 0x3e1   : > { %4436 = vst.msk [vmem:[#allocation3 + $0xf8] sm:$0xf] %vm1961_vm8, %v4434_v7  ;;  %4540 = vrot.lane.b32.xlu1 %v4538_v47, %s7990_s17 }
 0x3e2   : > { %2448 = vrot.lane.b32.xlu0 %v5916_v23, %s7988_s16 }
 0x3e3   : > { %v4460_v30 = vpop.permute.xlu1 %4459 }
 0x3e4   : > { %v4467_v24 = vpop.permute.xlu0 %4466  ;;  %4462 = vst.msk [vmem:[#allocation3 + $0xf8] sm:$0xf0] %vm1993_vm13, %v4460_v30 }
 0x3e5   : > { %2503 = vrot.lane.b32.xlu1 %v5917_v59, %s7992_s25 }
 0x3e6   : > { %3114 = vrot.lane.b32.xlu0 %v3112_v48, %s7994_s23  ;;  %v5926_v48 = vld [vmem:[#allocation2 + $0x8] ss:$0 sps:$4 sm:$0xff]  }
 0x3e7   : > { %v4469_v28 = vpop.permute.xlu1 %4468  ;;  %v4741_v60 = vld [vmem:[#allocation3 + $0xd8] sm:$0xff] }
 0x3e8   : > { %v4530_v37 = vpop.permute.xlu0 %4529  ;;  %v4470_v55 = vsel %vm2177_vm3, %v4467_v24, %v4469_v28  ;;  %v3852_v24 = vld [vmem:[#allocation2 + $0x10] sm:$0xf]  ;;  %v4581_v28 = vld [vmem:[#allocation2 + $0x1c] sm:$0xf] }
 0x3e9   : > { %4472 = vst.msk [vmem:[#allocation3 + $0x118] sm:$0xf] %vm1940_vm4, %v4470_v55  ;;  %3145 = vrot.lane.b32.xlu1 %v5918_v52, %s7996_s24  ;;  %v7503_v52 = vld [vmem:[#allocation2 + $0x1c] sm:$0xff] }
 0x3ea   : > { %3165 = vrot.lane.b32.xlu0 %v3163_v14, %s7991_s26  ;;  %v4589_v14 = vcombine.high %v7503_v52, %v7503_v52 }
 0x3eb   : > { %v4532_v6 = vpop.permute.xlu1 %4531  ;;  %v4745_v9 = vld [vmem:[#allocation3 + $0xf8] sm:$0xff] }
 0x3ec   : > { %v2306_v57 = vpop.permute.xlu0 %2305  ;;  %v4533_v13 = vsel %vm2376_vm2, %v4530_v37, %v4532_v6  ;;  %v5669_v21 = vpack.c.bf16 %v4745_v9, %v4741_v60  ;;  %v4637_v60 = vld [vmem:[#allocation2 + $0x1c] sm:$0xf] }
 0x3ed   : > { %2308 = vst.msk [vmem:[#allocation3 + $0xc0] sm:$0xf] %vm1961_vm8, %v2306_v57  ;;  %3193 = vrot.lane.b32.xlu1 %v5919_v46, %s8001_s2  ;;  %v5928_v46 = vld [vmem:[#allocation2 + $0x14] ss:$0 sps:$4 sm:$0xff]  }
 0x3ee   : > { %4535 = vst.msk [vmem:[#allocation3 + $0x138] sm:$0xf] %vm1940_vm4, %v4533_v13  ;;  %3220 = vrot.lane.b32.xlu0 %v7320_v41, %s7998_s0  ;;  %5670 = vmatprep.subr.bf16.mxu1 %v5669_v21 }
 0x3ef   : > { %4537 = vst.msk [vmem:[#allocation3 + $0x138] sm:$0xf] %vm1947_vm6, %v4536_v32  ;;  %v2366_v25 = vpop.permute.xlu1 %2365 }
 0x3f0   : > { %v2396_v58 = vpop.permute.xlu0 %2395  ;;  %2368 = vst.msk [vmem:[#allocation3 + $0xe0] sm:$0xf] %vm1961_vm8, %v2366_v25  ;;  %v5929_v25 = vld [vmem:[#allocation2 + $0x14] ss:$0 sps:$4 sm:$0xff]  }
 0x3f1   : > { %2398 = vst.msk [vmem:[#allocation3 + $0xe0] sm:$0xf0] %vm1993_vm13, %v2396_v58  ;;  %3222 = vrot.lane.b32.xlu1 %v7277_v17, %s7998_s0 }
 0x3f2   : > { %3282 = vrot.lane.b32.xlu0 %v7320_v41, %s7997_s27 }
 0x3f3   : > { %v2431_v16 = vpop.permute.xlu1 %2430 }
 0x3f4   : > { %v2433_v34 = vpop.permute.xlu0 %2432  ;;  %v4738_v39 = vld [vmem:[#allocation3 + $0xc0] sm:$0xff] }
 0x3f5   : > { %v2435_v26 = vsel %vm8004_vm1, %v2431_v16, %v2433_v34  ;;  %3284 = vrot.lane.b32.xlu1 %v7277_v17, %s7997_s27  ;;  %v2514_v34 = vld [vmem:[#allocation2] sm:$0xf]  ;;  %vm8007_vm1 = vcmask 850944  }
 0x3f6   : > { %2437 = vst.msk [vmem:[#allocation3 + $0x100] sm:$0xf0] %vm1969_vm5, %v2435_v26  ;;  %3786 = vrot.lane.b32.xlu0 %v3784_v15, %s7992_s25  ;;  %v5930_v15 = vld [vmem:[#allocation2 + $0xc] ss:$0 sps:$4 sm:$0xff]  }
 0x3f7   : > { %v3122_v19 = vpop.permute.xlu1 %3121 }
 0x3f8   : > { %v3173_v56 = vpop.permute.xlu0 %3172  ;;  %v4742_v41 = vld [vmem:[#allocation3 + $0xe0] sm:$0xff]  ;;  %3124 = vst.msk [vmem:[#allocation3 + $0x108] sm:$0xf0] %vm1969_vm5, %v3122_v19  ;;  %v3199_v19 = vld [vmem:[#allocation2 + $0xc] sm:$0xf] }
 0x3f9   : > { %3175 = vst.msk [vmem:[#allocation3 + $0x128] sm:$0xf0] %vm1969_vm5, %v3173_v56  ;;  %v5647_v49 = vpack.c.bf16 %v4742_v41, %v4738_v39  ;;  %3816 = vrot.lane.b32.xlu1 %v5920_v36, %s7989_s14  ;;  %v5931_v41 = vld [vmem:[#allocation2 + $0x4] ss:$0 sps:$4 sm:$0xff]  }
 0x3fa   : > { %3823 = vrot.lane.b32.xlu0 %v7260_v44, %s7988_s16  ;;  %v4544_v44 = vld [vmem:[#allocation2 + $0x8] sm:$0xf] }
 0x3fb   : > { %5648 = vmatpush1.bf16.msra.mxu0 %v5647_v49  ;;  %v3693_v31 = vpop.permute.xlu1 %3692 }
 0x3fc   : > { %v3724_v3 = vpop.permute.xlu0 %3723  ;;  %3695 = vst.msk [vmem:[#allocation3 + $0xd0] sm:$0xf] %vm1961_vm8, %v3693_v31 }
 0x3fd   : > { %3726 = vst.msk [vmem:[#allocation3 + $0xd0] sm:$0xf0] %vm1993_vm13, %v3724_v3  ;;  %3825 = vrot.lane.b32.xlu1 %v7254_v63, %s7988_s16  ;;  %v3257_v3 = vld [vmem:[#allocation2 + $0xc] sm:$0xf] }
 0x3fe   : > { %3876 = vrot.lane.b32.xlu0 %v5921_v4, %s7990_s17 }
 0x3ff   : > { %v3744_v53 = vpop.permute.xlu1 %3743 }
 0x400   : > { %v3800_v62 = vpop.permute.xlu0 %3799  ;;  %3746 = vst.msk [vmem:[#allocation3 + $0xf0] sm:$0xf] %vm1961_vm8, %v3744_v53 }
 0x401   : > { %4522 = vrot.lane.b32.xlu1 %v5922_v38, %s7987_s21  ;;  %v5932_v38 = vld [vmem:[#allocation2 + $0x1c] ss:$0 sps:$4 sm:$0xff]  }
 0x402   : > { %4546 = vrot.lane.b32.xlu0 %v4544_v44, %s7992_s25 }
 0x403   : > { %v3802_v29 = vpop.permute.xlu1 %3801 }
 0x404   : > { %v3862_v54 = vpop.permute.xlu0 %3861  ;;  %v3803_v35 = vsel %vm2177_vm3, %v3800_v62, %v3802_v29  ;;  %v4740_v42 = vld [vmem:[#allocation3 + $0xd0] sm:$0xff] }
 0x405   : > { %3805 = vst.msk [vmem:[#allocation3 + $0x110] sm:$0xf0] %vm1969_vm5, %v3803_v35  ;;  %4577 = vrot.lane.b32.xlu1 %v5923_v2, %s7993_s28 }
 0x406   : > { %2423 = vrot.lane.b32.xlu0 %v2421_v50, %s7993_s28 }
 0x407   : > { %v3864_v51 = vpop.permute.xlu1 %3863  ;;  %v4744_v11 = vld [vmem:[#allocation3 + $0xf0] sm:$0xff] }
 0x408   : > { %v4499_v63 = vpop.permute.xlu0 %4498  ;;  %v3865_v40 = vsel %vm2376_vm2, %v3862_v54, %v3864_v51  ;;  %v5671_v1 = vpack.c.bf16 %v4744_v11, %v4740_v42  ;;  %v3887_v54 = vld [vmem:[#allocation2 + $0x14] sm:$0xf] }
 0x409   : > { %4501 = vst.msk [vmem:[#allocation3 + $0x118] sm:$0xf0] %vm1969_vm5, %v4499_v63  ;;  %3867 = vst.msk [vmem:[#allocation3 + $0x130] sm:$0xf0] %vm1969_vm5, %v3865_v40  ;;  %2455 = vrot.lane.b32.xlu1 %v5924_v33, %s7994_s23  ;;  %v5934_v63 = vld [vmem:[#allocation2 + $0x1c] ss:$0 sps:$4 sm:$0xff]  }
 0x40a   : > { %2484 = vrot.lane.b32.xlu0 %v2482_v61, %s7996_s24  ;;  %5672 = vmatpush1.bf16.msra.mxu1 %v5671_v1  ;;  %3872 = vst.msk [vmem:[#allocation3 + $0x130] sm:$0xf0] %vm1977_vm11, %v5944_v43  ;;  %v3942_v51 = vld [vmem:[#allocation2 + $0x14] sm:$0xf] }
 0x40b   : > { %v4554_v18 = vpop.permute.xlu1 %4553  ;;  %v5935_v61 = vld [vmem:[#allocation2 + $0x14] ss:$0 sps:$4 sm:$0xff]  }
 0x40c   : > { %v2402_v45 = vpop.permute.xlu0 %2401  ;;  %4556 = vst.msk [vmem:[#allocation3 + $0x138] sm:$0xf0] %vm1969_vm5, %v4554_v18  ;;  %v5936_v1 = vld [vmem:[#allocation2 + $0x14] ss:$0 sps:$4 sm:$0xff]   ;;  %v5937_v18 = vld [vmem:[#allocation2 + $0xc] ss:$0 sps:$4 sm:$0xff]  }
 0x40d   : > { %2404 = vst.msk [vmem:[#allocation3 + $0x100] sm:$0xf] %vm1940_vm4, %v2402_v45  ;;  %2510 = vrot.lane.b32.xlu1 %v5925_v20, %s7991_s26 }
 0x40e   : > { %2567 = vrot.lane.b32.xlu0 %v7277_v17, %s7998_s0  ;;  %v3790_v17 = vld [vmem:[#allocation2 + $0x10] sm:$0xf] }
 0x40f   : > { %v2462_v7 = vpop.permute.xlu1 %2461 }
 0x410   : > { %v3103_v27 = vpop.permute.xlu0 %3102  ;;  %2464 = vst.msk [vmem:[#allocation3 + $0x120] sm:$0xf] %vm1940_vm4, %v2462_v7 }
 0x411   : > { %3105 = vst.msk [vmem:[#allocation3 + $0x108] sm:$0xf] %vm1947_vm6, %v3103_v27  ;;  %2569 = vrot.lane.b32.xlu1 %v7284_v12, %s7998_s0  ;;  %v2520_v27 = vld [vmem:[#allocation2 + $0x4] sm:$0xf] }
 0x412   : > { %3253 = vrot.lane.b32.xlu0 %v3251_v22, %s7989_s14 }
 0x413   : > { %v3129_v47 = vpop.permute.xlu1 %3128 }
 0x414   : > { %v3136_v23 = vpop.permute.xlu0 %3135  ;;  %3131 = vst.msk [vmem:[#allocation3 + $0x108] sm:$0xf0] %vm1977_vm11, %v3129_v47 }
 0x415   : > { %3792 = vrot.lane.b32.xlu1 %v3790_v17, %s7991_s26 }
 0x416   : > { %3854 = vrot.lane.b32.xlu0 %v3852_v24, %s7987_s21  ;;  %v2574_v24 = vld [vmem:[#allocation2 + $0x4] sm:$0xf] }
 0x417   : > { %v3138_v59 = vpop.permute.xlu1 %3137 }
 0x418   : > { %v3154_v30 = vpop.permute.xlu0 %3153  ;;  %v3139_v37 = vsel %vm2478_vm10, %v3136_v23, %v3138_v59  ;;  %v5938_v23 = vld [vmem:[#allocation2 + $0xc] ss:$0 sps:$4 sm:$0xff]  }
 0x419   : > { %3156 = vst.msk [vmem:[#allocation3 + $0x128] sm:$0xf] %vm1947_vm6, %v3154_v30  ;;  %3883 = vrot.lane.b32.xlu1 %v5926_v48, %s7992_s25 }
 0x41a   : > { %3141 = vst.msk [vmem:[#allocation3 + $0x108] sm:$0xf0] %vm1985_vm12, %v3139_v37  ;;  %4583 = vrot.lane.b32.xlu0 %v4581_v28, %s7993_s28  ;;  %v5939_v37 = vld [vmem:[#allocation2 + $0x4] ss:$0 sps:$4 sm:$0xff]   ;;  %v3205_v28 = vld [vmem:[#allocation2 + $0xc] sm:$0xf] }
 0x41b   : > { %v3180_v55 = vpop.permute.xlu1 %3179 }
 0x41c   : > { %v3833_v12 = vpop.permute.xlu0 %3832  ;;  %3182 = vst.msk [vmem:[#allocation3 + $0x128] sm:$0xf0] %vm1977_vm11, %v3180_v55 }
 0x41d   : > { %3835 = vst.msk [vmem:[#allocation3 + $0x130] sm:$0xf] %vm1940_vm4, %v3833_v12  ;;  %4590 = vrot.lane.b32.xlu1 %v7503_v52, %s8001_s2 }
 0x41e   : > { %4592 = vrot.lane.b32.xlu0 %v4589_v14, %s8001_s2 }
 0x41f   : > { %v4476_v6 = vpop.permute.xlu1 %4475 }
 0x420   : > { %v4506_v57 = vpop.permute.xlu0 %4505  ;;  %4478 = vst.msk [vmem:[#allocation3 + $0x118] sm:$0xf] %vm1947_vm6, %v4476_v6  ;;  %v3893_v6 = vld [vmem:[#allocation2 + $0x14] sm:$0xf] }
 0x421   : > { %4508 = vst.msk [vmem:[#allocation3 + $0x118] sm:$0xf0] %vm1977_vm11, %v4506_v57  ;;  %4612 = vrot.lane.b32.xlu1 %v5928_v46, %s7994_s23  ;;  %v5941_v57 = vld [vmem:[#allocation2 + $0x4] ss:$0 sps:$4 sm:$0xff]  }
 0x422   : > { %4639 = vrot.lane.b32.xlu0 %v4637_v60, %s7996_s24 }
 0x423   : > { %v4513_v13 = vpop.permute.xlu1 %4512 }
 0x424   : > { %v4515_v9 = vpop.permute.xlu0 %4514 }
 0x425   : > { %v4516_v21 = vsel %vm8005_vm14, %v4513_v13, %v4515_v9  ;;  %4646 = vrot.lane.b32.xlu1 %v7503_v52, %s8000_s1  ;;  %v4597_v13 = vld [vmem:[#allocation2 + $0x20] sm:$0xf] }
 0x426   : > { %4518 = vst.msk [vmem:[#allocation3 + $0x118] sm:$0xf0] %vm1985_vm12, %v4516_v21  ;;  %4648 = vrot.lane.b32.xlu0 %v4589_v14, %s8000_s1  ;;  %v3948_v21 = vld [vmem:[#allocation2 + $0x14] sm:$0xf] }
 0x427   : > { %v4561_v58 = vpop.permute.xlu1 %4560 }
 0x428   : > { %v4568_v32 = vpop.permute.xlu0 %4567  ;;  %4563 = vst.msk [vmem:[#allocation3 + $0x138] sm:$0xf0] %vm1977_vm11, %v4561_v58 }
 0x429   : > { %4668 = vrot.lane.b32.xlu1 %v5929_v25, %s7991_s26  ;;  %v5942_v25 = vld [vmem:[#allocation2 + $0x18] ss:$0 sps:$4 sm:$0xff]  }
 0x42a   : > { %2516 = vrot.lane.b32.xlu0 %v2514_v34, %s7999_s29 }
 0x42b   : > { %v4570_v26 = vpop.permute.xlu1 %4569 }
 0x42c   : > { %v2408_v16 = vpop.permute.xlu0 %2407  ;;  %v4571_v56 = vsel %vm2071_vm9, %v4568_v32, %v4570_v26 }
 0x42d   : > { %2410 = vst.msk [vmem:[#allocation3 + $0x100] sm:$0xf] %vm1947_vm6, %v2408_v16  ;;  %2599 = vrot.lane.b32.xlu1 %v5930_v15, %s7989_s14  ;;  %v4653_v15 = vld [vmem:[#allocation2 + $0x20] sm:$0xf] }
 0x42e   : > { %4573 = vst.msk [vmem:[#allocation3 + $0x138] sm:$0xf0] %vm1985_vm12, %v4571_v56  ;;  %3201 = vrot.lane.b32.xlu0 %v3199_v19, %s7990_s17  ;;  %v5958_v19 = vld [vmem:[#allocation2 + $0x4] ss:$0 sps:$4 sm:$0xff]  }
 0x42f   : > { %v2415_v39 = vpop.permute.xlu1 %2414 }
 0x430   : > { %v2417_v36 = vpop.permute.xlu0 %2416 }
 0x431   : > { %v2418_v49 = vsel %vm2071_vm9, %v2415_v39, %v2417_v36  ;;  %3230 = vrot.lane.b32.xlu1 %v5931_v41, %s7995_s22  ;;  %v5943_v41 = vld [vmem:[#allocation2 + $0x18] ss:$0 sps:$4 sm:$0xff]  }
 0x432   : > { %2420 = vst.msk [vmem:[#allocation3 + $0x100] sm:$0xf] %vm1954_vm7, %v2418_v49  ;;  %3259 = vrot.lane.b32.xlu0 %v3257_v3, %s7988_s16 }
 0x433   : > { %v2442_v4 = vpop.permute.xlu1 %2441 }
 0x434   : > { %v2468_v31 = vpop.permute.xlu0 %2467  ;;  %2444 = vst.msk [vmem:[#allocation3 + $0x100] sm:$0xf0] %vm1977_vm11, %v2442_v4  ;;  %v5945_v4 = vld [vmem:[#allocation2 + $0xc] ss:$0 sps:$4 sm:$0xff]  }
 0x435   : > { %2470 = vst.msk [vmem:[#allocation3 + $0x120] sm:$0xf] %vm1947_vm6, %v2468_v31  ;;  %3266 = vrot.lane.b32.xlu1 %v7361_v10, %s7994_s23 }
 0x436   : > { %3268 = vrot.lane.b32.xlu0 %v7422_v8, %s7994_s23  ;;  %v3920_v8 = vcombine.low %v7503_v52, %v7503_v52 }
 0x437   : > { %v2475_v53 = vpop.permute.xlu1 %2474 }
 0x438   : > { %v2477_v62 = vpop.permute.xlu0 %2476 }
 0x439   : > { %v2479_v44 = vsel %vm2478_vm10, %v2475_v53, %v2477_v62  ;;  %3889 = vrot.lane.b32.xlu1 %v3887_v54, %s7992_s25  ;;  %vm8006_vm10 = vmmov %vm8005_vm14 }
 0x43a   : > { %2481 = vst.msk [vmem:[#allocation3 + $0x120] sm:$0xf] %vm1954_vm7, %v2479_v44  ;;  %3914 = vrot.lane.b32.xlu0 %v5932_v38, %s7993_s28  ;;  %vm8008_vm14 = vmmov %vm8007_vm1  ;;  %v2580_v44 = vld [vmem:[#allocation2 + $0x4] sm:$0xf] }
 0x43b   : > { %v2497_v2 = vpop.permute.xlu1 %2496 }
 0x43c   : > { %v3109_v29 = vpop.permute.xlu0 %3108  ;;  %2499 = vst.msk [vmem:[#allocation3 + $0x120] sm:$0xf0] %vm1977_vm11, %v2497_v2  ;;  %v3211_v2 = vld [vmem:[#allocation2 + $0x10] sm:$0xf] }
 0x43d   : > { %3111 = vst.msk [vmem:[#allocation3 + $0x108] sm:$0xf] %vm1954_vm7, %v3109_v29  ;;  %3921 = vrot.lane.b32.xlu1 %v3920_v8, %s8001_s2 }
 0x43e   : > { %3923 = vrot.lane.b32.xlu0 %v7503_v52, %s8001_s2 }
 0x43f   : > { %v3160_v50 = vpop.permute.xlu1 %3159 }
 0x440   : > { %v3187_v35 = vpop.permute.xlu0 %3186  ;;  %3162 = vst.msk [vmem:[#allocation3 + $0x128] sm:$0xf] %vm1954_vm7, %v3160_v50  ;;  %v5946_v50 = vld [vmem:[#allocation2 + $0x8] ss:$0 sps:$4 sm:$0xff]  }
 0x441   : > { %3189 = vst.msk [vmem:[#allocation3 + $0x128] sm:$0xf0] %vm1985_vm12, %v3187_v35  ;;  %3944 = vrot.lane.b32.xlu1 %v3942_v51, %s7994_s23 }
 0x442   : > { %3969 = vrot.lane.b32.xlu0 %v5934_v63, %s7996_s24  ;;  %v3273_v63 = vld [vmem:[#allocation2 + $0x10] sm:$0xf] }
 0x443   : > { %v3781_v42 = vpop.permute.xlu1 %3780 }
 0x444   : > { %v3810_v33 = vpop.permute.xlu0 %3809  ;;  %3783 = vst.msk [vmem:[#allocation3 + $0x110] sm:$0xf] %vm1947_vm6, %v3781_v42  ;;  %v5947_v42 = vld [vmem:[#allocation2 + $0x20] ss:$0 sps:$4 sm:$0xff]  }
 0x445   : > { %3812 = vst.msk [vmem:[#allocation3 + $0x110] sm:$0xf0] %vm1977_vm11, %v3810_v33  ;;  %3976 = vrot.lane.b32.xlu1 %v3920_v8, %s8000_s1 }
 0x446   : > { %3978 = vrot.lane.b32.xlu0 %v7503_v52, %s8000_s1  ;;  %v3241_v52 = vld [vmem:[#allocation2 + $0x4] sm:$0xff] }
 0x447   : > { %v3839_v40 = vpop.permute.xlu1 %3838  ;;  %v3243_v14 = vcombine.low %v3241_v52, %v3241_v52  ;;  %v2530_v49 = vcombine.high %v3241_v52, %v3241_v52 }
 0x448   : > { %v3846_v11 = vpop.permute.xlu0 %3845  ;;  %3841 = vst.msk [vmem:[#allocation3 + $0x130] sm:$0xf] %vm1947_vm6, %v3839_v40 }
 0x449   : > { %4619 = vrot.lane.b32.xlu1 %v5936_v1, %s7987_s21 }
 0x44a   : > { %4675 = vrot.lane.b32.xlu0 %v5935_v61, %s7993_s28  ;;  %v3899_v61 = vld [vmem:[#allocation2 + $0x18] sm:$0xf] }
 0x44b   : > { %v3848_v45 = vpop.permute.xlu1 %3847 }
 0x44c   : > { %v4482_v43 = vpop.permute.xlu0 %4481  ;;  %v3849_v20 = vsel %vm8006_vm10, %v3846_v11, %v3848_v45 }
 0x44d   : > { %4484 = vst.msk [vmem:[#allocation3 + $0x118] sm:$0xf] %vm1954_vm7, %v4482_v43  ;;  %3851 = vst.msk [vmem:[#allocation3 + $0x130] sm:$0xf] %vm1954_vm7, %v3849_v20  ;;  %2522 = vrot.lane.b32.xlu1 %v2520_v27, %s7997_s27  ;;  %v3954_v27 = vld [vmem:[#allocation2 + $0x18] sm:$0xf] }
 0x44e   : > { %2546 = vrot.lane.b32.xlu0 %v5937_v18, %s7990_s17  ;;  %v5948_v18 = vld [vmem:[#allocation2 + $0x20] ss:$0 sps:$4 sm:$0xff]  }
 0x44f   : > { %v4489_v22 = vpop.permute.xlu1 %4488 }
 0x450   : > { %v4491_v7 = vpop.permute.xlu0 %4490 }
 0x451   : > { %v4492_v47 = vsel %vm8007_vm1, %v4489_v22, %v4491_v7  ;;  %2576 = vrot.lane.b32.xlu1 %v2574_v24, %s7995_s22 }
 0x452   : > { %4494 = vst.msk [vmem:[#allocation3 + $0x118] sm:$0xf] %vm1961_vm8, %v4492_v47  ;;  %2606 = vrot.lane.b32.xlu0 %v5938_v23, %s7988_s16  ;;  %v5949_v23 = vld [vmem:[#allocation2 + $0x18] ss:$0 sps:$4 sm:$0xff]  }
 0x453   : > { %v4541_v30 = vpop.permute.xlu1 %4540 }
 0x454   : > { %v2449_v17 = vpop.permute.xlu0 %2448  ;;  %4543 = vst.msk [vmem:[#allocation3 + $0x138] sm:$0xf] %vm1954_vm7, %v4541_v30 }
 0x455   : > { %2451 = vst.msk [vmem:[#allocation3 + $0x100] sm:$0xf0] %vm1985_vm12, %v2449_v17  ;;  %2613 = vrot.lane.b32.xlu1 %v7368_v5, %s7994_s23  ;;  %v4603_v17 = vld [vmem:[#allocation2 + $0x20] sm:$0xf] }
 0x456   : > { %2615 = vrot.lane.b32.xlu0 %v7361_v10, %s7994_s23 }
 0x457   : > { %v2504_v48 = vpop.permute.xlu1 %2503 }
 0x458   : > { %v3115_v59 = vpop.permute.xlu0 %3114  ;;  %2506 = vst.msk [vmem:[#allocation3 + $0x120] sm:$0xf0] %vm1985_vm12, %v2504_v48 }
 0x459   : > { %3117 = vst.msk [vmem:[#allocation3 + $0x108] sm:$0xf] %vm1961_vm8, %v3115_v59  ;;  %3207 = vrot.lane.b32.xlu1 %v3205_v28, %s7992_s25  ;;  %v4659_v28 = vld [vmem:[#allocation2 + $0x20] sm:$0xf] }
 0x45a   : > { %3237 = vrot.lane.b32.xlu0 %v5939_v37, %s7989_s14  ;;  %v5950_v37 = vld [vmem:[#allocation2 + $0x18] ss:$0 sps:$4 sm:$0xff]  }
 0x45b   : > { %v3146_v55 = vpop.permute.xlu1 %3145 }
 0x45c   : > { %v3166_v12 = vpop.permute.xlu0 %3165  ;;  %3148 = vst.msk [vmem:[#allocation3 + $0x108] sm:$0xf0] %vm1993_vm13, %v3146_v55  ;;  %v5951_v55 = vld [vmem:[#allocation2 + $0x10] ss:$0 sps:$4 sm:$0xff]  }
 0x45d   : > { %3168 = vst.msk [vmem:[#allocation3 + $0x128] sm:$0xf] %vm1961_vm8, %v3166_v12  ;;  %3244 = vrot.lane.b32.xlu1 %v3243_v14, %s7988_s16  ;;  %v5952_v14 = vld [vmem:[#allocation2 + $0x10] ss:$0 sps:$4 sm:$0xff]  }
 0x45e   : > { %3246 = vrot.lane.b32.xlu0 %v3241_v52, %s7988_s16 }
 0x45f   : > { %v3194_v5 = vpop.permute.xlu1 %3193 }
 0x460   : > { %v3221_v10 = vpop.permute.xlu0 %3220  ;;  %3196 = vst.msk [vmem:[#allocation3 + $0x128] sm:$0xf0] %vm1993_vm13, %v3194_v5 }
 0x461   : > { %3297 = vrot.lane.b32.xlu1 %v5941_v57, %s7990_s17 }
 0x462   : > { %3895 = vrot.lane.b32.xlu0 %v3893_v6, %s7991_s26  ;;  %v5953_v6 = vld [vmem:[#allocation2 + $0x20] ss:$0 sps:$4 sm:$0xff]  }
 0x463   : > { %v3223_v60 = vpop.permute.xlu1 %3222  ;;  %v4747_v34 = vld [vmem:[#allocation3 + $0x108] sm:$0xff] }
 0x464   : > { %v3283_v46 = vpop.permute.xlu0 %3282  ;;  %v3224_v9 = vsel %vm2177_vm3, %v3221_v10, %v3223_v60 }
 0x465   : > { %3226 = vst.msk [vmem:[#allocation3 + $0x148] sm:$0xf0] %vm1969_vm5, %v3224_v9  ;;  %3950 = vrot.lane.b32.xlu1 %v3948_v21, %s7987_s21  ;;  %v3905_v9 = vld [vmem:[#allocation2 + $0x18] sm:$0xf] }
 0x466   : > { %4599 = vrot.lane.b32.xlu0 %v4597_v13, %s7999_s29 }
 0x467   : > { %v3285_v58 = vpop.permute.xlu1 %3284  ;;  %v4751_v16 = vld [vmem:[#allocation3 + $0x128] sm:$0xff] }
 0x468   : > { %v3787_v32 = vpop.permute.xlu0 %3786  ;;  %v3286_v26 = vsel %vm2376_vm2, %v3283_v46, %v3285_v58  ;;  %v5649_v56 = vpack.c.bf16 %v4751_v16, %v4747_v34  ;;  %v5954_v58 = vld [vmem:[#allocation2 + $0x20] ss:$0 sps:$4 sm:$0xff]   ;;  %v3960_v34 = vld [vmem:[#allocation2 + $0x18] sm:$0xf] }
 0x469   : > { %3789 = vst.msk [vmem:[#allocation3 + $0x110] sm:$0xf] %vm1954_vm7, %v3787_v32  ;;  %4626 = vrot.lane.b32.xlu1 %v5942_v25, %s7996_s24  ;;  %v2627_v16 = vld [vmem:[#allocation2] sm:$0xff] }
 0x46a   : > { %3288 = vst.msk [vmem:[#allocation3 + $0x168] sm:$0xf0] %vm1969_vm5, %v3286_v26  ;;  %4655 = vrot.lane.b32.xlu0 %v4653_v15, %s7998_s0  ;;  %5650 = vmatprep.subr.bf16.mxu0 %v5649_v56  ;;  %v2629_v56 = vcombine.high %v2627_v16, %v2627_v16 }
 0x46b   : > { %3293 = vst.msk [vmem:[#allocation3 + $0x168] sm:$0xf0] %vm1977_vm11, %v5958_v19  ;;  %v3817_v39 = vpop.permute.xlu1 %3816 }
 0x46c   : > { %v3824_v36 = vpop.permute.xlu0 %3823  ;;  %3819 = vst.msk [vmem:[#allocation3 + $0x110] sm:$0xf0] %vm1985_vm12, %v3817_v39  ;;  %v4693_v39 = vld [vmem:[#allocation2 + $0x1c] sm:$0xf] }
 0x46d   : > { %4682 = vrot.lane.b32.xlu1 %v5943_v41, %s8001_s2  ;;  %v3308_v41 = vld [vmem:[#allocation2 + $0xc] sm:$0xf] }
 0x46e   : > { %2531 = vrot.lane.b32.xlu0 %v3241_v52, %s7990_s17 }
 0x46f   : > { %v3826_v31 = vpop.permute.xlu1 %3825 }
 0x470   : > { %v3877_v3 = vpop.permute.xlu0 %3876  ;;  %v3827_v62 = vsel %vm8008_vm14, %v3824_v36, %v3826_v31  ;;  %v3320_v31 = vld [vmem:[#allocation2 + $0xc] sm:$0xff] }
 0x471   : > { %3879 = vst.msk [vmem:[#allocation3 + $0x130] sm:$0xf0] %vm1985_vm12, %v3877_v3  ;;  %2533 = vrot.lane.b32.xlu1 %v2530_v49, %s7990_s17 }
 0x472   : > { %3829 = vst.msk [vmem:[#allocation3 + $0x110] sm:$0xf0] %vm1993_vm13, %v3827_v62  ;;  %2553 = vrot.lane.b32.xlu0 %v5945_v4, %s7992_s25  ;;  %v3314_v4 = vld [vmem:[#allocation2 + $0xc] sm:$0xf]  ;;  %v3322_v62 = vcombine.high %v3320_v31, %v3320_v31 }
 0x473   : > { %v4523_v38 = vpop.permute.xlu1 %4522 }
 0x474   : > { %v4547_v53 = vpop.permute.xlu0 %4546  ;;  %4525 = vst.msk [vmem:[#allocation3 + $0x118] sm:$0xf0] %vm1993_vm13, %v4523_v38 }
 0x475   : > { %4549 = vst.msk [vmem:[#allocation3 + $0x138] sm:$0xf] %vm1961_vm8, %v4547_v53  ;;  %2582 = vrot.lane.b32.xlu1 %v2580_v44, %s7989_s14 }
 0x476   : > { %2589 = vrot.lane.b32.xlu0 %v3241_v52, %s7988_s16 }
 0x477   : > { %v4578_v29 = vpop.permute.xlu1 %4577 }
 0x478   : > { %v2424_v54 = vpop.permute.xlu0 %2423  ;;  %4580 = vst.msk [vmem:[#allocation3 + $0x138] sm:$0xf0] %vm1993_vm13, %v4578_v29 }
 0x479   : > { %2426 = vst.msk [vmem:[#allocation3 + $0x100] sm:$0xf] %vm1961_vm8, %v2424_v54  ;;  %2591 = vrot.lane.b32.xlu1 %v2530_v49, %s7988_s16  ;;  %v3997_v54 = vld [vmem:[#allocation2 + $0x14] sm:$0xf] }
 0x47a   : > { %3213 = vrot.lane.b32.xlu0 %v3211_v2, %s7991_s26 }
 0x47b   : > { %v2456_v35 = vpop.permute.xlu1 %2455  ;;  %v4749_v11 = vld [vmem:[#allocation3 + $0x118] sm:$0xff] }
 0x47c   : > { %v2485_v8 = vpop.permute.xlu0 %2484  ;;  %2458 = vst.msk [vmem:[#allocation3 + $0x100] sm:$0xf0] %vm1993_vm13, %v2456_v35  ;;  %v4699_v35 = vld [vmem:[#allocation2 + $0x20] sm:$0xf] }
 0x47d   : > { %2487 = vst.msk [vmem:[#allocation3 + $0x120] sm:$0xf] %vm1961_vm8, %v2485_v8  ;;  %3275 = vrot.lane.b32.xlu1 %v3273_v63, %s7987_s21  ;;  %v4003_v8 = vld [vmem:[#allocation2 + $0x14] sm:$0xf] }
 0x47e   : > { %3304 = vrot.lane.b32.xlu0 %v5946_v50, %s7992_s25 }
 0x47f   : > { %v2511_v33 = vpop.permute.xlu1 %2510  ;;  %v4753_v40 = vld [vmem:[#allocation3 + $0x138] sm:$0xff] }
 0x480   : > { %v2568_v51 = vpop.permute.xlu0 %2567  ;;  %2513 = vst.msk [vmem:[#allocation3 + $0x120] sm:$0xf0] %vm1993_vm13, %v2511_v33  ;;  %v5673_v1 = vpack.c.bf16 %v4753_v40, %v4749_v11  ;;  %v2639_v33 = vld [vmem:[#allocation2 + $0x4] sm:$0xf] }
 0x481   : > { %3901 = vrot.lane.b32.xlu1 %v3899_v61, %s7993_s28  ;;  %v4009_v61 = vld [vmem:[#allocation2 + $0x18] sm:$0xf] }
 0x482   : > { %3931 = vrot.lane.b32.xlu0 %v5947_v42, %s7999_s29  ;;  %5674 = vmatprep.subr.bf16.mxu1 %v5673_v1  ;;  %v4705_v42 = vld [vmem:[#allocation2 + $0x20] sm:$0xf]  ;;  %v3330_v1 = vld [vmem:[#allocation2 + $0x10] sm:$0xf] }
 0x483   : > { %v2570_v45 = vpop.permute.xlu1 %2569  ;;  %v4746_v47 = vld [vmem:[#allocation3 + $0x100] sm:$0xff] }
 0x484   : > { %v3254_v43 = vpop.permute.xlu0 %3253  ;;  %v2571_v20 = vsel %vm2177_vm3, %v2568_v51, %v2570_v45  ;;  %vm8009_vm3 = vcmask 326656  }
 0x485   : > { %3256 = vst.msk [vmem:[#allocation3 + $0x168] sm:$0xf] %vm1940_vm4, %v3254_v43  ;;  %2573 = vst.msk [vmem:[#allocation3 + $0x160] sm:$0xf] %vm1940_vm4, %v2571_v20  ;;  %3956 = vrot.lane.b32.xlu1 %v3954_v27, %s7996_s24  ;;  %v4015_v20 = vld [vmem:[#allocation2 + $0x18] sm:$0xf] }
 0x486   : > { %3986 = vrot.lane.b32.xlu0 %v5948_v18, %s7998_s0  ;;  %v2645_v27 = vld [vmem:[#allocation2 + $0x8] sm:$0xf] }
 0x487   : > { %v3793_v22 = vpop.permute.xlu1 %3792  ;;  %v4750_v24 = vld [vmem:[#allocation3 + $0x120] sm:$0xff] }
 0x488   : > { %v3855_v7 = vpop.permute.xlu0 %3854  ;;  %3795 = vst.msk [vmem:[#allocation3 + $0x110] sm:$0xf] %vm1961_vm8, %v3793_v22  ;;  %v5651_v30 = vpack.c.bf16 %v4750_v24, %v4746_v47 }
 0x489   : > { %3857 = vst.msk [vmem:[#allocation3 + $0x130] sm:$0xf] %vm1961_vm8, %v3855_v7  ;;  %4605 = vrot.lane.b32.xlu1 %v4603_v17, %s7997_s27  ;;  %v4928_v7 = vld [vmem:[%s7934_s4] sm:$0xff] }
 0x48a   : > { %4633 = vrot.lane.b32.xlu0 %v5949_v23, %s8000_s1  ;;  %5652 = vmatpush1.bf16.msra.mxu0 %v5651_v30  ;;  %v2526_v17 = vld [vmem:[#allocation2 + $0x4] sm:$0xf] }
 0x48b   : > { %v3884_v48 = vpop.permute.xlu1 %3883 }
 0x48c   : > { %v4584_v59 = vpop.permute.xlu0 %4583  ;;  %3886 = vst.msk [vmem:[#allocation3 + $0x130] sm:$0xf0] %vm1993_vm13, %v3884_v48 }
 0x48d   : > { %4586 = vst.msk [vmem:[#allocation3 + $0x158] sm:$0xf] %vm1940_vm4, %v4584_v59  ;;  %4661 = vrot.lane.b32.xlu1 %v4659_v28, %s7995_s22 }
 0x48e   : > { %4689 = vrot.lane.b32.xlu0 %v5950_v37, %s7999_s29 }
 0x48f   : > { %v4591_v12 = vpop.permute.xlu1 %4590  ;;  %v4748_v46 = vld [vmem:[#allocation3 + $0x110] sm:$0xff] }
 0x490   : > { %v4593_v52 = vpop.permute.xlu0 %4592 }
 0x491   : > { %v4594_v10 = vsel %vm2095_vm15, %v4591_v12, %v4593_v52  ;;  %2560 = vrot.lane.b32.xlu1 %v5952_v14, %s7991_s26 }
 0x492   : > { %4596 = vst.msk [vmem:[#allocation3 + $0x158] sm:$0xf] %vm1947_vm6, %v4594_v10  ;;  %2623 = vrot.lane.b32.xlu0 %v5951_v55, %s7987_s21 }
 0x493   : > { %v4613_v57 = vpop.permute.xlu1 %4612  ;;  %v4752_v60 = vld [vmem:[#allocation3 + $0x130] sm:$0xff] }
 0x494   : > { %v4640_v5 = vpop.permute.xlu0 %4639  ;;  %4615 = vst.msk [vmem:[#allocation3 + $0x158] sm:$0xf0] %vm1969_vm5, %v4613_v57  ;;  %v5675_v13 = vpack.c.bf16 %v4752_v60, %v4748_v46 }
 0x495   : > { %4642 = vst.msk [vmem:[#allocation3 + $0x178] sm:$0xf] %vm1940_vm4, %v4640_v5  ;;  %3907 = vrot.lane.b32.xlu1 %v3905_v9, %s8001_s2 }
 0x496   : > { %3938 = vrot.lane.b32.xlu0 %v5953_v6, %s7997_s27  ;;  %5676 = vmatpush1.bf16.msra.mxu1 %v5675_v13 }
 0x497   : > { %v4647_v32 = vpop.permute.xlu1 %4646 }
 0x498   : > { %v4649_v21 = vpop.permute.xlu0 %4648 }
 0x499   : > { %v4650_v25 = vsel %vm8009_vm3, %v4647_v32, %v4649_v21  ;;  %3962 = vrot.lane.b32.xlu1 %v3960_v34, %s8000_s1 }
 0x49a   : > { %4652 = vst.msk [vmem:[#allocation3 + $0x178] sm:$0xf] %vm1947_vm6, %v4650_v25  ;;  %3993 = vrot.lane.b32.xlu0 %v5954_v58, %s7995_s22 }
 0x49b   : > { %v4669_v15 = vpop.permute.xlu1 %4668 }
 0x49c   : > { %v2517_v26 = vpop.permute.xlu0 %2516  ;;  %4671 = vst.msk [vmem:[#allocation3 + $0x178] sm:$0xf0] %vm1969_vm5, %v4669_v15 }
 0x49d   : > { %2519 = vst.msk [vmem:[#allocation3 + $0x140] sm:$0xf] %vm1940_vm4, %v2517_v26  ;;  %2630 = vrot.lane.b32.xlu1 %v2627_v16, %s7997_s27 }
 0x49e   : > { %2632 = vrot.lane.b32.xlu0 %v2629_v56, %s7997_s27 }
 0x49f   : > { %v2600_v36 = vpop.permute.xlu1 %2599 }
 0x4a0   : > { %v3202_v19 = vpop.permute.xlu0 %3201  ;;  %2602 = vst.msk [vmem:[#allocation3 + $0x160] sm:$0xf0] %vm1969_vm5, %v2600_v36 }
 0x4a1   : > { %3204 = vst.msk [vmem:[#allocation3 + $0x148] sm:$0xf] %vm1947_vm6, %v3202_v19  ;;  %3310 = vrot.lane.b32.xlu1 %v3308_v41, %s7990_s17 }
 0x4a2   : > { %4695 = vrot.lane.b32.xlu0 %v4693_v39, %s8001_s2 }
 0x4a3   : > { %v3231_v3 = vpop.permute.xlu1 %3230 }
 0x4a4   : > { %v3260_v49 = vpop.permute.xlu0 %3259  ;;  %3233 = vst.msk [vmem:[#allocation3 + $0x148] sm:$0xf0] %vm1977_vm11, %v3231_v3 }
 0x4a5   : > { %3262 = vst.msk [vmem:[#allocation3 + $0x168] sm:$0xf] %vm1947_vm6, %v3260_v49  ;;  %3316 = vrot.lane.b32.xlu1 %v3314_v4, %s7992_s25 }
 0x4a6   : > { %3323 = vrot.lane.b32.xlu0 %v3320_v31, %s7991_s26 }
 0x4a7   : > { %v3267_v38 = vpop.permute.xlu1 %3266 }
 0x4a8   : > { %v3269_v53 = vpop.permute.xlu0 %3268 }
 0x4a9   : > { %v3270_v44 = vsel %vm8006_vm10, %v3267_v38, %v3269_v53  ;;  %3325 = vrot.lane.b32.xlu1 %v3322_v62, %s7991_s26 }
 0x4aa   : > { %3272 = vst.msk [vmem:[#allocation3 + $0x168] sm:$0xf] %vm1954_vm7, %v3270_v44  ;;  %3999 = vrot.lane.b32.xlu0 %v3997_v54, %s7991_s26 }
 0x4ab   : > { %v3890_v2 = vpop.permute.xlu1 %3889 }
 0x4ac   : > { %v3915_v29 = vpop.permute.xlu0 %3914  ;;  %3892 = vst.msk [vmem:[#allocation3 + $0x150] sm:$0xf] %vm1940_vm4, %v3890_v2 }
 0x4ad   : > { %3917 = vst.msk [vmem:[#allocation3 + $0x150] sm:$0xf0] %vm1969_vm5, %v3915_v29  ;;  %4701 = vrot.lane.b32.xlu1 %v4699_v35, %s7999_s29 }
 0x4ae   : > { %4005 = vrot.lane.b32.xlu0 %v4003_v8, %s7993_s28 }
 0x4af   : > { %v3922_v63 = vpop.permute.xlu1 %3921 }
 0x4b0   : > { %v3924_v50 = vpop.permute.xlu0 %3923 }
 0x4b1   : > { %v3925_v51 = vsel %vm2095_vm15, %v3922_v63, %v3924_v50  ;;  %4707 = vrot.lane.b32.xlu1 %v4705_v42, %s7997_s27  ;;  %vm8010_vm15 = vmmov %vm8009_vm3 }
 0x4b2   : > { %3927 = vst.msk [vmem:[#allocation3 + $0x150] sm:$0xf0] %vm1977_vm11, %v3925_v51  ;;  %2641 = vrot.lane.b32.xlu0 %v2639_v33, %s7990_s17 }
 0x4b3   : > { %v3945_v40 = vpop.permute.xlu1 %3944 }
 0x4b4   : > { %v3970_v11 = vpop.permute.xlu0 %3969  ;;  %3947 = vst.msk [vmem:[#allocation3 + $0x170] sm:$0xf] %vm1940_vm4, %v3945_v40 }
 0x4b5   : > { %3972 = vst.msk [vmem:[#allocation3 + $0x170] sm:$0xf0] %vm1969_vm5, %v3970_v11  ;;  %3332 = vrot.lane.b32.xlu1 %v3330_v1, %s7993_s28  ;;  %vm8011_vm5 = vmmov %vm8006_vm10 }
 0x4b6   : > { %4011 = vrot.lane.b32.xlu0 %v4009_v61, %s8001_s2 }
 0x4b7   : > { %v3977_v45 = vpop.permute.xlu1 %3976 }
 0x4b8   : > { %v3979_v43 = vpop.permute.xlu0 %3978 }
 0x4b9   : > { %v3980_v18 = vsel %vm8010_vm15, %v3977_v45, %v3979_v43  ;;  %2647 = vrot.lane.b32.xlu1 %v2645_v27, %s7992_s25 }
 0x4ba   : > { %3982 = vst.msk [vmem:[#allocation3 + $0x170] sm:$0xf0] %vm1977_vm11, %v3980_v18  ;;  %4017 = vrot.lane.b32.xlu0 %v4015_v20, %s7999_s29  ;;  %v2637_v18 = vld [vmem:[#allocation2 + $0x4] sm:$0xf] }
 0x4bb   : > { %v4620_v23 = vpop.permute.xlu1 %4619 }
 0x4bc   : > { %v4676_v22 = vpop.permute.xlu0 %4675  ;;  %4622 = vst.msk [vmem:[#allocation3 + $0x158] sm:$0xf0] %vm1977_vm11, %v4620_v23 }
 0x4bd   : > { %4678 = vst.msk [vmem:[#allocation3 + $0x178] sm:$0xf0] %vm1977_vm11, %v4676_v22  ;;  %4931 = vperm.xlu1 %5790, %v4928_v7  }
 0x4bf   : > { %v2523_v24 = vpop.permute.xlu1 %2522 }
 0x4c0   : > { %v2547_v47 = vpop.permute.xlu0 %2546  ;;  %2525 = vst.msk [vmem:[#allocation3 + $0x140] sm:$0xf] %vm1947_vm6, %v2523_v24 }
 0x4c1   : > { %2549 = vst.msk [vmem:[#allocation3 + $0x140] sm:$0xf0] %vm1977_vm11, %v2547_v47 }
 0x4c2   : > { %2527 = vst.msk [vmem:[#allocation3 + $0x140] sm:$0xf] %vm1954_vm7, %v2526_v17 }
 0x4c3   : > { %v2577_v59 = vpop.permute.xlu1 %2576 }
 0x4c4   : > { %v2607_v30 = vpop.permute.xlu0 %2606  ;;  %2579 = vst.msk [vmem:[#allocation3 + $0x160] sm:$0xf] %vm1947_vm6, %v2577_v59 }
 0x4c5   : > { %2609 = vst.msk [vmem:[#allocation3 + $0x160] sm:$0xf0] %vm1977_vm11, %v2607_v30  ;;  %vm8012_vm11 = vmmov %vm8007_vm1 }
 0x4c7   : > { %v2614_v37 = vpop.permute.xlu1 %2613 }
 0x4c8   : > { %v2616_v48 = vpop.permute.xlu0 %2615 }
 0x4c9   : > { %v2617_v28 = vsel %vm8011_vm5, %v2614_v37, %v2616_v48 }
 0x4ca   : > { %2619 = vst.msk [vmem:[#allocation3 + $0x160] sm:$0xf0] %vm1985_vm12, %v2617_v28 }
 0x4cb   : > { %v3208_v12 = vpop.permute.xlu1 %3207 }
 0x4cc   : > { %v3238_v52 = vpop.permute.xlu0 %3237  ;;  %3210 = vst.msk [vmem:[#allocation3 + $0x148] sm:$0xf] %vm1954_vm7, %v3208_v12  ;;  %v4711_v12 = vld [vmem:[#allocation2 + $0x20] sm:$0xf] }
 0x4cd   : > { %3240 = vst.msk [vmem:[#allocation3 + $0x148] sm:$0xf0] %vm1985_vm12, %v3238_v52 }
 0x4cf   : > { %v3245_v14 = vpop.permute.xlu1 %3244 }
 0x4d0   : > { %v3247_v55 = vpop.permute.xlu0 %3246 }
 0x4d1   : > { %v3248_v10 = vsel %vm8007_vm1, %v3245_v14, %v3247_v55 }
 0x4d2   : > { %3250 = vst.msk [vmem:[#allocation3 + $0x148] sm:$0xf0] %vm1993_vm13, %v3248_v10 }
 0x4d3   : > { %v3298_v57 = vpop.permute.xlu1 %3297 }
 0x4d4   : > { %v3896_v5 = vpop.permute.xlu0 %3895  ;;  %3300 = vst.msk [vmem:[#allocation3 + $0x168] sm:$0xf0] %vm1985_vm12, %v3298_v57 }
 0x4d5   : > { %3898 = vst.msk [vmem:[#allocation3 + $0x150] sm:$0xf] %vm1947_vm6, %v3896_v5 }
 0x4d7   : > { %v3951_v46 = vpop.permute.xlu1 %3950 }
 0x4d8   : > { %v4600_v6 = vpop.permute.xlu0 %4599  ;;  %3953 = vst.msk [vmem:[#allocation3 + $0x170] sm:$0xf] %vm1947_vm6, %v3951_v46  ;;  %v4713_v46 = vld [vmem:[%s7933_s3] sm:$0xff] }
 0x4d9   : > { %4602 = vst.msk [vmem:[#allocation3 + $0x158] sm:$0xf] %vm1954_vm7, %v4600_v6 }
 0x4db   : > { %v4627_v9 = vpop.permute.xlu1 %4626 }
 0x4dc   : > { %v4656_v60 = vpop.permute.xlu0 %4655  ;;  %4629 = vst.msk [vmem:[#allocation3 + $0x158] sm:$0xf0] %vm1985_vm12, %v4627_v9 }
 0x4dd   : > { %4658 = vst.msk [vmem:[#allocation3 + $0x178] sm:$0xf] %vm1954_vm7, %v4656_v60 }
 0x4df   : > { %v4683_v21 = vpop.permute.xlu1 %4682 }
 0x4e0   : > { %v2532_v13 = vpop.permute.xlu0 %2531  ;;  %4685 = vst.msk [vmem:[#allocation3 + $0x178] sm:$0xf0] %vm1985_vm12, %v4683_v21 }
 0x4e3   : > { %v2534_v58 = vpop.permute.xlu1 %2533 }
 0x4e4   : > { %v2554_v32 = vpop.permute.xlu0 %2553  ;;  %v2535_v25 = vsel %vm2134_vm0, %v2532_v13, %v2534_v58 }
 0x4e5   : > { %2556 = vst.msk [vmem:[#allocation3 + $0x140] sm:$0xf0] %vm1985_vm12, %v2554_v32 }
 0x4e6   : > { %2537 = vst.msk [vmem:[#allocation3 + $0x140] sm:$0xf] %vm1961_vm8, %v2535_v25 }
 0x4e7   : > { %v2583_v16 = vpop.permute.xlu1 %2582 }
 0x4e8   : > { %v2590_v34 = vpop.permute.xlu0 %2589  ;;  %2585 = vst.msk [vmem:[#allocation3 + $0x160] sm:$0xf] %vm1954_vm7, %v2583_v16 }
 0x4eb   : > { %v2592_v15 = vpop.permute.xlu1 %2591 }
 0x4ec   : > { %v3214_v26 = vpop.permute.xlu0 %3213  ;;  %v2593_v56 = vsel %vm8012_vm11, %v2590_v34, %v2592_v15 }
 0x4ed   : > { %3216 = vst.msk [vmem:[#allocation3 + $0x148] sm:$0xf] %vm1961_vm8, %v3214_v26  ;;  %2595 = vst.msk [vmem:[#allocation3 + $0x160] sm:$0xf] %vm1961_vm8, %v2593_v56 }
 0x4ef   : > { %v3276_v36 = vpop.permute.xlu1 %3275 }
 0x4f0   : > { %v3305_v19 = vpop.permute.xlu0 %3304  ;;  %3278 = vst.msk [vmem:[#allocation3 + $0x168] sm:$0xf] %vm1961_vm8, %v3276_v36  ;;  %v5017_v36 = vld [vmem:[%s7935_s5 + $0x8] sm:$0xff] }
 0x4f1   : > { %3307 = vst.msk [vmem:[#allocation3 + $0x168] sm:$0xf0] %vm1993_vm13, %v3305_v19  ;;  %v5016_v19 = vld [vmem:[%s7935_s5] sm:$0xff] }
 0x4f3   : > { %v3902_v41 = vpop.permute.xlu1 %3901 }
 0x4f4   : > { %v3932_v39 = vpop.permute.xlu0 %3931  ;;  %3904 = vst.msk [vmem:[#allocation3 + $0x150] sm:$0xf] %vm1954_vm7, %v3902_v41  ;;  %v4755_v31 = vld [vmem:[#allocation3 + $0x148] sm:$0xff]  ;;  %v6046_v41 = vmov 0.0|0.0  }
 0x4f5   : > { %3934 = vst.msk [vmem:[#allocation3 + $0x150] sm:$0xf0] %vm1985_vm12, %v3932_v39  ;;  %v5018_v39 = vld [vmem:[%s7935_s5 + $0x10] sm:$0xff] }
 0x4f7   : > { %v3957_v3 = vpop.permute.xlu1 %3956 }
 0x4f8   : > { %v3987_v49 = vpop.permute.xlu0 %3986  ;;  %v4759_v4 = vld [vmem:[#allocation3 + $0x168] sm:$0xff]  ;;  %3959 = vst.msk [vmem:[#allocation3 + $0x170] sm:$0xf] %vm1954_vm7, %v3957_v3  ;;  %v5019_v3 = vld [vmem:[%s7935_s5 + $0x18] sm:$0xff] }
 0x4f9   : > { %3989 = vst.msk [vmem:[#allocation3 + $0x170] sm:$0xf0] %vm1985_vm12, %v3987_v49  ;;  %v5653_v62 = vpack.c.bf16 %v4759_v4, %v4755_v31  ;;  %v5682_v49 = vpack.c.bf16 %v5017_v36, %v5016_v19  ;;  %v5685_v31 = vpack.c.bf16 %v5019_v3, %v5018_v39  ;;  %v5020_v4 = vld [vmem:[%s7935_s5 + $0x20] sm:$0xff] }
 0x4fa   : > { %v5343_v36 = vld [vmem:[%s7936_s6] ss:$0 sm:$0xff] }
 0x4fb   : > { %5654 = vmatprep.subr.bf16.mxu0 %v5653_v62  ;;  %v4606_v38 = vpop.permute.xlu1 %4605  ;;  %v5021_v62 = vld [vmem:[%s7935_s5 + $0x28] sm:$0xff] }
 0x4fc   : > { %v4634_v53 = vpop.permute.xlu0 %4633  ;;  %4608 = vst.msk [vmem:[#allocation3 + $0x158] sm:$0xf] %vm1961_vm8, %v4606_v38  ;;  %v5023_v38 = vld [vmem:[%s7935_s5 + $0x38] sm:$0xff] }
 0x4fd   : > { %4636 = vst.msk [vmem:[#allocation3 + $0x158] sm:$0xf0] %vm1993_vm13, %v4634_v53  ;;  %v5688_v53 = vpack.c.bf16 %v5021_v62, %v5020_v4 }
 0x4ff   : > { %v4662_v54 = vpop.permute.xlu1 %4661 }
 0x500   : > { %v4690_v44 = vpop.permute.xlu0 %4689  ;;  %4664 = vst.msk [vmem:[#allocation3 + $0x178] sm:$0xf] %vm1961_vm8, %v4662_v54  ;;  %v5024_v54 = vld [vmem:[%s7935_s5 + $0x40] sm:$0xff] }
 0x501   : > { %4692 = vst.msk [vmem:[#allocation3 + $0x178] sm:$0xf0] %vm1993_vm13, %v4690_v44 }
 0x503   : > { %v2561_v2 = vpop.permute.xlu1 %2560 }
 0x504   : > { %v2624_v29 = vpop.permute.xlu0 %2623  ;;  %2563 = vst.msk [vmem:[#allocation3 + $0x140] sm:$0xf0] %vm1993_vm13, %v2561_v2  ;;  %v4757_v50 = vld [vmem:[#allocation3 + $0x158] sm:$0xff] }
 0x505   : > { %2626 = vst.msk [vmem:[#allocation3 + $0x160] sm:$0xf0] %vm1993_vm13, %v2624_v29  ;;  %v5025_v29 = vld [vmem:[%s7935_s5 + $0x48] sm:$0xff] }
 0x506   : > { %v5694_v2 = vpack.c.bf16 %v5025_v29, %v5024_v54 }
 0x507   : > { %v3908_v35 = vpop.permute.xlu1 %3907 }
 0x508   : > { %v3939_v8 = vpop.permute.xlu0 %3938  ;;  %v4761_v63 = vld [vmem:[#allocation3 + $0x178] sm:$0xff]  ;;  %3910 = vst.msk [vmem:[#allocation3 + $0x150] sm:$0xf] %vm1961_vm8, %v3908_v35 }
 0x509   : > { %3941 = vst.msk [vmem:[#allocation3 + $0x150] sm:$0xf0] %vm1993_vm13, %v3939_v8  ;;  %v5677_v51 = vpack.c.bf16 %v4761_v63, %v4757_v50  ;;  %v5026_v8 = vld [vmem:[%s7935_s5 + $0x50] sm:$0xff]  ;;  %v5027_v35 = vld [vmem:[%s7935_s5 + $0x58] sm:$0xff]  ;;  %v5028_v63 = vld [vmem:[%s7935_s5 + $0x60] sm:$0xff] }
 0x50a   : > { %v5697_v50 = vpack.c.bf16 %v5027_v35, %v5026_v8 }
 0x50b   : > { %5678 = vmatprep.subr.bf16.mxu1 %v5677_v51  ;;  %v3963_v42 = vpop.permute.xlu1 %3962  ;;  %v4754_v11 = vld [vmem:[#allocation3 + $0x140] sm:$0xff] }
 0x50c   : > { %v3994_v33 = vpop.permute.xlu0 %3993  ;;  %v4758_v40 = vld [vmem:[#allocation3 + $0x160] sm:$0xff]  ;;  %3965 = vst.msk [vmem:[#allocation3 + $0x170] sm:$0xf] %vm1961_vm8, %v3963_v42  ;;  %v5030_v42 = vld [vmem:[%s7935_s5 + $0x70] sm:$0xff] }
 0x50d   : > { %3996 = vst.msk [vmem:[#allocation3 + $0x170] sm:$0xf0] %vm1993_vm13, %v3994_v33  ;;  %v5655_v61 = vpack.c.bf16 %v4758_v40, %v4754_v11  ;;  %v5029_v51 = vld [vmem:[%s7935_s5 + $0x68] sm:$0xff]  ;;  %v5031_v11 = vld [vmem:[%s7935_s5 + $0x78] sm:$0xff] }
 0x50e   : > { %v5700_v33 = vpack.c.bf16 %v5029_v51, %v5028_v63  ;;  %v5703_v40 = vpack.c.bf16 %v5031_v11, %v5030_v42 }
 0x50f   : > { %5656 = vmatpush1.bf16.msra.mxu0 %v5655_v61  ;;  %v2631_v43 = vpop.permute.xlu1 %2630  ;;  %v5110_v61 = vld [vmem:[%s7937_s7] sm:$0xff] }
 0x510   : > { %v2633_v1 = vpop.permute.xlu0 %2632  ;;  %v4756_v7 = vld [vmem:[#allocation3 + $0x150] sm:$0xff] }
 0x511   : > { %v2634_v45 = vsel %vm2376_vm2, %v2631_v43, %v2633_v1  ;;  %v5111_v1 = vld [vmem:[%s7937_s7 + $0x8] sm:$0xff]  ;;  %v5112_v43 = vld [vmem:[%s7937_s7 + $0x10] sm:$0xff] }
 0x512   : > { %2636 = vst.msk [vmem:[#allocation3 + $0x180] sm:$0xf] %vm1940_vm4, %v2634_v45  ;;  %v5706_v45 = vpack.c.bf16 %v5111_v1, %v5110_v61 }
 0x513   : > { %2638 = vst.msk [vmem:[#allocation3 + $0x180] sm:$0xf] %vm1947_vm6, %v2637_v18  ;;  %v3311_v27 = vpop.permute.xlu1 %3310  ;;  %v5113_v18 = vld [vmem:[%s7937_s7 + $0x18] sm:$0xff] }
 0x514   : > { %v4696_v20 = vpop.permute.xlu0 %4695  ;;  %v4760_v22 = vld [vmem:[#allocation3 + $0x170] sm:$0xff]  ;;  %3313 = vst.msk [vmem:[#allocation3 + $0x188] sm:$0xf] %vm1940_vm4, %v3311_v27  ;;  %v5709_v27 = vpack.c.bf16 %v5113_v18, %v5112_v43 }
 0x515   : > { %4698 = vst.msk [vmem:[#allocation3 + $0x198] sm:$0xf] %vm1940_vm4, %v4696_v20  ;;  %v5679_v23 = vpack.c.bf16 %v4760_v22, %v4756_v7  ;;  %v5114_v7 = vld [vmem:[%s7937_s7 + $0x20] sm:$0xff]  ;;  %v5115_v22 = vld [vmem:[%s7937_s7 + $0x28] sm:$0xff] }
 0x517   : > { %5680 = vmatpush1.bf16.msra.mxu1 %v5679_v23  ;;  %v3317_v24 = vpop.permute.xlu1 %3316 }
 0x518   : > { %v3324_v47 = vpop.permute.xlu0 %3323  ;;  %3319 = vst.msk [vmem:[#allocation3 + $0x188] sm:$0xf] %vm1947_vm6, %v3317_v24  ;;  %v5116_v24 = vld [vmem:[%s7937_s7 + $0x30] sm:$0xff] }
 0x51b   : > { %v3326_v30 = vpop.permute.xlu1 %3325 }
 0x51c   : > { %v4000_v17 = vpop.permute.xlu0 %3999  ;;  %v3327_v59 = vsel %vm2071_vm9, %v3324_v47, %v3326_v30  ;;  %v5712_v47 = vpack.c.bf16 %v5115_v22, %v5114_v7 }
 0x51d   : > { %4002 = vst.msk [vmem:[#allocation3 + $0x190] sm:$0xf] %vm1940_vm4, %v4000_v17  ;;  %vm4770_vm4 = vcmask 1043456   ;;  %v5117_v17 = vld [vmem:[%s7937_s7 + $0x38] sm:$0xff] }
 0x51e   : > { %3329 = vst.msk [vmem:[#allocation3 + $0x188] sm:$0xf] %vm1954_vm7, %v3327_v59  ;;  %v5715_v59 = vpack.c.bf16 %v5117_v17, %v5116_v24 }
 0x51f   : > { %v4702_v37 = vpop.permute.xlu1 %4701 }
 0x520   : > { %v4006_v48 = vpop.permute.xlu0 %4005  ;;  %4704 = vst.msk [vmem:[#allocation3 + $0x198] sm:$0xf] %vm1947_vm6, %v4702_v37  ;;  %v5119_v37 = vld [vmem:[%s7937_s7 + $0x48] sm:$0xff] }
 0x521   : > { %4008 = vst.msk [vmem:[#allocation3 + $0x190] sm:$0xf] %vm1947_vm6, %v4006_v48  ;;  %vm4766_vm6 = vcmask 818176   ;;  %v5118_v48 = vld [vmem:[%s7937_s7 + $0x40] sm:$0xff] }
 0x523   : > { %v4708_v52 = vpop.permute.xlu1 %4707 }
 0x524   : > { %v2642_v28 = vpop.permute.xlu0 %2641  ;;  %4710 = vst.msk [vmem:[#allocation3 + $0x198] sm:$0xf] %vm1954_vm7, %v4708_v52  ;;  %v5718_v52 = vpack.c.bf16 %v5119_v37, %v5118_v48 }
 0x525   : > { %2644 = vst.msk [vmem:[#allocation3 + $0x180] sm:$0xf] %vm1954_vm7, %v2642_v28 }
 0x526   : > { %4712 = vst.msk [vmem:[#allocation3 + $0x198] sm:$0xf] %vm1961_vm8, %v4711_v12  ;;  %v5120_v12 = vld [vmem:[%s7937_s7 + $0x50] sm:$0xff] }
 0x527   : > { %v3333_v14 = vpop.permute.xlu1 %3332 }
 0x528   : > { %v4012_v55 = vpop.permute.xlu0 %4011  ;;  %3335 = vst.msk [vmem:[#allocation3 + $0x188] sm:$0xf] %vm1961_vm8, %v3333_v14 }
 0x529   : > { %4014 = vst.msk [vmem:[#allocation3 + $0x190] sm:$0xf] %vm1954_vm7, %v4012_v55  ;;  %vm6047_vm7 = vmmov 0   ;;  %v5121_v55 = vld [vmem:[%s7937_s7 + $0x58] sm:$0xff] }
 0x52b   : > { %v2648_v5 = vpop.permute.xlu1 %2647 }
 0x52c   : > { %v4018_v10 = vpop.permute.xlu0 %4017  ;;  %2650 = vst.msk [vmem:[#allocation3 + $0x180] sm:$0xf] %vm1961_vm8, %v2648_v5  ;;  %v5122_v5 = vld [vmem:[%s7937_s7 + $0x60] sm:$0xff] }
 0x52d   : > { %4020 = vst.msk [vmem:[#allocation3 + $0x190] sm:$0xf] %vm1961_vm8, %v4018_v10  ;;  %v4765_v57 = vld [vmem:[#allocation3 + $0x198] sm:$0xf]  ;;  %v5721_v10 = vpack.c.bf16 %v5121_v55, %v5120_v12 }
 0x52e   : > { %5340 = vmatprep.subr.msk.mxu1 %vm4770_vm4, %v4765_v57  ;;  %v5123_v57 = vld [vmem:[%s7937_s7 + $0x68] sm:$0xff] }
 0x52f   : > { %v4763_v6 = vld [vmem:[#allocation3 + $0x188] sm:$0xf] }
 0x530   : > { %5337 = vmatprep.subr.msk.mxu0 %vm4770_vm4, %v4763_v6 }
 0x533   : > { %v4762_v60 = vld [vmem:[#allocation3 + $0x180] sm:$0xf] }
 0x534   : > { %v4764_v9 = vld [vmem:[#allocation3 + $0x190] sm:$0xf]  ;;  %5338 = vmatpush1.msk.msra.mxu0 %vm4770_vm4, %v4762_v60 }
 0x535   : > { %5341 = vmatpush1.msk.msra.mxu1 %vm4770_vm4, %v4764_v9  ;;  %5339 = vmatmul.mubr.msk.f32.vlgmr.msra.gmra.mrb[18].mxu0 %vm4766_vm6, %v4713_v46 }
 0x536   : > { %5342 = vmatmul.mubr.msk.f32.vlgmr.msra.gmra.mrb[18].mxu1 %vm4766_vm6, %v4713_v46  ;;  %5681 = vmatprep.subr.bf16.mxu0 %v6046_v41  ;;  %v5724_v46 = vpack.c.bf16 %v5123_v57, %v5122_v5 }
 0x537   : > { %5415 = vmatprep.mubr.msk.f32.mxu0 %vm6047_vm7, %v6028_v0  ;;  %5705 = vmatprep.subr.bf16.mxu1 %v6046_v41 }
 0x538   : > { %5450 = vmatprep.mubr.msk.f32.mxu1 %vm6047_vm7, %v6028_v0  ;;  %5683 = vmatpush3.bf16.msra.mxu0 %v5682_v49  ;;  %v5022_v0 = vld [vmem:[%s7935_s5 + $0x30] sm:$0xff] }
 0x539   : > { %5684 = vmatprep.subr.bf16.mxu0 %v6046_v41  ;;  %v5691_v44 = vpack.c.bf16 %v5023_v38, %v5022_v0  ;;  %5707 = vmatpush3.bf16.msra.mxu1 %v5706_v45 }
 0x53a   : > { %5708 = vmatprep.subr.bf16.mxu1 %v6046_v41 }
 0x53c   : > { %v4932_v16 = vpop.permute.xlu1 %4931  ;;  %5686 = vmatpush3.bf16.msra.mxu0 %v5685_v31  ;;  %v5344_v31 = vld [vmem:[%s7938_s8] ss:$0 sm:$0xff] }
 0x53d   : > { %5687 = vmatprep.subr.bf16.mxu0 %v6046_v41  ;;  %5710 = vmatpush3.bf16.msra.mxu1 %v5709_v27 }
 0x53e   : > { %5711 = vmatprep.subr.bf16.mxu1 %v6046_v41 }
 0x540   : > { %5689 = vmatpush3.bf16.msra.mxu0 %v5688_v53 }
 0x541   : > { %5690 = vmatprep.subr.bf16.mxu0 %v6046_v41  ;;  %5713 = vmatpush3.bf16.msra.mxu1 %v5712_v47 }
 0x542   : > { %5714 = vmatprep.subr.bf16.mxu1 %v6046_v41 }
 0x544   : > { %5692 = vmatpush3.bf16.msra.mxu0 %v5691_v44 }
 0x545   : > { %5693 = vmatprep.subr.bf16.mxu0 %v6046_v41  ;;  %5716 = vmatpush3.bf16.msra.mxu1 %v5715_v59 }
 0x546   : > { %5717 = vmatprep.subr.bf16.mxu1 %v6046_v41 }
 0x548   : > { %5695 = vmatpush3.bf16.msra.mxu0 %v5694_v2 }
 0x549   : > { %5696 = vmatprep.subr.bf16.mxu0 %v6046_v41  ;;  %5719 = vmatpush3.bf16.msra.mxu1 %v5718_v52 }
 0x54a   : > { %5720 = vmatprep.subr.bf16.mxu1 %v6046_v41 }
 0x54c   : > { %5698 = vmatpush3.bf16.msra.mxu0 %v5697_v50 }
 0x54d   : > { %5699 = vmatprep.subr.bf16.mxu0 %v6046_v41  ;;  %5722 = vmatpush3.bf16.msra.mxu1 %v5721_v10 }
 0x54e   : > { %5723 = vmatprep.subr.bf16.mxu1 %v6046_v41 }
 0x550   : > { %5701 = vmatpush3.bf16.msra.mxu0 %v5700_v33 }
 0x551   : > { %5702 = vmatprep.subr.bf16.mxu0 %v6046_v41  ;;  %5725 = vmatpush3.bf16.msra.mxu1 %v5724_v46 }
 0x552   : > { %5726 = vmatprep.subr.bf16.mxu1 %v6046_v41 }
 0x554   : > { %5704 = vmatpush3.bf16.msra.mxu0 %v5703_v40 }
 0x608   : > { %v4849_v13 = vpop.f32.mrb[18].mxu0 }
 0x609   : > { %v4920_v21 = vpop.f32.mrb[18].mxu1  ;;  %v4851_v32 = vpop.f32.mrb[19].mxu0 }
 0x60a   : > { %v4922_v58 = vpop.f32.mrb[19].mxu1  ;;  %v4925_v25 = vmax.f32 %v4849_v13, %v4851_v32 }
 0x60b   : > { %v4926_v34 = vmax.f32 %v4920_v21, %v4922_v58 }
 0x60d   : > { %v4927_v26 = vmax.f32 %v4925_v25, %v4926_v34 }
 0x60f   : > { %v4934_v15 = vadd.f32 %v4932_v16, %v4927_v26 }
 0x611   : > { %v4935_v56 = vmax.f32 %v4934_v15, 0.0  ;;  %v5124_v15 = vld [vmem:[%s7937_s7 + $0x70] sm:$0xff] }
 0x613   : > { %4942 = vrot.lane.b32.xlu1 %v4935_v56, %s7990_s17  ;;  %4939 = vrot.lane.b32.xlu0 %v4935_v56, %s7989_s14  ;;  %s5346_s17 = sshll.u32 %s6120_s13, 7  ;;  %s6048_s13 = smov [#allocation5]  }
 0x617   : > { %4948 = vrot.lane.b32.xlu1 %v4935_v56, %s7992_s25  ;;  %4945 = vrot.lane.b32.xlu0 %v4935_v56, %s7988_s16  ;;  %s5968_s25 = sshll.u32 %s6048_s13, 4  ;;  %s5969_s25 = int_to_ptr.vmem [resolvable:$false] %s5968_s25 }
 0x61b   : > { %4954 = vrot.lane.b32.xlu1 %v4935_v56, %s7991_s26  ;;  %4951 = vrot.lane.b32.xlu0 %v4935_v56, %s7994_s23  ;;  %s5970_s26 = scalar_lea.vmem %s5969_s25, 256 }
 0x61f   : > { %4960 = vrot.lane.b32.xlu1 %v4935_v56, %s7993_s28  ;;  %4957 = vrot.lane.b32.xlu0 %v4935_v56, %s7987_s21  ;;  %s325_s21 = scalar_lea.vmem [#allocation5], %s5281_s18 }
 0x623   : > { %4966 = vrot.lane.b32.xlu1 %v4935_v56, %s8001_s2  ;;  %4963 = vrot.lane.b32.xlu0 %v4935_v56, %s7996_s24  ;;  %s5218_s2 = sshll.u32 %s325_s21, 4  ;;  %s7890_s2 = int_to_ptr.vmem [resolvable:$true] %s5218_s2 }
 0x624   : > { %s5964_s24 = scalar_lea.vmem %s7890_s2, 128  ;;  %p5971_p0 = scmp.lt.s32.totalorder %s7890_s2, %s5969_s25 }
 0x625   : > { %p5965_p11 = scmp.ne.s32.totalorder %s7890_s2, %s5964_s24  ;;  %p5972_p1 = scmp.lt.s32.totalorder %s5970_s26, %s5964_s24 }
 0x627   : > { %4972 = vrot.lane.b32.xlu1 %v4935_v56, %s7999_s29  ;;  %4969 = vrot.lane.b32.xlu0 %v4935_v56, %s8000_s1  ;;  %p5966_p12 = pnand %p5965_p11, %p6137_p5  ;;  %p5973_p2 = por %p5972_p1, %p5971_p0 }
 0x629   : > { %p5967_p13 = pneg %p5966_p12 }
 0x62b   : > { %4978 = vrot.lane.b32.xlu1 %v4935_v56, %s7997_s27  ;;  %4975 = vrot.lane.b32.xlu0 %v4935_v56, %s7998_s0  ;;  %s7888_s0 = scalar_lea.hbm %s7939_s9, %s5346_s17  ;;  %p5974_p3 = pnand %p5973_p2, %p5967_p13 }
 0x62f   : > { %4981 = vrot.lane.b32.xlu0 %v4935_v56, %s7995_s22  ;;  %s5205_s22 = scalar_lea.sflag [#allocation6], %s323_s11 }
 0x654   : > { %4984 = vxpose.xlu1.b32.start [1/16] (narrow) %v4935_v56, 8  ;;  %v5125_v56 = vld [vmem:[%s7937_s7 + $0x78] sm:$0xff] }
 0x655   : > { %v5727_v19 = vpack.c.bf16 %v5125_v56, %v5124_v15 }
 0x657   : > { %5728 = vmatpush3.bf16.msra.mxu1 %v5727_v19 }
 0x685   : > { %v4940_v20 = vpop.permute.xlu0 %4939  ;;  %v4943_v23 = vpop.permute.xlu1 %4942 }
 0x686   : > { %4985 = vxpose.xlu1.b32.cont [2/16] (narrow) %v4940_v20, 8 }
 0x689   : > { %v4946_v30 = vpop.permute.xlu0 %4945  ;;  %v4949_v28 = vpop.permute.xlu1 %4948 }
 0x68a   : > { %4986 = vxpose.xlu1.b32.cont [3/16] (narrow) %v4943_v23, 8 }
 0x68d   : > { %v4952_v14 = vpop.permute.xlu0 %4951  ;;  %v4955_v6 = vpop.permute.xlu1 %4954 }
 0x68e   : > { %4987 = vxpose.xlu1.b32.cont [4/16] (narrow) %v4946_v30, 8 }
 0x691   : > { %v4958_v60 = vpop.permute.xlu0 %4957  ;;  %v4961_v9 = vpop.permute.xlu1 %4960 }
 0x692   : > { %4988 = vxpose.xlu1.b32.cont [5/16] (narrow) %v4949_v28, 8 }
 0x695   : > { %v4964_v13 = vpop.permute.xlu0 %4963  ;;  %v4967_v21 = vpop.permute.xlu1 %4966 }
 0x696   : > { %4989 = vxpose.xlu1.b32.cont [6/16] (narrow) %v4952_v14, 8 }
 0x699   : > { %v4970_v32 = vpop.permute.xlu0 %4969  ;;  %v4973_v58 = vpop.permute.xlu1 %4972 }
 0x69a   : > { %4990 = vxpose.xlu1.b32.cont [7/16] (narrow) %v4955_v6, 8 }
 0x69d   : > { %v4976_v25 = vpop.permute.xlu0 %4975  ;;  %v4979_v34 = vpop.permute.xlu1 %4978 }
 0x69e   : > { %4991 = vxpose.xlu1.b32.cont [8/16] (narrow) %v4958_v60, 8 }
 0x6a1   : > { %v4982_v16 = vpop.permute.xlu0 %4981 }
 0x6a2   : > { %4992 = vxpose.xlu1.b32.cont [9/16] (narrow) %v4961_v9, 8 }
 0x6a6   : > { %4993 = vxpose.xlu1.b32.cont [10/16] (narrow) %v4964_v13, 8 }
 0x6aa   : > { %4994 = vxpose.xlu1.b32.cont [11/16] (narrow) %v4967_v21, 8 }
 0x6ae   : > { %4995 = vxpose.xlu1.b32.cont [12/16] (narrow) %v4970_v32, 8 }
 0x6b2   : > { %4996 = vxpose.xlu1.b32.cont [13/16] (narrow) %v4973_v58, 8 }
 0x6b6   : > { %4997 = vxpose.xlu1.b32.cont [14/16] (narrow) %v4976_v25, 8 }
 0x6ba   : > { %4998 = vxpose.xlu1.b32.cont [15/16] (narrow) %v4979_v34, 8 }
 0x6be   : > { %4999 = vxpose.xlu1.b32.end [16/16] (narrow) %v4982_v16, 8 }
 0x702   : > { %v5000_v26 = vpop.trf.xlu1 }
 0x703   : > { %5416 = vmatmul.mubr.f32.vlgmr.msra.gmra.mrb[20].mxu0 %v5000_v26 }
 0x7d6   : > { %v5105_v39 = vpop.f32.mrb[20].mxu0 }
 0x7d7   : > { %v5106_v41 = vadd.f32 %v5343_v36, %v5105_v39  ;;  %v5417_v49 = vpop.f32.mrb[21].mxu0 }
 0x7d9   : > { %v5109_v3 = vmax.f32 %v5106_v41, 0.0 }
 0x7db   : > { %5451 = vmatmul.mubr.f32.vlgmr.msra.gmra.mrb[20].mxu1 %v5109_v3 }
 0x8ae   : > { %v5199_v4 = vpop.f32.mrb[20].mxu1 }
 0x8af   : > { %v5200_v62 = vadd.f32 %v5344_v31, %v5199_v4  ;;  %v5452_v53 = vpop.f32.mrb[21].mxu1 }
 0x8b1   : > { %5203 = vst [vmem:[%s325_s21] sm:$0xff] %v5200_v62 }
 0x8b2   : > { %5977 = shalt.err (!%p5974_p3)
}
 0x8b3   : > { %s5978_s27 = scalar_lea.hbm %s7888_s0, 128  ;;  %s5982_s11 = scalar_lea.hbm %s7939_s9, 256 }
 0x8b4   : > { %p5979_p4 = scmp.ne.s32.totalorder %s7888_s0, %s5978_s27  ;;  %p5983_p9 = scmp.lt.u32.totalorder %s7888_s0, %s7939_s9 }
 0x8b5   : > { %p5984_p10 = scmp.lt.u32.totalorder %s5982_s11, %s5978_s27  ;;  %p5986_p12 = scmp.lt.u32.totalorder %s5978_s27, %s7888_s0 }
 0x8b6   : > { %p5980_p7 = pnand %p5979_p4, %p6137_p5 }
 0x8b7   : > { %p5985_p11 = por %p5984_p10, %p5983_p9 }
 0x8b8   : > { %p5981_p8 = pneg %p5980_p7 }
 0x8b9   : > { %p5987_p13 = por %p5986_p12, %p5985_p11 }
 0x8bb   : > { %p5988_p0 = pnand %p5987_p13, %p5981_p8 }
 0x8bd   : > { %5991 = shalt.err (!%p5988_p0)
}
 0x8be   : > { %5730 = dma.vmem_to_hbm [thread:$0]  (%p6137_p5), %s7890_s2, 128, %s7888_s0, %s5205_s22  }
 0x8bf PF: > { %p5736_p1 = scmp.ge.s32.totalorder %s6026_s12, 2  ;;  %s5230_s16 = sand.u32 1, %s6014_s30  }
 0x8c0   : > { %s5231_s17 = scalar_lea.sflag [#allocation6], %s5230_s16 }
 0x8c1   : > { %p5733_p2 = pnand %p5736_p1, %p6141_p6 }
 0x8c3   : > { %6009 = dma.done.wait (!%p5733_p2), %s5231_s17, 128  }
 0x8c4   : > { %6011 = vsyncadd (!%p5733_p2), %s5231_s17, 4294967168  ;;  %s8013_s21 = sld [smem:[#allocation8_spill]]  ;;  %s8014_s11 = sld [smem:[#allocation9_spill]] }
 0x8c5   : > { %p19_p3 = scmp.ge.s32.totalorder %s6124_s15, 4   ;;  %s8015_s30 = smov %s6018_s10 }
 0x8c6   : > { %s8017_s12 = smov %s6124_s15 }
 0x8c7   :  { %21 = sbr.rel (!%p19_p3) target bundleno = 7 (0x7), region = 91 }
 0x8ca   : > { %s8016_s10 = smov %s8013_s21 }
 0x8ce   :  { %5236 = vsyncpa [#allocation6], 1 }
 0x8cf   :  { %5238 = vsyncpa [#allocation6 + $0x1], 1 }

</bundles_post_ra>
